<compile_context>
chip_gen: v5e
topology: v5e:2x2
jax: 0.10.0
libtpu: 0.0.40
codegen_flags: <defaults>
</compile_context>

<pallas_src>
import numpy as np
import jax
import jax.numpy as jnp
from jax.experimental import pallas as pl
from jax.experimental.pallas import tpu as pltpu


# ----------------------------- Pallas kernel ------------------------------ #
def _make_kernel(n_batch, hw1, hw2, hw3, c1, c2, c3p, taps_per_step):
    """Build the fused 3-layer CNN kernel with static shape parameters."""

    def kernel(x_ref, w1_ref, b1_ref, s1_ref,
               w2_ref, b2_ref, s2_ref,
               w3_ref, b3_ref, s3_ref,
               o_ref, acc1_ref):
        # x_ref : (N*HW1, Cin)                 bf16
        # w1_ref: (Cin, taps_per_step*C1)      bf16  -- this step's tap group
        # s1_ref: (1, HW1, taps_per_step*HW1)  bf16  -- this step's shift group
        # w2_ref: (C1, 9*C2)  s2_ref: (HW2, 9*HW1)   (pool folded into s2)
        # w3_ref: (C2, 9*C3p) s3_ref: (HW3, 9*HW2)   (pool folded into s3)
        # bL_ref: (1, CL) f32, o_ref: (N*HW3, C3p) f32, acc1_ref: (N*HW1, C1) f32
        g = pl.program_id(0)
        n_steps = pl.num_programs(0)

        @pl.when(g == 0)
        def _():
            acc1_ref[...] = jnp.zeros_like(acc1_ref)

        # ---- layer 1, taps [3g, 3g+1, 3g+2]: one MXU pass over this chunk --
        y1 = jnp.dot(x_ref[...], w1_ref[...],
                     preferred_element_type=jnp.float32).astype(jnp.bfloat16)
        s1g = s1_ref[0]                                   # (HW1, taps*HW1)
        parts = []
        for n in range(n_batch):                          # static batch loop
            yb = y1[n * hw1:(n + 1) * hw1, :]
            stk = jnp.concatenate(
                [yb[:, t * c1:(t + 1) * c1] for t in range(taps_per_step)],
                axis=0)                                   # (taps*HW1, C1)
            parts.append(jnp.dot(s1g, stk, preferred_element_type=jnp.float32))
        acc1_ref[...] += jnp.concatenate(parts, axis=0)   # (N*HW1, C1)

        @pl.when(g == n_steps - 1)
        def _():
            # ---- layer 1 epilogue: bias + relu ----
            a1 = jnp.maximum(acc1_ref[...] + b1_ref[...], 0.0).astype(jnp.bfloat16)

            # ---- layer 2 (2x2 avg-pool of layer-1 folded into s2) ----
            y2 = jnp.dot(a1, w2_ref[...],
                         preferred_element_type=jnp.float32).astype(jnp.bfloat16)
            a2_parts = []
            for n in range(n_batch):
                yb = y2[n * hw1:(n + 1) * hw1, :]
                stk = jnp.concatenate(
                    [yb[:, t * c2:(t + 1) * c2] for t in range(9)], axis=0)
                z = jnp.dot(s2_ref[...], stk, preferred_element_type=jnp.float32)
                a2_parts.append(
                    jnp.maximum(z + b2_ref[...], 0.0).astype(jnp.bfloat16))
            a2 = jnp.concatenate(a2_parts, axis=0)        # (N*HW2, C2)

            # ---- layer 3 (2x2 avg-pool of layer-2 folded into s3) ----
            y3 = jnp.dot(a2, w3_ref[...],
                         preferred_element_type=jnp.float32).astype(jnp.bfloat16)
            o_parts = []
            for n in range(n_batch):
                yb = y3[n * hw2:(n + 1) * hw2, :]
                stk = jnp.concatenate(
                    [yb[:, t * c3p:(t + 1) * c3p] for t in range(9)], axis=0)
                z = jnp.dot(s3_ref[...], stk, preferred_element_type=jnp.float32)
                o_parts.append(jnp.maximum(z + b3_ref[...], 0.0))
            o_ref[...] = jnp.concatenate(o_parts, axis=0)  # (N*HW3, C3p) f32

    return kernel


def fused_forward(x_flat, W1, b1, S1g, W2, b2, S2cat, W3, b3, S3cat,
                  *, n_batch, hw1, hw2, hw3):
    cin = x_flat.shape[1]
    c1 = W1.shape[1] // 9
    c2 = W2.shape[1] // 9
    c3p = W3.shape[1] // 9
    m1 = n_batch * hw1
    m3 = n_batch * hw3
    taps_per_step = 3
    n_steps = 9 // taps_per_step
    w1_cols = taps_per_step * c1

    kernel = _make_kernel(n_batch, hw1, hw2, hw3, c1, c2, c3p, taps_per_step)

    grid_spec = pltpu.PrefetchScalarGridSpec(
        num_scalar_prefetch=0,
        grid=(n_steps,),
        in_specs=[
            pl.BlockSpec((m1, cin), lambda g: (0, 0)),                    # x
            pl.BlockSpec((cin, w1_cols), lambda g: (0, g)),               # W1 streamed
            pl.BlockSpec((1, c1), lambda g: (0, 0)),                      # b1
            pl.BlockSpec((1, hw1, taps_per_step * hw1), lambda g: (g, 0, 0)),  # S1 group
            pl.BlockSpec((c1, 9 * c2), lambda g: (0, 0)),                 # W2
            pl.BlockSpec((1, c2), lambda g: (0, 0)),                      # b2
            pl.BlockSpec((hw2, 9 * hw1), lambda g: (0, 0)),               # S2 (pool folded)
            pl.BlockSpec((c2, 9 * c3p), lambda g: (0, 0)),                # W3
            pl.BlockSpec((1, c3p), lambda g: (0, 0)),                     # b3
            pl.BlockSpec((hw3, 9 * hw2), lambda g: (0, 0)),               # S3 (pool folded)
        ],
        out_specs=pl.BlockSpec((m3, c3p), lambda g: (0, 0)),
        scratch_shapes=[pltpu.VMEM((m1, c1), jnp.float32)],
    )

    return pl.pallas_call(
        kernel,
        out_shape=jax.ShapeDtypeStruct((m3, c3p), jnp.float32),
        grid_spec=grid_spec,
        compiler_params=pltpu.CompilerParams(
            dimension_semantics=("arbitrary",),   # sequential accumulation, single core
            vmem_limit_bytes=24 << 20),
    )(x_flat, W1, b1, S1g, W2, b2, S2cat, W3, b3, S3cat)


# ------------------------------ JAX glue ---------------------------------- #
def make_shift_mats(h, w):
    """S_t (t = dh*3+dw): selects input pixel (y+dh-1, x+dw-1) or 0 (padding=1)."""
    hw = h * w
    mats = np.zeros((9, hw, hw), np.float32)
    for dh in range(3):
        for dw in range(3):
            t = dh * 3 + dw
            for y in range(h):
                for x in range(w):
                    iy, ix = y + dh - 1, x + dw - 1
                    if 0 <= iy < h and 0 <= ix < w:
                        mats[t, y * w + x, iy * w + ix] = 1.0
    return mats


def make_pool_mat(h, w):
    """P: (Ho*Wo, H*W) average-pool (2x2, stride 2) selection matrix."""
    ho, wo = h // 2, w // 2
    m = np.zeros((ho * wo, h * w), np.float32)
    for y2 in range(ho):
        for x2 in range(wo):
            for i in range(2):
                for j in range(2):
                    m[y2 * wo + x2, (2 * y2 + i) * w + (2 * x2 + j)] = 0.25
    return m


def build_shift_constants(h1, w1):
    """Per-image shift matrices in bf16 (entries 0 / 0.25 / 1 are exact).
    Layer 1: taps grouped 3-at-a-time to match the W1 column streaming grid.
    Layers 2/3: all 9 taps concatenated, previous 2x2 avg-pool folded in."""
    hw1 = h1 * w1
    s1 = make_shift_mats(h1, w1)                      # (9, hw1, hw1)
    p1 = make_pool_mat(h1, w1)                        # (hw2, hw1)
    h2, w2 = h1 // 2, w1 // 2
    s2 = make_shift_mats(h2, w2)                      # (9, hw2, hw2)
    p2 = make_pool_mat(h2, w2)                        # (hw3, hw2)
    h3, w3 = h2 // 2, w2 // 2
    s3 = make_shift_mats(h3, w3)                      # (9, hw3, hw3)

    s1g = np.zeros((3, hw1, 3 * hw1), np.float32)
    for g in range(3):
        for tl in range(3):
            s1g[g, :, tl * hw1:(tl + 1) * hw1] = s1[3 * g + tl]
    s2cat = np.concatenate([s2[t] @ p1 for t in range(9)], axis=1)   # (hw2, 9*hw1)
    s3cat = np.concatenate([s3[t] @ p2 for t in range(9)], axis=1)   # (hw3, 9*hw2)

    return (jnp.asarray(s1g, jnp.bfloat16),
            jnp.asarray(s2cat, jnp.bfloat16),
            jnp.asarray(s3cat, jnp.bfloat16))


def stack_weight(w_oihw, cout_pad=None):
    """(Cout,Cin,3,3) -> (Cin, 9*Cout) bf16, column index = (dh*3+dw)*Cout + o."""
    cout, cin, kh, kw = w_oihw.shape
    if cout_pad is not None and cout_pad > cout:
        w_oihw = jnp.concatenate(
            [w_oihw, jnp.zeros((cout_pad - cout, cin, kh, kw), w_oihw.dtype)], axis=0)
        cout = cout_pad
    w = jnp.transpose(w_oihw, (1, 2, 3, 0)).reshape(cin, kh * kw * cout)
    return w.astype(jnp.bfloat16)


def model_forward(x_nchw, params):
    (w1, b1), (w2, b2), (w3, b3) = params
    n, cin, h, w = x_nchw.shape
    hw1 = h * w
    hw2 = (h // 2) * (w // 2)
    hw3 = (h // 4) * (w // 4)
    cout3 = w3.shape[0]
    c3_pad = 128                                      # lane-dense output

    # NCHW -> (N*H*W, C) slab, bf16 for the MXU (f32 accumulation in-kernel).
    x_flat = jnp.transpose(x_nchw, (0, 2, 3, 1)).reshape(n * hw1, cin)
    x_flat = x_flat.astype(jnp.bfloat16)

    S1g, S2cat, S3cat = build_shift_constants(h, w)
    W1 = stack_weight(w1)
    W2 = stack_weight(w2)
    W3 = stack_weight(w3, cout_pad=c3_pad)
    b3p = jnp.zeros((c3_pad,), jnp.float32).at[:cout3].set(b3)

    out = fused_forward(x_flat,
                        W1, b1.reshape(1, -1), S1g,
                        W2, b2.reshape(1, -1), S2cat,
                        W3, b3p.reshape(1, -1), S3cat,
                        n_batch=n, hw1=hw1, hw2=hw2, hw3=hw3)   # (N*HW3, 128)

    ho, wo = h // 4, w // 4
    out = out.reshape(n, ho, wo, c3_pad)[..., :cout3]
    return jnp.transpose(out, (0, 3, 1, 2))           # NCHW


# --------------------------- pure-JAX reference ---------------------------- #
def reference_forward(x, params):
    (w1, b1), (w2, b2), (w3, b3) = params

    def conv(x, w, b):
        y = jax.lax.conv_general_dilated(
            x, w, window_strides=(1, 1), padding=((1, 1), (1, 1)),
            dimension_numbers=("NCHW", "OIHW", "NCHW"))
        return y + b[None, :, None, None]

    def avgpool(x):
        s = jax.lax.reduce_window(x, 0.0, jax.lax.add,
                                  (1, 1, 2, 2), (1, 1, 2, 2), "VALID")
        return s * 0.25

    v = avgpool(jax.nn.relu(conv(x, w1, b1)))
    v = avgpool(jax.nn.relu(conv(v, w2, b2)))
    return jax.nn.relu(conv(v, w3, b3))


# --------------------------------- main ------------------------------------ #
if __name__ == "__main__":
    key = jax.random.PRNGKey(0)
    k = jax.random.split(key, 8)

    # Deterministic parameter init (shapes from Model.__init__, OIHW layout).
    def init_conv(kw, kb, cout, cin):
        scale = 1.0 / np.sqrt(cin * 9)
        w = jax.random.normal(kw, (cout, cin, 3, 3), jnp.float32) * scale
        b = jax.random.normal(kb, (cout,), jnp.float32) * 0.01
        return w, b

    params = (
        init_conv(k[0], k[1], 256, 784),
        init_conv(k[2], k[3], 128, 256),
        init_conv(k[4], k[5], 10, 128),
    )

    # Small input consistent with conv1 (784 in-channels): NCHW (2, 784, 8, 8).
    x = jax.random.normal(k[6], (2, 784, 8, 8), jnp.float32)

    out = model_forward(x, params)
    out = jax.block_until_ready(out)
    assert out.shape == (2, 10, 2, 2), out.shape

    ref = jax.block_until_ready(reference_forward(x, params))
    max_diff = float(jnp.max(jnp.abs(out - ref)))
    # bf16 matmul inputs / bf16 intermediates (f32 accumulation) across 3 layers.
    assert max_diff < 1e-1, f"mismatch vs reference: {max_diff}"

    print("KERNEL_OK")
</pallas_src>

<mosaic_0001>
module attributes {stable_mosaic.version = 11 : i64} {
  func.func @kernel(%arg0: i32, %arg1: memref<128x784xbf16, #tpu.memory_space<vmem>>, %arg2: memref<784x768xbf16, #tpu.memory_space<vmem>>, %arg3: memref<1x256xf32, #tpu.memory_space<vmem>>, %arg4: memref<1x64x192xbf16, #tpu.memory_space<vmem>>, %arg5: memref<256x1152xbf16, #tpu.memory_space<vmem>>, %arg6: memref<1x128xf32, #tpu.memory_space<vmem>>, %arg7: memref<16x576xbf16, #tpu.memory_space<vmem>>, %arg8: memref<128x1152xbf16, #tpu.memory_space<vmem>>, %arg9: memref<1x128xf32, #tpu.memory_space<vmem>>, %arg10: memref<4x144xbf16, #tpu.memory_space<vmem>>, %arg11: memref<8x128xf32, #tpu.memory_space<vmem>>, %arg12: memref<128x256xf32, #tpu.memory_space<vmem>>) attributes {dimension_semantics = [#tpu.dimension_semantics<arbitrary>], iteration_bounds = array<i64: 3>, scalar_prefetch = 0 : i64, scratch_operands = 1 : i64, tpu.core_type = #tpu.core_type<tc>, window_params = [{pipeline_mode = #tpu.pipeline_mode<synchronous>, transform_indices = @transform_0, window_bounds = array<i64: 128, 784>}, {transform_indices = @transform_1, window_bounds = array<i64: 784, 768>}, {pipeline_mode = #tpu.pipeline_mode<synchronous>, transform_indices = @transform_2, window_bounds = array<i64: 1, 256>}, {transform_indices = @transform_3, window_bounds = array<i64: 1, 64, 192>}, {pipeline_mode = #tpu.pipeline_mode<synchronous>, transform_indices = @transform_4, window_bounds = array<i64: 256, 1152>}, {pipeline_mode = #tpu.pipeline_mode<synchronous>, transform_indices = @transform_5, window_bounds = array<i64: 1, 128>}, {pipeline_mode = #tpu.pipeline_mode<synchronous>, transform_indices = @transform_6, window_bounds = array<i64: 16, 576>}, {pipeline_mode = #tpu.pipeline_mode<synchronous>, transform_indices = @transform_7, window_bounds = array<i64: 128, 1152>}, {pipeline_mode = #tpu.pipeline_mode<synchronous>, transform_indices = @transform_8, window_bounds = array<i64: 1, 128>}, {pipeline_mode = #tpu.pipeline_mode<synchronous>, transform_indices = @transform_9, window_bounds = array<i64: 4, 144>}, {pipeline_mode = #tpu.pipeline_mode<synchronous>, transform_indices = @transform_10, window_bounds = array<i64: 8, 128>}]} {
    %c0_i32 = arith.constant 0 : i32
    %0 = arith.cmpi eq, %arg0, %c0_i32 : i32
    %1 = arith.extui %0 : i1 to i32
    %c0_i32_0 = arith.constant 0 : i32
    %2 = arith.cmpi ne, %1, %c0_i32_0 : i32
    scf.if %2 {
      %cst_14 = arith.constant 0.000000e+00 : f32
      %28 = vector.broadcast %cst_14 : f32 to vector<128x256xf32>
      %c0_15 = arith.constant 0 : index
      %c0_16 = arith.constant 0 : index
      %29 = vector.load %arg12[%c0_15, %c0_16] : memref<128x256xf32, #tpu.memory_space<vmem>>, vector<128x256xf32>
      tpu.vector_store %arg12[%c0_15, %c0_16], %28 {strides = array<i32>} : memref<128x256xf32, #tpu.memory_space<vmem>>, vector<128x256xf32>,
    } else {
    }
    %c0 = arith.constant 0 : index
    %c0_1 = arith.constant 0 : index
    %3 = vector.load %arg1[%c0, %c0_1] : memref<128x784xbf16, #tpu.memory_space<vmem>>, vector<128x784xbf16>
    %c0_2 = arith.constant 0 : index
    %c0_3 = arith.constant 0 : index
    %4 = vector.load %arg2[%c0_2, %c0_3] : memref<784x768xbf16, #tpu.memory_space<vmem>>, vector<784x768xbf16>
    %cst = arith.constant dense<0.000000e+00> : vector<128x768xf32>
    %5 = tpu.matmul %3, %4, %cst {dimension_numbers = #tpu.dot_dimension_numbers<[1], [0], [0], [1], [0, 0, 1, 1], [], []>} : vector<128x784xbf16>, vector<784x768xbf16>, vector<128x768xf32> -> vector<128x768xf32>
    %6 = arith.truncf %5 : vector<128x768xf32> to vector<128x768xbf16>
    %c0_4 = arith.constant 0 : index
    %c0_5 = arith.constant 0 : index
    %c0_6 = arith.constant 0 : index
    %7 = vector.load %arg4[%c0_4, %c0_5, %c0_6] : memref<1x64x192xbf16, #tpu.memory_space<vmem>>, vector<1x64x192xbf16>
    %8 = vector.shape_cast %7 : vector<1x64x192xbf16> to vector<64x192xbf16>
    %9 = vector.extract_strided_slice %6 {offsets = [0, 0], sizes = [64, 768], strides = [1, 1]} : vector<128x768xbf16> to vector<64x768xbf16>
    %10 = vector.extract_strided_slice %9 {offsets = [0, 0], sizes = [64, 256], strides = [1, 1]} : vector<64x768xbf16> to vector<64x256xbf16>
    %11 = vector.extract_strided_slice %9 {offsets = [0, 256], sizes = [64, 256], strides = [1, 1]} : vector<64x768xbf16> to vector<64x256xbf16>
    %12 = vector.extract_strided_slice %9 {offsets = [0, 512], sizes = [64, 256], strides = [1, 1]} : vector<64x768xbf16> to vector<64x256xbf16>
    %13 = tpu.concatenate %10, %11, %12 in 0 : vector<64x256xbf16>, vector<64x256xbf16>, vector<64x256xbf16> -> vector<192x256xbf16>
    %cst_7 = arith.constant dense<0.000000e+00> : vector<64x256xf32>
    %14 = tpu.matmul %8, %13, %cst_7 {dimension_numbers = #tpu.dot_dimension_numbers<[1], [0], [0], [1], [0, 0, 1, 1], [], []>} : vector<64x192xbf16>, vector<192x256xbf16>, vector<64x256xf32> -> vector<64x256xf32>
    %15 = vector.extract_strided_slice %6 {offsets = [64, 0], sizes = [64, 768], strides = [1, 1]} : vector<128x768xbf16> to vector<64x768xbf16>
    %16 = vector.extract_strided_slice %15 {offsets = [0, 0], sizes = [64, 256], strides = [1, 1]} : vector<64x768xbf16> to vector<64x256xbf16>
    %17 = vector.extract_strided_slice %15 {offsets = [0, 256], sizes = [64, 256], strides = [1, 1]} : vector<64x768xbf16> to vector<64x256xbf16>
    %18 = vector.extract_strided_slice %15 {offsets = [0, 512], sizes = [64, 256], strides = [1, 1]} : vector<64x768xbf16> to vector<64x256xbf16>
    %19 = tpu.concatenate %16, %17, %18 in 0 : vector<64x256xbf16>, vector<64x256xbf16>, vector<64x256xbf16> -> vector<192x256xbf16>
    %cst_8 = arith.constant dense<0.000000e+00> : vector<64x256xf32>
    %20 = tpu.matmul %8, %19, %cst_8 {dimension_numbers = #tpu.dot_dimension_numbers<[1], [0], [0], [1], [0, 0, 1, 1], [], []>} : vector<64x192xbf16>, vector<192x256xbf16>, vector<64x256xf32> -> vector<64x256xf32>
    %c0_9 = arith.constant 0 : index
    %c0_10 = arith.constant 0 : index
    %21 = vector.load %arg12[%c0_9, %c0_10] : memref<128x256xf32, #tpu.memory_space<vmem>>, vector<128x256xf32>
    %22 = tpu.concatenate %14, %20 in 0 : vector<64x256xf32>, vector<64x256xf32> -> vector<128x256xf32>
    %23 = arith.addf %21, %22 : vector<128x256xf32>
    %c0_11 = arith.constant 0 : index
    %c0_12 = arith.constant 0 : index
    %24 = vector.load %arg12[%c0_11, %c0_12] : memref<128x256xf32, #tpu.memory_space<vmem>>, vector<128x256xf32>
    tpu.vector_store %arg12[%c0_11, %c0_12], %23 {strides = array<i32>} : memref<128x256xf32, #tpu.memory_space<vmem>>, vector<128x256xf32>,
    %c2_i32 = arith.constant 2 : i32
    %25 = arith.cmpi eq, %arg0, %c2_i32 : i32
    %26 = arith.extui %25 : i1 to i32
    %c0_i32_13 = arith.constant 0 : i32
    %27 = arith.cmpi ne, %26, %c0_i32_13 : i32
    scf.if %27 {
      %c0_14 = arith.constant 0 : index
      %c0_15 = arith.constant 0 : index
      %28 = vector.load %arg12[%c0_14, %c0_15] : memref<128x256xf32, #tpu.memory_space<vmem>>, vector<128x256xf32>
      %c0_16 = arith.constant 0 : index
      %c0_17 = arith.constant 0 : index
      %29 = vector.load %arg3[%c0_16, %c0_17] : memref<1x256xf32, #tpu.memory_space<vmem>>, vector<1x256xf32>
      %30 = vector.broadcast %29 : vector<1x256xf32> to vector<128x256xf32>
      %31 = arith.addf %28, %30 : vector<128x256xf32>
      %cst_18 = arith.constant 0.000000e+00 : f32
      %32 = vector.broadcast %cst_18 : f32 to vector<128x256xf32>
      %33 = arith.maximumf %31, %32 : vector<128x256xf32>
      %34 = arith.truncf %33 : vector<128x256xf32> to vector<128x256xbf16>
      %c0_19 = arith.constant 0 : index
      %c0_20 = arith.constant 0 : index
      %35 = vector.load %arg5[%c0_19, %c0_20] : memref<256x1152xbf16, #tpu.memory_space<vmem>>, vector<256x1152xbf16>
      %cst_21 = arith.constant dense<0.000000e+00> : vector<128x1152xf32>
      %36 = tpu.matmul %34, %35, %cst_21 {dimension_numbers = #tpu.dot_dimension_numbers<[1], [0], [0], [1], [0, 0, 1, 1], [], []>} : vector<128x256xbf16>, vector<256x1152xbf16>, vector<128x1152xf32> -> vector<128x1152xf32>
      %37 = arith.truncf %36 : vector<128x1152xf32> to vector<128x1152xbf16>
      %38 = vector.extract_strided_slice %37 {offsets = [0, 0], sizes = [64, 1152], strides = [1, 1]} : vector<128x1152xbf16> to vector<64x1152xbf16>
      %39 = vector.extract_strided_slice %38 {offsets = [0, 0], sizes = [64, 128], strides = [1, 1]} : vector<64x1152xbf16> to vector<64x128xbf16>
      %40 = vector.extract_strided_slice %38 {offsets = [0, 128], sizes = [64, 128], strides = [1, 1]} : vector<64x1152xbf16> to vector<64x128xbf16>
      %41 = vector.extract_strided_slice %38 {offsets = [0, 256], sizes = [64, 128], strides = [1, 1]} : vector<64x1152xbf16> to vector<64x128xbf16>
      %42 = vector.extract_strided_slice %38 {offsets = [0, 384], sizes = [64, 128], strides = [1, 1]} : vector<64x1152xbf16> to vector<64x128xbf16>
      %43 = vector.extract_strided_slice %38 {offsets = [0, 512], sizes = [64, 128], strides = [1, 1]} : vector<64x1152xbf16> to vector<64x128xbf16>
      %44 = vector.extract_strided_slice %38 {offsets = [0, 640], sizes = [64, 128], strides = [1, 1]} : vector<64x1152xbf16> to vector<64x128xbf16>
      %45 = vector.extract_strided_slice %38 {offsets = [0, 768], sizes = [64, 128], strides = [1, 1]} : vector<64x1152xbf16> to vector<64x128xbf16>
      %46 = vector.extract_strided_slice %38 {offsets = [0, 896], sizes = [64, 128], strides = [1, 1]} : vector<64x1152xbf16> to vector<64x128xbf16>
      %47 = vector.extract_strided_slice %38 {offsets = [0, 1024], sizes = [64, 128], strides = [1, 1]} : vector<64x1152xbf16> to vector<64x128xbf16>
      %48 = tpu.concatenate %39, %40, %41, %42, %43, %44, %45, %46, %47 in 0 : vector<64x128xbf16>, vector<64x128xbf16>, vector<64x128xbf16>, vector<64x128xbf16>, vector<64x128xbf16>, vector<64x128xbf16>, vector<64x128xbf16>, vector<64x128xbf16>, vector<64x128xbf16> -> vector<576x128xbf16>
      %c0_22 = arith.constant 0 : index
      %c0_23 = arith.constant 0 : index
      %49 = vector.load %arg7[%c0_22, %c0_23] : memref<16x576xbf16, #tpu.memory_space<vmem>>, vector<16x576xbf16>
      %cst_24 = arith.constant dense<0.000000e+00> : vector<16x128xf32>
      %50 = tpu.matmul %49, %48, %cst_24 {dimension_numbers = #tpu.dot_dimension_numbers<[1], [0], [0], [1], [0, 0, 1, 1], [], []>} : vector<16x576xbf16>, vector<576x128xbf16>, vector<16x128xf32> -> vector<16x128xf32>
      %c0_25 = arith.constant 0 : index
      %c0_26 = arith.constant 0 : index
      %51 = vector.load %arg6[%c0_25, %c0_26] : memref<1x128xf32, #tpu.memory_space<vmem>>, vector<1x128xf32>
      %52 = vector.broadcast %51 : vector<1x128xf32> to vector<16x128xf32>
      %53 = arith.addf %50, %52 : vector<16x128xf32>
      %cst_27 = arith.constant 0.000000e+00 : f32
      %54 = vector.broadcast %cst_27 : f32 to vector<16x128xf32>
      %55 = arith.maximumf %53, %54 : vector<16x128xf32>
      %56 = arith.truncf %55 : vector<16x128xf32> to vector<16x128xbf16>
      %57 = vector.extract_strided_slice %37 {offsets = [64, 0], sizes = [64, 1152], strides = [1, 1]} : vector<128x1152xbf16> to vector<64x1152xbf16>
      %58 = vector.extract_strided_slice %57 {offsets = [0, 0], sizes = [64, 128], strides = [1, 1]} : vector<64x1152xbf16> to vector<64x128xbf16>
      %59 = vector.extract_strided_slice %57 {offsets = [0, 128], sizes = [64, 128], strides = [1, 1]} : vector<64x1152xbf16> to vector<64x128xbf16>
      %60 = vector.extract_strided_slice %57 {offsets = [0, 256], sizes = [64, 128], strides = [1, 1]} : vector<64x1152xbf16> to vector<64x128xbf16>
      %61 = vector.extract_strided_slice %57 {offsets = [0, 384], sizes = [64, 128], strides = [1, 1]} : vector<64x1152xbf16> to vector<64x128xbf16>
      %62 = vector.extract_strided_slice %57 {offsets = [0, 512], sizes = [64, 128], strides = [1, 1]} : vector<64x1152xbf16> to vector<64x128xbf16>
      %63 = vector.extract_strided_slice %57 {offsets = [0, 640], sizes = [64, 128], strides = [1, 1]} : vector<64x1152xbf16> to vector<64x128xbf16>
      %64 = vector.extract_strided_slice %57 {offsets = [0, 768], sizes = [64, 128], strides = [1, 1]} : vector<64x1152xbf16> to vector<64x128xbf16>
      %65 = vector.extract_strided_slice %57 {offsets = [0, 896], sizes = [64, 128], strides = [1, 1]} : vector<64x1152xbf16> to vector<64x128xbf16>
      %66 = vector.extract_strided_slice %57 {offsets = [0, 1024], sizes = [64, 128], strides = [1, 1]} : vector<64x1152xbf16> to vector<64x128xbf16>
      %67 = tpu.concatenate %58, %59, %60, %61, %62, %63, %64, %65, %66 in 0 : vector<64x128xbf16>, vector<64x128xbf16>, vector<64x128xbf16>, vector<64x128xbf16>, vector<64x128xbf16>, vector<64x128xbf16>, vector<64x128xbf16>, vector<64x128xbf16>, vector<64x128xbf16> -> vector<576x128xbf16>
      %c0_28 = arith.constant 0 : index
      %c0_29 = arith.constant 0 : index
      %68 = vector.load %arg7[%c0_28, %c0_29] : memref<16x576xbf16, #tpu.memory_space<vmem>>, vector<16x576xbf16>
      %cst_30 = arith.constant dense<0.000000e+00> : vector<16x128xf32>
      %69 = tpu.matmul %68, %67, %cst_30 {dimension_numbers = #tpu.dot_dimension_numbers<[1], [0], [0], [1], [0, 0, 1, 1], [], []>} : vector<16x576xbf16>, vector<576x128xbf16>, vector<16x128xf32> -> vector<16x128xf32>
      %c0_31 = arith.constant 0 : index
      %c0_32 = arith.constant 0 : index
      %70 = vector.load %arg6[%c0_31, %c0_32] : memref<1x128xf32, #tpu.memory_space<vmem>>, vector<1x128xf32>
      %71 = vector.broadcast %70 : vector<1x128xf32> to vector<16x128xf32>
      %72 = arith.addf %69, %71 : vector<16x128xf32>
      %cst_33 = arith.constant 0.000000e+00 : f32
      %73 = vector.broadcast %cst_33 : f32 to vector<16x128xf32>
      %74 = arith.maximumf %72, %73 : vector<16x128xf32>
      %75 = arith.truncf %74 : vector<16x128xf32> to vector<16x128xbf16>
      %76 = tpu.concatenate %56, %75 in 0 : vector<16x128xbf16>, vector<16x128xbf16> -> vector<32x128xbf16>
      %c0_34 = arith.constant 0 : index
      %c0_35 = arith.constant 0 : index
      %77 = vector.load %arg8[%c0_34, %c0_35] : memref<128x1152xbf16, #tpu.memory_space<vmem>>, vector<128x1152xbf16>
      %cst_36 = arith.constant dense<0.000000e+00> : vector<32x1152xf32>
      %78 = tpu.matmul %76, %77, %cst_36 {dimension_numbers = #tpu.dot_dimension_numbers<[1], [0], [0], [1], [0, 0, 1, 1], [], []>} : vector<32x128xbf16>, vector<128x1152xbf16>, vector<32x1152xf32> -> vector<32x1152xf32>
      %79 = arith.truncf %78 : vector<32x1152xf32> to vector<32x1152xbf16>
      %80 = vector.extract_strided_slice %79 {offsets = [0, 0], sizes = [16, 1152], strides = [1, 1]} : vector<32x1152xbf16> to vector<16x1152xbf16>
      %81 = vector.extract_strided_slice %80 {offsets = [0, 0], sizes = [16, 128], strides = [1, 1]} : vector<16x1152xbf16> to vector<16x128xbf16>
      %82 = vector.extract_strided_slice %80 {offsets = [0, 128], sizes = [16, 128], strides = [1, 1]} : vector<16x1152xbf16> to vector<16x128xbf16>
      %83 = vector.extract_strided_slice %80 {offsets = [0, 256], sizes = [16, 128], strides = [1, 1]} : vector<16x1152xbf16> to vector<16x128xbf16>
      %84 = vector.extract_strided_slice %80 {offsets = [0, 384], sizes = [16, 128], strides = [1, 1]} : vector<16x1152xbf16> to vector<16x128xbf16>
      %85 = vector.extract_strided_slice %80 {offsets = [0, 512], sizes = [16, 128], strides = [1, 1]} : vector<16x1152xbf16> to vector<16x128xbf16>
      %86 = vector.extract_strided_slice %80 {offsets = [0, 640], sizes = [16, 128], strides = [1, 1]} : vector<16x1152xbf16> to vector<16x128xbf16>
      %87 = vector.extract_strided_slice %80 {offsets = [0, 768], sizes = [16, 128], strides = [1, 1]} : vector<16x1152xbf16> to vector<16x128xbf16>
      %88 = vector.extract_strided_slice %80 {offsets = [0, 896], sizes = [16, 128], strides = [1, 1]} : vector<16x1152xbf16> to vector<16x128xbf16>
      %89 = vector.extract_strided_slice %80 {offsets = [0, 1024], sizes = [16, 128], strides = [1, 1]} : vector<16x1152xbf16> to vector<16x128xbf16>
      %90 = tpu.concatenate %81, %82, %83, %84, %85, %86, %87, %88, %89 in 0 : vector<16x128xbf16>, vector<16x128xbf16>, vector<16x128xbf16>, vector<16x128xbf16>, vector<16x128xbf16>, vector<16x128xbf16>, vector<16x128xbf16>, vector<16x128xbf16>, vector<16x128xbf16> -> vector<144x128xbf16>
      %c0_37 = arith.constant 0 : index
      %c0_38 = arith.constant 0 : index
      %91 = vector.load %arg10[%c0_37, %c0_38] : memref<4x144xbf16, #tpu.memory_space<vmem>>, vector<4x144xbf16>
      %cst_39 = arith.constant dense<0.000000e+00> : vector<4x128xf32>
      %92 = tpu.matmul %91, %90, %cst_39 {dimension_numbers = #tpu.dot_dimension_numbers<[1], [0], [0], [1], [0, 0, 1, 1], [], []>} : vector<4x144xbf16>, vector<144x128xbf16>, vector<4x128xf32> -> vector<4x128xf32>
      %c0_40 = arith.constant 0 : index
      %c0_41 = arith.constant 0 : index
      %93 = vector.load %arg9[%c0_40, %c0_41] : memref<1x128xf32, #tpu.memory_space<vmem>>, vector<1x128xf32>
      %94 = vector.broadcast %93 : vector<1x128xf32> to vector<4x128xf32>
      %95 = arith.addf %92, %94 : vector<4x128xf32>
      %cst_42 = arith.constant 0.000000e+00 : f32
      %96 = vector.broadcast %cst_42 : f32 to vector<4x128xf32>
      %97 = arith.maximumf %95, %96 : vector<4x128xf32>
      %98 = vector.extract_strided_slice %79 {offsets = [16, 0], sizes = [16, 1152], strides = [1, 1]} : vector<32x1152xbf16> to vector<16x1152xbf16>
      %99 = vector.extract_strided_slice %98 {offsets = [0, 0], sizes = [16, 128], strides = [1, 1]} : vector<16x1152xbf16> to vector<16x128xbf16>
      %100 = vector.extract_strided_slice %98 {offsets = [0, 128], sizes = [16, 128], strides = [1, 1]} : vector<16x1152xbf16> to vector<16x128xbf16>
      %101 = vector.extract_strided_slice %98 {offsets = [0, 256], sizes = [16, 128], strides = [1, 1]} : vector<16x1152xbf16> to vector<16x128xbf16>
      %102 = vector.extract_strided_slice %98 {offsets = [0, 384], sizes = [16, 128], strides = [1, 1]} : vector<16x1152xbf16> to vector<16x128xbf16>
      %103 = vector.extract_strided_slice %98 {offsets = [0, 512], sizes = [16, 128], strides = [1, 1]} : vector<16x1152xbf16> to vector<16x128xbf16>
      %104 = vector.extract_strided_slice %98 {offsets = [0, 640], sizes = [16, 128], strides = [1, 1]} : vector<16x1152xbf16> to vector<16x128xbf16>
      %105 = vector.extract_strided_slice %98 {offsets = [0, 768], sizes = [16, 128], strides = [1, 1]} : vector<16x1152xbf16> to vector<16x128xbf16>
      %106 = vector.extract_strided_slice %98 {offsets = [0, 896], sizes = [16, 128], strides = [1, 1]} : vector<16x1152xbf16> to vector<16x128xbf16>
      %107 = vector.extract_strided_slice %98 {offsets = [0, 1024], sizes = [16, 128], strides = [1, 1]} : vector<16x1152xbf16> to vector<16x128xbf16>
      %108 = tpu.concatenate %99, %100, %101, %102, %103, %104, %105, %106, %107 in 0 : vector<16x128xbf16>, vector<16x128xbf16>, vector<16x128xbf16>, vector<16x128xbf16>, vector<16x128xbf16>, vector<16x128xbf16>, vector<16x128xbf16>, vector<16x128xbf16>, vector<16x128xbf16> -> vector<144x128xbf16>
      %c0_43 = arith.constant 0 : index
      %c0_44 = arith.constant 0 : index
      %109 = vector.load %arg10[%c0_43, %c0_44] : memref<4x144xbf16, #tpu.memory_space<vmem>>, vector<4x144xbf16>
      %cst_45 = arith.constant dense<0.000000e+00> : vector<4x128xf32>
      %110 = tpu.matmul %109, %108, %cst_45 {dimension_numbers = #tpu.dot_dimension_numbers<[1], [0], [0], [1], [0, 0, 1, 1], [], []>} : vector<4x144xbf16>, vector<144x128xbf16>, vector<4x128xf32> -> vector<4x128xf32>
      %c0_46 = arith.constant 0 : index
      %c0_47 = arith.constant 0 : index
      %111 = vector.load %arg9[%c0_46, %c0_47] : memref<1x128xf32, #tpu.memory_space<vmem>>, vector<1x128xf32>
      %112 = vector.broadcast %111 : vector<1x128xf32> to vector<4x128xf32>
      %113 = arith.addf %110, %112 : vector<4x128xf32>
      %cst_48 = arith.constant 0.000000e+00 : f32
      %114 = vector.broadcast %cst_48 : f32 to vector<4x128xf32>
      %115 = arith.maximumf %113, %114 : vector<4x128xf32>
      %116 = tpu.concatenate %97, %115 in 0 : vector<4x128xf32>, vector<4x128xf32> -> vector<8x128xf32>
      %c0_49 = arith.constant 0 : index
      %c0_50 = arith.constant 0 : index
      %117 = vector.load %arg11[%c0_49, %c0_50] : memref<8x128xf32, #tpu.memory_space<vmem>>, vector<8x128xf32>
      tpu.vector_store %arg11[%c0_49, %c0_50], %116 {strides = array<i32>} : memref<8x128xf32, #tpu.memory_space<vmem>>, vector<8x128xf32>,
    } else {
    }
    return
  }
  func.func @transform_0(%arg0: i32) -> (i32, i32) {
    %c0_i32 = arith.constant 0 : i32
    %c0_i32_0 = arith.constant 0 : i32
    %c0_i32_1 = arith.constant 0 : i32
    return %c0_i32, %c0_i32_0 : i32, i32
  }
  func.func @transform_1(%arg0: i32) -> (i32, i32) {
    %c0_i32 = arith.constant 0 : i32
    %c0_i32_0 = arith.constant 0 : i32
    return %c0_i32, %arg0 : i32, i32
  }
  func.func @transform_2(%arg0: i32) -> (i32, i32) {
    %c0_i32 = arith.constant 0 : i32
    %c0_i32_0 = arith.constant 0 : i32
    %c0_i32_1 = arith.constant 0 : i32
    return %c0_i32, %c0_i32_0 : i32, i32
  }
  func.func @transform_3(%arg0: i32) -> (i32, i32, i32) {
    %c0_i32 = arith.constant 0 : i32
    %c0_i32_0 = arith.constant 0 : i32
    %c0_i32_1 = arith.constant 0 : i32
    return %arg0, %c0_i32, %c0_i32_0 : i32, i32, i32
  }
  func.func @transform_4(%arg0: i32) -> (i32, i32) {
    %c0_i32 = arith.constant 0 : i32
    %c0_i32_0 = arith.constant 0 : i32
    %c0_i32_1 = arith.constant 0 : i32
    return %c0_i32, %c0_i32_0 : i32, i32
  }
  func.func @transform_5(%arg0: i32) -> (i32, i32) {
    %c0_i32 = arith.constant 0 : i32
    %c0_i32_0 = arith.constant 0 : i32
    %c0_i32_1 = arith.constant 0 : i32
    return %c0_i32, %c0_i32_0 : i32, i32
  }
  func.func @transform_6(%arg0: i32) -> (i32, i32) {
    %c0_i32 = arith.constant 0 : i32
    %c0_i32_0 = arith.constant 0 : i32
    %c0_i32_1 = arith.constant 0 : i32
    return %c0_i32, %c0_i32_0 : i32, i32
  }
  func.func @transform_7(%arg0: i32) -> (i32, i32) {
    %c0_i32 = arith.constant 0 : i32
    %c0_i32_0 = arith.constant 0 : i32
    %c0_i32_1 = arith.constant 0 : i32
    return %c0_i32, %c0_i32_0 : i32, i32
  }
  func.func @transform_8(%arg0: i32) -> (i32, i32) {
    %c0_i32 = arith.constant 0 : i32
    %c0_i32_0 = arith.constant 0 : i32
    %c0_i32_1 = arith.constant 0 : i32
    return %c0_i32, %c0_i32_0 : i32, i32
  }
  func.func @transform_9(%arg0: i32) -> (i32, i32) {
    %c0_i32 = arith.constant 0 : i32
    %c0_i32_0 = arith.constant 0 : i32
    %c0_i32_1 = arith.constant 0 : i32
    return %c0_i32, %c0_i32_0 : i32, i32
  }
  func.func @transform_10(%arg0: i32) -> (i32, i32) {
    %c0_i32 = arith.constant 0 : i32
    %c0_i32_0 = arith.constant 0 : i32
    %c0_i32_1 = arith.constant 0 : i32
    return %c0_i32, %c0_i32_0 : i32, i32
  }
}

</mosaic_0001>

<bundles_post_ra>
// kernel: tpu_custom_call.1
= control target key start
LH: loop header
LB: loop body
LE: loop exit
PB: predicated region body
PF: predicated region fallthrough
CT: control target
= control target key end

     0   :  { %s15543_s0 = inlined_call_operand.vmem [shape: bf16[128,784], index: 0, kind: input, shape index: {}]   ;;  %s15544_s1 = inlined_call_operand.hbm [shape: bf16[784,2304], index: 1, kind: input, shape index: {}]   ;;  %s15545_s2 = inlined_call_operand.hbm [shape: f32[1,256], index: 2, kind: input, shape index: {}]   ;;  %s15546_s3 = inlined_call_operand.hbm [shape: bf16[3,64,192], index: 3, kind: input, shape index: {}]   ;;  %s15547_s4 = inlined_call_operand.hbm [shape: bf16[256,1152], index: 4, kind: input, shape index: {}]   ;;  %s15548_s5 = inlined_call_operand.hbm [shape: f32[1,128], index: 5, kind: input, shape index: {}]   ;;  %s15549_s6 = inlined_call_operand.hbm [shape: bf16[16,576], index: 6, kind: input, shape index: {}]   ;;  %s15550_s7 = inlined_call_operand.hbm [shape: bf16[128,1152], index: 7, kind: input, shape index: {}]   ;;  %s15551_s8 = inlined_call_operand.hbm [shape: f32[1,128], index: 8, kind: input, shape index: {}]   ;;  %s15552_s9 = inlined_call_operand.hbm [shape: bf16[4,144], index: 9, kind: input, shape index: {}]   ;;  %s15553_s10 = inlined_call_operand.hbm [shape: f32[8,128], index: 10, kind: output, shape index: {}]  }
   0x1   :  { %15684 = sst [smem:[#allocation108_spill]] %s15544_s1 }
   0x2   :  { %15685 = sst [smem:[#allocation109_spill]] %s15545_s2 }
   0x3   :  { %15686 = sst [smem:[#allocation110_spill]] %s15547_s4 }
   0x4   :  { %15687 = sst [smem:[#allocation111_spill]] %s15548_s5 }
   0x5   :  { %15688 = sst [smem:[#allocation112_spill]] %s15550_s7 }
   0x6   :  { %15 = vsyncpa [#allocation4], 0 }
   0x7   :  { %17 = vsyncpa [#allocation4 + $0x1], 0 }
   0x8   :  { %18 = vsyncpa [#allocation7], 0 }
   0x9   :  { %19 = vsyncpa [#allocation11], 0 }
   0xa   :  { %20 = vsyncpa [#allocation14], 0 }
   0xb   :  { %21 = vsyncpa [#allocation17], 0 }
   0xc   :  { %22 = vsyncpa [#allocation5], 0  ;;  %s12483_s13 = smov 0   ;;  %s12485_s14 = smov 0  }
   0xd   :  { %s12487_s15 = smov 0   ;;  %s12489_s16 = smov 0  }
   0xe LB: > { %s15689_s2 = sld [smem:[#allocation109_spill]]  ;;  %s12507_s20 = sadd.s32 4294967295, %s12408_s16   ;;  %s12408_s16 = sphi %s12489_s16, %s15991_s16   ;;  %s12404_s15 = sphi %s12487_s15, %s15995_s15   ;;  %s12400_s14 = sphi %s12485_s14, %s15994_s14   ;;  %s12396_s13 = sphi %s12483_s13, %s15993_s13  }
   0xf   : > { %p8919_p0 = scmp.ge.s32.totalorder %s12408_s16, 1  ;;  %p70_p1 = scmp.eq.s32.totalorder %s12507_s20, 0 }
  0x10   : > { %p274_p2 = scmp.lt.s32.totalorder %s12408_s16, 4  ;;  %p8920_p3 = scmp.ne.s32.totalorder %s12507_s20, 0 }
  0x11   : > { %s12410_s22 = smov [#allocation6]   ;;  %s15691_s5 = sld [smem:[#allocation111_spill]] }
  0x12   : > { %p12513_p4 = pnand %p8919_p0, %p274_p2  ;;  %s291_s23 = sshll.u32 %s12410_s22, 4  ;;  %s292_s23 = int_to_ptr.vmem [resolvable:$true] %s291_s23 }
  0x13   : > { %s12411_s28 = smov [#allocation10]   ;;  %s15693_s7 = sld [smem:[#allocation112_spill]] }
  0x14   : > { %s289_s19 = sshll.u32 %s15689_s2, 4  ;;  %p11950_p5 = pneg %p12513_p4  ;;  %s290_s19 = int_to_ptr.hbm [resolvable:$true] %s289_s19 }
  0x15   : > { %s317_s29 = sshll.u32 %s12411_s28, 4  ;;  %s12412_s17 = smov [#allocation13]   ;;  %s318_s29 = int_to_ptr.vmem [resolvable:$true] %s317_s29 }
  0x16   : > { %p12524_p6 = pnand %p11950_p5, %p70_p1  ;;  %s342_s18 = sshll.u32 %s12412_s17, 4  ;;  %s343_s18 = int_to_ptr.vmem [resolvable:$true] %s342_s18 }
  0x17   : > { %s315_s26 = sshll.u32 %s15691_s5, 4  ;;  %s15554_s22 = smov 576   ;;  %s316_s26 = int_to_ptr.hbm [resolvable:$true] %s315_s26 }
  0x18   : > { %11953 = dma.hbm_to_vmem [thread:$0]  (!%p12524_p6), %s290_s19, 32, %s292_s23, [#allocation7]  }
  0x19   : > { %11959 = dma.hbm_to_vmem [thread:$0]  (!%p12524_p6), %s316_s26, 16, %s318_s29, [#allocation11]  }
  0x1a   : > { %s340_s12 = sshll.u32 %s15693_s7, 4  ;;  %s15555_s19 = smov 36   ;;  %s341_s12 = int_to_ptr.hbm [resolvable:$true] %s340_s12 }
  0x1b   : > { %11965 = dma.hbm_to_vmem [thread:$0]  (!%p12524_p6), %s341_s12, 9216, %s343_s18, [#allocation14], %s15554_s22, %s15554_s22, %s15555_s19  }
  0x1c   : > { %s12541_s23 = sadd.s32 1, %s12408_s16   ;;  %s56_s25 = sadd.s32 1, %s12404_s15 }
  0x1d   : > { %15694 = sst [smem:[#allocation27_spill]] %s12541_s23  ;;  %s53_s24 = ssub.s32 %s12408_s16, %s12541_s23 }
  0x1e   : > { %p54_p7 = scmp.eq.s32.totalorder %s53_s24, 0  ;;  %p63_p8 = scmp.ne.s32.totalorder %s12404_s15, %s12400_s14 }
  0x1f   : > { %p64_p9 = scmp.eq.s32.totalorder %s12408_s16, 0  ;;  %p69_p10 = scmp.ne.s32.totalorder %s12400_s14, %s12396_s13 }
  0x20   : > { %s12552_s26 = scalar_select %p54_p7, %s12404_s15, %s56_s25  }
  0x21   : > { %p65_p11 = por %p64_p9, %p63_p8  ;;  %p12556_p12 = por %p70_p1, %p69_p10 }
  0x22   : > { %15695 = sst [smem:[#allocation28_spill]] %s12552_s26  ;;  %p11986_p13 = scmp.lt.s32.totalorder %s12408_s16, 3 }
  0x23   : > { %s380_s29 = sand.u32 1, %s12408_s16   ;;  %s15556_s30 = sand.u32 1, %s12404_s15  }
  0x24   : > { %s11912_s11 = smul.u32 2352, %s15556_s30  ;;  %p12565_p0 = pnand %p11986_p13, %p65_p11 }
  0x25   : > { %s11331_s13 = smul.u32 24, %s12408_s16  ;;  %s15698_s1 = sld [smem:[#allocation108_spill]] }
  0x26   : > { %s384_s25 = scalar_lea.vmem [#allocation3], %s11912_s11  ;;  %s15699_s4 = sld [smem:[#allocation110_spill]] }
  0x27   : > { %s392_s22 = sshll.u32 %s384_s25, 4  ;;  %s12576_s7 = scalar_lea.sflag [#allocation4], %s380_s29  ;;  %s393_s22 = int_to_ptr.vmem [resolvable:$true] %s392_s22 }
  0x28   : > { %p12142_p5 = pneg %p12565_p0 }
  0x2b   : > { %s389_s24 = scalar_lea.hbm %s15698_s1, %s11331_s13  ;;  %s12145_s17 = scalar_lea.hbm %s15698_s1, 7056 }
  0x2c   : > { %s390_s19 = sshll.u32 %s389_s24, 4  ;;  %s300_s30 = sshll.u32 %s15699_s4, 4  ;;  %s391_s19 = int_to_ptr.hbm [resolvable:$true] %s390_s19  ;;  %s301_s30 = int_to_ptr.hbm [resolvable:$true] %s300_s30 }
  0x2d   : > { %s12138_s26 = sshra.s32 %s391_s19, 4  ;;  %s12139_s26 = int_to_ptr.hbm [resolvable:$true] %s12138_s26 }
  0x2e   : > { %s12140_s23 = scalar_lea.hbm %s12139_s26, 2352  ;;  %p12146_p9 = scmp.lt.s32.totalorder %s12139_s26, %s15698_s1 }
  0x2f   : > { %p12141_p2 = scmp.ne.s32.totalorder %s12139_s26, %s12140_s23  ;;  %p12147_p10 = scmp.lt.s32.totalorder %s12145_s17, %s12140_s23 }
  0x31   : > { %p12143_p7 = pnand %p12142_p5, %p12141_p2  ;;  %p12148_p11 = por %p12147_p10, %p12146_p9 }
  0x33   : > { %p12144_p8 = pneg %p12143_p7 }
  0x35   : > { %p12149_p13 = pnand %p12148_p11, %p12144_p8 }
  0x37   : > { %12152 = shalt.err (!%p12149_p13)
}
  0x38   : > { %s12415_s2 = smov 1152   ;;  %s12416_s5 = smov 384  }
  0x39   : > { %s12417_s29 = smov 24   ;;  %s12418_s25 = smov [#allocation9]  }
  0x3a   : > { %11975 = dma.hbm_to_vmem [thread:$0]  (!%p12565_p0), %s391_s19, 37632, %s393_s22, %s12576_s7, %s12415_s2, %s12416_s5, %s12417_s29  }
  0x3b   : > { %s302_s11 = sshll.u32 %s12418_s25, 4  ;;  %s326_s26 = sshll.u32 %s15549_s6, 4  ;;  %s303_s11 = int_to_ptr.vmem [resolvable:$true] %s302_s11  ;;  %s327_s26 = int_to_ptr.hbm [resolvable:$true] %s326_s26 }
  0x3c   : > { %s15700_s23 = smov 36   ;;  %s15701_s17 = smov 576  }
  0x3d   : > { %11956 = dma.hbm_to_vmem [thread:$0]  (!%p12524_p6), %s301_s30, 18432, %s303_s11, [#allocation7], %s15701_s17, %s15701_s17, %s15700_s23  }
  0x3e   : > { %s12419_s18 = smov [#allocation12]   ;;  %s355_s2 = sshll.u32 %s15551_s8, 4  ;;  %s356_s2 = int_to_ptr.hbm [resolvable:$true] %s355_s2 }
  0x3f   : > { %s328_s24 = sshll.u32 %s12419_s18, 4  ;;  %s12420_s4 = smov 320   ;;  %s329_s24 = int_to_ptr.vmem [resolvable:$true] %s328_s24 }
  0x40   : > { %s12421_s5 = smov 20   ;;  %s12422_s29 = smov [#allocation15]  }
  0x41   : > { %11962 = dma.hbm_to_vmem [thread:$0]  (!%p12524_p6), %s327_s26, 640, %s329_s24, [#allocation11], %s12420_s4, %s12420_s4, %s12421_s5  }
  0x42   : > { %s357_s25 = sshll.u32 %s12422_s29, 4  ;;  %s367_s30 = sshll.u32 %s15552_s9, 4  ;;  %s358_s25 = int_to_ptr.vmem [resolvable:$true] %s357_s25  ;;  %s368_s30 = int_to_ptr.hbm [resolvable:$true] %s367_s30 }
  0x43   : > { %11968 = dma.hbm_to_vmem [thread:$0]  (!%p12524_p6), %s356_s2, 16, %s358_s25, [#allocation14]  }
  0x44   : > { %s15702_s11 = sand.u32 1, %s12404_s15   ;;  %s12423_s17 = smov [#allocation16]  }
  0x45   : > { %s8929_s23 = sshll.u32 %s15702_s11, 6  ;;  %s369_s18 = sshll.u32 %s12423_s17, 4  ;;  %s370_s18 = int_to_ptr.vmem [resolvable:$true] %s369_s18 }
  0x46   : > { %s11332_s22 = sshll.u32 %s12408_s16, 6  ;;  %s406_s4 = scalar_lea.vmem [#allocation8], %s8929_s23 }
  0x47   : > { %11971 = dma.hbm_to_vmem [thread:$0]  (!%p12524_p6), %s368_s30, 64, %s370_s18, [#allocation17]  }
  0x48   : > { %s411_s19 = scalar_lea.hbm %s15546_s3, %s11332_s22  ;;  %s414_s1 = sshll.u32 %s406_s4, 4  ;;  %s415_s1 = int_to_ptr.vmem [resolvable:$true] %s414_s1 }
  0x49   : > { %s412_s5 = sshll.u32 %s411_s19, 4  ;;  %s12295_s25 = scalar_lea.hbm %s15546_s3, 192  ;;  %s413_s5 = int_to_ptr.hbm [resolvable:$true] %s412_s5 }
  0x4a   : > { %s12288_s29 = sshra.s32 %s413_s5, 4  ;;  %s12289_s29 = int_to_ptr.hbm [resolvable:$true] %s12288_s29 }
  0x4b   : > { %s12290_s2 = scalar_lea.hbm %s12289_s29, 64  ;;  %p12296_p6 = scmp.lt.s32.totalorder %s12289_s29, %s15546_s3 }
  0x4c   : > { %p12291_p2 = scmp.ne.s32.totalorder %s12289_s29, %s12290_s2  ;;  %p12297_p9 = scmp.lt.s32.totalorder %s12295_s25, %s12290_s2 }
  0x4e   : > { %p12293_p7 = pnand %p12291_p2, %p12142_p5  ;;  %p12298_p10 = por %p12297_p9, %p12296_p6 }
  0x50   : > { %p12294_p8 = pneg %p12293_p7 }
  0x52   : > { %p12299_p11 = pnand %p12298_p10, %p12294_p8 }
  0x54   : > { %12302 = shalt.err (!%p12299_p11)
}
  0x55   : > { %s12424_s11 = smov 128   ;;  %s12425_s23 = smov 8  }
  0x56   : > { %11978 = dma.hbm_to_vmem [thread:$0]  (!%p12565_p0), %s413_s5, 1024, %s415_s1, %s12576_s7, %s12424_s11, %s12424_s11, %s12425_s23  }
  0x57   : > { %426 = sbr.rel (%p12513_p4) target bundleno = 3315 (0xcf3), region = 60 }
  0x5c   : > { %s428_s17 = sand.u32 1, %s12507_s20   ;;  %s430_s18 = sand.u32 1, %s12400_s14  }
  0x5d   : > { %s11913_s22 = smul.u32 2352, %s430_s18  ;;  %s429_s26 = scalar_lea.sflag [#allocation4], %s428_s17 }
  0x5f   : > { %s12634_s24 = scalar_lea.vmem [#allocation3], %s11913_s22 }
  0x60   : > { %12363 = dma.done.wait (%p12556_p12), %s429_s26, 37632  }
  0x61   : > { %12365 = vsyncadd (%p12556_p12), %s429_s26, 4294929664 }
  0x62   : > { %12367 = dma.done.wait (%p70_p1), [#allocation7], 32  }
  0x63   : > { %12369 = vsyncadd (%p70_p1), [#allocation7], 4294967264  ;;  %s8934_s7 = sshll.u32 %s430_s18, 6 }
  0x64   : > { %s12644_s21 = scalar_lea.vmem [#allocation8], %s8934_s7 }
  0x65   : > { %12371 = dma.done.wait (%p12556_p12), %s429_s26, 1024  }
  0x66   : > { %12373 = vsyncadd (%p12556_p12), %s429_s26, 4294966272 }
  0x67   : > { %12375 = dma.done.wait (%p70_p1), [#allocation7], 18432  }
  0x68   : > { %12377 = vsyncadd (%p70_p1), [#allocation7], 4294948864 }
  0x69   : > { %12379 = dma.done.wait (%p70_p1), [#allocation11], 656  }
  0x6a   : > { %12381 = vsyncadd (%p70_p1), [#allocation11], 4294966640 }
  0x6b   : > { %12383 = dma.done.wait (%p70_p1), [#allocation14], 9232  }
  0x6c   : > { %12385 = vsyncadd (%p70_p1), [#allocation14], 4294958064 }
  0x6d   : > { %12387 = dma.done.wait (%p70_p1), [#allocation17], 64  }
  0x6e   : > { %12389 = vsyncadd (%p70_p1), [#allocation17], 4294967232  ;;  %520 = sbr.rel (%p8920_p3) target bundleno = 148 (0x94), region = 100 }
  0x73   : > { %v12426_v0 = vmov 0.0  }
  0x74   : > { %521 = vst [vmem:[#allocation2 + $0xb0] sm:$0xff] %v12426_v0 }
  0x75   : > { %522 = vst [vmem:[#allocation2] sm:$0xff] %v12426_v0 }
  0x76   : > { %523 = vst [vmem:[#allocation2 + $0xd8] sm:$0xff] %v12426_v0 }
  0x77   : > { %524 = vst [vmem:[#allocation2 + $0x18] sm:$0xff] %v12426_v0 }
  0x78   : > { %525 = vst [vmem:[#allocation2 + $0x50] sm:$0xff] %v12426_v0 }
  0x79   : > { %526 = vst [vmem:[#allocation2 + $0x68] sm:$0xff] %v12426_v0 }
  0x7a   : > { %527 = vst [vmem:[#allocation2 + $0x30] sm:$0xff] %v12426_v0 }
  0x7b   : > { %528 = vst [vmem:[#allocation2 + $0x48] sm:$0xff] %v12426_v0 }
  0x7c   : > { %529 = vst [vmem:[#allocation2 + $0x80] sm:$0xff] %v12426_v0 }
  0x7d   : > { %530 = vst [vmem:[#allocation2 + $0x88] sm:$0xff] %v12426_v0 }
  0x7e   : > { %531 = vst [vmem:[#allocation2 + $0xe8] sm:$0xff] %v12426_v0 }
  0x7f   : > { %532 = vst [vmem:[#allocation2 + $0xb8] sm:$0xff] %v12426_v0 }
  0x80   : > { %533 = vst [vmem:[#allocation2 + $0x60] sm:$0xff] %v12426_v0 }
  0x81   : > { %534 = vst [vmem:[#allocation2 + $0xf0] sm:$0xff] %v12426_v0 }
  0x82   : > { %535 = vst [vmem:[#allocation2 + $0x8] sm:$0xff] %v12426_v0 }
  0x83   : > { %536 = vst [vmem:[#allocation2 + $0x78] sm:$0xff] %v12426_v0 }
  0x84   : > { %537 = vst [vmem:[#allocation2 + $0x38] sm:$0xff] %v12426_v0 }
  0x85   : > { %538 = vst [vmem:[#allocation2 + $0x58] sm:$0xff] %v12426_v0 }
  0x86   : > { %539 = vst [vmem:[#allocation2 + $0x40] sm:$0xff] %v12426_v0 }
  0x87   : > { %540 = vst [vmem:[#allocation2 + $0xc8] sm:$0xff] %v12426_v0 }
  0x88   : > { %541 = vst [vmem:[#allocation2 + $0xe0] sm:$0xff] %v12426_v0 }
  0x89   : > { %542 = vst [vmem:[#allocation2 + $0x90] sm:$0xff] %v12426_v0 }
  0x8a   : > { %543 = vst [vmem:[#allocation2 + $0x70] sm:$0xff] %v12426_v0 }
  0x8b   : > { %544 = vst [vmem:[#allocation2 + $0xc0] sm:$0xff] %v12426_v0 }
  0x8c   : > { %545 = vst [vmem:[#allocation2 + $0xa8] sm:$0xff] %v12426_v0 }
  0x8d   : > { %546 = vst [vmem:[#allocation2 + $0xd0] sm:$0xff] %v12426_v0 }
  0x8e   : > { %547 = vst [vmem:[#allocation2 + $0x10] sm:$0xff] %v12426_v0 }
  0x8f   : > { %548 = vst [vmem:[#allocation2 + $0x28] sm:$0xff] %v12426_v0 }
  0x90   : > { %549 = vst [vmem:[#allocation2 + $0xa0] sm:$0xff] %v12426_v0 }
  0x91   : > { %550 = vst [vmem:[#allocation2 + $0xf8] sm:$0xff] %v12426_v0 }
  0x92   : > { %551 = vst [vmem:[#allocation2 + $0x20] sm:$0xff] %v12426_v0 }
  0x93   : > { %552 = vst [vmem:[#allocation2 + $0x98] sm:$0xff] %v12426_v0 }
  0x94 PF: > { %v9336_v1 = vld [vmem:[%s12634_s24 + $0x150] sm:$0xf]  ;;  %v11434_v2 = vld [vmem:[%s12634_s24 + $0x164] sm:$0xf0]  ;;  %v9312_v12 = vld [vmem:[%s12634_s24 + $0x120] sm:$0xf] }
  0x95   : > { %v9528_v3 = vld [vmem:[%s12634_s24 + $0x2d0] sm:$0xf]  ;;  %v9337_v4 = vor.u32 %v11434_v2, %v9336_v1  ;;  %v11482_v5 = vld [vmem:[%s12634_s24 + $0x2e4] sm:$0xf0]  ;;  %v11428_v14 = vld [vmem:[%s12634_s24 + $0x134] sm:$0xf0] }
  0x96   : > { %v9720_v6 = vld [vmem:[%s12634_s24 + $0x450] sm:$0xf]  ;;  %v11530_v7 = vld [vmem:[%s12634_s24 + $0x464] sm:$0xf0]  ;;  %v9529_v8 = vor.u32 %v11482_v5, %v9528_v3  ;;  %v9504_v15 = vld [vmem:[%s12634_s24 + $0x2a0] sm:$0xf]  ;;  %v9313_v17 = vor.u32 %v11428_v14, %v9312_v12 }
  0x97   : > { %v9721_v9 = vor.u32 %v11530_v7, %v9720_v6  ;;  %v9912_v10 = vld [vmem:[%s12634_s24 + $0x5d0] sm:$0xf]  ;;  %v11578_v11 = vld [vmem:[%s12634_s24 + $0x5e4] sm:$0xf0]  ;;  %2686 = vmatpush.bf16.msra.mxu0 %v9337_v4  ;;  %v11476_v16 = vld [vmem:[%s12634_s24 + $0x2b4] sm:$0xf0] }
  0x98   : > { %v9913_v13 = vor.u32 %v11578_v11, %v9912_v10  ;;  %2735 = vmatpush.bf16.msra.mxu1 %v9529_v8  ;;  %v9505_v18 = vor.u32 %v11476_v16, %v9504_v15  ;;  %v9696_v19 = vld [vmem:[%s12634_s24 + $0x420] sm:$0xf]  ;;  %v11524_v20 = vld [vmem:[%s12634_s24 + $0x434] sm:$0xf0]  ;;  %v9288_v24 = vld [vmem:[%s12634_s24 + $0xf0] sm:$0xf] }
  0x99   : > { %2784 = vmatpush.bf16.msra.mxu2 %v9721_v9  ;;  %v9888_v21 = vld [vmem:[%s12634_s24 + $0x5a0] sm:$0xf]  ;;  %v9697_v22 = vor.u32 %v11524_v20, %v9696_v19  ;;  %v11572_v23 = vld [vmem:[%s12634_s24 + $0x5b4] sm:$0xf0]  ;;  %v11422_v25 = vld [vmem:[%s12634_s24 + $0x104] sm:$0xf0] }
  0x9a   : > { %2833 = vmatpush.bf16.msra.mxu3 %v9913_v13  ;;  %v9889_v26 = vor.u32 %v11572_v23, %v9888_v21  ;;  %v9480_v27 = vld [vmem:[%s12634_s24 + $0x270] sm:$0xf]  ;;  %v11470_v28 = vld [vmem:[%s12634_s24 + $0x284] sm:$0xf0]  ;;  %v9289_v30 = vor.u32 %v11422_v25, %v9288_v24  ;;  %v9264_v36 = vld [vmem:[%s12634_s24 + $0xc0] sm:$0xf] }
  0x9b   : > { %v9672_v29 = vld [vmem:[%s12634_s24 + $0x3f0] sm:$0xf]  ;;  %2687 = vmatpush.bf16.msra.mxu0 %v9313_v17  ;;  %v11518_v31 = vld [vmem:[%s12634_s24 + $0x404] sm:$0xf0]  ;;  %v9481_v34 = vor.u32 %v11470_v28, %v9480_v27  ;;  %v11416_v37 = vld [vmem:[%s12634_s24 + $0xd4] sm:$0xf0] }
  0x9c   : > { %v9864_v32 = vld [vmem:[%s12634_s24 + $0x570] sm:$0xf]  ;;  %v11566_v33 = vld [vmem:[%s12634_s24 + $0x584] sm:$0xf0]  ;;  %2736 = vmatpush.bf16.msra.mxu1 %v9505_v18  ;;  %v9673_v35 = vor.u32 %v11518_v31, %v9672_v29  ;;  %v9456_v38 = vld [vmem:[%s12634_s24 + $0x240] sm:$0xf]  ;;  %v9265_v45 = vor.u32 %v11416_v37, %v9264_v36 }
  0x9d   : > { %2785 = vmatpush.bf16.msra.mxu2 %v9697_v22  ;;  %v9865_v39 = vor.u32 %v11566_v33, %v9864_v32  ;;  %v11464_v40 = vld [vmem:[%s12634_s24 + $0x254] sm:$0xf0]  ;;  %v9648_v41 = vld [vmem:[%s12634_s24 + $0x3c0] sm:$0xf]  ;;  %v9240_v48 = vld [vmem:[%s12634_s24 + $0x90] sm:$0xf] }
  0x9e   : > { %2834 = vmatpush.bf16.msra.mxu3 %v9889_v26  ;;  %v11512_v42 = vld [vmem:[%s12634_s24 + $0x3d4] sm:$0xf0]  ;;  %v9840_v43 = vld [vmem:[%s12634_s24 + $0x540] sm:$0xf]  ;;  %v9457_v46 = vor.u32 %v11464_v40, %v9456_v38  ;;  %v11410_v49 = vld [vmem:[%s12634_s24 + $0xa4] sm:$0xf0] }
  0x9f   : > { %v11560_v44 = vld [vmem:[%s12634_s24 + $0x554] sm:$0xf0]  ;;  %2688 = vmatpush.bf16.msra.mxu0 %v9289_v30  ;;  %v9649_v47 = vor.u32 %v11512_v42, %v9648_v41  ;;  %v9432_v50 = vld [vmem:[%s12634_s24 + $0x210] sm:$0xf]  ;;  %v11458_v52 = vld [vmem:[%s12634_s24 + $0x224] sm:$0xf0]  ;;  %v9241_v57 = vor.u32 %v11410_v49, %v9240_v48 }
  0xa0   : > { %2737 = vmatpush.bf16.msra.mxu1 %v9481_v34  ;;  %v9841_v51 = vor.u32 %v11560_v44, %v9840_v43  ;;  %v9624_v53 = vld [vmem:[%s12634_s24 + $0x390] sm:$0xf]  ;;  %v11506_v54 = vld [vmem:[%s12634_s24 + $0x3a4] sm:$0xf0]  ;;  %v9433_v58 = vor.u32 %v11458_v52, %v9432_v50  ;;  %v9216_v60 = vld [vmem:[%s12634_s24 + $0x60] sm:$0xf] }
  0xa1   : > { %2786 = vmatpush.bf16.msra.mxu2 %v9673_v35  ;;  %v9816_v55 = vld [vmem:[%s12634_s24 + $0x510] sm:$0xf]  ;;  %v11554_v56 = vld [vmem:[%s12634_s24 + $0x524] sm:$0xf0]  ;;  %v9625_v59 = vor.u32 %v11506_v54, %v9624_v53  ;;  %v11404_v61 = vld [vmem:[%s12634_s24 + $0x74] sm:$0xf0] }
  0xa2   : > { %2835 = vmatpush.bf16.msra.mxu3 %v9865_v39  ;;  %v9408_v62 = vld [vmem:[%s12634_s24 + $0x1e0] sm:$0xf]  ;;  %v9817_v63 = vor.u32 %v11554_v56, %v9816_v55  ;;  %v11452_v0 = vld [vmem:[%s12634_s24 + $0x1f4] sm:$0xf0]  ;;  %v9217_v5 = vor.u32 %v11404_v61, %v9216_v60  ;;  %v9192_v8 = vld [vmem:[%s12634_s24 + $0x30] sm:$0xf] }
  0xa3   : > { %2689 = vmatpush.bf16.msra.mxu0 %v9265_v45  ;;  %v9600_v1 = vld [vmem:[%s12634_s24 + $0x360] sm:$0xf]  ;;  %v11500_v2 = vld [vmem:[%s12634_s24 + $0x374] sm:$0xf0]  ;;  %v9409_v6 = vor.u32 %v11452_v0, %v9408_v62  ;;  %v11398_v9 = vld [vmem:[%s12634_s24 + $0x44] sm:$0xf0] }
  0xa4   : > { %2738 = vmatpush.bf16.msra.mxu1 %v9457_v46  ;;  %v9792_v3 = vld [vmem:[%s12634_s24 + $0x4e0] sm:$0xf]  ;;  %v11548_v4 = vld [vmem:[%s12634_s24 + $0x4f4] sm:$0xf0]  ;;  %v9601_v7 = vor.u32 %v11500_v2, %v9600_v1  ;;  %v9384_v10 = vld [vmem:[%s12634_s24 + $0x1b0] sm:$0xf]  ;;  %v9193_v17 = vor.u32 %v11398_v9, %v9192_v8 }
  0xa5   : > { %2787 = vmatpush.bf16.msra.mxu2 %v9649_v47  ;;  %v9793_v11 = vor.u32 %v11548_v4, %v9792_v3  ;;  %v11446_v12 = vld [vmem:[%s12634_s24 + $0x1c4] sm:$0xf0]  ;;  %v9576_v13 = vld [vmem:[%s12634_s24 + $0x330] sm:$0xf]  ;;  %v9168_v20 = vld [vmem:[%s12634_s24] sm:$0xf] }
  0xa6   : > { %2836 = vmatpush.bf16.msra.mxu3 %v9841_v51  ;;  %v11494_v14 = vld [vmem:[%s12634_s24 + $0x344] sm:$0xf0]  ;;  %v9768_v15 = vld [vmem:[%s12634_s24 + $0x4b0] sm:$0xf]  ;;  %v9385_v18 = vor.u32 %v11446_v12, %v9384_v10  ;;  %v11392_v21 = vld [vmem:[%s12634_s24 + $0x14] sm:$0xf0] }
  0xa7   : > { %2690 = vmatpush.bf16.msra.mxu0 %v9241_v57  ;;  %v11542_v16 = vld [vmem:[%s12634_s24 + $0x4c4] sm:$0xf0]  ;;  %v9577_v19 = vor.u32 %v11494_v14, %v9576_v13  ;;  %v9360_v22 = vld [vmem:[%s12634_s24 + $0x180] sm:$0xf]  ;;  %v11440_v24 = vld [vmem:[%s12634_s24 + $0x194] sm:$0xf0]  ;;  %v9169_v29 = vor.u32 %v11392_v21, %v9168_v20 }
  0xa8   : > { %2739 = vmatpush.bf16.msra.mxu1 %v9433_v58  ;;  %v9769_v23 = vor.u32 %v11542_v16, %v9768_v15  ;;  %v9552_v25 = vld [vmem:[%s12634_s24 + $0x300] sm:$0xf]  ;;  %v11488_v26 = vld [vmem:[%s12634_s24 + $0x314] sm:$0xf0]  ;;  %v11336_v31 = vld [vmem:[%s15543_s0 + $0x18] sm:$0xf0]  ;;  %v9361_v33 = vor.u32 %v11440_v24, %v9360_v22 }
  0xa9   : > { %2788 = vmatpush.bf16.msra.mxu2 %v9625_v59  ;;  %v9744_v27 = vld [vmem:[%s12634_s24 + $0x480] sm:$0xf]  ;;  %v11536_v28 = vld [vmem:[%s12634_s24 + $0x494] sm:$0xf0]  ;;  %v11333_v32 = vld [vmem:[%s15543_s0 + $0x4] sm:$0xf]  ;;  %v9553_v34 = vor.u32 %v11488_v26, %v9552_v25 }
  0xaa   : > { %2837 = vmatpush.bf16.msra.mxu3 %v9817_v63  ;;  %v8944_v30 = vld [vmem:[%s15543_s0] sm:$0xf]  ;;  %v8952_v36 = vld [vmem:[%s15543_s0 + $0x8] sm:$0xf]  ;;  %v11337_v37 = vld [vmem:[%s15543_s0 + $0x20] sm:$0xf0]  ;;  %v9745_v38 = vor.u32 %v11536_v28, %v9744_v27 }
  0xab   : > { %2691 = vmatpush.bf16.msra.mxu0 %v9217_v5  ;;  %v8946_v35 = vld [vmem:[%s15543_s0 + $0x1c] sm:$0xf0]  ;;  %v11334_v39 = vld [vmem:[%s15543_s0 + $0xc] sm:$0xf]  ;;  %v8954_v40 = vld [vmem:[%s15543_s0 + $0x24] sm:$0xf0]  ;;  %v12756_v41 = vor.u32 %v11336_v31, %v8944_v30  ;;  %v12760_v43 = vor.u32 %v11337_v37, %v8952_v36 }
  0xac   : > { %2740 = vmatpush.bf16.msra.mxu1 %v9409_v6  ;;  %v12758_v42 = vor.u32 %v11333_v32, %v8946_v35  ;;  %v12762_v44 = vor.u32 %v11334_v39, %v8954_v40  ;;  %v8972_v45 = vld [vmem:[%s15543_s0 + $0x38] sm:$0xf]  ;;  %v11343_v46 = vld [vmem:[%s15543_s0 + $0x50] sm:$0xf0]  ;;  %v11340_v47 = vld [vmem:[%s15543_s0 + $0x3c] sm:$0xf] }
  0xad   : > { %2789 = vmatpush.bf16.msra.mxu2 %v9601_v7  ;;  %15703 = vst [vmem:[#allocation29_spill] sm:$0xff] %v12756_v41  ;;  %v8974_v48 = vld [vmem:[%s15543_s0 + $0x54] sm:$0xf0]  ;;  %v8980_v49 = vld [vmem:[%s15543_s0 + $0x40] sm:$0xf]  ;;  %v12792_v53 = vor.u32 %v11343_v46, %v8972_v45  ;;  %vm2661_vm0 = vcmask 130048  }
  0xae   : > { %2838 = vmatpush.bf16.msra.mxu3 %v9793_v11  ;;  %15704 = vst [vmem:[#allocation30_spill] sm:$0xff] %v12758_v42  ;;  %v11344_v50 = vld [vmem:[%s15543_s0 + $0x58] sm:$0xf0]  ;;  %v11341_v51 = vld [vmem:[%s15543_s0 + $0x44] sm:$0xf]  ;;  %v12794_v54 = vor.u32 %v11340_v47, %v8974_v48  ;;  %vm4956_vm1 = vcmask 523264  }
  0xaf   : > { %2692 = vmatpush.bf16.msra.mxu0 %v9193_v17  ;;  %15705 = vst [vmem:[#allocation31_spill] sm:$0xff] %v12760_v43  ;;  %v8982_v52 = vld [vmem:[%s15543_s0 + $0x5c] sm:$0xf0]  ;;  %v12796_v55 = vor.u32 %v11344_v50, %v8980_v49  ;;  %v9000_v57 = vld [vmem:[%s15543_s0 + $0x70] sm:$0xf]  ;;  %p10438_p1 = scmp.ne.s32.totalorder %s12507_s20, 2 }
  0xb0   : > { %2741 = vmatpush.bf16.msra.mxu1 %v9385_v18  ;;  %15706 = vst [vmem:[#allocation32_spill] sm:$0xff] %v12762_v44  ;;  %v12798_v56 = vor.u32 %v11341_v51, %v8982_v52  ;;  %v11350_v58 = vld [vmem:[%s15543_s0 + $0x88] sm:$0xf0]  ;;  %v11347_v59 = vld [vmem:[%s15543_s0 + $0x74] sm:$0xf] }
  0xb1   : > { %2790 = vmatpush.bf16.msra.mxu2 %v9577_v19  ;;  %15707 = vst [vmem:[#allocation33_spill] sm:$0xff] %v12792_v53  ;;  %v9002_v60 = vld [vmem:[%s15543_s0 + $0x8c] sm:$0xf0]  ;;  %v9008_v61 = vld [vmem:[%s15543_s0 + $0x78] sm:$0xf]  ;;  %v12828_v1 = vor.u32 %v11350_v58, %v9000_v57 }
  0xb2   : > { %2839 = vmatpush.bf16.msra.mxu3 %v9769_v23  ;;  %15708 = vst [vmem:[#allocation34_spill] sm:$0xff] %v12794_v54  ;;  %v11351_v62 = vld [vmem:[%s15543_s0 + $0x90] sm:$0xf0]  ;;  %v11348_v63 = vld [vmem:[%s15543_s0 + $0x7c] sm:$0xf]  ;;  %v12830_v2 = vor.u32 %v11347_v59, %v9002_v60 }
  0xb3   : > { %2693 = vmatpush.bf16.msra.mxu0 %v9169_v29  ;;  %15709 = vst [vmem:[#allocation35_spill] sm:$0xff] %v12796_v55  ;;  %v9010_v0 = vld [vmem:[%s15543_s0 + $0x94] sm:$0xf0]  ;;  %v12832_v3 = vor.u32 %v11351_v62, %v9008_v61  ;;  %v9028_v5 = vld [vmem:[%s15543_s0 + $0xa8] sm:$0xf] }
  0xb4   : > { %2742 = vmatpush.bf16.msra.mxu1 %v9361_v33  ;;  %15710 = vst [vmem:[#allocation36_spill] sm:$0xff] %v12798_v56  ;;  %v12834_v4 = vor.u32 %v11348_v63, %v9010_v0  ;;  %v11357_v6 = vld [vmem:[%s15543_s0 + $0xc0] sm:$0xf0]  ;;  %v11354_v7 = vld [vmem:[%s15543_s0 + $0xac] sm:$0xf] }
  0xb5   : > { %2791 = vmatpush.bf16.msra.mxu2 %v9553_v34  ;;  %15711 = vst [vmem:[#allocation37_spill] sm:$0xff] %v12828_v1  ;;  %v9030_v8 = vld [vmem:[%s15543_s0 + $0xc4] sm:$0xf0]  ;;  %v9036_v9 = vld [vmem:[%s15543_s0 + $0xb0] sm:$0xf]  ;;  %v12864_v13 = vor.u32 %v11357_v6, %v9028_v5 }
  0xb6   : > { %2840 = vmatpush.bf16.msra.mxu3 %v9745_v38  ;;  %2694 = vmatmul.bf16.vlgmr.msra.gmra.mxu0 %v12756_v41  ;;  %15712 = vst [vmem:[#allocation38_spill] sm:$0xff] %v12830_v2  ;;  %v11358_v10 = vld [vmem:[%s15543_s0 + $0xc8] sm:$0xf0]  ;;  %v11355_v11 = vld [vmem:[%s15543_s0 + $0xb4] sm:$0xf]  ;;  %v12866_v14 = vor.u32 %v11354_v7, %v9030_v8 }
  0xb7   : > { %2743 = vmatmul.bf16.vlgmr.msra.gmra.mxu1 %v12758_v42  ;;  %15713 = vst [vmem:[#allocation39_spill] sm:$0xff] %v12832_v3  ;;  %v9038_v12 = vld [vmem:[%s15543_s0 + $0xcc] sm:$0xf0]  ;;  %v12868_v15 = vor.u32 %v11358_v10, %v9036_v9  ;;  %v9056_v17 = vld [vmem:[%s15543_s0 + $0xe0] sm:$0xf] }
  0xb8   : > { %2792 = vmatmul.bf16.vlgmr.msra.gmra.mxu2 %v12760_v43  ;;  %15714 = vst [vmem:[#allocation40_spill] sm:$0xff] %v12834_v4  ;;  %v12870_v16 = vor.u32 %v11355_v11, %v9038_v12  ;;  %v11364_v18 = vld [vmem:[%s15543_s0 + $0xf8] sm:$0xf0]  ;;  %v11361_v19 = vld [vmem:[%s15543_s0 + $0xe4] sm:$0xf] }
  0xb9   : > { %2841 = vmatmul.bf16.vlgmr.msra.gmra.mxu3 %v12762_v44  ;;  %15715 = vst [vmem:[#allocation41_spill] sm:$0xff] %v12864_v13  ;;  %v9058_v20 = vld [vmem:[%s15543_s0 + $0xfc] sm:$0xf0]  ;;  %v9064_v21 = vld [vmem:[%s15543_s0 + $0xe8] sm:$0xf]  ;;  %v12900_v25 = vor.u32 %v11364_v18, %v9056_v17 }
  0xba   : > { %15716 = vst [vmem:[#allocation42_spill] sm:$0xff] %v12866_v14  ;;  %v11365_v22 = vld [vmem:[%s15543_s0 + $0x100] sm:$0xf0]  ;;  %v11362_v23 = vld [vmem:[%s15543_s0 + $0xec] sm:$0xf]  ;;  %v12902_v26 = vor.u32 %v11361_v19, %v9058_v20 }
  0xbb   : > { %15717 = vst [vmem:[#allocation43_spill] sm:$0xff] %v12868_v15  ;;  %v9066_v24 = vld [vmem:[%s15543_s0 + $0x104] sm:$0xf0]  ;;  %v12904_v27 = vor.u32 %v11365_v22, %v9064_v21  ;;  %v11626_v30 = vld [vmem:[%s12634_s24 + $0x764] sm:$0xf0] }
  0xbc   : > { %15718 = vst [vmem:[#allocation44_spill] sm:$0xff] %v12870_v16  ;;  %v12906_v28 = vor.u32 %v11362_v23, %v9066_v24  ;;  %v10104_v29 = vld [vmem:[%s12634_s24 + $0x750] sm:$0xf]  ;;  %v11674_v33 = vld [vmem:[%s12634_s24 + $0x8e4] sm:$0xf0] }
  0xbd   : > { %15719 = vst [vmem:[#allocation45_spill] sm:$0xff] %v12900_v25  ;;  %v10105_v31 = vor.u32 %v11626_v30, %v10104_v29  ;;  %v10296_v32 = vld [vmem:[%s12634_s24 + $0x8d0] sm:$0xf]  ;;  %v11431_v35 = vld [vmem:[%s12634_s24 + $0x154] sm:$0xf] }
  0xbe   : > { %15720 = vst [vmem:[#allocation46_spill] sm:$0xff] %v12902_v26  ;;  %v10297_v34 = vor.u32 %v11674_v33, %v10296_v32  ;;  %v9338_v36 = vld [vmem:[%s12634_s24 + $0x168] sm:$0xf0]  ;;  %v10080_v38 = vld [vmem:[%s12634_s24 + $0x720] sm:$0xf] }
  0xbf   : > { %15721 = vst [vmem:[#allocation47_spill] sm:$0xff] %v12904_v27  ;;  %2882 = vmatpush.bf16.msrb.mxu0 %v10105_v31  ;;  %v9341_v37 = vor.u32 %v11431_v35, %v9338_v36  ;;  %v11620_v39 = vld [vmem:[%s12634_s24 + $0x734] sm:$0xf0]  ;;  %v10272_v40 = vld [vmem:[%s12634_s24 + $0x8a0] sm:$0xf] }
  0xc0   : > { %15722 = vst [vmem:[#allocation48_spill] sm:$0xff] %v12906_v28  ;;  %2931 = vmatpush.bf16.msrb.mxu1 %v10297_v34  ;;  %v10081_v45 = vor.u32 %v11620_v39, %v10080_v38  ;;  %v11668_v46 = vld [vmem:[%s12634_s24 + $0x8b4] sm:$0xf0]  ;;  %v11425_v47 = vld [vmem:[%s12634_s24 + $0x124] sm:$0xf] }
  0xc1   : > { %v9314_v48 = vld [vmem:[%s12634_s24 + $0x138] sm:$0xf0]  ;;  %3029 = vmatpush.bf16.msrb.mxu3 %v9341_v37  ;;  %v10273_v49 = vor.u32 %v11668_v46, %v10272_v40  ;;  %v10056_v51 = vld [vmem:[%s12634_s24 + $0x6f0] sm:$0xf]  ;;  %v11614_v52 = vld [vmem:[%s12634_s24 + $0x704] sm:$0xf0] }
  0xc2   : > { %v9317_v50 = vor.u32 %v11425_v47, %v9314_v48  ;;  %v10248_v57 = vld [vmem:[%s12634_s24 + $0x870] sm:$0xf]  ;;  %v11662_v58 = vld [vmem:[%s12634_s24 + $0x884] sm:$0xf0]  ;;  %v11419_v59 = vld [vmem:[%s12634_s24 + $0xf4] sm:$0xf]  ;;  %v10057_v61 = vor.u32 %v11614_v52, %v10056_v51 }
  0xc3   : > { %v9290_v60 = vld [vmem:[%s12634_s24 + $0x108] sm:$0xf0]  ;;  %2883 = vmatpush.bf16.msrb.mxu0 %v10081_v45  ;;  %v9084_v62 = vld [vmem:[%s15543_s0 + $0x118] sm:$0xf]  ;;  %v10249_v63 = vor.u32 %v11662_v58, %v10248_v57  ;;  %v11608_v5 = vld [vmem:[%s12634_s24 + $0x6d4] sm:$0xf0] }
  0xc4   : > { %2932 = vmatpush.bf16.msrb.mxu1 %v10273_v49  ;;  %v10032_v0 = vld [vmem:[%s12634_s24 + $0x6c0] sm:$0xf]  ;;  %v11371_v6 = vld [vmem:[%s15543_s0 + $0x130] sm:$0xf0]  ;;  %v9293_v7 = vor.u32 %v11419_v59, %v9290_v60  ;;  %v11656_v9 = vld [vmem:[%s12634_s24 + $0x854] sm:$0xf0] }
  0xc5   : > { %3030 = vmatpush.bf16.msrb.mxu3 %v9317_v50  ;;  %v10224_v8 = vld [vmem:[%s12634_s24 + $0x840] sm:$0xf]  ;;  %v11368_v10 = vld [vmem:[%s15543_s0 + $0x11c] sm:$0xf]  ;;  %v9266_v12 = vld [vmem:[%s12634_s24 + $0xd8] sm:$0xf0]  ;;  %v10033_v20 = vor.u32 %v11608_v5, %v10032_v0  ;;  %v12960_v24 = vor.u32 %v11371_v6, %v9084_v62 }
  0xc6   : > { %2699 = vmatmul.bf16.gmra.mxu0 %v12792_v53  ;;  %v11413_v11 = vld [vmem:[%s12634_s24 + $0xc4] sm:$0xf]  ;;  %v9086_v17 = vld [vmem:[%s15543_s0 + $0x134] sm:$0xf0]  ;;  %v9092_v18 = vld [vmem:[%s15543_s0 + $0x120] sm:$0xf]  ;;  %v10225_v23 = vor.u32 %v11656_v9, %v10224_v8 }
  0xc7   : > { %2748 = vmatmul.bf16.gmra.mxu1 %v12794_v54  ;;  %v11372_v19 = vld [vmem:[%s15543_s0 + $0x138] sm:$0xf0]  ;;  %2884 = vmatpush.bf16.msrb.mxu0 %v10057_v61  ;;  %v11369_v21 = vld [vmem:[%s15543_s0 + $0x124] sm:$0xf]  ;;  %v9094_v22 = vld [vmem:[%s15543_s0 + $0x13c] sm:$0xf0]  ;;  %v9269_v29 = vor.u32 %v11413_v11, %v9266_v12  ;;  %v12962_v30 = vor.u32 %v11368_v10, %v9086_v17 }
  0xc8   : > { %2797 = vmatmul.bf16.gmra.mxu2 %v12796_v55  ;;  %2933 = vmatpush.bf16.msrb.mxu1 %v10249_v63  ;;  %15723 = vst [vmem:[#allocation49_spill] sm:$0xff] %v12960_v24  ;;  %v12964_v31 = vor.u32 %v11372_v19, %v9092_v18  ;;  %v12966_v32 = vor.u32 %v11369_v21, %v9094_v22  ;;  %v10008_v33 = vld [vmem:[%s12634_s24 + $0x690] sm:$0xf]  ;;  %v11602_v34 = vld [vmem:[%s12634_s24 + $0x6a4] sm:$0xf0] }
  0xc9   : > { %2846 = vmatmul.bf16.gmra.mxu3 %v12798_v56  ;;  %15724 = vst [vmem:[#allocation50_spill] sm:$0xff] %v12962_v30  ;;  %v10009_v35 = vor.u32 %v11602_v34, %v10008_v33  ;;  %v10200_v36 = vld [vmem:[%s12634_s24 + $0x810] sm:$0xf]  ;;  %v11650_v37 = vld [vmem:[%s12634_s24 + $0x824] sm:$0xf0] }
  0xca   : > { %3031 = vmatpush.bf16.msrb.mxu3 %v9293_v7  ;;  %15725 = vst [vmem:[#allocation51_spill] sm:$0xff] %v12964_v31  ;;  %v10201_v38 = vor.u32 %v11650_v37, %v10200_v36  ;;  %v11407_v39 = vld [vmem:[%s12634_s24 + $0x94] sm:$0xf]  ;;  %v9242_v40 = vld [vmem:[%s12634_s24 + $0xa8] sm:$0xf0] }
  0xcb   : > { %15726 = vst [vmem:[#allocation52_spill] sm:$0xff] %v12966_v32  ;;  %2885 = vmatpush.bf16.msrb.mxu0 %v10033_v20  ;;  %v9245_v45 = vor.u32 %v11407_v39, %v9242_v40  ;;  %v9984_v46 = vld [vmem:[%s12634_s24 + $0x660] sm:$0xf]  ;;  %v11596_v47 = vld [vmem:[%s12634_s24 + $0x674] sm:$0xf0] }
  0xcc   : > { %2934 = vmatpush.bf16.msrb.mxu1 %v10225_v23  ;;  %v10176_v48 = vld [vmem:[%s12634_s24 + $0x7e0] sm:$0xf]  ;;  %v9985_v49 = vor.u32 %v11596_v47, %v9984_v46  ;;  %v11644_v50 = vld [vmem:[%s12634_s24 + $0x7f4] sm:$0xf0]  ;;  %v11401_v51 = vld [vmem:[%s12634_s24 + $0x64] sm:$0xf] }
  0xcd   : > { %v9218_v52 = vld [vmem:[%s12634_s24 + $0x78] sm:$0xf0]  ;;  %v10177_v57 = vor.u32 %v11644_v50, %v10176_v48  ;;  %v9960_v59 = vld [vmem:[%s12634_s24 + $0x630] sm:$0xf]  ;;  %v11590_v60 = vld [vmem:[%s12634_s24 + $0x644] sm:$0xf0] }
  0xce   : > { %3032 = vmatpush.bf16.msrb.mxu3 %v9269_v29  ;;  %v9221_v58 = vor.u32 %v11401_v51, %v9218_v52  ;;  %v10152_v61 = vld [vmem:[%s12634_s24 + $0x7b0] sm:$0xf]  ;;  %v11638_v62 = vld [vmem:[%s12634_s24 + $0x7c4] sm:$0xf0]  ;;  %v11395_v63 = vld [vmem:[%s12634_s24 + $0x34] sm:$0xf]  ;;  %v9961_v5 = vor.u32 %v11590_v60, %v9960_v59 }
  0xcf   : > { %2886 = vmatpush.bf16.msrb.mxu0 %v10009_v35  ;;  %v9194_v0 = vld [vmem:[%s12634_s24 + $0x48] sm:$0xf0]  ;;  %v10153_v6 = vor.u32 %v11638_v62, %v10152_v61  ;;  %v9112_v7 = vld [vmem:[%s15543_s0 + $0x150] sm:$0xf]  ;;  %v11378_v8 = vld [vmem:[%s15543_s0 + $0x168] sm:$0xf0] }
  0xd0   : > { %2935 = vmatpush.bf16.msrb.mxu1 %v10201_v38  ;;  %v9197_v9 = vor.u32 %v11395_v63, %v9194_v0  ;;  %v11375_v10 = vld [vmem:[%s15543_s0 + $0x154] sm:$0xf]  ;;  %v9114_v11 = vld [vmem:[%s15543_s0 + $0x16c] sm:$0xf0]  ;;  %v9120_v12 = vld [vmem:[%s15543_s0 + $0x158] sm:$0xf]  ;;  %v13017_v23 = vor.u32 %v11378_v8, %v9112_v7 }
  0xd1   : > { %v11379_v17 = vld [vmem:[%s15543_s0 + $0x170] sm:$0xf0]  ;;  %v11376_v18 = vld [vmem:[%s15543_s0 + $0x15c] sm:$0xf]  ;;  %v9122_v19 = vld [vmem:[%s15543_s0 + $0x174] sm:$0xf0]  ;;  %v13022_v36 = vor.u32 %v11375_v10, %v9114_v11 }
  0xd2   : > { %3033 = vmatpush.bf16.msrb.mxu3 %v9245_v45  ;;  %v9936_v20 = vld [vmem:[%s12634_s24 + $0x600] sm:$0xf]  ;;  %v11584_v21 = vld [vmem:[%s12634_s24 + $0x614] sm:$0xf0]  ;;  %v13024_v37 = vor.u32 %v11379_v17, %v9120_v12  ;;  %v11389_v40 = vld [vmem:[%s12634_s24 + $0x4] sm:$0xf]  ;;  %v13028_v46 = vor.u32 %v11376_v18, %v9122_v19 }
  0xd3   : > { %2887 = vmatpush.bf16.msrb.mxu0 %v9985_v49  ;;  %v10128_v22 = vld [vmem:[%s12634_s24 + $0x780] sm:$0xf]  ;;  %v9937_v29 = vor.u32 %v11584_v21, %v9936_v20  ;;  %v11632_v33 = vld [vmem:[%s12634_s24 + $0x794] sm:$0xf0]  ;;  %15727 = vst [vmem:[#allocation53_spill] sm:$0xff] %v13022_v36 }
  0xd4   : > { %2936 = vmatpush.bf16.msrb.mxu1 %v10177_v57  ;;  %v10320_v34 = vld [vmem:[%s12634_s24 + $0x900] sm:$0xf]  ;;  %v11680_v35 = vld [vmem:[%s12634_s24 + $0x914] sm:$0xf0]  ;;  %15728 = vst [vmem:[#allocation54_spill] sm:$0xff] %v13024_v37  ;;  %v10129_v38 = vor.u32 %v11632_v33, %v10128_v22 }
  0xd5   : > { %v10321_v39 = vor.u32 %v11680_v35, %v10320_v34  ;;  %v9170_v45 = vld [vmem:[%s12634_s24 + $0x18] sm:$0xf0]  ;;  %15729 = vst [vmem:[#allocation55_spill] sm:$0xff] %v13028_v46  ;;  %v9140_v48 = vld [vmem:[%s15543_s0 + $0x188] sm:$0xf] }
  0xd6   : > { %2704 = vmatmul.bf16.gmra.mxu0 %v12828_v1  ;;  %3034 = vmatpush.bf16.msrb.mxu3 %v9221_v58  ;;  %v9173_v47 = vor.u32 %v11389_v40, %v9170_v45  ;;  %v11385_v49 = vld [vmem:[%s15543_s0 + $0x1a0] sm:$0xf0]  ;;  %v11382_v50 = vld [vmem:[%s15543_s0 + $0x18c] sm:$0xf]  ;;  %v9142_v51 = vld [vmem:[%s15543_s0 + $0x1a4] sm:$0xf0] }
  0xd7   : > { %2753 = vmatmul.bf16.gmra.mxu1 %v12830_v2  ;;  %2888 = vmatpush.bf16.msrb.mxu0 %v9961_v5  ;;  %v9148_v52 = vld [vmem:[%s15543_s0 + $0x190] sm:$0xf]  ;;  %v11386_v57 = vld [vmem:[%s15543_s0 + $0x1a8] sm:$0xf0]  ;;  %v11383_v58 = vld [vmem:[%s15543_s0 + $0x194] sm:$0xf]  ;;  %v13058_v60 = vor.u32 %v11385_v49, %v9140_v48  ;;  %v13060_v61 = vor.u32 %v11382_v50, %v9142_v51 }
  0xd8   : > { %2802 = vmatmul.bf16.gmra.mxu2 %v12832_v3  ;;  %2937 = vmatpush.bf16.msrb.mxu1 %v10153_v6  ;;  %v9150_v59 = vld [vmem:[%s15543_s0 + $0x1ac] sm:$0xf0]  ;;  %v13062_v62 = vor.u32 %v11386_v57, %v9148_v52  ;;  %v11338_v5 = vld [vmem:[%s15543_s0 + $0x28] sm:$0xf0]  ;;  %v11335_v6 = vld [vmem:[%s15543_s0 + $0x14] sm:$0xf] }
  0xd9   : > { %2851 = vmatmul.bf16.gmra.mxu3 %v12834_v4  ;;  %2987 = vmatpush.bf16.msrb.mxu2 %v10321_v39  ;;  %15730 = vst [vmem:[#allocation56_spill] sm:$0xff] %v13060_v61  ;;  %v13064_v63 = vor.u32 %v11383_v58, %v9150_v59  ;;  %v8960_v0 = vld [vmem:[%s15543_s0 + $0x10] sm:$0xf]  ;;  %v8968_v8 = vld [vmem:[%s15543_s0 + $0x18] sm:$0xf] }
  0xda   : > { %3035 = vmatpush.bf16.msrb.mxu3 %v9197_v9  ;;  %15731 = vst [vmem:[#allocation57_spill] sm:$0xff] %v13062_v62  ;;  %v8962_v7 = vld [vmem:[%s15543_s0 + $0x2c] sm:$0xf0]  ;;  %v11339_v9 = vld [vmem:[%s15543_s0 + $0x30] sm:$0xf0]  ;;  %v13088_v10 = vor.u32 %v11338_v5, %v8960_v0 }
  0xdb   : > { %2889 = vmatpush.bf16.msrb.mxu0 %v9937_v29  ;;  %15732 = vst [vmem:[#allocation58_spill] sm:$0xff] %v13064_v63  ;;  %v13090_v12 = vor.u32 %v11335_v6, %v8962_v7  ;;  %v13092_v17 = vor.u32 %v11339_v9, %v8968_v8  ;;  %v11345_v39 = vld [vmem:[%s15543_s0 + $0x60] sm:$0xf0]  ;;  %v11342_v40 = vld [vmem:[%s15543_s0 + $0x4c] sm:$0xf] }
  0xdc   : > { %2938 = vmatpush.bf16.msrb.mxu1 %v10129_v38  ;;  %15733 = vst [vmem:[#allocation59_spill] sm:$0xff] %v13088_v10  ;;  %v8988_v38 = vld [vmem:[%s15543_s0 + $0x48] sm:$0xf]  ;;  %v11346_v48 = vld [vmem:[%s15543_s0 + $0x68] sm:$0xf0] }
  0xdd   : > { %15734 = vst [vmem:[#allocation60_spill] sm:$0xff] %v13090_v12  ;;  %v8990_v45 = vld [vmem:[%s15543_s0 + $0x64] sm:$0xf0]  ;;  %v13119_v50 = vor.u32 %v11345_v39, %v8988_v38  ;;  %v11353_v38 = vld [vmem:[%s15543_s0 + $0xa0] sm:$0xf0] }
  0xde   : > { %3036 = vmatpush.bf16.msrb.mxu3 %v9173_v47  ;;  %15735 = vst [vmem:[#allocation61_spill] sm:$0xff] %v13092_v17  ;;  %v8996_v47 = vld [vmem:[%s15543_s0 + $0x50] sm:$0xf]  ;;  %v13121_v58 = vor.u32 %v11342_v40, %v8990_v45 }
  0xdf   : > { %15736 = vst [vmem:[#allocation62_spill] sm:$0xff] %v13119_v50  ;;  %v13123_v59 = vor.u32 %v11346_v48, %v8996_v47 }
  0xe0   : > { %15737 = vst [vmem:[#allocation63_spill] sm:$0xff] %v13121_v58 }
  0xe1   : > { %15738 = vst [vmem:[#allocation64_spill] sm:$0xff] %v13123_v59 }
  0xe6   : > { %2709 = vmatmul.bf16.gmra.mxu0 %v12864_v13 }
  0xe7   : > { %2758 = vmatmul.bf16.gmra.mxu1 %v12866_v14 }
  0xe8   : > { %2807 = vmatmul.bf16.gmra.mxu2 %v12868_v15 }
  0xe9   : > { %2856 = vmatmul.bf16.gmra.mxu3 %v12870_v16 }
  0xf6   : > { %2714 = vmatmul.bf16.gmra.mxu0 %v12900_v25 }
  0xf7   : > { %2763 = vmatmul.bf16.gmra.mxu1 %v12902_v26 }
  0xf8   : > { %2812 = vmatmul.bf16.gmra.mxu2 %v12904_v27 }
  0xf9   : > { %2861 = vmatmul.bf16.gmra.mxu3 %v12906_v28 }
 0x106   : > { %2719 = vmatmul.bf16.gmra.mxu0 %v12960_v24 }
 0x107   : > { %2768 = vmatmul.bf16.gmra.mxu1 %v12962_v30 }
 0x108   : > { %2817 = vmatmul.bf16.gmra.mxu2 %v12964_v31 }
 0x109   : > { %2866 = vmatmul.bf16.gmra.mxu3 %v12966_v32 }
 0x116   : > { %2724 = vmatmul.bf16.gmra.mxu0 %v13017_v23 }
 0x117   : > { %2773 = vmatmul.bf16.gmra.mxu1 %v13022_v36 }
 0x118   : > { %2822 = vmatmul.bf16.gmra.mxu2 %v13024_v37  ;;  %v9746_v37 = vld [vmem:[%s12634_s24 + $0x498] sm:$0xf0] }
 0x119   : > { %2871 = vmatmul.bf16.gmra.mxu3 %v13028_v46  ;;  %v11533_v46 = vld [vmem:[%s12634_s24 + $0x484] sm:$0xf] }
 0x11a   : > { %v9749_v32 = vor.u32 %v11533_v46, %v9746_v37 }
 0x126   : > { %2729 = vmatmul.bf16.gmra.mxu0 %v13058_v60 }
 0x127   : > { %2778 = vmatmul.bf16.gmra.mxu1 %v13060_v61  ;;  %v9554_v61 = vld [vmem:[%s12634_s24 + $0x318] sm:$0xf0] }
 0x128   : > { %2827 = vmatmul.bf16.gmra.mxu2 %v13062_v62 }
 0x129   : > { %2876 = vmatmul.bf16.gmra.mxu3 %v13064_v63 }
 0x133   : > { %v2695_v11 = vpop.f32.mrf.mxu0 }
 0x134   : > { %v2744_v18 = vpop.f32.mrf.mxu1 }
 0x135   : > { %v2745_v19 = vadd.f32 %v2744_v18, %v2695_v11 }
 0x136   : > { %2890 = vmatmul.bf16.vlgmr.msrb.gmra.mxu0 %v13088_v10 }
 0x137   : > { %2939 = vmatmul.bf16.vlgmr.msrb.gmra.mxu1 %v13090_v12 }
 0x138   : > { %10342 = vmatmul.msk.bf16.vlgmr.msrb.gmra.mxu2 %vm2661_vm0, %v13092_v17  ;;  %v9842_v17 = vld [vmem:[%s12634_s24 + $0x558] sm:$0xf0] }
 0x139   : > { %3037 = vmatmul.bf16.vlgmr.msrb.gmra.mxu3 %v12756_v41  ;;  %v11557_v41 = vld [vmem:[%s12634_s24 + $0x544] sm:$0xf] }
 0x13b   : > { %v2793_v20 = vpop.f32.mrf.mxu2  ;;  %v2697_v22 = vpop.f32.mrf.mxu0 }
 0x13c   : > { %v2794_v21 = vadd.f32 %v2793_v20, %v2745_v19  ;;  %v2842_v29 = vpop.f32.mrf.mxu3  ;;  %v2746_v33 = vpop.f32.mrf.mxu1 }
 0x13d   : > { %v2747_v34 = vadd.f32 %v2746_v33, %v2697_v22  ;;  %v11352_v22 = vld [vmem:[%s15543_s0 + $0x98] sm:$0xf0]  ;;  %v9018_v33 = vld [vmem:[%s15543_s0 + $0x9c] sm:$0xf0] }
 0x13e   : > { %v13099_v35 = vadd.f32 %v2842_v29, %v2794_v21  ;;  %v9016_v21 = vld [vmem:[%s15543_s0 + $0x80] sm:$0xf]  ;;  %v11349_v29 = vld [vmem:[%s15543_s0 + $0x84] sm:$0xf] }
 0x13f   : > { %v13152_v40 = vor.u32 %v11352_v22, %v9016_v21  ;;  %v9044_v21 = vld [vmem:[%s15543_s0 + $0xb8] sm:$0xf]  ;;  %v11359_v22 = vld [vmem:[%s15543_s0 + $0xd0] sm:$0xf0] }
 0x141   : > { %15739 = vst [vmem:[#allocation65_spill] sm:$0xff] %v13152_v40 }
 0x143   : > { %v2795_v49 = vpop.f32.mrf.mxu2  ;;  %v2700_v52 = vpop.f32.mrf.mxu0 }
 0x144   : > { %v2796_v51 = vadd.f32 %v2795_v49, %v2747_v34  ;;  %v2844_v57 = vpop.f32.mrf.mxu3  ;;  %v2749_v0 = vpop.f32.mrf.mxu1  ;;  %v9024_v34 = vld [vmem:[%s15543_s0 + $0x88] sm:$0xf]  ;;  %v13154_v49 = vor.u32 %v11349_v29, %v9018_v33  ;;  %v11356_v29 = vld [vmem:[%s15543_s0 + $0xbc] sm:$0xf]  ;;  %v9046_v33 = vld [vmem:[%s15543_s0 + $0xd4] sm:$0xf0] }
 0x145   : > { %v2750_v5 = vadd.f32 %v2749_v0, %v2700_v52 }
 0x146   : > { %v13125_v6 = vadd.f32 %v2844_v57, %v2796_v51  ;;  %2895 = vmatmul.bf16.gmra.mxu0 %v13119_v50  ;;  %15740 = vst [vmem:[#allocation66_spill] sm:$0xff] %v13154_v49  ;;  %v13156_v51 = vor.u32 %v11353_v38, %v9024_v34  ;;  %v9052_v34 = vld [vmem:[%s15543_s0 + $0xc0] sm:$0xf]  ;;  %v11360_v38 = vld [vmem:[%s15543_s0 + $0xd8] sm:$0xf0] }
 0x147   : > { %2944 = vmatmul.bf16.gmra.mxu1 %v13121_v58  ;;  %v9650_v58 = vld [vmem:[%s12634_s24 + $0x3d8] sm:$0xf0] }
 0x148   : > { %10343 = vmatmul.msk.bf16.gmra.mxu2 %vm2661_vm0, %v13123_v59  ;;  %15741 = vst [vmem:[#allocation67_spill] sm:$0xff] %v13156_v51  ;;  %v9890_v59 = vld [vmem:[%s12634_s24 + $0x5b8] sm:$0xf0] }
 0x149   : > { %3042 = vmatmul.bf16.gmra.mxu3 %v12792_v53  ;;  %v11569_v53 = vld [vmem:[%s12634_s24 + $0x5a4] sm:$0xf] }
 0x14b   : > { %v2798_v7 = vpop.f32.mrf.mxu2  ;;  %v2702_v9 = vpop.f32.mrf.mxu0 }
 0x14c   : > { %v2799_v8 = vadd.f32 %v2798_v7, %v2750_v5  ;;  %v2847_v11 = vpop.f32.mrf.mxu3  ;;  %v2751_v18 = vpop.f32.mrf.mxu1 }
 0x14d   : > { %v2752_v19 = vadd.f32 %v2751_v18, %v2702_v9 }
 0x14e   : > { %v13132_v20 = vadd.f32 %v2847_v11, %v2799_v8 }
 0x153   : > { %v2800_v39 = vpop.f32.mrf.mxu2  ;;  %v2705_v47 = vpop.f32.mrf.mxu0 }
 0x154   : > { %v2801_v45 = vadd.f32 %v2800_v39, %v2752_v19  ;;  %v2849_v48 = vpop.f32.mrf.mxu3  ;;  %v2754_v52 = vpop.f32.mrf.mxu1 }
 0x155   : > { %v2755_v57 = vadd.f32 %v2754_v52, %v2705_v47 }
 0x156   : > { %v13158_v0 = vadd.f32 %v2849_v48, %v2801_v45  ;;  %2900 = vmatmul.bf16.gmra.mxu0 %v13152_v40  ;;  %v13185_v45 = vor.u32 %v11359_v22, %v9044_v21 }
 0x157   : > { %2949 = vmatmul.bf16.gmra.mxu1 %v13154_v49  ;;  %v9698_v49 = vld [vmem:[%s12634_s24 + $0x438] sm:$0xf0] }
 0x158   : > { %10344 = vmatmul.msk.bf16.gmra.mxu2 %vm2661_vm0, %v13156_v51  ;;  %15742 = vst [vmem:[#allocation68_spill] sm:$0xff] %v13185_v45  ;;  %v11473_v51 = vld [vmem:[%s12634_s24 + $0x2a4] sm:$0xf] }
 0x159   : > { %3047 = vmatmul.bf16.gmra.mxu3 %v12828_v1 }
 0x15b   : > { %v2803_v5 = vpop.f32.mrf.mxu2  ;;  %v2707_v8 = vpop.f32.mrf.mxu0 }
 0x15c   : > { %v2804_v7 = vadd.f32 %v2803_v5, %v2755_v57  ;;  %v2852_v9 = vpop.f32.mrf.mxu3  ;;  %v2756_v11 = vpop.f32.mrf.mxu1  ;;  %v13187_v57 = vor.u32 %v11356_v29, %v9046_v33  ;;  %v13189_v5 = vor.u32 %v11360_v38, %v9052_v34  ;;  %v9072_v38 = vld [vmem:[%s15543_s0 + $0xf0] sm:$0xf] }
 0x15d   : > { %v2757_v18 = vadd.f32 %v2756_v11, %v2707_v8 }
 0x15e   : > { %v13165_v19 = vadd.f32 %v2852_v9, %v2804_v7  ;;  %15743 = vst [vmem:[#allocation69_spill] sm:$0xff] %v13187_v57 }
 0x15f   : > { %15744 = vst [vmem:[#allocation70_spill] sm:$0xff] %v13189_v5 }
 0x163   : > { %v2805_v39 = vpop.f32.mrf.mxu2  ;;  %v2710_v48 = vpop.f32.mrf.mxu0 }
 0x164   : > { %v2806_v47 = vadd.f32 %v2805_v39, %v2757_v18  ;;  %v2854_v52 = vpop.f32.mrf.mxu3  ;;  %v2759_v7 = vpop.f32.mrf.mxu1  ;;  %v11366_v39 = vld [vmem:[%s15543_s0 + $0x108] sm:$0xf0] }
 0x165   : > { %v2760_v8 = vadd.f32 %v2759_v7, %v2710_v48  ;;  %v9074_v48 = vld [vmem:[%s15543_s0 + $0x10c] sm:$0xf0]  ;;  %v11367_v7 = vld [vmem:[%s15543_s0 + $0x110] sm:$0xf0] }
 0x166   : > { %v13191_v9 = vadd.f32 %v2854_v52, %v2806_v47  ;;  %2905 = vmatmul.bf16.gmra.mxu0 %v13185_v45  ;;  %v11363_v47 = vld [vmem:[%s15543_s0 + $0xf4] sm:$0xf]  ;;  %v9080_v52 = vld [vmem:[%s15543_s0 + $0xf8] sm:$0xf] }
 0x167   : > { %2954 = vmatmul.bf16.gmra.mxu1 %v13187_v57 }
 0x168   : > { %10345 = vmatmul.msk.bf16.gmra.mxu2 %vm2661_vm0, %v13189_v5 }
 0x169   : > { %3052 = vmatmul.bf16.gmra.mxu3 %v12864_v13  ;;  %v13222_v13 = vor.u32 %v11367_v7, %v9080_v52  ;;  %v11575_v52 = vld [vmem:[%s12634_s24 + $0x5d4] sm:$0xf] }
 0x16b   : > { %v2808_v11 = vpop.f32.mrf.mxu2  ;;  %v2712_v21 = vpop.f32.mrf.mxu0  ;;  %15747 = vst [vmem:[#allocation73_spill] sm:$0xff] %v13222_v13 }
 0x16c   : > { %v2809_v18 = vadd.f32 %v2808_v11, %v2760_v8  ;;  %v2857_v22 = vpop.f32.mrf.mxu3  ;;  %v2761_v29 = vpop.f32.mrf.mxu1  ;;  %v13218_v11 = vor.u32 %v11366_v39, %v9072_v38  ;;  %v11479_v38 = vld [vmem:[%s12634_s24 + $0x2d4] sm:$0xf]  ;;  %v9530_v39 = vld [vmem:[%s12634_s24 + $0x2e8] sm:$0xf0] }
 0x16d   : > { %v2762_v33 = vadd.f32 %v2761_v29, %v2712_v21  ;;  %v13220_v29 = vor.u32 %v11363_v47, %v9074_v48  ;;  %v9533_v47 = vor.u32 %v11479_v38, %v9530_v39  ;;  %v9722_v48 = vld [vmem:[%s12634_s24 + $0x468] sm:$0xf0] }
 0x16e   : > { %v13198_v34 = vadd.f32 %v2857_v22, %v2809_v18  ;;  %15745 = vst [vmem:[#allocation71_spill] sm:$0xff] %v13218_v11 }
 0x16f   : > { %15746 = vst [vmem:[#allocation72_spill] sm:$0xff] %v13220_v29  ;;  %3078 = vmatpush.bf16.msra.mxu0 %v9533_v47 }
 0x173   : > { %v2810_v8 = vpop.f32.mrf.mxu2  ;;  %v2715_v21 = vpop.f32.mrf.mxu0 }
 0x174   : > { %v2811_v18 = vadd.f32 %v2810_v8, %v2762_v33  ;;  %v2859_v22 = vpop.f32.mrf.mxu3  ;;  %v2764_v5 = vpop.f32.mrf.mxu1  ;;  %v11527_v33 = vld [vmem:[%s12634_s24 + $0x454] sm:$0xf] }
 0x175   : > { %v2765_v57 = vadd.f32 %v2764_v5, %v2715_v21  ;;  %v9914_v5 = vld [vmem:[%s12634_s24 + $0x5e8] sm:$0xf0]  ;;  %v9725_v7 = vor.u32 %v11527_v33, %v9722_v48 }
 0x176   : > { %v13224_v1 = vadd.f32 %v2859_v22, %v2811_v18  ;;  %2910 = vmatmul.bf16.gmra.mxu0 %v13218_v11  ;;  %v9917_v8 = vor.u32 %v11575_v52, %v9914_v5  ;;  %v11623_v18 = vld [vmem:[%s12634_s24 + $0x754] sm:$0xf]  ;;  %v10106_v21 = vld [vmem:[%s12634_s24 + $0x768] sm:$0xf0]  ;;  %v9893_v52 = vor.u32 %v11569_v53, %v9890_v59  ;;  %v11617_v5 = vld [vmem:[%s12634_s24 + $0x724] sm:$0xf] }
 0x177   : > { %2959 = vmatmul.bf16.gmra.mxu1 %v13220_v29  ;;  %v10109_v22 = vor.u32 %v11623_v18, %v10106_v21  ;;  %v9506_v29 = vld [vmem:[%s12634_s24 + $0x2b8] sm:$0xf0]  ;;  %v11467_v53 = vld [vmem:[%s12634_s24 + $0x274] sm:$0xf]  ;;  %v9482_v59 = vld [vmem:[%s12634_s24 + $0x288] sm:$0xf0] }
 0x178   : > { %10346 = vmatmul.msk.bf16.gmra.mxu2 %vm2661_vm0, %v13222_v13  ;;  %v11521_v13 = vld [vmem:[%s12634_s24 + $0x424] sm:$0xf]  ;;  %3127 = vmatpush.bf16.msra.mxu1 %v9725_v7  ;;  %v9509_v39 = vor.u32 %v11473_v51, %v9506_v29  ;;  %v10082_v18 = vld [vmem:[%s12634_s24 + $0x738] sm:$0xf0]  ;;  %v9485_v21 = vor.u32 %v11467_v53, %v9482_v59 }
 0x179   : > { %3057 = vmatmul.bf16.gmra.mxu3 %v12900_v25  ;;  %3176 = vmatpush.bf16.msra.mxu2 %v9917_v8  ;;  %v9701_v47 = vor.u32 %v11521_v13, %v9698_v49  ;;  %v10085_v8 = vor.u32 %v11617_v5, %v10082_v18  ;;  %v11373_v13 = vld [vmem:[%s15543_s0 + $0x140] sm:$0xf0]  ;;  %v11515_v49 = vld [vmem:[%s12634_s24 + $0x3f4] sm:$0xf]  ;;  %v11461_v53 = vld [vmem:[%s12634_s24 + $0x244] sm:$0xf] }
 0x17a   : > { %3225 = vmatpush.bf16.msra.mxu3 %v10109_v22  ;;  %3079 = vmatpush.bf16.msra.mxu0 %v9509_v39  ;;  %v11563_v22 = vld [vmem:[%s12634_s24 + $0x574] sm:$0xf]  ;;  %v10058_v18 = vld [vmem:[%s12634_s24 + $0x708] sm:$0xf0]  ;;  %v9458_v59 = vld [vmem:[%s12634_s24 + $0x258] sm:$0xf0] }
 0x17b   : > { %v2813_v38 = vpop.f32.mrf.mxu2  ;;  %v2717_v33 = vpop.f32.mrf.mxu0  ;;  %v11611_v39 = vld [vmem:[%s12634_s24 + $0x6f4] sm:$0xf] }
 0x17c   : > { %v2814_v25 = vadd.f32 %v2813_v38, %v2765_v57  ;;  %v2862_v48 = vpop.f32.mrf.mxu3  ;;  %v2766_v7 = vpop.f32.mrf.mxu1  ;;  %v9100_v57 = vld [vmem:[%s15543_s0 + $0x128] sm:$0xf]  ;;  %3128 = vmatpush.bf16.msra.mxu1 %v9701_v47  ;;  %v9866_v38 = vld [vmem:[%s12634_s24 + $0x588] sm:$0xf0] }
 0x17d   : > { %v2767_v51 = vadd.f32 %v2766_v7, %v2717_v33  ;;  %3177 = vmatpush.bf16.msra.mxu2 %v9893_v52  ;;  %v11370_v33 = vld [vmem:[%s15543_s0 + $0x12c] sm:$0xf]  ;;  %v9869_v5 = vor.u32 %v11563_v22, %v9866_v38  ;;  %v9102_v47 = vld [vmem:[%s15543_s0 + $0x144] sm:$0xf0]  ;;  %v9108_v52 = vld [vmem:[%s15543_s0 + $0x130] sm:$0xf]  ;;  %v13278_v22 = vor.u32 %v11373_v13, %v9100_v57  ;;  %v9461_v38 = vor.u32 %v11461_v53, %v9458_v59 }
 0x17e   : > { %v13247_v29 = vadd.f32 %v2862_v48, %v2814_v25  ;;  %v9674_v25 = vld [vmem:[%s12634_s24 + $0x408] sm:$0xf0]  ;;  %3226 = vmatpush.bf16.msra.mxu3 %v10085_v8  ;;  %v11374_v7 = vld [vmem:[%s15543_s0 + $0x148] sm:$0xf0]  ;;  %v10061_v8 = vor.u32 %v11611_v39, %v10058_v18  ;;  %3080 = vmatpush.bf16.msra.mxu0 %v9485_v21  ;;  %v13283_v21 = vor.u32 %v11370_v33, %v9102_v47  ;;  %v10034_v13 = vld [vmem:[%s12634_s24 + $0x6d8] sm:$0xf0] }
 0x17f   : > { %v9677_v48 = vor.u32 %v11515_v49, %v9674_v25  ;;  %v11509_v49 = vld [vmem:[%s12634_s24 + $0x3c4] sm:$0xf]  ;;  %15748 = vst [vmem:[#allocation74_spill] sm:$0xff] %v13278_v22  ;;  %v13285_v39 = vor.u32 %v11374_v7, %v9108_v52  ;;  %v11455_v33 = vld [vmem:[%s12634_s24 + $0x214] sm:$0xf] }
 0x180   : > { %15749 = vst [vmem:[#allocation75_spill] sm:$0xff] %v13283_v21  ;;  %v9653_v18 = vor.u32 %v11509_v49, %v9650_v58  ;;  %v11605_v57 = vld [vmem:[%s12634_s24 + $0x6c4] sm:$0xf]  ;;  %v9434_v47 = vld [vmem:[%s12634_s24 + $0x228] sm:$0xf0] }
 0x181   : > { %3129 = vmatpush.bf16.msra.mxu1 %v9677_v48  ;;  %3178 = vmatpush.bf16.msra.mxu2 %v9869_v5  ;;  %15750 = vst [vmem:[#allocation76_spill] sm:$0xff] %v13285_v39  ;;  %v9845_v5 = vor.u32 %v11557_v41, %v9842_v17  ;;  %v10037_v59 = vor.u32 %v11605_v57, %v10034_v13  ;;  %v11503_v58 = vld [vmem:[%s12634_s24 + $0x394] sm:$0xf] }
 0x182   : > { %3227 = vmatpush.bf16.msra.mxu3 %v10061_v8  ;;  %3081 = vmatpush.bf16.msra.mxu0 %v9461_v38  ;;  %v9437_v41 = vor.u32 %v11455_v33, %v9434_v47  ;;  %v11599_v7 = vld [vmem:[%s12634_s24 + $0x694] sm:$0xf]  ;;  %v10010_v8 = vld [vmem:[%s12634_s24 + $0x6a8] sm:$0xf0]  ;;  %v9410_v38 = vld [vmem:[%s12634_s24 + $0x1f8] sm:$0xf0] }
 0x183   : > { %v2815_v25 = vpop.f32.mrf.mxu2  ;;  %v2720_v63 = vpop.f32.mrf.mxu0  ;;  %v10013_v49 = vor.u32 %v11599_v7, %v10010_v8  ;;  %v11545_v33 = vld [vmem:[%s12634_s24 + $0x4e4] sm:$0xf]  ;;  %v9794_v47 = vld [vmem:[%s12634_s24 + $0x4f8] sm:$0xf0] }
 0x184   : > { %v2816_v12 = vadd.f32 %v2815_v25, %v2767_v51  ;;  %v2864_v62 = vpop.f32.mrf.mxu3  ;;  %v2769_v48 = vpop.f32.mrf.mxu1  ;;  %v11449_v25 = vld [vmem:[%s12634_s24 + $0x1e4] sm:$0xf]  ;;  %v9797_v7 = vor.u32 %v11545_v33, %v9794_v47  ;;  %v9578_v33 = vld [vmem:[%s12634_s24 + $0x348] sm:$0xf0]  ;;  %v11539_v47 = vld [vmem:[%s12634_s24 + $0x4b4] sm:$0xf] }
 0x185   : > { %v2770_v53 = vadd.f32 %v2769_v48, %v2720_v63  ;;  %3130 = vmatpush.bf16.msra.mxu1 %v9653_v18  ;;  %v11551_v63 = vld [vmem:[%s12634_s24 + $0x514] sm:$0xf]  ;;  %3179 = vmatpush.bf16.msra.mxu2 %v9845_v5  ;;  %v11497_v18 = vld [vmem:[%s12634_s24 + $0x364] sm:$0xf]  ;;  %v9413_v13 = vor.u32 %v11449_v25, %v9410_v38  ;;  %v9602_v48 = vld [vmem:[%s12634_s24 + $0x378] sm:$0xf0] }
 0x186   : > { %v13289_v51 = vadd.f32 %v2864_v62, %v2816_v12  ;;  %2915 = vmatmul.bf16.gmra.mxu0 %v13278_v22  ;;  %v9626_v62 = vld [vmem:[%s12634_s24 + $0x3a8] sm:$0xf0]  ;;  %3228 = vmatpush.bf16.msra.mxu3 %v10037_v59  ;;  %v9605_v59 = vor.u32 %v11497_v18, %v9602_v48  ;;  %v11380_v25 = vld [vmem:[%s15543_s0 + $0x178] sm:$0xf0] }
 0x187   : > { %2964 = vmatmul.bf16.gmra.mxu1 %v13283_v21  ;;  %v9818_v12 = vld [vmem:[%s12634_s24 + $0x528] sm:$0xf0]  ;;  %v9629_v17 = vor.u32 %v11503_v58, %v9626_v62  ;;  %3082 = vmatpush.bf16.msra.mxu0 %v9437_v41  ;;  %v9986_v41 = vld [vmem:[%s12634_s24 + $0x678] sm:$0xf0]  ;;  %v11443_v18 = vld [vmem:[%s12634_s24 + $0x1b4] sm:$0xf] }
 0x188   : > { %10347 = vmatmul.msk.bf16.gmra.mxu2 %vm2661_vm0, %v13285_v39  ;;  %v9821_v52 = vor.u32 %v11551_v63, %v9818_v12  ;;  %v11593_v63 = vld [vmem:[%s12634_s24 + $0x664] sm:$0xf] }
 0x189   : > { %3062 = vmatmul.bf16.gmra.mxu3 %v12960_v24  ;;  %3131 = vmatpush.bf16.msra.mxu1 %v9629_v17  ;;  %v9989_v38 = vor.u32 %v11593_v63, %v9986_v41  ;;  %v11381_v63 = vld [vmem:[%s15543_s0 + $0x180] sm:$0xf0] }
 0x18a   : > { %3180 = vmatpush.bf16.msra.mxu2 %v9821_v52  ;;  %3229 = vmatpush.bf16.msra.mxu3 %v10013_v49  ;;  %v9386_v52 = vld [vmem:[%s12634_s24 + $0x1c8] sm:$0xf0] }
 0x18b   : > { %v2818_v57 = vpop.f32.mrf.mxu2  ;;  %v2722_v58 = vpop.f32.mrf.mxu0  ;;  %3083 = vmatpush.bf16.msra.mxu0 %v9413_v13  ;;  %v9389_v48 = vor.u32 %v11443_v18, %v9386_v52  ;;  %v9962_v49 = vld [vmem:[%s12634_s24 + $0x648] sm:$0xf0]  ;;  %v9130_v13 = vld [vmem:[%s15543_s0 + $0x17c] sm:$0xf0]  ;;  %v11437_v52 = vld [vmem:[%s12634_s24 + $0x184] sm:$0xf] }
 0x18c   : > { %v2819_v5 = vadd.f32 %v2818_v57, %v2770_v53  ;;  %v2867_v62 = vpop.f32.mrf.mxu3  ;;  %v2771_v12 = vpop.f32.mrf.mxu1  ;;  %v9128_v53 = vld [vmem:[%s15543_s0 + $0x160] sm:$0xf]  ;;  %v11491_v57 = vld [vmem:[%s12634_s24 + $0x334] sm:$0xf] }
 0x18d   : > { %v2772_v17 = vadd.f32 %v2771_v12, %v2722_v58  ;;  %3132 = vmatpush.bf16.msra.mxu1 %v9605_v59  ;;  %v11377_v58 = vld [vmem:[%s15543_s0 + $0x164] sm:$0xf]  ;;  %v11587_v12 = vld [vmem:[%s12634_s24 + $0x634] sm:$0xf]  ;;  %v9136_v59 = vld [vmem:[%s15543_s0 + $0x168] sm:$0xf]  ;;  %v13343_v39 = vor.u32 %v11380_v25, %v9128_v53 }
 0x18e   : > { %v13312_v8 = vadd.f32 %v2867_v62, %v2819_v5  ;;  %v9770_v5 = vld [vmem:[%s12634_s24 + $0x4c8] sm:$0xf0]  ;;  %v9581_v62 = vor.u32 %v11491_v57, %v9578_v33  ;;  %3181 = vmatpush.bf16.msra.mxu2 %v9797_v7  ;;  %3230 = vmatpush.bf16.msra.mxu3 %v9989_v38  ;;  %v9965_v18 = vor.u32 %v11587_v12, %v9962_v49  ;;  %v9362_v57 = vld [vmem:[%s12634_s24 + $0x198] sm:$0xf0]  ;;  %v11485_v33 = vld [vmem:[%s12634_s24 + $0x304] sm:$0xf] }
 0x18f   : > { %v9773_v41 = vor.u32 %v11539_v47, %v9770_v5  ;;  %3084 = vmatpush.bf16.msra.mxu0 %v9389_v48  ;;  %15751 = vst [vmem:[#allocation77_spill] sm:$0xff] %v13343_v39  ;;  %v9365_v21 = vor.u32 %v11437_v52, %v9362_v57  ;;  %v13348_v47 = vor.u32 %v11377_v58, %v9130_v13  ;;  %v11581_v5 = vld [vmem:[%s12634_s24 + $0x604] sm:$0xf]  ;;  %v9938_v12 = vld [vmem:[%s12634_s24 + $0x618] sm:$0xf0] }
 0x190   : > { %v13350_v38 = vor.u32 %v11381_v63, %v9136_v59  ;;  %v9557_v48 = vor.u32 %v11485_v33, %v9554_v61  ;;  %v11387_v58 = vld [vmem:[%s15543_s0 + $0x1b0] sm:$0xf0]  ;;  %v9158_v13 = vld [vmem:[%s15543_s0 + $0x1b4] sm:$0xf0]  ;;  %v9164_v59 = vld [vmem:[%s15543_s0 + $0x1a0] sm:$0xf] }
 0x191   : > { %3133 = vmatpush.bf16.msra.mxu1 %v9581_v62  ;;  %15752 = vst [vmem:[#allocation78_spill] sm:$0xff] %v13348_v47  ;;  %v9941_v62 = vor.u32 %v11581_v5, %v9938_v12  ;;  %v11388_v63 = vld [vmem:[%s15543_s0 + $0x1b8] sm:$0xf0] }
 0x192   : > { %15753 = vst [vmem:[#allocation79_spill] sm:$0xff] %v13350_v38  ;;  %3182 = vmatpush.bf16.msra.mxu2 %v9773_v41  ;;  %3231 = vmatpush.bf16.msra.mxu3 %v9965_v18 }
 0x193   : > { %v2820_v24 = vpop.f32.mrf.mxu2  ;;  %v2725_v22 = vpop.f32.mrf.mxu0  ;;  %3085 = vmatpush.bf16.msra.mxu0 %v9365_v21 }
 0x194   : > { %v2821_v36 = vadd.f32 %v2820_v24, %v2772_v17  ;;  %v2869_v7 = vpop.f32.mrf.mxu3  ;;  %v2774_v49 = vpop.f32.mrf.mxu1  ;;  %v9156_v17 = vld [vmem:[%s15543_s0 + $0x198] sm:$0xf] }
 0x195   : > { %v2775_v53 = vadd.f32 %v2774_v49, %v2725_v22  ;;  %3134 = vmatpush.bf16.msra.mxu1 %v9557_v48  ;;  %v13381_v18 = vor.u32 %v11387_v58, %v9156_v17  ;;  %v13385_v48 = vor.u32 %v11388_v63, %v9164_v59 }
 0x196   : > { %v13354_v25 = vadd.f32 %v2869_v7, %v2821_v36  ;;  %2920 = vmatmul.bf16.gmra.mxu0 %v13343_v39  ;;  %3183 = vmatpush.bf16.msra.mxu2 %v9749_v32  ;;  %v11384_v32 = vld [vmem:[%s15543_s0 + $0x19c] sm:$0xf] }
 0x197   : > { %2969 = vmatmul.bf16.gmra.mxu1 %v13348_v47  ;;  %3232 = vmatpush.bf16.msra.mxu3 %v9941_v62  ;;  %15754 = vst [vmem:[#allocation80_spill] sm:$0xff] %v13381_v18  ;;  %v13383_v7 = vor.u32 %v11384_v32, %v9158_v13 }
 0x198   : > { %10348 = vmatmul.msk.bf16.gmra.mxu2 %vm2661_vm0, %v13350_v38  ;;  %15756 = vst [vmem:[#allocation82_spill] sm:$0xff] %v13385_v48 }
 0x199   : > { %3067 = vmatmul.bf16.gmra.mxu3 %v13017_v23  ;;  %15755 = vst [vmem:[#allocation81_spill] sm:$0xff] %v13383_v7 }
 0x19b   : > { %v2823_v24 = vpop.f32.mrf.mxu2  ;;  %v2727_v46 = vpop.f32.mrf.mxu0 }
 0x19c   : > { %v2824_v37 = vadd.f32 %v2823_v24, %v2775_v53  ;;  %v2872_v36 = vpop.f32.mrf.mxu3  ;;  %v2776_v61 = vpop.f32.mrf.mxu1 }
 0x19d   : > { %v2777_v22 = vadd.f32 %v2776_v61, %v2727_v46 }
 0x19e   : > { %v13361_v21 = vadd.f32 %v2872_v36, %v2824_v37 }
 0x1a3   : > { %v2825_v41 = vpop.f32.mrf.mxu2  ;;  %v2730_v57 = vpop.f32.mrf.mxu0 }
 0x1a4   : > { %v2826_v52 = vadd.f32 %v2825_v41, %v2777_v22  ;;  %v2874_v33 = vpop.f32.mrf.mxu3  ;;  %v2779_v5 = vpop.f32.mrf.mxu1 }
 0x1a5   : > { %v2780_v12 = vadd.f32 %v2779_v5, %v2730_v57 }
 0x1a6   : > { %v13387_v49 = vadd.f32 %v2874_v33, %v2826_v52  ;;  %2925 = vmatmul.bf16.gmra.mxu0 %v13381_v18 }
 0x1a7   : > { %2974 = vmatmul.bf16.gmra.mxu1 %v13383_v7 }
 0x1a8   : > { %10349 = vmatmul.msk.bf16.gmra.mxu2 %vm2661_vm0, %v13385_v48 }
 0x1a9   : > { %3072 = vmatmul.bf16.gmra.mxu3 %v13058_v60 }
 0x1ab   : > { %v2828_v53 = vpop.f32.mrf.mxu2  ;;  %v2732_v24 = vpop.f32.mrf.mxu0 }
 0x1ac   : > { %v2829_v62 = vadd.f32 %v2828_v53, %v2780_v12  ;;  %v2877_v37 = vpop.f32.mrf.mxu3  ;;  %v2781_v46 = vpop.f32.mrf.mxu1 }
 0x1ad   : > { %v2782_v36 = vadd.f32 %v2781_v46, %v2732_v24 }
 0x1ae   : > { %v13394_v61 = vadd.f32 %v2877_v37, %v2829_v62 }
 0x1b3   : > { %v2830_v22 = vpop.f32.mrf.mxu2  ;;  %v2891_v32 = vpop.f32.mrf.mxu0 }
 0x1b4   : > { %v2831_v17 = vadd.f32 %v2830_v22, %v2782_v36  ;;  %v2879_v58 = vpop.f32.mrf.mxu3  ;;  %v2892_v13 = vadd.f32 %v2891_v32, %v13099_v35  ;;  %v2940_v59 = vpop.f32.mrf.mxu1 }
 0x1b6   : > { %v13397_v63 = vadd.f32 %v2879_v58, %v2831_v17  ;;  %v2941_v41 = vadd.f32 %v2940_v59, %v2892_v13  ;;  %3086 = vmatmul.bf16.vlgmr.msra.gmra.mxu0 %v12758_v42 }
 0x1b7   : > { %3135 = vmatmul.bf16.vlgmr.msra.gmra.mxu1 %v12760_v43 }
 0x1b8   : > { %3184 = vmatmul.bf16.vlgmr.msra.gmra.mxu2 %v12762_v44 }
 0x1b9   : > { %3233 = vmatmul.bf16.vlgmr.msra.gmra.mxu3 %v13088_v10 }
 0x1bb   : > { %v2989_v52 = vpop.f32.mrf.mxu2  ;;  %v2893_v33 = vpop.f32.mrf.mxu0 }
 0x1bc   : > { %v13403_v57 = vadd.f32 %v2989_v52, %v2941_v41  ;;  %v13405_v5 = vpop.f32.mrf.mxu3  ;;  %v2894_v35 = vadd.f32 %v2893_v33, %v13125_v6  ;;  %v2942_v12 = vpop.f32.mrf.mxu1 }
 0x1be   : > { %v2943_v53 = vadd.f32 %v2942_v12, %v2894_v35 }
 0x1c3   : > { %v2991_v62 = vpop.f32.mrf.mxu2  ;;  %v2896_v37 = vpop.f32.mrf.mxu0 }
 0x1c4   : > { %v13408_v24 = vadd.f32 %v2991_v62, %v2943_v53  ;;  %v13410_v46 = vpop.f32.mrf.mxu3  ;;  %v2897_v36 = vadd.f32 %v2896_v37, %v13132_v20  ;;  %v2945_v22 = vpop.f32.mrf.mxu1 }
 0x1c6   : > { %v2946_v17 = vadd.f32 %v2945_v22, %v2897_v36  ;;  %3091 = vmatmul.bf16.gmra.mxu0 %v12794_v54 }
 0x1c7   : > { %3140 = vmatmul.bf16.gmra.mxu1 %v12796_v55 }
 0x1c8   : > { %3189 = vmatmul.bf16.gmra.mxu2 %v12798_v56 }
 0x1c9   : > { %3238 = vmatmul.bf16.gmra.mxu3 %v13119_v50 }
 0x1cb   : > { %v2994_v6 = vpop.f32.mrf.mxu2  ;;  %v2898_v32 = vpop.f32.mrf.mxu0 }
 0x1cc   : > { %v13417_v58 = vadd.f32 %v2994_v6, %v2946_v17  ;;  %v13419_v13 = vpop.f32.mrf.mxu3  ;;  %v2899_v59 = vadd.f32 %v2898_v32, %v13158_v0  ;;  %v2947_v41 = vpop.f32.mrf.mxu1 }
 0x1ce   : > { %v2948_v20 = vadd.f32 %v2947_v41, %v2899_v59 }
 0x1d3   : > { %v2996_v52 = vpop.f32.mrf.mxu2  ;;  %v2901_v35 = vpop.f32.mrf.mxu0 }
 0x1d4   : > { %v13422_v33 = vadd.f32 %v2996_v52, %v2948_v20  ;;  %v13424_v12 = vpop.f32.mrf.mxu3  ;;  %v2902_v53 = vadd.f32 %v2901_v35, %v13165_v19  ;;  %v2950_v62 = vpop.f32.mrf.mxu1 }
 0x1d6   : > { %v2951_v37 = vadd.f32 %v2950_v62, %v2902_v53  ;;  %3096 = vmatmul.bf16.gmra.mxu0 %v12830_v2 }
 0x1d7   : > { %3145 = vmatmul.bf16.gmra.mxu1 %v12832_v3 }
 0x1d8   : > { %3194 = vmatmul.bf16.gmra.mxu2 %v12834_v4 }
 0x1d9   : > { %3243 = vmatmul.bf16.gmra.mxu3 %v13152_v40 }
 0x1db   : > { %v2999_v0 = vpop.f32.mrf.mxu2  ;;  %v2903_v22 = vpop.f32.mrf.mxu0 }
 0x1dc   : > { %v13431_v36 = vadd.f32 %v2999_v0, %v2951_v37  ;;  %v13433_v17 = vpop.f32.mrf.mxu3  ;;  %v2904_v6 = vadd.f32 %v2903_v22, %v13191_v9  ;;  %v2952_v32 = vpop.f32.mrf.mxu1 }
 0x1de   : > { %v2953_v19 = vadd.f32 %v2952_v32, %v2904_v6 }
 0x1e3   : > { %v3001_v59 = vpop.f32.mrf.mxu2  ;;  %v2906_v20 = vpop.f32.mrf.mxu0 }
 0x1e4   : > { %v13436_v41 = vadd.f32 %v3001_v59, %v2953_v19  ;;  %v13438_v52 = vpop.f32.mrf.mxu3  ;;  %v2907_v35 = vadd.f32 %v2906_v20, %v13198_v34  ;;  %v2955_v53 = vpop.f32.mrf.mxu1 }
 0x1e6   : > { %v2956_v62 = vadd.f32 %v2955_v53, %v2907_v35  ;;  %3101 = vmatmul.bf16.gmra.mxu0 %v12866_v14 }
 0x1e7   : > { %3150 = vmatmul.bf16.gmra.mxu1 %v12868_v15  ;;  %v11393_v15 = vld [vmem:[%s12634_s24 + $0x1c] sm:$0xf0] }
 0x1e8   : > { %3199 = vmatmul.bf16.gmra.mxu2 %v12870_v16  ;;  %v11471_v16 = vld [vmem:[%s12634_s24 + $0x28c] sm:$0xf0] }
 0x1e9   : > { %3248 = vmatmul.bf16.gmra.mxu3 %v13185_v45  ;;  %v9344_v45 = vld [vmem:[%s12634_s24 + $0x158] sm:$0xf] }
 0x1eb   : > { %v3004_v9 = vpop.f32.mrf.mxu2  ;;  %v2908_v0 = vpop.f32.mrf.mxu0 }
 0x1ec   : > { %v13445_v37 = vadd.f32 %v3004_v9, %v2956_v62  ;;  %v13447_v22 = vpop.f32.mrf.mxu3  ;;  %v2909_v34 = vadd.f32 %v2908_v0, %v13224_v1  ;;  %v2957_v6 = vpop.f32.mrf.mxu1  ;;  %v11671_v9 = vld [vmem:[%s12634_s24 + $0x8d4] sm:$0xf] }
 0x1ee   : > { %15757 = vst [vmem:[#allocation83_spill] sm:$0xff] %v13445_v37  ;;  %v2958_v32 = vadd.f32 %v2957_v6, %v2909_v34  ;;  %v10298_v37 = vld [vmem:[%s12634_s24 + $0x8e8] sm:$0xf0]  ;;  %v11435_v34 = vld [vmem:[%s12634_s24 + $0x16c] sm:$0xf0] }
 0x1ef   : > { %v10301_v0 = vor.u32 %v11671_v9, %v10298_v37  ;;  %v9345_v6 = vor.u32 %v11435_v34, %v9344_v45 }
 0x1f1   : > { %3274 = vmatpush.bf16.msrb.mxu0 %v10301_v0  ;;  %3372 = vmatpush.bf16.msrb.mxu2 %v9345_v6  ;;  %v9512_v0 = vld [vmem:[%s12634_s24 + $0x2a8] sm:$0xf]  ;;  %v11477_v6 = vld [vmem:[%s12634_s24 + $0x2bc] sm:$0xf0] }
 0x1f3   : > { %v3006_v19 = vpop.f32.mrf.mxu2  ;;  %v2911_v20 = vpop.f32.mrf.mxu0 }
 0x1f4   : > { %v13450_v59 = vadd.f32 %v3006_v19, %v2958_v32  ;;  %v13452_v35 = vpop.f32.mrf.mxu3  ;;  %v2912_v53 = vadd.f32 %v2911_v20, %v13247_v29  ;;  %v2960_v62 = vpop.f32.mrf.mxu1  ;;  %v9536_v32 = vld [vmem:[%s12634_s24 + $0x2d8] sm:$0xf]  ;;  %v11483_v29 = vld [vmem:[%s12634_s24 + $0x2ec] sm:$0xf0]  ;;  %v11665_v20 = vld [vmem:[%s12634_s24 + $0x8a4] sm:$0xf] }
 0x1f5   : > { %v9537_v19 = vor.u32 %v11483_v29, %v9536_v32 }
 0x1f6   : > { %15758 = vst [vmem:[#allocation84_spill] sm:$0xff] %v13450_v59  ;;  %v2961_v1 = vadd.f32 %v2960_v62, %v2912_v53  ;;  %3106 = vmatmul.bf16.gmra.mxu0 %v12902_v26  ;;  %v10274_v53 = vld [vmem:[%s12634_s24 + $0x8b8] sm:$0xf0]  ;;  %v9320_v62 = vld [vmem:[%s12634_s24 + $0x128] sm:$0xf] }
 0x1f7   : > { %3155 = vmatmul.bf16.gmra.mxu1 %v12904_v27  ;;  %3421 = vmatpush.bf16.msrb.mxu3 %v9537_v19  ;;  %v10277_v9 = vor.u32 %v11665_v20, %v10274_v53  ;;  %v9513_v19 = vor.u32 %v11477_v6, %v9512_v0  ;;  %v10250_v20 = vld [vmem:[%s12634_s24 + $0x888] sm:$0xf0]  ;;  %v9296_v53 = vld [vmem:[%s12634_s24 + $0xf8] sm:$0xf] }
 0x1f8   : > { %3204 = vmatmul.bf16.gmra.mxu2 %v12906_v28  ;;  %v11429_v28 = vld [vmem:[%s12634_s24 + $0x13c] sm:$0xf0]  ;;  %v9488_v59 = vld [vmem:[%s12634_s24 + $0x278] sm:$0xf] }
 0x1f9   : > { %3253 = vmatmul.bf16.gmra.mxu3 %v13218_v11  ;;  %v9321_v11 = vor.u32 %v11429_v28, %v9320_v62  ;;  %3275 = vmatpush.bf16.msrb.mxu0 %v10277_v9  ;;  %v11423_v62 = vld [vmem:[%s12634_s24 + $0x10c] sm:$0xf0]  ;;  %v11653_v9 = vld [vmem:[%s12634_s24 + $0x844] sm:$0xf] }
 0x1fb   : > { %v3009_v37 = vpop.f32.mrf.mxu2  ;;  %v2913_v34 = vpop.f32.mrf.mxu0  ;;  %3373 = vmatpush.bf16.msrb.mxu2 %v9321_v11  ;;  %3422 = vmatpush.bf16.msrb.mxu3 %v9513_v19  ;;  %v9272_v11 = vld [vmem:[%s12634_s24 + $0xc8] sm:$0xf] }
 0x1fc   : > { %v13469_v45 = vadd.f32 %v3009_v37, %v2961_v1  ;;  %v13471_v27 = vpop.f32.mrf.mxu3  ;;  %v2914_v32 = vadd.f32 %v2913_v34, %v13289_v51  ;;  %v2962_v29 = vpop.f32.mrf.mxu1  ;;  %v11659_v1 = vld [vmem:[%s12634_s24 + $0x874] sm:$0xf]  ;;  %v9489_v51 = vor.u32 %v11471_v16, %v9488_v59  ;;  %v10226_v34 = vld [vmem:[%s12634_s24 + $0x858] sm:$0xf0]  ;;  %v11465_v16 = vld [vmem:[%s12634_s24 + $0x25c] sm:$0xf0] }
 0x1fd   : > { %v10253_v28 = vor.u32 %v11659_v1, %v10250_v20  ;;  %v10229_v6 = vor.u32 %v11653_v9, %v10226_v34 }
 0x1fe   : > { %15759 = vst [vmem:[#allocation85_spill] sm:$0xff] %v13469_v45  ;;  %v2963_v37 = vadd.f32 %v2962_v29, %v2914_v32  ;;  %v9297_v45 = vor.u32 %v11423_v62, %v9296_v53  ;;  %v11417_v32 = vld [vmem:[%s12634_s24 + $0xdc] sm:$0xf0]  ;;  %v9464_v53 = vld [vmem:[%s12634_s24 + $0x248] sm:$0xf] }
 0x1ff   : > { %3276 = vmatpush.bf16.msrb.mxu0 %v10253_v28  ;;  %3423 = vmatpush.bf16.msrb.mxu3 %v9489_v51  ;;  %v9273_v20 = vor.u32 %v11417_v32, %v9272_v11  ;;  %v9465_v28 = vor.u32 %v11465_v16, %v9464_v53  ;;  %v11647_v62 = vld [vmem:[%s12634_s24 + $0x814] sm:$0xf]  ;;  %v10202_v51 = vld [vmem:[%s12634_s24 + $0x828] sm:$0xf0]  ;;  %v11411_v11 = vld [vmem:[%s12634_s24 + $0xac] sm:$0xf0] }
 0x200   : > { %3374 = vmatpush.bf16.msrb.mxu2 %v9297_v45  ;;  %v10205_v34 = vor.u32 %v11647_v62, %v10202_v51  ;;  %v11459_v32 = vld [vmem:[%s12634_s24 + $0x22c] sm:$0xf0]  ;;  %v11641_v53 = vld [vmem:[%s12634_s24 + $0x7e4] sm:$0xf]  ;;  %v10178_v16 = vld [vmem:[%s12634_s24 + $0x7f8] sm:$0xf0] }
 0x201   : > { %v11405_v62 = vld [vmem:[%s12634_s24 + $0x7c] sm:$0xf0] }
 0x203   : > { %v3011_v0 = vpop.f32.mrf.mxu2  ;;  %v2916_v19 = vpop.f32.mrf.mxu0  ;;  %3277 = vmatpush.bf16.msrb.mxu0 %v10229_v6  ;;  %3424 = vmatpush.bf16.msrb.mxu3 %v9465_v28  ;;  %v9440_v6 = vld [vmem:[%s12634_s24 + $0x218] sm:$0xf]  ;;  %v10181_v28 = vor.u32 %v11641_v53, %v10178_v16  ;;  %v11453_v53 = vld [vmem:[%s12634_s24 + $0x1fc] sm:$0xf0]  ;;  %v11635_v16 = vld [vmem:[%s12634_s24 + $0x7b4] sm:$0xf] }
 0x204   : > { %v13486_v29 = vadd.f32 %v3011_v0, %v2963_v37  ;;  %v13488_v1 = vpop.f32.mrf.mxu3  ;;  %v2917_v59 = vadd.f32 %v2916_v19, %v13312_v8  ;;  %v2965_v45 = vpop.f32.mrf.mxu1  ;;  %3375 = vmatpush.bf16.msrb.mxu2 %v9273_v20  ;;  %v9248_v37 = vld [vmem:[%s12634_s24 + $0x98] sm:$0xf]  ;;  %v9441_v20 = vor.u32 %v11459_v32, %v9440_v6  ;;  %v9416_v6 = vld [vmem:[%s12634_s24 + $0x1e8] sm:$0xf] }
 0x205   : > { %v15761_v8 = vld [vmem:[#allocation52_spill] sm:$0xff]  ;;  %v9249_v0 = vor.u32 %v11411_v11, %v9248_v37  ;;  %v15762_v19 = vld [vmem:[#allocation74_spill] sm:$0xff] }
 0x206   : > { %15760 = vst [vmem:[#allocation86_spill] sm:$0xff] %v13486_v29  ;;  %v2966_v9 = vadd.f32 %v2965_v45, %v2917_v59  ;;  %3111 = vmatmul.bf16.gmra.mxu0 %v12962_v30  ;;  %v9224_v59 = vld [vmem:[%s12634_s24 + $0x68] sm:$0xf] }
 0x207   : > { %3160 = vmatmul.bf16.gmra.mxu1 %v12964_v31  ;;  %3278 = vmatpush.bf16.msrb.mxu0 %v10205_v34  ;;  %v11677_v34 = vld [vmem:[%s12634_s24 + $0x904] sm:$0xf] }
 0x208   : > { %3209 = vmatmul.bf16.gmra.mxu2 %v15761_v8  ;;  %3425 = vmatpush.bf16.msrb.mxu3 %v9441_v20 }
 0x209   : > { %3258 = vmatmul.bf16.gmra.mxu3 %v15762_v19  ;;  %3376 = vmatpush.bf16.msrb.mxu2 %v9249_v0  ;;  %v10322_v19 = vld [vmem:[%s12634_s24 + $0x918] sm:$0xf0]  ;;  %v9225_v0 = vor.u32 %v11405_v62, %v9224_v59  ;;  %v11399_v62 = vld [vmem:[%s12634_s24 + $0x4c] sm:$0xf0] }
 0x20a   : > { %v10325_v20 = vor.u32 %v11677_v34, %v10322_v19  ;;  %v11447_v19 = vld [vmem:[%s12634_s24 + $0x1cc] sm:$0xf0]  ;;  %v11629_v34 = vld [vmem:[%s12634_s24 + $0x784] sm:$0xf] }
 0x20b   : > { %v3014_v45 = vpop.f32.mrf.mxu2  ;;  %v2918_v37 = vpop.f32.mrf.mxu0  ;;  %3279 = vmatpush.bf16.msrb.mxu0 %v10181_v28 }
 0x20c   : > { %v13507_v51 = vadd.f32 %v3014_v45, %v2966_v9  ;;  %v13509_v11 = vpop.f32.mrf.mxu3  ;;  %v2919_v32 = vadd.f32 %v2918_v37, %v13354_v25  ;;  %v2967_v8 = vpop.f32.mrf.mxu1  ;;  %v9417_v9 = vor.u32 %v11453_v53, %v9416_v6  ;;  %v10154_v45 = vld [vmem:[%s12634_s24 + $0x7c8] sm:$0xf0]  ;;  %3330 = vmatpush.bf16.msrb.mxu1 %v10325_v20  ;;  %v9392_v37 = vld [vmem:[%s12634_s24 + $0x1b8] sm:$0xf]  ;;  %v9176_v6 = vld [vmem:[%s12634_s24 + $0x8] sm:$0xf] }
 0x20d   : > { %3377 = vmatpush.bf16.msrb.mxu2 %v9225_v0  ;;  %v10157_v59 = vor.u32 %v11635_v16, %v10154_v45  ;;  %v9393_v28 = vor.u32 %v11447_v19, %v9392_v37  ;;  %v10130_v0 = vld [vmem:[%s12634_s24 + $0x798] sm:$0xf0]  ;;  %v11441_v16 = vld [vmem:[%s12634_s24 + $0x19c] sm:$0xf0] }
 0x20e   : > { %15763 = vst [vmem:[#allocation87_spill] sm:$0xff] %v13507_v51  ;;  %v9200_v51 = vld [vmem:[%s12634_s24 + $0x38] sm:$0xf]  ;;  %v2968_v31 = vadd.f32 %v2967_v8, %v2919_v32  ;;  %3426 = vmatpush.bf16.msrb.mxu3 %v9417_v9  ;;  %v10133_v29 = vor.u32 %v11629_v34, %v10130_v0  ;;  %v9368_v9 = vld [vmem:[%s12634_s24 + $0x188] sm:$0xf] }
 0x20f   : > { %v9201_v25 = vor.u32 %v11399_v62, %v9200_v51  ;;  %3280 = vmatpush.bf16.msrb.mxu0 %v10157_v59  ;;  %v9177_v51 = vor.u32 %v11393_v15, %v9176_v6  ;;  %v9369_v62 = vor.u32 %v11441_v16, %v9368_v9  ;;  %v15765_v37 = vld [vmem:[#allocation53_spill] sm:$0xff]  ;;  %v15766_v19 = vld [vmem:[#allocation54_spill] sm:$0xff] }
 0x211   : > { %3378 = vmatpush.bf16.msrb.mxu2 %v9201_v25 }
 0x212   : > { %3427 = vmatpush.bf16.msrb.mxu3 %v9393_v28 }
 0x213   : > { %v3016_v53 = vpop.f32.mrf.mxu2  ;;  %v2921_v32 = vpop.f32.mrf.mxu0  ;;  %3281 = vmatpush.bf16.msrb.mxu0 %v10133_v29 }
 0x214   : > { %v13526_v8 = vadd.f32 %v3016_v53, %v2968_v31  ;;  %v13528_v20 = vpop.f32.mrf.mxu3  ;;  %v2922_v45 = vadd.f32 %v2921_v32, %v13361_v21  ;;  %v2970_v59 = vpop.f32.mrf.mxu1  ;;  %v15767_v31 = vld [vmem:[#allocation55_spill] sm:$0xff] }
 0x215   : > { %3379 = vmatpush.bf16.msrb.mxu2 %v9177_v51 }
 0x216   : > { %15764 = vst [vmem:[#allocation88_spill] sm:$0xff] %v13526_v8  ;;  %v2971_v25 = vadd.f32 %v2970_v59, %v2922_v45  ;;  %3116 = vmatmul.bf16.gmra.mxu0 %v15765_v37  ;;  %3428 = vmatpush.bf16.msrb.mxu3 %v9369_v62  ;;  %v15770_v62 = vld [vmem:[#allocation56_spill] sm:$0xff] }
 0x217   : > { %3165 = vmatmul.bf16.gmra.mxu1 %v15766_v19  ;;  %v11585_v19 = vld [vmem:[%s12634_s24 + $0x61c] sm:$0xf0] }
 0x218   : > { %3214 = vmatmul.bf16.gmra.mxu2 %v15767_v31  ;;  %v15778_v31 = vld [vmem:[#allocation63_spill] sm:$0xff] }
 0x219   : > { %3263 = vmatmul.bf16.gmra.mxu3 %v13343_v39 }
 0x21b   : > { %v3019_v28 = vpop.f32.mrf.mxu2  ;;  %v2923_v34 = vpop.f32.mrf.mxu0 }
 0x21c   : > { %v13537_v15 = vadd.f32 %v3019_v28, %v2971_v25  ;;  %v13539_v0 = vpop.f32.mrf.mxu3  ;;  %v2924_v21 = vadd.f32 %v2923_v34, %v13387_v49  ;;  %v2972_v29 = vpop.f32.mrf.mxu1  ;;  %v15771_v25 = vld [vmem:[#allocation57_spill] sm:$0xff]  ;;  %v15772_v28 = vld [vmem:[#allocation58_spill] sm:$0xff] }
 0x21e   : > { %15768 = vst [vmem:[#allocation53_spill] sm:$0xff] %v13537_v15  ;;  %v2973_v6 = vadd.f32 %v2972_v29, %v2924_v21  ;;  %v15775_v15 = vld [vmem:[#allocation60_spill] sm:$0xff] }
 0x223   : > { %v3021_v53 = vpop.f32.mrf.mxu2  ;;  %v2926_v51 = vpop.f32.mrf.mxu0 }
 0x224   : > { %v13542_v32 = vadd.f32 %v3021_v53, %v2973_v6  ;;  %v13544_v9 = vpop.f32.mrf.mxu3  ;;  %v2927_v16 = vadd.f32 %v2926_v51, %v13394_v61  ;;  %v2975_v45 = vpop.f32.mrf.mxu1 }
 0x226   : > { %15769 = vst [vmem:[#allocation89_spill] sm:$0xff] %v13542_v32  ;;  %v2976_v59 = vadd.f32 %v2975_v45, %v2927_v16  ;;  %3121 = vmatmul.bf16.gmra.mxu0 %v15770_v62 }
 0x227   : > { %3170 = vmatmul.bf16.gmra.mxu1 %v15771_v25 }
 0x228   : > { %3219 = vmatmul.bf16.gmra.mxu2 %v15772_v28 }
 0x229   : > { %3268 = vmatmul.bf16.gmra.mxu3 %v13381_v18 }
 0x22b   : > { %v3024_v49 = vpop.f32.mrf.mxu2  ;;  %v2928_v21 = vpop.f32.mrf.mxu0 }
 0x22c   : > { %v13551_v34 = vadd.f32 %v3024_v49, %v2976_v59  ;;  %v13553_v29 = vpop.f32.mrf.mxu3  ;;  %v2929_v6 = vadd.f32 %v2928_v21, %v13397_v63  ;;  %v2977_v53 = vpop.f32.mrf.mxu1  ;;  %v15776_v59 = vld [vmem:[#allocation61_spill] sm:$0xff] }
 0x22d   : > { %v15777_v49 = vld [vmem:[#allocation29_spill] sm:$0xff] }
 0x22e   : > { %15773 = vst [vmem:[#allocation56_spill] sm:$0xff] %v13551_v34  ;;  %v2978_v61 = vadd.f32 %v2977_v53, %v2929_v6 }
 0x233   : > { %v3026_v51 = vpop.f32.mrf.mxu2  ;;  %v3087_v25 = vpop.f32.mrf.mxu0 }
 0x234   : > { %v13556_v16 = vadd.f32 %v3026_v51, %v2978_v61  ;;  %v13558_v45 = vpop.f32.mrf.mxu3  ;;  %v3088_v28 = vadd.f32 %v3087_v25, %v13405_v5  ;;  %v3136_v32 = vpop.f32.mrf.mxu1 }
 0x236   : > { %15774 = vst [vmem:[#allocation90_spill] sm:$0xff] %v13556_v16  ;;  %v3137_v18 = vadd.f32 %v3136_v32, %v3088_v28  ;;  %3282 = vmatmul.bf16.vlgmr.msrb.gmra.mxu0 %v15775_v15 }
 0x237   : > { %10350 = vmatmul.msk.bf16.vlgmr.msrb.gmra.mxu1 %vm2661_vm0, %v15776_v59 }
 0x238   : > { %3380 = vmatmul.bf16.vlgmr.msrb.gmra.mxu2 %v15777_v49 }
 0x239   : > { %3429 = vmatmul.bf16.vlgmr.msrb.gmra.mxu3 %v12758_v42 }
 0x23b   : > { %v3185_v63 = vpop.f32.mrf.mxu2  ;;  %v3089_v6 = vpop.f32.mrf.mxu0 }
 0x23c   : > { %v3186_v21 = vadd.f32 %v3185_v63, %v3137_v18  ;;  %v3234_v53 = vpop.f32.mrf.mxu3  ;;  %v3090_v61 = vadd.f32 %v3089_v6, %v13410_v46  ;;  %v3138_v51 = vpop.f32.mrf.mxu1  ;;  %v15779_v18 = vld [vmem:[#allocation64_spill] sm:$0xff]  ;;  %v15780_v46 = vld [vmem:[#allocation33_spill] sm:$0xff] }
 0x23e   : > { %v13567_v16 = vadd.f32 %v3234_v53, %v3186_v21  ;;  %v3139_v5 = vadd.f32 %v3138_v51, %v3090_v61 }
 0x243   : > { %v3187_v32 = vpop.f32.mrf.mxu2  ;;  %v3092_v28 = vpop.f32.mrf.mxu0 }
 0x244   : > { %v3188_v25 = vadd.f32 %v3187_v32, %v3139_v5  ;;  %v3236_v34 = vpop.f32.mrf.mxu3  ;;  %v3093_v59 = vadd.f32 %v3092_v28, %v13419_v13  ;;  %v3141_v39 = vpop.f32.mrf.mxu1 }
 0x246   : > { %v13570_v49 = vadd.f32 %v3236_v34, %v3188_v25  ;;  %v3142_v42 = vadd.f32 %v3141_v39, %v3093_v59  ;;  %3287 = vmatmul.bf16.gmra.mxu0 %v15778_v31 }
 0x247   : > { %10351 = vmatmul.msk.bf16.gmra.mxu1 %vm2661_vm0, %v15779_v18  ;;  %v15781_v18 = vld [vmem:[#allocation66_spill] sm:$0xff] }
 0x248   : > { %3385 = vmatmul.bf16.gmra.mxu2 %v15780_v46 }
 0x249   : > { %3434 = vmatmul.bf16.gmra.mxu3 %v12794_v54 }
 0x24b   : > { %v3190_v63 = vpop.f32.mrf.mxu2  ;;  %v3094_v6 = vpop.f32.mrf.mxu0 }
 0x24c   : > { %v3191_v21 = vadd.f32 %v3190_v63, %v3142_v42  ;;  %v3239_v53 = vpop.f32.mrf.mxu3  ;;  %v3095_v61 = vadd.f32 %v3094_v6, %v13424_v12  ;;  %v3143_v13 = vpop.f32.mrf.mxu1  ;;  %v15782_v42 = vld [vmem:[#allocation67_spill] sm:$0xff]  ;;  %v15783_v12 = vld [vmem:[#allocation37_spill] sm:$0xff] }
 0x24e   : > { %v13578_v51 = vadd.f32 %v3239_v53, %v3191_v21  ;;  %v3144_v34 = vadd.f32 %v3143_v13, %v3095_v61 }
 0x253   : > { %v3192_v39 = vpop.f32.mrf.mxu2  ;;  %v3097_v5 = vpop.f32.mrf.mxu0 }
 0x254   : > { %v3193_v59 = vadd.f32 %v3192_v39, %v3144_v34  ;;  %v3241_v32 = vpop.f32.mrf.mxu3  ;;  %v3098_v25 = vadd.f32 %v3097_v5, %v13433_v17  ;;  %v3146_v28 = vpop.f32.mrf.mxu1 }
 0x256   : > { %v13581_v46 = vadd.f32 %v3241_v32, %v3193_v59  ;;  %v3147_v54 = vadd.f32 %v3146_v28, %v3098_v25  ;;  %3292 = vmatmul.bf16.gmra.mxu0 %v15781_v18 }
 0x257   : > { %10352 = vmatmul.msk.bf16.gmra.mxu1 %vm2661_vm0, %v15782_v42  ;;  %v15784_v42 = vld [vmem:[#allocation69_spill] sm:$0xff] }
 0x258   : > { %3390 = vmatmul.bf16.gmra.mxu2 %v15783_v12 }
 0x259   : > { %3439 = vmatmul.bf16.gmra.mxu3 %v12830_v2 }
 0x25b   : > { %v3195_v63 = vpop.f32.mrf.mxu2  ;;  %v3099_v6 = vpop.f32.mrf.mxu0 }
 0x25c   : > { %v3196_v21 = vadd.f32 %v3195_v63, %v3147_v54  ;;  %v3244_v53 = vpop.f32.mrf.mxu3  ;;  %v3100_v61 = vadd.f32 %v3099_v6, %v13438_v52  ;;  %v3148_v17 = vpop.f32.mrf.mxu1  ;;  %v15785_v54 = vld [vmem:[#allocation70_spill] sm:$0xff]  ;;  %v15786_v52 = vld [vmem:[#allocation41_spill] sm:$0xff] }
 0x25e   : > { %v13589_v13 = vadd.f32 %v3244_v53, %v3196_v21  ;;  %v3149_v34 = vadd.f32 %v3148_v17, %v3100_v61 }
 0x263   : > { %v3197_v39 = vpop.f32.mrf.mxu2  ;;  %v3102_v5 = vpop.f32.mrf.mxu0 }
 0x264   : > { %v3198_v59 = vadd.f32 %v3197_v39, %v3149_v34  ;;  %v3246_v32 = vpop.f32.mrf.mxu3  ;;  %v3103_v25 = vadd.f32 %v3102_v5, %v13447_v22  ;;  %v3151_v28 = vpop.f32.mrf.mxu1 }
 0x266   : > { %v13592_v12 = vadd.f32 %v3246_v32, %v3198_v59  ;;  %v3152_v2 = vadd.f32 %v3151_v28, %v3103_v25  ;;  %3297 = vmatmul.bf16.gmra.mxu0 %v15784_v42 }
 0x267   : > { %10353 = vmatmul.msk.bf16.gmra.mxu1 %vm2661_vm0, %v15785_v54 }
 0x268   : > { %3395 = vmatmul.bf16.gmra.mxu2 %v15786_v52 }
 0x269   : > { %3444 = vmatmul.bf16.gmra.mxu3 %v12866_v14 }
 0x26b   : > { %v3200_v63 = vpop.f32.mrf.mxu2  ;;  %v3104_v6 = vpop.f32.mrf.mxu0 }
 0x26c   : > { %v3201_v21 = vadd.f32 %v3200_v63, %v3152_v2  ;;  %v3249_v22 = vpop.f32.mrf.mxu3  ;;  %v3105_v53 = vadd.f32 %v3104_v6, %v13452_v35  ;;  %v3153_v61 = vpop.f32.mrf.mxu1  ;;  %v9728_v63 = vld [vmem:[%s12634_s24 + $0x458] sm:$0xf]  ;;  %v11531_v35 = vld [vmem:[%s12634_s24 + $0x46c] sm:$0xf0] }
 0x26d   : > { %v9920_v6 = vld [vmem:[%s12634_s24 + $0x5d8] sm:$0xf] }
 0x26e   : > { %v13600_v17 = vadd.f32 %v3249_v22, %v3201_v21  ;;  %v3154_v34 = vadd.f32 %v3153_v61, %v3105_v53  ;;  %v15787_v21 = vld [vmem:[#allocation72_spill] sm:$0xff]  ;;  %v9729_v22 = vor.u32 %v11531_v35, %v9728_v63 }
 0x26f   : > { %v11579_v53 = vld [vmem:[%s12634_s24 + $0x5ec] sm:$0xf0]  ;;  %v10112_v61 = vld [vmem:[%s12634_s24 + $0x758] sm:$0xf]  ;;  %v9704_v63 = vld [vmem:[%s12634_s24 + $0x428] sm:$0xf] }
 0x270   : > { %3470 = vmatpush.bf16.msra.mxu0 %v9729_v22  ;;  %v11525_v35 = vld [vmem:[%s12634_s24 + $0x43c] sm:$0xf0] }
 0x273   : > { %v3202_v39 = vpop.f32.mrf.mxu2  ;;  %v3107_v5 = vpop.f32.mrf.mxu0 }
 0x274   : > { %v3203_v59 = vadd.f32 %v3202_v39, %v3154_v34  ;;  %v3251_v32 = vpop.f32.mrf.mxu3  ;;  %v3108_v25 = vadd.f32 %v3107_v5, %v13471_v27  ;;  %v3156_v2 = vpop.f32.mrf.mxu1  ;;  %v11627_v34 = vld [vmem:[%s12634_s24 + $0x76c] sm:$0xf0] }
 0x275   : > { %v15788_v39 = vld [vmem:[#allocation73_spill] sm:$0xff]  ;;  %v10113_v5 = vor.u32 %v11627_v34, %v10112_v61 }
 0x276   : > { %v13603_v28 = vadd.f32 %v3251_v32, %v3203_v59  ;;  %v3157_v14 = vadd.f32 %v3156_v2, %v3108_v25  ;;  %3302 = vmatmul.bf16.gmra.mxu0 %v15787_v21  ;;  %v15789_v27 = vld [vmem:[#allocation45_spill] sm:$0xff]  ;;  %v9921_v59 = vor.u32 %v11579_v53, %v9920_v6 }
 0x277   : > { %10354 = vmatmul.msk.bf16.gmra.mxu1 %vm2661_vm0, %v15788_v39  ;;  %v10304_v32 = vld [vmem:[%s12634_s24 + $0x8d8] sm:$0xf]  ;;  %v11675_v25 = vld [vmem:[%s12634_s24 + $0x8ec] sm:$0xf0]  ;;  %3568 = vmatpush.bf16.msra.mxu2 %v10113_v5  ;;  %v9896_v39 = vld [vmem:[%s12634_s24 + $0x5a8] sm:$0xf] }
 0x278   : > { %3400 = vmatmul.bf16.gmra.mxu2 %v15789_v27  ;;  %v10305_v2 = vor.u32 %v11675_v25, %v10304_v32  ;;  %3519 = vmatpush.bf16.msra.mxu1 %v9921_v59  ;;  %v9705_v27 = vor.u32 %v11525_v35, %v9704_v63  ;;  %v11573_v6 = vld [vmem:[%s12634_s24 + $0x5bc] sm:$0xf0]  ;;  %v10088_v53 = vld [vmem:[%s12634_s24 + $0x728] sm:$0xf] }
 0x279   : > { %3449 = vmatmul.bf16.gmra.mxu3 %v12902_v26  ;;  %v11621_v61 = vld [vmem:[%s12634_s24 + $0x73c] sm:$0xf0]  ;;  %v9897_v32 = vor.u32 %v11573_v6, %v9896_v39  ;;  %v10280_v5 = vld [vmem:[%s12634_s24 + $0x8a8] sm:$0xf]  ;;  %v9872_v39 = vld [vmem:[%s12634_s24 + $0x578] sm:$0xf] }
 0x27a   : > { %3617 = vmatpush.bf16.msra.mxu3 %v10305_v2  ;;  %v10089_v59 = vor.u32 %v11621_v61, %v10088_v53  ;;  %v11669_v25 = vld [vmem:[%s12634_s24 + $0x8bc] sm:$0xf0]  ;;  %3471 = vmatpush.bf16.msra.mxu0 %v9705_v27  ;;  %v11567_v61 = vld [vmem:[%s12634_s24 + $0x58c] sm:$0xf0] }
 0x27b   : > { %v3205_v52 = vpop.f32.mrf.mxu2  ;;  %v3109_v26 = vpop.f32.mrf.mxu0  ;;  %v10281_v63 = vor.u32 %v11669_v25, %v10280_v5  ;;  %v9873_v27 = vor.u32 %v11567_v61, %v9872_v39  ;;  %v11513_v5 = vld [vmem:[%s12634_s24 + $0x3dc] sm:$0xf0]  ;;  %v9848_v25 = vld [vmem:[%s12634_s24 + $0x548] sm:$0xf] }
 0x27c   : > { %v3206_v34 = vadd.f32 %v3205_v52, %v3157_v14  ;;  %v3254_v22 = vpop.f32.mrf.mxu3  ;;  %v3110_v54 = vadd.f32 %v3109_v26, %v13488_v1  ;;  %v3158_v2 = vpop.f32.mrf.mxu1  ;;  %3520 = vmatpush.bf16.msra.mxu1 %v9897_v32  ;;  %3569 = vmatpush.bf16.msra.mxu2 %v10089_v59  ;;  %v9680_v14 = vld [vmem:[%s12634_s24 + $0x3f8] sm:$0xf]  ;;  %v11519_v52 = vld [vmem:[%s12634_s24 + $0x40c] sm:$0xf0]  ;;  %v11609_v39 = vld [vmem:[%s12634_s24 + $0x6dc] sm:$0xf0] }
 0x27d   : > { %v9681_v53 = vor.u32 %v11519_v52, %v9680_v14  ;;  %v10064_v26 = vld [vmem:[%s12634_s24 + $0x6f8] sm:$0xf]  ;;  %v11615_v1 = vld [vmem:[%s12634_s24 + $0x70c] sm:$0xf0]  ;;  %v11561_v14 = vld [vmem:[%s12634_s24 + $0x55c] sm:$0xf0] }
 0x27e   : > { %v13627_v35 = vadd.f32 %v3254_v22, %v3206_v34  ;;  %v3159_v6 = vadd.f32 %v3158_v2, %v3110_v54  ;;  %3618 = vmatpush.bf16.msra.mxu3 %v10281_v63  ;;  %v10065_v34 = vor.u32 %v11615_v1, %v10064_v26  ;;  %v10256_v22 = vld [vmem:[%s12634_s24 + $0x878] sm:$0xf]  ;;  %v11663_v32 = vld [vmem:[%s12634_s24 + $0x88c] sm:$0xf0]  ;;  %v9656_v54 = vld [vmem:[%s12634_s24 + $0x3c8] sm:$0xf]  ;;  %v9849_v1 = vor.u32 %v11561_v14, %v9848_v25 }
 0x27f   : > { %3472 = vmatpush.bf16.msra.mxu0 %v9681_v53  ;;  %v10257_v59 = vor.u32 %v11663_v32, %v10256_v22  ;;  %v9657_v63 = vor.u32 %v11513_v5, %v9656_v54  ;;  %v10040_v52 = vld [vmem:[%s12634_s24 + $0x6c8] sm:$0xf]  ;;  %v9824_v25 = vld [vmem:[%s12634_s24 + $0x518] sm:$0xf] }
 0x280   : > { %3521 = vmatpush.bf16.msra.mxu1 %v9873_v27  ;;  %3570 = vmatpush.bf16.msra.mxu2 %v10065_v34  ;;  %v10041_v27 = vor.u32 %v11609_v39, %v10040_v52  ;;  %v10232_v22 = vld [vmem:[%s12634_s24 + $0x848] sm:$0xf]  ;;  %v11657_v34 = vld [vmem:[%s12634_s24 + $0x85c] sm:$0xf0] }
 0x281   : > { %v10233_v54 = vor.u32 %v11657_v34, %v10232_v22  ;;  %v15790_v52 = vld [vmem:[#allocation75_spill] sm:$0xff] }
 0x282   : > { %3619 = vmatpush.bf16.msra.mxu3 %v10257_v59  ;;  %v10208_v22 = vld [vmem:[%s12634_s24 + $0x818] sm:$0xf]  ;;  %v11651_v34 = vld [vmem:[%s12634_s24 + $0x82c] sm:$0xf0] }
 0x283   : > { %v3207_v2 = vpop.f32.mrf.mxu2  ;;  %v3112_v26 = vpop.f32.mrf.mxu0  ;;  %3473 = vmatpush.bf16.msra.mxu0 %v9657_v63  ;;  %v10016_v63 = vld [vmem:[%s12634_s24 + $0x698] sm:$0xf] }
 0x284   : > { %v3208_v61 = vadd.f32 %v3207_v2, %v3159_v6  ;;  %v3256_v53 = vpop.f32.mrf.mxu3  ;;  %v3113_v32 = vadd.f32 %v3112_v26, %v13509_v11  ;;  %v3161_v59 = vpop.f32.mrf.mxu1  ;;  %3522 = vmatpush.bf16.msra.mxu1 %v9849_v1  ;;  %3571 = vmatpush.bf16.msra.mxu2 %v10041_v27  ;;  %v9632_v6 = vld [vmem:[%s12634_s24 + $0x398] sm:$0xf]  ;;  %v11507_v2 = vld [vmem:[%s12634_s24 + $0x3ac] sm:$0xf0] }
 0x285   : > { %v9633_v39 = vor.u32 %v11507_v2, %v9632_v6  ;;  %v11555_v11 = vld [vmem:[%s12634_s24 + $0x52c] sm:$0xf0]  ;;  %v9800_v6 = vld [vmem:[%s12634_s24 + $0x4e8] sm:$0xf] }
 0x286   : > { %v13646_v5 = vadd.f32 %v3256_v53, %v3208_v61  ;;  %v3162_v14 = vadd.f32 %v3161_v59, %v3113_v32  ;;  %3307 = vmatmul.bf16.gmra.mxu0 %v15790_v52  ;;  %3620 = vmatpush.bf16.msra.mxu3 %v10233_v54  ;;  %v11603_v26 = vld [vmem:[%s12634_s24 + $0x6ac] sm:$0xf0]  ;;  %v9825_v1 = vor.u32 %v11555_v11, %v9824_v25  ;;  %v9608_v59 = vld [vmem:[%s12634_s24 + $0x368] sm:$0xf]  ;;  %v11501_v54 = vld [vmem:[%s12634_s24 + $0x37c] sm:$0xf0] }
 0x287   : > { %v15791_v61 = vld [vmem:[#allocation76_spill] sm:$0xff]  ;;  %v15792_v53 = vld [vmem:[#allocation49_spill] sm:$0xff]  ;;  %v10017_v27 = vor.u32 %v11603_v26, %v10016_v63  ;;  %3474 = vmatpush.bf16.msra.mxu0 %v9633_v39  ;;  %v10209_v32 = vor.u32 %v11651_v34, %v10208_v22 }
 0x288   : > { %10355 = vmatmul.msk.bf16.gmra.mxu1 %vm2661_vm0, %v15791_v61  ;;  %3405 = vmatmul.bf16.gmra.mxu2 %v15792_v53  ;;  %v9609_v53 = vor.u32 %v11501_v54, %v9608_v59  ;;  %v11549_v25 = vld [vmem:[%s12634_s24 + $0x4fc] sm:$0xf0]  ;;  %v9992_v11 = vld [vmem:[%s12634_s24 + $0x668] sm:$0xf] }
 0x289   : > { %3454 = vmatmul.bf16.gmra.mxu3 %v12962_v30  ;;  %3523 = vmatpush.bf16.msra.mxu1 %v9825_v1  ;;  %v11597_v63 = vld [vmem:[%s12634_s24 + $0x67c] sm:$0xf0]  ;;  %v9801_v22 = vor.u32 %v11549_v25, %v9800_v6  ;;  %v9776_v6 = vld [vmem:[%s12634_s24 + $0x4b8] sm:$0xf] }
 0x28a   : > { %3572 = vmatpush.bf16.msra.mxu2 %v10017_v27  ;;  %3621 = vmatpush.bf16.msra.mxu3 %v10209_v32  ;;  %v9993_v1 = vor.u32 %v11597_v63, %v9992_v11  ;;  %v10184_v27 = vld [vmem:[%s12634_s24 + $0x7e8] sm:$0xf]  ;;  %v11645_v34 = vld [vmem:[%s12634_s24 + $0x7fc] sm:$0xf0]  ;;  %v11543_v63 = vld [vmem:[%s12634_s24 + $0x4cc] sm:$0xf0] }
 0x28b   : > { %v3210_v2 = vpop.f32.mrf.mxu2  ;;  %v3114_v30 = vpop.f32.mrf.mxu0  ;;  %3475 = vmatpush.bf16.msra.mxu0 %v9609_v53  ;;  %v10185_v59 = vor.u32 %v11645_v34, %v10184_v27  ;;  %v9777_v53 = vor.u32 %v11543_v63, %v9776_v6  ;;  %v11489_v27 = vld [vmem:[%s12634_s24 + $0x31c] sm:$0xf0]  ;;  %v9752_v34 = vld [vmem:[%s12634_s24 + $0x488] sm:$0xf] }
 0x28c   : > { %v3211_v26 = vadd.f32 %v3210_v2, %v3162_v14  ;;  %v3259_v39 = vpop.f32.mrf.mxu3  ;;  %v3115_v61 = vadd.f32 %v3114_v30, %v13528_v20  ;;  %v3163_v32 = vpop.f32.mrf.mxu1  ;;  %v9584_v14 = vld [vmem:[%s12634_s24 + $0x338] sm:$0xf]  ;;  %v11495_v2 = vld [vmem:[%s12634_s24 + $0x34c] sm:$0xf0] }
 0x28d   : > { %3524 = vmatpush.bf16.msra.mxu1 %v9801_v22  ;;  %v9585_v11 = vor.u32 %v11495_v2, %v9584_v14  ;;  %v9968_v30 = vld [vmem:[%s12634_s24 + $0x638] sm:$0xf]  ;;  %v11591_v20 = vld [vmem:[%s12634_s24 + $0x64c] sm:$0xf0]  ;;  %v11537_v14 = vld [vmem:[%s12634_s24 + $0x49c] sm:$0xf0] }
 0x28e   : > { %v13670_v54 = vadd.f32 %v3259_v39, %v3211_v26  ;;  %3573 = vmatpush.bf16.msra.mxu2 %v9993_v1  ;;  %v3164_v25 = vadd.f32 %v3163_v32, %v3115_v61  ;;  %3622 = vmatpush.bf16.msra.mxu3 %v10185_v59  ;;  %v9969_v26 = vor.u32 %v11591_v20, %v9968_v30  ;;  %v10160_v39 = vld [vmem:[%s12634_s24 + $0x7b8] sm:$0xf]  ;;  %v11639_v22 = vld [vmem:[%s12634_s24 + $0x7cc] sm:$0xf0]  ;;  %v9560_v61 = vld [vmem:[%s12634_s24 + $0x308] sm:$0xf] }
 0x28f   : > { %3476 = vmatpush.bf16.msra.mxu0 %v9585_v11  ;;  %v10161_v1 = vor.u32 %v11639_v22, %v10160_v39  ;;  %v9561_v59 = vor.u32 %v11489_v27, %v9560_v61  ;;  %v9944_v2 = vld [vmem:[%s12634_s24 + $0x608] sm:$0xf]  ;;  %v9753_v20 = vor.u32 %v11537_v14, %v9752_v34  ;;  %v11633_v39 = vld [vmem:[%s12634_s24 + $0x79c] sm:$0xf0] }
 0x290   : > { %v9945_v8 = vor.u32 %v11585_v19, %v9944_v2  ;;  %v10136_v11 = vld [vmem:[%s12634_s24 + $0x788] sm:$0xf] }
 0x291   : > { %3525 = vmatpush.bf16.msra.mxu1 %v9777_v53  ;;  %v10137_v22 = vor.u32 %v11633_v39, %v10136_v11 }
 0x292   : > { %3574 = vmatpush.bf16.msra.mxu2 %v9969_v26  ;;  %3623 = vmatpush.bf16.msra.mxu3 %v10161_v1 }
 0x293   : > { %v3212_v32 = vpop.f32.mrf.mxu2  ;;  %v3117_v63 = vpop.f32.mrf.mxu0  ;;  %3477 = vmatpush.bf16.msra.mxu0 %v9561_v59 }
 0x294   : > { %v3213_v6 = vadd.f32 %v3212_v32, %v3164_v25  ;;  %v3261_v30 = vpop.f32.mrf.mxu3  ;;  %v3118_v53 = vadd.f32 %v3117_v63, %v13539_v0  ;;  %v3166_v26 = vpop.f32.mrf.mxu1 }
 0x295   : > { %3526 = vmatpush.bf16.msra.mxu1 %v9753_v20 }
 0x296   : > { %v13689_v52 = vadd.f32 %v3261_v30, %v3213_v6  ;;  %3575 = vmatpush.bf16.msra.mxu2 %v9945_v8  ;;  %v3167_v1 = vadd.f32 %v3166_v26, %v3118_v53  ;;  %3312 = vmatmul.bf16.gmra.mxu0 %v13348_v47 }
 0x297   : > { %3624 = vmatpush.bf16.msra.mxu3 %v10137_v22 }
 0x298   : > { %10356 = vmatmul.msk.bf16.gmra.mxu1 %vm2661_vm0, %v13350_v38  ;;  %3410 = vmatmul.bf16.gmra.mxu2 %v13017_v23 }
 0x299   : > { %3459 = vmatmul.bf16.gmra.mxu3 %v15765_v37 }
 0x29b   : > { %v3215_v19 = vpop.f32.mrf.mxu2  ;;  %v3119_v25 = vpop.f32.mrf.mxu0 }
 0x29c   : > { %v3216_v0 = vadd.f32 %v3215_v19, %v3167_v1  ;;  %v3264_v61 = vpop.f32.mrf.mxu3  ;;  %v3120_v27 = vadd.f32 %v3119_v25, %v13544_v9  ;;  %v3168_v34 = vpop.f32.mrf.mxu1 }
 0x29e   : > { %v13697_v32 = vadd.f32 %v3264_v61, %v3216_v0  ;;  %v3169_v8 = vadd.f32 %v3168_v34, %v3120_v27 }
 0x2a3   : > { %v3217_v59 = vpop.f32.mrf.mxu2  ;;  %v3122_v2 = vpop.f32.mrf.mxu0 }
 0x2a4   : > { %v3218_v14 = vadd.f32 %v3217_v59, %v3169_v8  ;;  %v3266_v6 = vpop.f32.mrf.mxu3  ;;  %v3123_v63 = vadd.f32 %v3122_v2, %v13553_v29  ;;  %v3171_v30 = vpop.f32.mrf.mxu1 }
 0x2a6   : > { %v13700_v20 = vadd.f32 %v3266_v6, %v3218_v14  ;;  %v3172_v11 = vadd.f32 %v3171_v30, %v3123_v63  ;;  %3317 = vmatmul.bf16.gmra.mxu0 %v13383_v7 }
 0x2a8   : > { %10357 = vmatmul.msk.bf16.gmra.mxu1 %vm2661_vm0, %v13385_v48  ;;  %3415 = vmatmul.bf16.gmra.mxu2 %v13058_v60 }
 0x2a9   : > { %3464 = vmatmul.bf16.gmra.mxu3 %v15770_v62 }
 0x2ab   : > { %v3220_v9 = vpop.f32.mrf.mxu2  ;;  %v3124_v53 = vpop.f32.mrf.mxu0 }
 0x2ac   : > { %v3221_v39 = vadd.f32 %v3220_v9, %v3172_v11  ;;  %v3269_v26 = vpop.f32.mrf.mxu3  ;;  %v3125_v22 = vadd.f32 %v3124_v53, %v13558_v45  ;;  %v3173_v29 = vpop.f32.mrf.mxu1 }
 0x2ae   : > { %v13708_v1 = vadd.f32 %v3269_v26, %v3221_v39  ;;  %v3174_v19 = vadd.f32 %v3173_v29, %v3125_v22 }
 0x2b3   : > { %v3222_v0 = vpop.f32.mrf.mxu2  ;;  %v3283_v27 = vpop.f32.mrf.mxu0 }
 0x2b4   : > { %v3223_v25 = vadd.f32 %v3222_v0, %v3174_v19  ;;  %v3271_v61 = vpop.f32.mrf.mxu3  ;;  %v3284_v34 = vadd.f32 %v3283_v27, %v13567_v16  ;;  %v3332_v8 = vpop.f32.mrf.mxu1 }
 0x2b6   : > { %v13711_v59 = vadd.f32 %v3271_v61, %v3223_v25  ;;  %v3333_v14 = vadd.f32 %v3332_v8, %v3284_v34  ;;  %3478 = vmatmul.bf16.vlgmr.msra.gmra.mxu0 %v12760_v43 }
 0x2b8   : > { %3527 = vmatmul.bf16.vlgmr.msra.gmra.mxu1 %v12762_v44  ;;  %3576 = vmatmul.bf16.vlgmr.msra.gmra.mxu2 %v13088_v10  ;;  %v4744_v45 = vpack.c.bf16 %v3333_v14, %v13403_v57 }
 0x2b9   : > { %3625 = vmatmul.bf16.vlgmr.msra.gmra.mxu3 %v15775_v15 }
 0x2ba   : > { %v4808_v53 = vunpack.c.l.b16 %v4744_v45  ;;  %v4809_v26 = vunpack.c.h.b16 %v4744_v45 }
 0x2bb   : > { %v3381_v2 = vpop.f32.mrf.mxu2  ;;  %v3285_v6 = vpop.f32.mrf.mxu0 }
 0x2bc   : > { %v3430_v63 = vpop.f32.mrf.mxu3  ;;  %v3286_v30 = vadd.f32 %v3285_v6, %v13570_v49  ;;  %v3334_v16 = vpop.f32.mrf.mxu1 }
 0x2bd   : > { %v13719_v11 = vadd.f32 %v3430_v63, %v3381_v2 }
 0x2be   : > { %v3335_v9 = vadd.f32 %v3334_v16, %v3286_v30 }
 0x2c0   : > { %v4747_v39 = vpack.c.bf16 %v3335_v9, %v13408_v24 }
 0x2c2   : > { %v4810_v22 = vunpack.c.l.b16 %v4747_v39  ;;  %v4811_v29 = vunpack.c.h.b16 %v4747_v39 }
 0x2c3   : > { %v3383_v19 = vpop.f32.mrf.mxu2  ;;  %v3288_v0 = vpop.f32.mrf.mxu0 }
 0x2c4   : > { %v3432_v57 = vpop.f32.mrf.mxu3  ;;  %v3289_v25 = vadd.f32 %v3288_v0, %v13578_v51  ;;  %v3337_v61 = vpop.f32.mrf.mxu1  ;;  %v13725_v34 = vpack.c.b16 %v4810_v22, %v4808_v53  ;;  %v13727_v49 = vpack.c.b16 %v4811_v29, %v4809_v26 }
 0x2c5   : > { %v13723_v27 = vadd.f32 %v3432_v57, %v3383_v19 }
 0x2c6   : > { %15793 = vst [vmem:[#allocation91_spill] sm:$0xff] %v13725_v34  ;;  %v3338_v8 = vadd.f32 %v3337_v61, %v3289_v25  ;;  %3483 = vmatmul.bf16.gmra.mxu0 %v12796_v55 }
 0x2c7   : > { %15794 = vst [vmem:[#allocation92_spill] sm:$0xff] %v13727_v49  ;;  %v9538_v49 = vld [vmem:[%s12634_s24 + $0x2f0] sm:$0xf0] }
 0x2c8   : > { %3532 = vmatmul.bf16.gmra.mxu1 %v12798_v56  ;;  %3581 = vmatmul.bf16.gmra.mxu2 %v13119_v50  ;;  %v4750_v24 = vpack.c.bf16 %v3338_v8, %v13417_v58 }
 0x2c9   : > { %3630 = vmatmul.bf16.gmra.mxu3 %v15778_v31 }
 0x2ca   : > { %v4812_v9 = vunpack.c.l.b16 %v4750_v24  ;;  %v4813_v39 = vunpack.c.h.b16 %v4750_v24 }
 0x2cb   : > { %v3386_v14 = vpop.f32.mrf.mxu2  ;;  %v3290_v51 = vpop.f32.mrf.mxu0 }
 0x2cc   : > { %v3435_v45 = vpop.f32.mrf.mxu3  ;;  %v3291_v2 = vadd.f32 %v3290_v51, %v13581_v46  ;;  %v3339_v6 = vpop.f32.mrf.mxu1 }
 0x2cd   : > { %v13735_v63 = vadd.f32 %v3435_v45, %v3386_v14 }
 0x2ce   : > { %v3340_v30 = vadd.f32 %v3339_v6, %v3291_v2 }
 0x2d0   : > { %v4753_v16 = vpack.c.bf16 %v3340_v30, %v13422_v33 }
 0x2d2   : > { %v4814_v53 = vunpack.c.l.b16 %v4753_v16  ;;  %v4815_v26 = vunpack.c.h.b16 %v4753_v16 }
 0x2d3   : > { %v3388_v22 = vpop.f32.mrf.mxu2  ;;  %v3293_v29 = vpop.f32.mrf.mxu0 }
 0x2d4   : > { %v3437_v58 = vpop.f32.mrf.mxu3  ;;  %v3294_v19 = vadd.f32 %v3293_v29, %v13589_v13  ;;  %v3342_v0 = vpop.f32.mrf.mxu1  ;;  %v13741_v25 = vpack.c.b16 %v4814_v53, %v4812_v9  ;;  %v13743_v46 = vpack.c.b16 %v4815_v26, %v4813_v39 }
 0x2d5   : > { %v13739_v57 = vadd.f32 %v3437_v58, %v3388_v22 }
 0x2d6   : > { %15795 = vst [vmem:[#allocation93_spill] sm:$0xff] %v13741_v25  ;;  %v3343_v61 = vadd.f32 %v3342_v0, %v3294_v19  ;;  %3488 = vmatmul.bf16.gmra.mxu0 %v12832_v3 }
 0x2d7   : > { %15796 = vst [vmem:[#allocation94_spill] sm:$0xff] %v13743_v46 }
 0x2d8   : > { %3537 = vmatmul.bf16.gmra.mxu1 %v12834_v4  ;;  %3586 = vmatmul.bf16.gmra.mxu2 %v13152_v40  ;;  %v4756_v33 = vpack.c.bf16 %v3343_v61, %v13431_v36  ;;  %v15799_v61 = vld [vmem:[#allocation43_spill] sm:$0xff] }
 0x2d9   : > { %3635 = vmatmul.bf16.gmra.mxu3 %v15781_v18 }
 0x2da   : > { %v4816_v30 = vunpack.c.l.b16 %v4756_v33  ;;  %v4817_v16 = vunpack.c.h.b16 %v4756_v33  ;;  %v15801_v33 = vld [vmem:[#allocation68_spill] sm:$0xff] }
 0x2db   : > { %v3391_v8 = vpop.f32.mrf.mxu2  ;;  %v3295_v13 = vpop.f32.mrf.mxu0 }
 0x2dc   : > { %v3440_v24 = vpop.f32.mrf.mxu3  ;;  %v3296_v14 = vadd.f32 %v3295_v13, %v13592_v12  ;;  %v3344_v51 = vpop.f32.mrf.mxu1 }
 0x2dd   : > { %v13751_v45 = vadd.f32 %v3440_v24, %v3391_v8  ;;  %v15802_v8 = vld [vmem:[#allocation83_spill] sm:$0xff] }
 0x2de   : > { %v3345_v2 = vadd.f32 %v3344_v51, %v3296_v14 }
 0x2e0   : > { %v4759_v6 = vpack.c.bf16 %v3345_v2, %v13436_v41  ;;  %v15800_v41 = vld [vmem:[#allocation44_spill] sm:$0xff] }
 0x2e2   : > { %v4818_v9 = vunpack.c.l.b16 %v4759_v6  ;;  %v4819_v39 = vunpack.c.h.b16 %v4759_v6 }
 0x2e3   : > { %v3393_v53 = vpop.f32.mrf.mxu2  ;;  %v3298_v26 = vpop.f32.mrf.mxu0 }
 0x2e4   : > { %v3442_v36 = vpop.f32.mrf.mxu3  ;;  %v3299_v22 = vadd.f32 %v3298_v26, %v13600_v17  ;;  %v3347_v29 = vpop.f32.mrf.mxu1  ;;  %v13757_v19 = vpack.c.b16 %v4818_v9, %v4816_v30  ;;  %v13759_v12 = vpack.c.b16 %v4819_v39, %v4817_v16  ;;  %v15803_v16 = vld [vmem:[#allocation84_spill] sm:$0xff] }
 0x2e5   : > { %v13755_v58 = vadd.f32 %v3442_v36, %v3393_v53 }
 0x2e6   : > { %15797 = vst [vmem:[#allocation95_spill] sm:$0xff] %v13757_v19  ;;  %v3348_v0 = vadd.f32 %v3347_v29, %v3299_v22  ;;  %3493 = vmatmul.bf16.gmra.mxu0 %v15799_v61  ;;  %v11516_v19 = vld [vmem:[%s12634_s24 + $0x3fc] sm:$0xf] }
 0x2e7   : > { %15798 = vst [vmem:[#allocation96_spill] sm:$0xff] %v13759_v12 }
 0x2e8   : > { %3542 = vmatmul.bf16.gmra.mxu1 %v15800_v41  ;;  %3591 = vmatmul.bf16.gmra.mxu2 %v15801_v33  ;;  %v4762_v13 = vpack.c.bf16 %v3348_v0, %v15802_v8 }
 0x2e9   : > { %3640 = vmatmul.bf16.gmra.mxu3 %v15784_v42 }
 0x2ea   : > { %v4820_v39 = vunpack.c.l.b16 %v4762_v13  ;;  %v4821_v53 = vunpack.c.h.b16 %v4762_v13  ;;  %v11480_v13 = vld [vmem:[%s12634_s24 + $0x2dc] sm:$0xf] }
 0x2eb   : > { %v3396_v24 = vpop.f32.mrf.mxu2  ;;  %v3300_v17 = vpop.f32.mrf.mxu0 }
 0x2ec   : > { %v3445_v14 = vpop.f32.mrf.mxu3  ;;  %v3301_v51 = vadd.f32 %v3300_v17, %v13603_v28  ;;  %v3349_v2 = vpop.f32.mrf.mxu1 }
 0x2ed   : > { %v13767_v6 = vadd.f32 %v3445_v14, %v3396_v24 }
 0x2ee   : > { %v3350_v30 = vadd.f32 %v3349_v2, %v3301_v51  ;;  %v11432_v51 = vld [vmem:[%s12634_s24 + $0x15c] sm:$0xf]  ;;  %v9346_v2 = vld [vmem:[%s12634_s24 + $0x170] sm:$0xf0] }
 0x2f0   : > { %v4765_v9 = vpack.c.bf16 %v3350_v30, %v15803_v16  ;;  %v15806_v16 = vld [vmem:[#allocation47_spill] sm:$0xff] }
 0x2f2   : > { %v4822_v26 = vunpack.c.l.b16 %v4765_v9  ;;  %v4823_v36 = vunpack.c.h.b16 %v4765_v9  ;;  %v9349_v9 = vor.u32 %v11432_v51, %v9346_v2  ;;  %v11474_v51 = vld [vmem:[%s12634_s24 + $0x2ac] sm:$0xf] }
 0x2f3   : > { %v3398_v22 = vpop.f32.mrf.mxu2  ;;  %v3303_v29 = vpop.f32.mrf.mxu0 }
 0x2f4   : > { %v3447_v0 = vpop.f32.mrf.mxu3  ;;  %v3304_v28 = vadd.f32 %v3303_v29, %v13627_v35  ;;  %v3352_v8 = vpop.f32.mrf.mxu1  ;;  %v13773_v17 = vpack.c.b16 %v4822_v26, %v4820_v39  ;;  %v13775_v14 = vpack.c.b16 %v4823_v36, %v4821_v53  ;;  %v15807_v35 = vld [vmem:[#allocation48_spill] sm:$0xff]  ;;  %v15808_v29 = vld [vmem:[#allocation71_spill] sm:$0xff]  ;;  %v9541_v39 = vor.u32 %v11480_v13, %v9538_v49  ;;  %v15809_v36 = vld [vmem:[#allocation85_spill] sm:$0xff]  ;;  %3715 = vmatpush.bf16.msrb.mxu1 %v9349_v9 }
 0x2f5   : > { %v13771_v24 = vadd.f32 %v3447_v0, %v3398_v22  ;;  %v11528_v26 = vld [vmem:[%s12634_s24 + $0x45c] sm:$0xf]  ;;  %v9730_v53 = vld [vmem:[%s12634_s24 + $0x470] sm:$0xf0]  ;;  %v9514_v13 = vld [vmem:[%s12634_s24 + $0x2c0] sm:$0xf0] }
 0x2f6   : > { %15804 = vst [vmem:[#allocation44_spill] sm:$0xff] %v13773_v17  ;;  %v3353_v30 = vadd.f32 %v3352_v8, %v3304_v28  ;;  %3498 = vmatmul.bf16.gmra.mxu0 %v15806_v16  ;;  %v9733_v0 = vor.u32 %v11528_v26, %v9730_v53  ;;  %3764 = vmatpush.bf16.msrb.mxu2 %v9541_v39  ;;  %v11426_v28 = vld [vmem:[%s12634_s24 + $0x12c] sm:$0xf]  ;;  %v9322_v8 = vld [vmem:[%s12634_s24 + $0x140] sm:$0xf0] }
 0x2f7   : > { %15805 = vst [vmem:[#allocation83_spill] sm:$0xff] %v13775_v14  ;;  %v9325_v49 = vor.u32 %v11426_v28, %v9322_v8  ;;  %v9706_v14 = vld [vmem:[%s12634_s24 + $0x440] sm:$0xf0]  ;;  %v9298_v28 = vld [vmem:[%s12634_s24 + $0x110] sm:$0xf0] }
 0x2f8   : > { %3547 = vmatmul.bf16.gmra.mxu1 %v15807_v35  ;;  %3596 = vmatmul.bf16.gmra.mxu2 %v15808_v29  ;;  %v13787_v22 = vpack.c.bf16 %v3353_v30, %v15809_v36  ;;  %v9517_v30 = vor.u32 %v11474_v51, %v9514_v13  ;;  %v11522_v36 = vld [vmem:[%s12634_s24 + $0x42c] sm:$0xf]  ;;  %v11468_v8 = vld [vmem:[%s12634_s24 + $0x27c] sm:$0xf]  ;;  %v9490_v13 = vld [vmem:[%s12634_s24 + $0x290] sm:$0xf0] }
 0x2f9   : > { %3645 = vmatmul.bf16.gmra.mxu3 %v15787_v21  ;;  %3716 = vmatpush.bf16.msrb.mxu1 %v9325_v49  ;;  %v9709_v53 = vor.u32 %v11522_v36, %v9706_v14  ;;  %v9493_v25 = vor.u32 %v11468_v8, %v9490_v13  ;;  %v11414_v14 = vld [vmem:[%s12634_s24 + $0xcc] sm:$0xf]  ;;  %v9274_v49 = vld [vmem:[%s12634_s24 + $0xe0] sm:$0xf0] }
 0x2fa   : > { %3813 = vmatpush.bf16.msrb.mxu3 %v9733_v0  ;;  %3765 = vmatpush.bf16.msrb.mxu2 %v9517_v30  ;;  %v11420_v0 = vld [vmem:[%s12634_s24 + $0xfc] sm:$0xf]  ;;  %v11462_v30 = vld [vmem:[%s12634_s24 + $0x24c] sm:$0xf]  ;;  %v5093_v36 = vunpack.c.l.b16 %v13787_v22  ;;  %v9658_v13 = vld [vmem:[%s12634_s24 + $0x3e0] sm:$0xf0] }
 0x2fb   : > { %v3401_v2 = vpop.f32.mrf.mxu2  ;;  %v3305_v46 = vpop.f32.mrf.mxu0  ;;  %v9301_v51 = vor.u32 %v11420_v0, %v9298_v28  ;;  %v9277_v0 = vor.u32 %v11414_v14, %v9274_v49  ;;  %v9466_v28 = vld [vmem:[%s12634_s24 + $0x260] sm:$0xf0]  ;;  %v11408_v14 = vld [vmem:[%s12634_s24 + $0x9c] sm:$0xf] }
 0x2fc   : > { %v3450_v12 = vpop.f32.mrf.mxu3  ;;  %v3306_v9 = vadd.f32 %v3305_v46, %v13646_v5  ;;  %v3354_v39 = vpop.f32.mrf.mxu1  ;;  %v9682_v5 = vld [vmem:[%s12634_s24 + $0x410] sm:$0xf0]  ;;  %v11456_v49 = vld [vmem:[%s12634_s24 + $0x21c] sm:$0xf] }
 0x2fd   : > { %v13797_v26 = vadd.f32 %v3450_v12, %v3401_v2  ;;  %v15810_v46 = vld [vmem:[#allocation86_spill] sm:$0xff]  ;;  %3717 = vmatpush.bf16.msrb.mxu1 %v9301_v51  ;;  %v9685_v2 = vor.u32 %v11516_v19, %v9682_v5  ;;  %v11510_v51 = vld [vmem:[%s12634_s24 + $0x3cc] sm:$0xf] }
 0x2fe   : > { %v3355_v34 = vadd.f32 %v3354_v39, %v3306_v9  ;;  %3814 = vmatpush.bf16.msrb.mxu3 %v9709_v53  ;;  %3766 = vmatpush.bf16.msrb.mxu2 %v9493_v25  ;;  %v9469_v25 = vor.u32 %v11462_v30, %v9466_v28  ;;  %v15813_v28 = vld [vmem:[#allocation51_spill] sm:$0xff] }
 0x300   : > { %v4771_v12 = vpack.c.bf16 %v3355_v34, %v15810_v46  ;;  %v5094_v34 = vunpack.c.h.b16 %v13787_v22  ;;  %v9250_v22 = vld [vmem:[%s12634_s24 + $0xb0] sm:$0xf0] }
 0x301   : > { %3718 = vmatpush.bf16.msrb.mxu1 %v9277_v0  ;;  %v15814_v0 = vld [vmem:[#allocation52_spill] sm:$0xff] }
 0x302   : > { %v5095_v9 = vunpack.c.l.b16 %v4771_v12  ;;  %v5096_v39 = vunpack.c.h.b16 %v4771_v12  ;;  %3815 = vmatpush.bf16.msrb.mxu3 %v9685_v2  ;;  %v9661_v12 = vor.u32 %v11510_v51, %v9658_v13  ;;  %3767 = vmatpush.bf16.msrb.mxu2 %v9469_v25  ;;  %v15817_v25 = vld [vmem:[#allocation75_spill] sm:$0xff] }
 0x303   : > { %v3403_v53 = vpop.f32.mrf.mxu2  ;;  %v3308_v19 = vpop.f32.mrf.mxu0  ;;  %v11402_v13 = vld [vmem:[%s12634_s24 + $0x6c] sm:$0xf] }
 0x304   : > { %v3452_v8 = vpop.f32.mrf.mxu3  ;;  %v3309_v5 = vadd.f32 %v3308_v19, %v13670_v54  ;;  %v13817_v2 = vpack.c.b16 %v5095_v9, %v5093_v36  ;;  %v13822_v21 = vpack.c.b16 %v5096_v39, %v5094_v34  ;;  %v9253_v54 = vor.u32 %v11408_v14, %v9250_v22  ;;  %v15815_v36 = vld [vmem:[#allocation74_spill] sm:$0xff]  ;;  %v11504_v19 = vld [vmem:[%s12634_s24 + $0x39c] sm:$0xf] }
 0x305   : > { %v3357_v46 = vpop.f32.mrf.mxu1  ;;  %v13815_v17 = vadd.f32 %v3452_v8, %v3403_v53  ;;  %v9442_v53 = vld [vmem:[%s12634_s24 + $0x230] sm:$0xf0]  ;;  %v15816_v34 = vld [vmem:[#allocation87_spill] sm:$0xff] }
 0x306   : > { %15811 = vst [vmem:[#allocation84_spill] sm:$0xff] %v13817_v2  ;;  %v3358_v30 = vadd.f32 %v3357_v46, %v3309_v5  ;;  %3503 = vmatmul.bf16.gmra.mxu0 %v15813_v28  ;;  %3816 = vmatpush.bf16.msrb.mxu3 %v9661_v12  ;;  %v9445_v9 = vor.u32 %v11456_v49, %v9442_v53  ;;  %v9634_v39 = vld [vmem:[%s12634_s24 + $0x3b0] sm:$0xf0]  ;;  %v9226_v5 = vld [vmem:[%s12634_s24 + $0x80] sm:$0xf0] }
 0x307   : > { %15812 = vst [vmem:[#allocation85_spill] sm:$0xff] %v13822_v21  ;;  %3719 = vmatpush.bf16.msrb.mxu1 %v9253_v54  ;;  %v9637_v51 = vor.u32 %v11504_v19, %v9634_v39  ;;  %v11450_v46 = vld [vmem:[%s12634_s24 + $0x1ec] sm:$0xf]  ;;  %v10328_v14 = vld [vmem:[%s12634_s24 + $0x908] sm:$0xf]  ;;  %v9229_v49 = vor.u32 %v11402_v13, %v9226_v5 }
 0x308   : > { %3552 = vmatmul.bf16.gmra.mxu1 %v15814_v0  ;;  %3601 = vmatmul.bf16.gmra.mxu2 %v15815_v36  ;;  %v13831_v8 = vpack.c.bf16 %v3358_v30, %v15816_v34  ;;  %v11681_v22 = vld [vmem:[%s12634_s24 + $0x91c] sm:$0xf0]  ;;  %v9418_v53 = vld [vmem:[%s12634_s24 + $0x200] sm:$0xf0]  ;;  %v11498_v19 = vld [vmem:[%s12634_s24 + $0x36c] sm:$0xf] }
 0x309   : > { %3650 = vmatmul.bf16.gmra.mxu3 %v15817_v25  ;;  %3768 = vmatpush.bf16.msrb.mxu2 %v9445_v9  ;;  %v10329_v21 = vor.u32 %v11681_v22, %v10328_v14  ;;  %v9421_v54 = vor.u32 %v11450_v46, %v9418_v53  ;;  %v9610_v39 = vld [vmem:[%s12634_s24 + $0x380] sm:$0xf0]  ;;  %v11396_v13 = vld [vmem:[%s12634_s24 + $0x3c] sm:$0xf]  ;;  %v9202_v5 = vld [vmem:[%s12634_s24 + $0x50] sm:$0xf0] }
 0x30a   : > { %3817 = vmatpush.bf16.msrb.mxu3 %v9637_v51  ;;  %v9613_v51 = vor.u32 %v11498_v19, %v9610_v39  ;;  %v11444_v46 = vld [vmem:[%s12634_s24 + $0x1bc] sm:$0xf]  ;;  %v9205_v22 = vor.u32 %v11396_v13, %v9202_v5  ;;  %v9394_v53 = vld [vmem:[%s12634_s24 + $0x1d0] sm:$0xf0]  ;;  %v11438_v19 = vld [vmem:[%s12634_s24 + $0x18c] sm:$0xf]  ;;  %v5097_v39 = vunpack.c.l.b16 %v13831_v8 }
 0x30b   : > { %v3406_v12 = vpop.f32.mrf.mxu2  ;;  %v3310_v30 = vpop.f32.mrf.mxu0  ;;  %3720 = vmatpush.bf16.msrb.mxu1 %v9229_v49  ;;  %3673 = vmatpush.bf16.msrb.mxu0 %v10329_v21  ;;  %v9397_v36 = vor.u32 %v11444_v46, %v9394_v53  ;;  %v11390_v21 = vld [vmem:[%s12634_s24 + $0xc] sm:$0xf]  ;;  %v9370_v5 = vld [vmem:[%s12634_s24 + $0x1a0] sm:$0xf0]  ;;  %v5098_v46 = vunpack.c.h.b16 %v13831_v8 }
 0x30c   : > { %v3455_v34 = vpop.f32.mrf.mxu3  ;;  %v3311_v9 = vadd.f32 %v3310_v30, %v13689_v52  ;;  %v11492_v52 = vld [vmem:[%s12634_s24 + $0x33c] sm:$0xf]  ;;  %v9586_v30 = vld [vmem:[%s12634_s24 + $0x350] sm:$0xf0] }
 0x30d   : > { %v3359_v2 = vpop.f32.mrf.mxu1  ;;  %v13843_v25 = vadd.f32 %v3455_v34, %v3406_v12  ;;  %3769 = vmatpush.bf16.msrb.mxu2 %v9421_v54  ;;  %v15818_v12 = vld [vmem:[#allocation88_spill] sm:$0xff]  ;;  %v9589_v49 = vor.u32 %v11492_v52, %v9586_v30  ;;  %v11486_v52 = vld [vmem:[%s12634_s24 + $0x30c] sm:$0xf] }
 0x30e   : > { %v3360_v14 = vadd.f32 %v3359_v2, %v3311_v9  ;;  %3818 = vmatpush.bf16.msrb.mxu3 %v9613_v51  ;;  %v9178_v54 = vld [vmem:[%s12634_s24 + $0x20] sm:$0xf0]  ;;  %v15822_v8 = vld [vmem:[#allocation55_spill] sm:$0xff] }
 0x30f   : > { %3721 = vmatpush.bf16.msrb.mxu1 %v9205_v22  ;;  %v9181_v13 = vor.u32 %v11390_v21, %v9178_v54  ;;  %v9373_v22 = vor.u32 %v11438_v19, %v9370_v5  ;;  %v9562_v30 = vld [vmem:[%s12634_s24 + $0x320] sm:$0xf0]  ;;  %v15823_v54 = vld [vmem:[#allocation77_spill] sm:$0xff] }
 0x310   : > { %v4777_v34 = vpack.c.bf16 %v3360_v14, %v15818_v12  ;;  %v9565_v29 = vor.u32 %v11486_v52, %v9562_v30  ;;  %v15821_v21 = vld [vmem:[#allocation54_spill] sm:$0xff]  ;;  %v15824_v19 = vld [vmem:[#allocation53_spill] sm:$0xff] }
 0x311   : > { %3770 = vmatpush.bf16.msrb.mxu2 %v9397_v36 }
 0x312   : > { %v5099_v2 = vunpack.c.l.b16 %v4777_v34  ;;  %v5100_v9 = vunpack.c.h.b16 %v4777_v34  ;;  %3819 = vmatpush.bf16.msrb.mxu3 %v9589_v49 }
 0x313   : > { %v3408_v51 = vpop.f32.mrf.mxu2  ;;  %v3313_v53 = vpop.f32.mrf.mxu0  ;;  %3722 = vmatpush.bf16.msrb.mxu1 %v9181_v13 }
 0x314   : > { %v3457_v14 = vpop.f32.mrf.mxu3  ;;  %v3314_v36 = vadd.f32 %v3313_v53, %v13697_v32  ;;  %v13863_v35 = vpack.c.b16 %v5099_v2, %v5097_v39  ;;  %v13865_v34 = vpack.c.b16 %v5100_v9, %v5098_v46  ;;  %v15825_v53 = vld [vmem:[#allocation89_spill] sm:$0xff] }
 0x315   : > { %v3362_v12 = vpop.f32.mrf.mxu1  ;;  %v13861_v0 = vadd.f32 %v3457_v14, %v3408_v51  ;;  %3771 = vmatpush.bf16.msrb.mxu2 %v9373_v22 }
 0x316   : > { %15819 = vst [vmem:[#allocation86_spill] sm:$0xff] %v13863_v35  ;;  %v3363_v49 = vadd.f32 %v3362_v12, %v3314_v36  ;;  %3508 = vmatmul.bf16.gmra.mxu0 %v15821_v21  ;;  %3820 = vmatpush.bf16.msrb.mxu3 %v9565_v29 }
 0x317   : > { %15820 = vst [vmem:[#allocation87_spill] sm:$0xff] %v13865_v34 }
 0x318   : > { %3557 = vmatmul.bf16.gmra.mxu1 %v15822_v8  ;;  %3606 = vmatmul.bf16.gmra.mxu2 %v15823_v54  ;;  %v4780_v32 = vpack.c.bf16 %v3363_v49, %v15824_v19 }
 0x319   : > { %3655 = vmatmul.bf16.gmra.mxu3 %v13348_v47 }
 0x31a   : > { %v5101_v29 = vunpack.c.l.b16 %v4780_v32  ;;  %v5102_v22 = vunpack.c.h.b16 %v4780_v32  ;;  %v15830_v32 = vld [vmem:[#allocation80_spill] sm:$0xff] }
 0x31b   : > { %v3411_v51 = vpop.f32.mrf.mxu2  ;;  %v3315_v13 = vpop.f32.mrf.mxu0 }
 0x31c   : > { %v3460_v5 = vpop.f32.mrf.mxu3  ;;  %v3316_v39 = vadd.f32 %v3315_v13, %v13700_v20  ;;  %v15828_v13 = vld [vmem:[#allocation57_spill] sm:$0xff] }
 0x31d   : > { %v3364_v2 = vpop.f32.mrf.mxu1  ;;  %v13873_v9 = vadd.f32 %v3460_v5, %v3411_v51  ;;  %v15829_v5 = vld [vmem:[#allocation58_spill] sm:$0xff] }
 0x31e   : > { %v3365_v46 = vadd.f32 %v3364_v2, %v3316_v39  ;;  %v15831_v39 = vld [vmem:[#allocation56_spill] sm:$0xff] }
 0x320   : > { %v4783_v14 = vpack.c.bf16 %v3365_v46, %v15825_v53 }
 0x322   : > { %v5103_v52 = vunpack.c.l.b16 %v4783_v14  ;;  %v5104_v30 = vunpack.c.h.b16 %v4783_v14 }
 0x323   : > { %v3413_v36 = vpop.f32.mrf.mxu2  ;;  %v3318_v12 = vpop.f32.mrf.mxu0 }
 0x324   : > { %v3462_v49 = vpop.f32.mrf.mxu3  ;;  %v3319_v19 = vadd.f32 %v3318_v12, %v13708_v1  ;;  %v13879_v47 = vpack.c.b16 %v5103_v52, %v5101_v29  ;;  %v13881_v20 = vpack.c.b16 %v5104_v30, %v5102_v22 }
 0x325   : > { %v3367_v34 = vpop.f32.mrf.mxu1  ;;  %v13877_v35 = vadd.f32 %v3462_v49, %v3413_v36 }
 0x326   : > { %15826 = vst [vmem:[#allocation88_spill] sm:$0xff] %v13879_v47  ;;  %v3368_v51 = vadd.f32 %v3367_v34, %v3319_v19  ;;  %3513 = vmatmul.bf16.gmra.mxu0 %v15828_v13  ;;  %v15832_v34 = vld [vmem:[#allocation90_spill] sm:$0xff] }
 0x327   : > { %15827 = vst [vmem:[#allocation54_spill] sm:$0xff] %v13881_v20 }
 0x328   : > { %3562 = vmatmul.bf16.gmra.mxu1 %v15829_v5  ;;  %3611 = vmatmul.bf16.gmra.mxu2 %v15830_v32  ;;  %v4786_v2 = vpack.c.bf16 %v3368_v51, %v15831_v39 }
 0x329   : > { %3660 = vmatmul.bf16.gmra.mxu3 %v13383_v7 }
 0x32a   : > { %v5105_v36 = vunpack.c.l.b16 %v4786_v2  ;;  %v5106_v12 = vunpack.c.h.b16 %v4786_v2  ;;  %v15837_v2 = vld [vmem:[#allocation30_spill] sm:$0xff] }
 0x32b   : > { %v3416_v46 = vpop.f32.mrf.mxu2  ;;  %v3320_v1 = vpop.f32.mrf.mxu0 }
 0x32c   : > { %v3465_v53 = vpop.f32.mrf.mxu3  ;;  %v3321_v14 = vadd.f32 %v3320_v1, %v13711_v59  ;;  %v15835_v1 = vld [vmem:[#allocation61_spill] sm:$0xff] }
 0x32d   : > { %v3369_v29 = vpop.f32.mrf.mxu1  ;;  %v13889_v52 = vadd.f32 %v3465_v53, %v3416_v46  ;;  %v15836_v53 = vld [vmem:[#allocation29_spill] sm:$0xff] }
 0x32e   : > { %v3370_v22 = vadd.f32 %v3369_v29, %v3321_v14 }
 0x330   : > { %v4789_v30 = vpack.c.bf16 %v3370_v22, %v15832_v34 }
 0x332   : > { %v5107_v49 = vunpack.c.l.b16 %v4789_v30  ;;  %v5108_v19 = vunpack.c.h.b16 %v4789_v30 }
 0x333   : > { %v3418_v20 = vpop.f32.mrf.mxu2  ;;  %v3479_v51 = vpop.f32.mrf.mxu0 }
 0x334   : > { %v3467_v47 = vpop.f32.mrf.mxu3  ;;  %v3480_v7 = vadd.f32 %v3479_v51, %v13719_v11  ;;  %v13895_v5 = vpack.c.b16 %v5107_v49, %v5105_v36  ;;  %v13897_v59 = vpack.c.b16 %v5108_v19, %v5106_v12 }
 0x335   : > { %v13892_v39 = vadd.f32 %v3467_v47, %v3418_v20  ;;  %v3528_v32 = vpop.f32.mrf.mxu1 }
 0x336   : > { %15833 = vst [vmem:[#allocation55_spill] sm:$0xff] %v13895_v5  ;;  %v3529_v46 = vadd.f32 %v3528_v32, %v3480_v7  ;;  %10358 = vmatmul.msk.bf16.vlgmr.msrb.gmra.mxu0 %vm2661_vm0, %v15835_v1  ;;  %v15838_v5 = vld [vmem:[#allocation64_spill] sm:$0xff] }
 0x337   : > { %15834 = vst [vmem:[#allocation53_spill] sm:$0xff] %v13897_v59 }
 0x338   : > { %3723 = vmatmul.bf16.vlgmr.msrb.gmra.mxu1 %v15836_v53  ;;  %3772 = vmatmul.bf16.vlgmr.msrb.gmra.mxu2 %v15837_v2 }
 0x339   : > { %3821 = vmatmul.bf16.vlgmr.msrb.gmra.mxu3 %v12760_v43 }
 0x33b   : > { %v3577_v14 = vpop.f32.mrf.mxu2  ;;  %v3481_v20 = vpop.f32.mrf.mxu0 }
 0x33c   : > { %v3578_v47 = vadd.f32 %v3577_v14, %v3529_v46  ;;  %v3626_v29 = vpop.f32.mrf.mxu3  ;;  %v3482_v11 = vadd.f32 %v3481_v20, %v13723_v27  ;;  %v15839_v46 = vld [vmem:[#allocation33_spill] sm:$0xff]  ;;  %v15840_v27 = vld [vmem:[#allocation34_spill] sm:$0xff] }
 0x33d   : > { %v3530_v22 = vpop.f32.mrf.mxu1 }
 0x33e   : > { %v13905_v34 = vadd.f32 %v3626_v29, %v3578_v47  ;;  %v3531_v30 = vadd.f32 %v3530_v22, %v3482_v11 }
 0x343   : > { %v3579_v7 = vpop.f32.mrf.mxu2  ;;  %v3484_v36 = vpop.f32.mrf.mxu0 }
 0x344   : > { %v3580_v32 = vadd.f32 %v3579_v7, %v3531_v30  ;;  %v3628_v12 = vpop.f32.mrf.mxu3  ;;  %v3485_v49 = vadd.f32 %v3484_v36, %v13735_v63 }
 0x345   : > { %v3533_v19 = vpop.f32.mrf.mxu1 }
 0x346   : > { %v13908_v51 = vadd.f32 %v3628_v12, %v3580_v32  ;;  %v3534_v59 = vadd.f32 %v3533_v19, %v3485_v49  ;;  %10359 = vmatmul.msk.bf16.gmra.mxu0 %vm2661_vm0, %v15838_v5 }
 0x348   : > { %3728 = vmatmul.bf16.gmra.mxu1 %v15839_v46  ;;  %3777 = vmatmul.bf16.gmra.mxu2 %v15840_v27  ;;  %v15841_v46 = vld [vmem:[#allocation67_spill] sm:$0xff] }
 0x349   : > { %3826 = vmatmul.bf16.gmra.mxu3 %v12796_v55 }
 0x34b   : > { %v3582_v14 = vpop.f32.mrf.mxu2  ;;  %v3486_v20 = vpop.f32.mrf.mxu0 }
 0x34c   : > { %v3583_v47 = vadd.f32 %v3582_v14, %v3534_v59  ;;  %v3631_v29 = vpop.f32.mrf.mxu3  ;;  %v3487_v11 = vadd.f32 %v3486_v20, %v13739_v57  ;;  %v15842_v59 = vld [vmem:[#allocation37_spill] sm:$0xff]  ;;  %v15843_v57 = vld [vmem:[#allocation38_spill] sm:$0xff] }
 0x34d   : > { %v3535_v63 = vpop.f32.mrf.mxu1 }
 0x34e   : > { %v13916_v22 = vadd.f32 %v3631_v29, %v3583_v47  ;;  %v3536_v30 = vadd.f32 %v3535_v63, %v3487_v11 }
 0x353   : > { %v3584_v7 = vpop.f32.mrf.mxu2  ;;  %v3489_v36 = vpop.f32.mrf.mxu0 }
 0x354   : > { %v3585_v32 = vadd.f32 %v3584_v7, %v3536_v30  ;;  %v3633_v12 = vpop.f32.mrf.mxu3  ;;  %v3490_v49 = vadd.f32 %v3489_v36, %v13751_v45 }
 0x355   : > { %v3538_v19 = vpop.f32.mrf.mxu1 }
 0x356   : > { %v13919_v27 = vadd.f32 %v3633_v12, %v3585_v32  ;;  %v3539_v55 = vadd.f32 %v3538_v19, %v3490_v49  ;;  %10360 = vmatmul.msk.bf16.gmra.mxu0 %vm2661_vm0, %v15841_v46 }
 0x358   : > { %3733 = vmatmul.bf16.gmra.mxu1 %v15842_v59  ;;  %3782 = vmatmul.bf16.gmra.mxu2 %v15843_v57  ;;  %v15844_v59 = vld [vmem:[#allocation70_spill] sm:$0xff] }
 0x359   : > { %3831 = vmatmul.bf16.gmra.mxu3 %v12832_v3 }
 0x35b   : > { %v3587_v14 = vpop.f32.mrf.mxu2  ;;  %v3491_v20 = vpop.f32.mrf.mxu0 }
 0x35c   : > { %v3588_v47 = vadd.f32 %v3587_v14, %v3539_v55  ;;  %v3636_v29 = vpop.f32.mrf.mxu3  ;;  %v3492_v11 = vadd.f32 %v3491_v20, %v13755_v58  ;;  %v15845_v55 = vld [vmem:[#allocation41_spill] sm:$0xff]  ;;  %v15846_v58 = vld [vmem:[#allocation42_spill] sm:$0xff] }
 0x35d   : > { %v3540_v45 = vpop.f32.mrf.mxu1 }
 0x35e   : > { %v13927_v63 = vadd.f32 %v3636_v29, %v3588_v47  ;;  %v3541_v30 = vadd.f32 %v3540_v45, %v3492_v11 }
 0x363   : > { %v3589_v7 = vpop.f32.mrf.mxu2  ;;  %v3494_v36 = vpop.f32.mrf.mxu0 }
 0x364   : > { %v3590_v32 = vadd.f32 %v3589_v7, %v3541_v30  ;;  %v3638_v12 = vpop.f32.mrf.mxu3  ;;  %v3495_v49 = vadd.f32 %v3494_v36, %v13767_v6 }
 0x365   : > { %v3543_v19 = vpop.f32.mrf.mxu1 }
 0x366   : > { %v13930_v57 = vadd.f32 %v3638_v12, %v3590_v32  ;;  %v3544_v3 = vadd.f32 %v3543_v19, %v3495_v49  ;;  %10361 = vmatmul.msk.bf16.gmra.mxu0 %vm2661_vm0, %v15844_v59 }
 0x368   : > { %3738 = vmatmul.bf16.gmra.mxu1 %v15845_v55  ;;  %3787 = vmatmul.bf16.gmra.mxu2 %v15846_v58  ;;  %v10090_v58 = vld [vmem:[%s12634_s24 + $0x740] sm:$0xf0]  ;;  %v11666_v55 = vld [vmem:[%s12634_s24 + $0x8ac] sm:$0xf] }
 0x369   : > { %3836 = vmatmul.bf16.gmra.mxu3 %v15799_v61  ;;  %v9922_v61 = vld [vmem:[%s12634_s24 + $0x5f0] sm:$0xf0] }
 0x36b   : > { %v3592_v14 = vpop.f32.mrf.mxu2  ;;  %v3496_v20 = vpop.f32.mrf.mxu0 }
 0x36c   : > { %v3593_v47 = vadd.f32 %v3592_v14, %v3544_v3  ;;  %v3641_v6 = vpop.f32.mrf.mxu3  ;;  %v3497_v29 = vadd.f32 %v3496_v20, %v13771_v24  ;;  %v11576_v14 = vld [vmem:[%s12634_s24 + $0x5dc] sm:$0xf] }
 0x36d   : > { %v3545_v11 = vpop.f32.mrf.mxu1  ;;  %v11624_v24 = vld [vmem:[%s12634_s24 + $0x75c] sm:$0xf] }
 0x36e   : > { %v13938_v45 = vadd.f32 %v3641_v6, %v3593_v47  ;;  %v3546_v30 = vadd.f32 %v3545_v11, %v3497_v29  ;;  %v15847_v47 = vld [vmem:[#allocation73_spill] sm:$0xff]  ;;  %v9925_v6 = vor.u32 %v11576_v14, %v9922_v61  ;;  %v10114_v29 = vld [vmem:[%s12634_s24 + $0x770] sm:$0xf0] }
 0x36f   : > { %v11672_v11 = vld [vmem:[%s12634_s24 + $0x8dc] sm:$0xf]  ;;  %v11618_v61 = vld [vmem:[%s12634_s24 + $0x72c] sm:$0xf] }
 0x370   : > { %3862 = vmatpush.bf16.msra.mxu0 %v9925_v6  ;;  %v10093_v6 = vor.u32 %v11618_v61, %v10090_v58  ;;  %v11660_v58 = vld [vmem:[%s12634_s24 + $0x87c] sm:$0xf] }
 0x373   : > { %v3594_v7 = vpop.f32.mrf.mxu2  ;;  %v3499_v36 = vpop.f32.mrf.mxu0 }
 0x374   : > { %v3595_v32 = vadd.f32 %v3594_v7, %v3546_v30  ;;  %v3643_v12 = vpop.f32.mrf.mxu3  ;;  %v3500_v49 = vadd.f32 %v3499_v36, %v13797_v26  ;;  %v10306_v30 = vld [vmem:[%s12634_s24 + $0x8f0] sm:$0xf0]  ;;  %v15848_v26 = vld [vmem:[#allocation45_spill] sm:$0xff] }
 0x375   : > { %v3548_v19 = vpop.f32.mrf.mxu1  ;;  %v15849_v7 = vld [vmem:[#allocation46_spill] sm:$0xff]  ;;  %v10309_v36 = vor.u32 %v11672_v11, %v10306_v30 }
 0x376   : > { %v13941_v3 = vadd.f32 %v3643_v12, %v3595_v32  ;;  %v3549_v20 = vadd.f32 %v3548_v19, %v3500_v49  ;;  %10362 = vmatmul.msk.bf16.gmra.mxu0 %vm2661_vm0, %v15847_v47  ;;  %v10117_v32 = vor.u32 %v11624_v24, %v10114_v29  ;;  %v11570_v12 = vld [vmem:[%s12634_s24 + $0x5ac] sm:$0xf]  ;;  %v9898_v49 = vld [vmem:[%s12634_s24 + $0x5c0] sm:$0xf0] }
 0x377   : > { %3960 = vmatpush.bf16.msra.mxu2 %v10309_v36  ;;  %v9901_v14 = vor.u32 %v11570_v12, %v9898_v49  ;;  %v11564_v12 = vld [vmem:[%s12634_s24 + $0x57c] sm:$0xf] }
 0x378   : > { %3743 = vmatmul.bf16.gmra.mxu1 %v15848_v26  ;;  %3792 = vmatmul.bf16.gmra.mxu2 %v15849_v7  ;;  %v10282_v26 = vld [vmem:[%s12634_s24 + $0x8c0] sm:$0xf0]  ;;  %v11612_v49 = vld [vmem:[%s12634_s24 + $0x6fc] sm:$0xf] }
 0x379   : > { %3841 = vmatmul.bf16.gmra.mxu3 %v15806_v16  ;;  %3911 = vmatpush.bf16.msra.mxu1 %v10117_v32  ;;  %v10285_v11 = vor.u32 %v11666_v55, %v10282_v26  ;;  %v10066_v55 = vld [vmem:[%s12634_s24 + $0x710] sm:$0xf0] }
 0x37a   : > { %3863 = vmatpush.bf16.msra.mxu0 %v9901_v14  ;;  %v10069_v26 = vor.u32 %v11612_v49, %v10066_v55  ;;  %v9850_v14 = vld [vmem:[%s12634_s24 + $0x560] sm:$0xf0] }
 0x37b   : > { %v3597_v19 = vpop.f32.mrf.mxu2  ;;  %v3501_v24 = vpop.f32.mrf.mxu0  ;;  %3961 = vmatpush.bf16.msra.mxu2 %v10285_v11  ;;  %v10042_v11 = vld [vmem:[%s12634_s24 + $0x6e0] sm:$0xf0] }
 0x37c   : > { %v3598_v43 = vadd.f32 %v3597_v19, %v3549_v20  ;;  %v3646_v29 = vpop.f32.mrf.mxu3  ;;  %v3502_v30 = vadd.f32 %v3501_v24, %v13815_v17  ;;  %v9874_v20 = vld [vmem:[%s12634_s24 + $0x590] sm:$0xf0]  ;;  %v11606_v24 = vld [vmem:[%s12634_s24 + $0x6cc] sm:$0xf] }
 0x37d   : > { %v3550_v32 = vpop.f32.mrf.mxu1  ;;  %3912 = vmatpush.bf16.msra.mxu1 %v10093_v6  ;;  %v9877_v16 = vor.u32 %v11564_v12, %v9874_v20  ;;  %v10258_v17 = vld [vmem:[%s12634_s24 + $0x890] sm:$0xf0]  ;;  %v10045_v49 = vor.u32 %v11606_v24, %v10042_v11 }
 0x37e   : > { %v13961_v36 = vadd.f32 %v3646_v29, %v3598_v43  ;;  %v3551_v19 = vadd.f32 %v3550_v32, %v3502_v30  ;;  %v10261_v61 = vor.u32 %v11660_v58, %v10258_v17  ;;  %v11558_v43 = vld [vmem:[%s12634_s24 + $0x54c] sm:$0xf]  ;;  %v10234_v32 = vld [vmem:[%s12634_s24 + $0x860] sm:$0xf0] }
 0x37f   : > { %3864 = vmatpush.bf16.msra.mxu0 %v9877_v16  ;;  %v9853_v6 = vor.u32 %v11558_v43, %v9850_v14  ;;  %v11654_v30 = vld [vmem:[%s12634_s24 + $0x84c] sm:$0xf]  ;;  %v11600_v43 = vld [vmem:[%s12634_s24 + $0x69c] sm:$0xf]  ;;  %v15850_v14 = vld [vmem:[#allocation76_spill] sm:$0xff] }
 0x380   : > { %3962 = vmatpush.bf16.msra.mxu2 %v10261_v61  ;;  %v10237_v16 = vor.u32 %v11654_v30, %v10234_v32  ;;  %v9826_v61 = vld [vmem:[%s12634_s24 + $0x530] sm:$0xf0] }
 0x381   : > { %3913 = vmatpush.bf16.msra.mxu1 %v10069_v26  ;;  %v11552_v26 = vld [vmem:[%s12634_s24 + $0x51c] sm:$0xf]  ;;  %v15852_v11 = vld [vmem:[#allocation50_spill] sm:$0xff] }
 0x382   : > { %v9829_v24 = vor.u32 %v11552_v26, %v9826_v61  ;;  %v11642_v26 = vld [vmem:[%s12634_s24 + $0x7ec] sm:$0xf]  ;;  %v10186_v61 = vld [vmem:[%s12634_s24 + $0x800] sm:$0xf0] }
 0x383   : > { %v3599_v29 = vpop.f32.mrf.mxu2  ;;  %v3504_v20 = vpop.f32.mrf.mxu0  ;;  %3865 = vmatpush.bf16.msra.mxu0 %v9853_v6  ;;  %v10210_v6 = vld [vmem:[%s12634_s24 + $0x830] sm:$0xf0] }
 0x384   : > { %v3600_v12 = vadd.f32 %v3599_v29, %v3551_v19  ;;  %v3648_v7 = vpop.f32.mrf.mxu3  ;;  %v3505_v55 = vadd.f32 %v3504_v20, %v13843_v25  ;;  %3963 = vmatpush.bf16.msra.mxu2 %v10237_v16  ;;  %v10018_v29 = vld [vmem:[%s12634_s24 + $0x6b0] sm:$0xf0]  ;;  %v11648_v25 = vld [vmem:[%s12634_s24 + $0x81c] sm:$0xf]  ;;  %v9802_v20 = vld [vmem:[%s12634_s24 + $0x500] sm:$0xf0] }
 0x385   : > { %v3553_v58 = vpop.f32.mrf.mxu1  ;;  %3914 = vmatpush.bf16.msra.mxu1 %v10045_v49  ;;  %v10021_v30 = vor.u32 %v11600_v43, %v10018_v29  ;;  %v10213_v32 = vor.u32 %v11648_v25, %v10210_v6  ;;  %v11594_v49 = vld [vmem:[%s12634_s24 + $0x66c] sm:$0xf]  ;;  %v10189_v25 = vor.u32 %v11642_v26, %v10186_v61  ;;  %v9754_v61 = vld [vmem:[%s12634_s24 + $0x4a0] sm:$0xf0] }
 0x386   : > { %v13976_v17 = vadd.f32 %v3648_v7, %v3600_v12  ;;  %v3554_v19 = vadd.f32 %v3553_v58, %v3505_v55  ;;  %10363 = vmatmul.msk.bf16.gmra.mxu0 %vm2661_vm0, %v15850_v14  ;;  %v15851_v7 = vld [vmem:[#allocation49_spill] sm:$0xff]  ;;  %v9994_v58 = vld [vmem:[%s12634_s24 + $0x680] sm:$0xf0] }
 0x387   : > { %3866 = vmatpush.bf16.msra.mxu0 %v9829_v24  ;;  %v11546_v12 = vld [vmem:[%s12634_s24 + $0x4ec] sm:$0xf]  ;;  %v9997_v24 = vor.u32 %v11594_v49, %v9994_v58  ;;  %v9970_v49 = vld [vmem:[%s12634_s24 + $0x650] sm:$0xf0]  ;;  %v11636_v58 = vld [vmem:[%s12634_s24 + $0x7bc] sm:$0xf] }
 0x388   : > { %3748 = vmatmul.bf16.gmra.mxu1 %v15851_v7  ;;  %3797 = vmatmul.bf16.gmra.mxu2 %v15852_v11  ;;  %v9805_v55 = vor.u32 %v11546_v12, %v9802_v20  ;;  %v11540_v12 = vld [vmem:[%s12634_s24 + $0x4bc] sm:$0xf] }
 0x389   : > { %3846 = vmatmul.bf16.gmra.mxu3 %v15813_v28  ;;  %3915 = vmatpush.bf16.msra.mxu1 %v10021_v30  ;;  %v11588_v20 = vld [vmem:[%s12634_s24 + $0x63c] sm:$0xf] }
 0x38a   : > { %3964 = vmatpush.bf16.msra.mxu2 %v10213_v32  ;;  %v9973_v26 = vor.u32 %v11588_v20, %v9970_v49  ;;  %v11678_v20 = vld [vmem:[%s12634_s24 + $0x90c] sm:$0xf]  ;;  %v10330_v49 = vld [vmem:[%s12634_s24 + $0x920] sm:$0xf0] }
 0x38b   : > { %v3602_v16 = vpop.f32.mrf.mxu2  ;;  %v3506_v43 = vpop.f32.mrf.mxu0  ;;  %3867 = vmatpush.bf16.msra.mxu0 %v9805_v55 }
 0x38c   : > { %v3603_v7 = vadd.f32 %v3602_v16, %v3554_v19  ;;  %v3651_v29 = vpop.f32.mrf.mxu3  ;;  %v3507_v6 = vadd.f32 %v3506_v43, %v13861_v0  ;;  %v9778_v19 = vld [vmem:[%s12634_s24 + $0x4d0] sm:$0xf0]  ;;  %v11582_v43 = vld [vmem:[%s12634_s24 + $0x60c] sm:$0xf] }
 0x38d   : > { %v3555_v30 = vpop.f32.mrf.mxu1  ;;  %3916 = vmatpush.bf16.msra.mxu1 %v9997_v24  ;;  %v9781_v28 = vor.u32 %v11540_v12, %v9778_v19  ;;  %v10162_v0 = vld [vmem:[%s12634_s24 + $0x7d0] sm:$0xf0] }
 0x38e   : > { %v13996_v32 = vadd.f32 %v3651_v29, %v3603_v7  ;;  %3965 = vmatpush.bf16.msra.mxu2 %v10189_v25  ;;  %v3556_v16 = vadd.f32 %v3555_v30, %v3507_v6  ;;  %v10165_v55 = vor.u32 %v11636_v58, %v10162_v0  ;;  %v11534_v7 = vld [vmem:[%s12634_s24 + $0x48c] sm:$0xf]  ;;  %v9946_v25 = vld [vmem:[%s12634_s24 + $0x620] sm:$0xf0]  ;;  %v10333_v0 = vor.u32 %v11678_v20, %v10330_v49 }
 0x38f   : > { %3868 = vmatpush.bf16.msra.mxu0 %v9781_v28  ;;  %v9757_v24 = vor.u32 %v11534_v7, %v9754_v61  ;;  %v11630_v6 = vld [vmem:[%s12634_s24 + $0x78c] sm:$0xf]  ;;  %v10138_v30 = vld [vmem:[%s12634_s24 + $0x7a0] sm:$0xf0]  ;;  %v9949_v2 = vor.u32 %v11582_v43, %v9946_v25 }
 0x390   : > { %v10141_v53 = vor.u32 %v11630_v6, %v10138_v30  ;;  %4016 = vmatpush.bf16.msra.mxu3 %v10333_v0 }
 0x391   : > { %3917 = vmatpush.bf16.msra.mxu1 %v9973_v26 }
 0x392   : > { %3966 = vmatpush.bf16.msra.mxu2 %v10165_v55 }
 0x393   : > { %v3604_v29 = vpop.f32.mrf.mxu2  ;;  %v3509_v19 = vpop.f32.mrf.mxu0  ;;  %3869 = vmatpush.bf16.msra.mxu0 %v9757_v24 }
 0x394   : > { %v3605_v12 = vadd.f32 %v3604_v29, %v3556_v16  ;;  %v3653_v11 = vpop.f32.mrf.mxu3  ;;  %v3510_v28 = vadd.f32 %v3509_v19, %v13873_v9 }
 0x395   : > { %v3558_v58 = vpop.f32.mrf.mxu1  ;;  %3918 = vmatpush.bf16.msra.mxu1 %v9949_v2 }
 0x396   : > { %v14013_v26 = vadd.f32 %v3653_v11, %v3605_v12  ;;  %3967 = vmatpush.bf16.msra.mxu2 %v10141_v53  ;;  %v3559_v55 = vadd.f32 %v3558_v58, %v3510_v28  ;;  %10364 = vmatmul.msk.bf16.gmra.mxu0 %vm2661_vm0, %v13350_v38 }
 0x398   : > { %3753 = vmatmul.bf16.gmra.mxu1 %v13017_v23  ;;  %3802 = vmatmul.bf16.gmra.mxu2 %v15765_v37 }
 0x399   : > { %3851 = vmatmul.bf16.gmra.mxu3 %v15821_v21 }
 0x39b   : > { %v3607_v16 = vpop.f32.mrf.mxu2  ;;  %v3511_v7 = vpop.f32.mrf.mxu0 }
 0x39c   : > { %v3608_v9 = vadd.f32 %v3607_v16, %v3559_v55  ;;  %v3656_v61 = vpop.f32.mrf.mxu3  ;;  %v3512_v11 = vadd.f32 %v3511_v7, %v13877_v35 }
 0x39d   : > { %v3560_v43 = vpop.f32.mrf.mxu1 }
 0x39e   : > { %v14021_v2 = vadd.f32 %v3656_v61, %v3608_v9  ;;  %v3561_v53 = vadd.f32 %v3560_v43, %v3512_v11 }
 0x3a3   : > { %v3609_v29 = vpop.f32.mrf.mxu2  ;;  %v3514_v25 = vpop.f32.mrf.mxu0 }
 0x3a4   : > { %v3610_v24 = vadd.f32 %v3609_v29, %v3561_v53  ;;  %v3658_v6 = vpop.f32.mrf.mxu3  ;;  %v3515_v30 = vadd.f32 %v3514_v25, %v13889_v52 }
 0x3a5   : > { %v3563_v12 = vpop.f32.mrf.mxu1 }
 0x3a6   : > { %v14024_v19 = vadd.f32 %v3658_v6, %v3610_v24  ;;  %v3564_v20 = vadd.f32 %v3563_v12, %v3515_v30  ;;  %10365 = vmatmul.msk.bf16.gmra.mxu0 %vm2661_vm0, %v13385_v48 }
 0x3a8   : > { %3758 = vmatmul.bf16.gmra.mxu1 %v13058_v60  ;;  %3807 = vmatmul.bf16.gmra.mxu2 %v15770_v62 }
 0x3a9   : > { %3856 = vmatmul.bf16.gmra.mxu3 %v15828_v13 }
 0x3ab   : > { %v3612_v35 = vpop.f32.mrf.mxu2  ;;  %v3516_v28 = vpop.f32.mrf.mxu0 }
 0x3ac   : > { %v3613_v49 = vadd.f32 %v3612_v35, %v3564_v20  ;;  %v3661_v58 = vpop.f32.mrf.mxu3  ;;  %v3517_v0 = vadd.f32 %v3516_v28, %v13892_v39 }
 0x3ad   : > { %v3565_v52 = vpop.f32.mrf.mxu1 }
 0x3ae   : > { %v14032_v55 = vadd.f32 %v3661_v58, %v3613_v49  ;;  %v3566_v16 = vadd.f32 %v3565_v52, %v3517_v0 }
 0x3b3   : > { %v3614_v9 = vpop.f32.mrf.mxu2  ;;  %v3675_v11 = vpop.f32.mrf.mxu0 }
 0x3b4   : > { %v3615_v7 = vadd.f32 %v3614_v9, %v3566_v16  ;;  %v3663_v61 = vpop.f32.mrf.mxu3  ;;  %v14035_v43 = vadd.f32 %v3675_v11, %v13905_v34 }
 0x3b5   : > { %v3724_v53 = vpop.f32.mrf.mxu1 }
 0x3b6   : > { %v14037_v29 = vadd.f32 %v3663_v61, %v3615_v7  ;;  %3870 = vmatmul.bf16.vlgmr.msra.gmra.mxu0 %v12762_v44 }
 0x3b8   : > { %3919 = vmatmul.bf16.vlgmr.msra.gmra.mxu1 %v13088_v10  ;;  %3968 = vmatmul.bf16.vlgmr.msra.gmra.mxu2 %v15775_v15 }
 0x3b9   : > { %10366 = vmatmul.msk.bf16.vlgmr.msra.gmra.mxu3 %vm2661_vm0, %v15835_v1  ;;  %v11490_v1 = vld [vmem:[%s12634_s24 + $0x324] sm:$0xf0] }
 0x3bb   : > { %v3773_v39 = vpop.f32.mrf.mxu2  ;;  %v3677_v25 = vpop.f32.mrf.mxu0 }
 0x3bc   : > { %v3774_v24 = vadd.f32 %v3773_v39, %v3724_v53  ;;  %v3822_v6 = vpop.f32.mrf.mxu3  ;;  %v14045_v30 = vadd.f32 %v3677_v25, %v13908_v51 }
 0x3bd   : > { %v3726_v34 = vpop.f32.mrf.mxu1 }
 0x3be   : > { %v14047_v12 = vadd.f32 %v3822_v6, %v3774_v24 }
 0x3c3   : > { %v3775_v20 = vpop.f32.mrf.mxu2  ;;  %v3680_v49 = vpop.f32.mrf.mxu0 }
 0x3c4   : > { %v3776_v35 = vadd.f32 %v3775_v20, %v3726_v34  ;;  %v3824_v28 = vpop.f32.mrf.mxu3  ;;  %v14050_v58 = vadd.f32 %v3680_v49, %v13916_v22 }
 0x3c5   : > { %v3729_v0 = vpop.f32.mrf.mxu1 }
 0x3c6   : > { %v14052_v52 = vadd.f32 %v3824_v28, %v3776_v35  ;;  %3875 = vmatmul.bf16.gmra.mxu0 %v12798_v56 }
 0x3c8   : > { %3924 = vmatmul.bf16.gmra.mxu1 %v13119_v50  ;;  %3973 = vmatmul.bf16.gmra.mxu2 %v15778_v31  ;;  %v9568_v50 = vld [vmem:[%s12634_s24 + $0x310] sm:$0xf] }
 0x3c9   : > { %10367 = vmatmul.msk.bf16.gmra.mxu3 %vm2661_vm0, %v15838_v5  ;;  %v9664_v5 = vld [vmem:[%s12634_s24 + $0x3d0] sm:$0xf]  ;;  %v9569_v15 = vor.u32 %v11490_v1, %v9568_v50 }
 0x3cb   : > { %v3778_v51 = vpop.f32.mrf.mxu2  ;;  %v3682_v9 = vpop.f32.mrf.mxu0 }
 0x3cc   : > { %v3779_v16 = vadd.f32 %v3778_v51, %v3729_v0  ;;  %v3827_v7 = vpop.f32.mrf.mxu3  ;;  %v14060_v61 = vadd.f32 %v3682_v9, %v13919_v27 }
 0x3cd   : > { %v3731_v22 = vpop.f32.mrf.mxu1 }
 0x3ce   : > { %v14062_v11 = vadd.f32 %v3827_v7, %v3779_v16 }
 0x3d3   : > { %v3780_v53 = vpop.f32.mrf.mxu2  ;;  %v3685_v24 = vpop.f32.mrf.mxu0 }
 0x3d4   : > { %v3781_v39 = vadd.f32 %v3780_v53, %v3731_v22  ;;  %v3829_v25 = vpop.f32.mrf.mxu3  ;;  %v14065_v6 = vadd.f32 %v3685_v24, %v13927_v63 }
 0x3d5   : > { %v3734_v34 = vpop.f32.mrf.mxu1 }
 0x3d6   : > { %v14067_v20 = vadd.f32 %v3829_v25, %v3781_v39  ;;  %3880 = vmatmul.bf16.gmra.mxu0 %v12834_v4 }
 0x3d8   : > { %3929 = vmatmul.bf16.gmra.mxu1 %v13152_v40  ;;  %3978 = vmatmul.bf16.gmra.mxu2 %v15781_v18 }
 0x3d9   : > { %10368 = vmatmul.msk.bf16.gmra.mxu3 %vm2661_vm0, %v15841_v46  ;;  %v9520_v46 = vld [vmem:[%s12634_s24 + $0x2b0] sm:$0xf] }
 0x3db   : > { %v3783_v27 = vpop.f32.mrf.mxu2  ;;  %v3687_v49 = vpop.f32.mrf.mxu0 }
 0x3dc   : > { %v3784_v35 = vadd.f32 %v3783_v27, %v3734_v34  ;;  %v3832_v28 = vpop.f32.mrf.mxu3  ;;  %v14075_v0 = vadd.f32 %v3687_v49, %v13930_v57 }
 0x3dd   : > { %v3736_v63 = vpop.f32.mrf.mxu1 }
 0x3de   : > { %v14077_v51 = vadd.f32 %v3832_v28, %v3784_v35 }
 0x3e3   : > { %v3785_v16 = vpop.f32.mrf.mxu2  ;;  %v3690_v7 = vpop.f32.mrf.mxu0 }
 0x3e4   : > { %v3786_v9 = vadd.f32 %v3785_v16, %v3736_v63  ;;  %v3834_v22 = vpop.f32.mrf.mxu3  ;;  %v14080_v53 = vadd.f32 %v3690_v7, %v13938_v45 }
 0x3e5   : > { %v3739_v39 = vpop.f32.mrf.mxu1 }
 0x3e6   : > { %v14082_v24 = vadd.f32 %v3834_v22, %v3786_v9  ;;  %3885 = vmatmul.bf16.gmra.mxu0 %v15800_v41 }
 0x3e8   : > { %3934 = vmatmul.bf16.gmra.mxu1 %v15801_v33  ;;  %3983 = vmatmul.bf16.gmra.mxu2 %v15784_v42  ;;  %v15854_v42 = vld [vmem:[#allocation71_spill] sm:$0xff] }
 0x3e9   : > { %10369 = vmatmul.msk.bf16.gmra.mxu3 %vm2661_vm0, %v15844_v59  ;;  %v15853_v59 = vld [vmem:[#allocation48_spill] sm:$0xff] }
 0x3ea   : > { %v11580_v33 = vld [vmem:[%s12634_s24 + $0x5f4] sm:$0xf0] }
 0x3eb   : > { %v3788_v57 = vpop.f32.mrf.mxu2  ;;  %v3692_v34 = vpop.f32.mrf.mxu0 }
 0x3ec   : > { %v3789_v25 = vadd.f32 %v3788_v57, %v3739_v39  ;;  %v3837_v45 = vpop.f32.mrf.mxu3  ;;  %v14090_v27 = vadd.f32 %v3692_v34, %v13941_v3  ;;  %v9352_v57 = vld [vmem:[%s12634_s24 + $0x160] sm:$0xf]  ;;  %v11436_v3 = vld [vmem:[%s12634_s24 + $0x174] sm:$0xf0] }
 0x3ed   : > { %v3741_v35 = vpop.f32.mrf.mxu1  ;;  %v9544_v34 = vld [vmem:[%s12634_s24 + $0x2e0] sm:$0xf] }
 0x3ee   : > { %v14092_v49 = vadd.f32 %v3837_v45, %v3789_v25  ;;  %v9353_v25 = vor.u32 %v11436_v3, %v9352_v57  ;;  %v11484_v45 = vld [vmem:[%s12634_s24 + $0x2f4] sm:$0xf0]  ;;  %v9328_v3 = vld [vmem:[%s12634_s24 + $0x130] sm:$0xf] }
 0x3f0   : > { %4058 = vmatpush.bf16.msrb.mxu0 %v9353_v25 }
 0x3f3   : > { %v3790_v28 = vpop.f32.mrf.mxu2  ;;  %v3695_v16 = vpop.f32.mrf.mxu0 }
 0x3f4   : > { %v3791_v63 = vadd.f32 %v3790_v28, %v3741_v35  ;;  %v3839_v9 = vpop.f32.mrf.mxu3  ;;  %v14095_v7 = vadd.f32 %v3695_v16, %v13961_v36  ;;  %v9736_v35 = vld [vmem:[%s12634_s24 + $0x460] sm:$0xf]  ;;  %v11532_v28 = vld [vmem:[%s12634_s24 + $0x474] sm:$0xf0]  ;;  %v9545_v16 = vor.u32 %v11484_v45, %v9544_v34  ;;  %v11478_v45 = vld [vmem:[%s12634_s24 + $0x2c4] sm:$0xf0] }
 0x3f5   : > { %v3744_v22 = vpop.f32.mrf.mxu1  ;;  %v15855_v36 = vld [vmem:[#allocation72_spill] sm:$0xff] }
 0x3f6   : > { %v14097_v39 = vadd.f32 %v3839_v9, %v3791_v63  ;;  %3890 = vmatmul.bf16.gmra.mxu0 %v15853_v59  ;;  %v9737_v63 = vor.u32 %v11532_v28, %v9736_v35  ;;  %v9928_v9 = vld [vmem:[%s12634_s24 + $0x5e0] sm:$0xf]  ;;  %4107 = vmatpush.bf16.msrb.mxu1 %v9545_v16  ;;  %v9712_v35 = vld [vmem:[%s12634_s24 + $0x430] sm:$0xf]  ;;  %v11526_v28 = vld [vmem:[%s12634_s24 + $0x444] sm:$0xf0] }
 0x3f7   : > { %v9929_v57 = vor.u32 %v11580_v33, %v9928_v9  ;;  %v9521_v33 = vor.u32 %v11478_v45, %v9520_v46  ;;  %v9713_v16 = vor.u32 %v11526_v28, %v9712_v35  ;;  %v11574_v9 = vld [vmem:[%s12634_s24 + $0x5c4] sm:$0xf0]  ;;  %v11424_v46 = vld [vmem:[%s12634_s24 + $0x114] sm:$0xf0] }
 0x3f8   : > { %3939 = vmatmul.bf16.gmra.mxu1 %v15854_v42  ;;  %3988 = vmatmul.bf16.gmra.mxu2 %v15855_v36  ;;  %v11430_v42 = vld [vmem:[%s12634_s24 + $0x144] sm:$0xf0]  ;;  %v11472_v35 = vld [vmem:[%s12634_s24 + $0x294] sm:$0xf0] }
 0x3f9   : > { %10370 = vmatmul.msk.bf16.gmra.mxu3 %vm2661_vm0, %v15847_v47  ;;  %4156 = vmatpush.bf16.msrb.mxu2 %v9737_v63  ;;  %v9329_v34 = vor.u32 %v11430_v42, %v9328_v3  ;;  %v9904_v63 = vld [vmem:[%s12634_s24 + $0x5b0] sm:$0xf] }
 0x3fa   : > { %4205 = vmatpush.bf16.msrb.mxu3 %v9929_v57  ;;  %v9905_v57 = vor.u32 %v11574_v9, %v9904_v63  ;;  %4108 = vmatpush.bf16.msrb.mxu1 %v9521_v33  ;;  %v11418_v63 = vld [vmem:[%s12634_s24 + $0xe4] sm:$0xf0]  ;;  %v9472_v9 = vld [vmem:[%s12634_s24 + $0x250] sm:$0xf] }
 0x3fb   : > { %v3793_v36 = vpop.f32.mrf.mxu2  ;;  %v3697_v47 = vpop.f32.mrf.mxu0  ;;  %4059 = vmatpush.bf16.msrb.mxu0 %v9329_v34 }
 0x3fc   : > { %v3794_v18 = vadd.f32 %v3793_v36, %v3744_v22  ;;  %v3842_v25 = vpop.f32.mrf.mxu3  ;;  %v14121_v40 = vadd.f32 %v3697_v47, %v13976_v17  ;;  %v9304_v22 = vld [vmem:[%s12634_s24 + $0x100] sm:$0xf]  ;;  %v11520_v17 = vld [vmem:[%s12634_s24 + $0x414] sm:$0xf0] }
 0x3fd   : > { %v3746_v42 = vpop.f32.mrf.mxu1  ;;  %4157 = vmatpush.bf16.msrb.mxu2 %v9713_v16  ;;  %v9496_v36 = vld [vmem:[%s12634_s24 + $0x280] sm:$0xf]  ;;  %v9305_v45 = vor.u32 %v11424_v46, %v9304_v22  ;;  %v9280_v16 = vld [vmem:[%s12634_s24 + $0xd0] sm:$0xf]  ;;  %v11466_v46 = vld [vmem:[%s12634_s24 + $0x264] sm:$0xf0] }
 0x3fe   : > { %v14123_v3 = vadd.f32 %v3842_v25, %v3794_v18  ;;  %4206 = vmatpush.bf16.msrb.mxu3 %v9905_v57  ;;  %v9688_v47 = vld [vmem:[%s12634_s24 + $0x400] sm:$0xf]  ;;  %v9497_v34 = vor.u32 %v11472_v35, %v9496_v36  ;;  %v11568_v25 = vld [vmem:[%s12634_s24 + $0x594] sm:$0xf0]  ;;  %v9281_v22 = vor.u32 %v11418_v63, %v9280_v16  ;;  %v11514_v36 = vld [vmem:[%s12634_s24 + $0x3e4] sm:$0xf0] }
 0x3ff   : > { %v9689_v28 = vor.u32 %v11520_v17, %v9688_v47  ;;  %v9880_v18 = vld [vmem:[%s12634_s24 + $0x580] sm:$0xf]  ;;  %4060 = vmatpush.bf16.msrb.mxu0 %v9305_v45  ;;  %v9473_v17 = vor.u32 %v11466_v46, %v9472_v9  ;;  %v11412_v9 = vld [vmem:[%s12634_s24 + $0xb4] sm:$0xf0] }
 0x400   : > { %v9881_v33 = vor.u32 %v11568_v25, %v9880_v18  ;;  %4109 = vmatpush.bf16.msrb.mxu1 %v9497_v34  ;;  %v9665_v34 = vor.u32 %v11514_v36, %v9664_v5  ;;  %v11562_v18 = vld [vmem:[%s12634_s24 + $0x564] sm:$0xf0]  ;;  %v9448_v5 = vld [vmem:[%s12634_s24 + $0x220] sm:$0xf] }
 0x401   : > { %4158 = vmatpush.bf16.msrb.mxu2 %v9689_v28  ;;  %v9856_v28 = vld [vmem:[%s12634_s24 + $0x550] sm:$0xf]  ;;  %v9640_v36 = vld [vmem:[%s12634_s24 + $0x3a0] sm:$0xf] }
 0x402   : > { %4207 = vmatpush.bf16.msrb.mxu3 %v9881_v33  ;;  %v9857_v16 = vor.u32 %v11562_v18, %v9856_v28  ;;  %v11556_v28 = vld [vmem:[%s12634_s24 + $0x534] sm:$0xf0] }
 0x403   : > { %v3795_v57 = vpop.f32.mrf.mxu2  ;;  %v3700_v47 = vpop.f32.mrf.mxu0  ;;  %4061 = vmatpush.bf16.msrb.mxu0 %v9281_v22  ;;  %v11508_v22 = vld [vmem:[%s12634_s24 + $0x3b4] sm:$0xf0] }
 0x404   : > { %v3796_v35 = vadd.f32 %v3795_v57, %v3746_v42  ;;  %v3844_v45 = vpop.f32.mrf.mxu3  ;;  %v14142_v25 = vadd.f32 %v3700_v47, %v13996_v32  ;;  %4110 = vmatpush.bf16.msrb.mxu1 %v9473_v17  ;;  %v9256_v42 = vld [vmem:[%s12634_s24 + $0xa0] sm:$0xf]  ;;  %v11460_v32 = vld [vmem:[%s12634_s24 + $0x234] sm:$0xf0]  ;;  %v9641_v17 = vor.u32 %v11508_v22, %v9640_v36  ;;  %v9616_v36 = vld [vmem:[%s12634_s24 + $0x370] sm:$0xf] }
 0x405   : > { %v3749_v33 = vpop.f32.mrf.mxu1  ;;  %4159 = vmatpush.bf16.msrb.mxu2 %v9665_v34  ;;  %v15856_v57 = vld [vmem:[#allocation52_spill] sm:$0xff]  ;;  %v9257_v46 = vor.u32 %v11412_v9, %v9256_v42  ;;  %v15857_v47 = vld [vmem:[#allocation74_spill] sm:$0xff] }
 0x406   : > { %v14144_v63 = vadd.f32 %v3844_v45, %v3796_v35  ;;  %3895 = vmatmul.bf16.gmra.mxu0 %v15856_v57  ;;  %4208 = vmatpush.bf16.msrb.mxu3 %v9857_v16  ;;  %v15858_v35 = vld [vmem:[#allocation75_spill] sm:$0xff]  ;;  %v9449_v45 = vor.u32 %v11460_v32, %v9448_v5 }
 0x407   : > { %v9832_v34 = vld [vmem:[%s12634_s24 + $0x520] sm:$0xf]  ;;  %4062 = vmatpush.bf16.msrb.mxu0 %v9257_v46  ;;  %v9232_v16 = vld [vmem:[%s12634_s24 + $0x70] sm:$0xf]  ;;  %v11406_v42 = vld [vmem:[%s12634_s24 + $0x84] sm:$0xf0] }
 0x408   : > { %3944 = vmatmul.bf16.gmra.mxu1 %v15857_v47  ;;  %3993 = vmatmul.bf16.gmra.mxu2 %v15858_v35  ;;  %v9833_v18 = vor.u32 %v11556_v28, %v9832_v34  ;;  %v9424_v9 = vld [vmem:[%s12634_s24 + $0x1f0] sm:$0xf]  ;;  %v9233_v5 = vor.u32 %v11406_v42, %v9232_v16  ;;  %v11454_v32 = vld [vmem:[%s12634_s24 + $0x204] sm:$0xf0] }
 0x409   : > { %10371 = vmatmul.msk.bf16.gmra.mxu3 %vm2661_vm0, %v15850_v14  ;;  %4111 = vmatpush.bf16.msrb.mxu1 %v9449_v45  ;;  %v11502_v22 = vld [vmem:[%s12634_s24 + $0x384] sm:$0xf0]  ;;  %v9425_v34 = vor.u32 %v11454_v32, %v9424_v9  ;;  %v9400_v9 = vld [vmem:[%s12634_s24 + $0x1c0] sm:$0xf] }
 0x40a   : > { %4160 = vmatpush.bf16.msrb.mxu2 %v9641_v17  ;;  %4209 = vmatpush.bf16.msrb.mxu3 %v9833_v18  ;;  %v9617_v45 = vor.u32 %v11502_v22, %v9616_v36  ;;  %v9808_v17 = vld [vmem:[%s12634_s24 + $0x4f0] sm:$0xf]  ;;  %v11550_v28 = vld [vmem:[%s12634_s24 + $0x504] sm:$0xf0]  ;;  %v11448_v36 = vld [vmem:[%s12634_s24 + $0x1d4] sm:$0xf0] }
 0x40b   : > { %v3798_v35 = vpop.f32.mrf.mxu2  ;;  %v3702_v14 = vpop.f32.mrf.mxu0  ;;  %4063 = vmatpush.bf16.msrb.mxu0 %v9233_v5  ;;  %v9809_v16 = vor.u32 %v11550_v28, %v9808_v17  ;;  %v9401_v5 = vor.u32 %v11448_v36, %v9400_v9  ;;  %v11394_v17 = vld [vmem:[%s12634_s24 + $0x24] sm:$0xf0]  ;;  %v9376_v28 = vld [vmem:[%s12634_s24 + $0x190] sm:$0xf] }
 0x40c   : > { %v3799_v47 = vadd.f32 %v3798_v35, %v3749_v33  ;;  %v3847_v46 = vpop.f32.mrf.mxu3  ;;  %v14168_v31 = vadd.f32 %v3702_v14, %v14013_v26  ;;  %v9208_v33 = vld [vmem:[%s12634_s24 + $0x40] sm:$0xf]  ;;  %v11400_v35 = vld [vmem:[%s12634_s24 + $0x54] sm:$0xf0] }
 0x40d   : > { %v3751_v18 = vpop.f32.mrf.mxu1  ;;  %4112 = vmatpush.bf16.msrb.mxu1 %v9425_v34  ;;  %v9209_v32 = vor.u32 %v11400_v35, %v9208_v33  ;;  %v9592_v14 = vld [vmem:[%s12634_s24 + $0x340] sm:$0xf]  ;;  %v11496_v26 = vld [vmem:[%s12634_s24 + $0x354] sm:$0xf0]  ;;  %v11442_v35 = vld [vmem:[%s12634_s24 + $0x1a4] sm:$0xf0] }
 0x40e   : > { %v14170_v42 = vadd.f32 %v3847_v46, %v3799_v47  ;;  %4161 = vmatpush.bf16.msrb.mxu2 %v9617_v45  ;;  %4210 = vmatpush.bf16.msrb.mxu3 %v9809_v16  ;;  %v9593_v22 = vor.u32 %v11496_v26, %v9592_v14  ;;  %v9784_v47 = vld [vmem:[%s12634_s24 + $0x4c0] sm:$0xf]  ;;  %v11544_v46 = vld [vmem:[%s12634_s24 + $0x4d4] sm:$0xf0]  ;;  %v9184_v45 = vld [vmem:[%s12634_s24 + $0x10] sm:$0xf]  ;;  %v9377_v26 = vor.u32 %v11442_v35, %v9376_v28 }
 0x40f   : > { %4064 = vmatpush.bf16.msrb.mxu0 %v9209_v32  ;;  %v9785_v34 = vor.u32 %v11544_v46, %v9784_v47  ;;  %v9185_v33 = vor.u32 %v11394_v17, %v9184_v45  ;;  %v9760_v32 = vld [vmem:[%s12634_s24 + $0x490] sm:$0xf]  ;;  %v11538_v47 = vld [vmem:[%s12634_s24 + $0x4a4] sm:$0xf0] }
 0x410   : > { %v9761_v46 = vor.u32 %v11538_v47, %v9760_v32  ;;  %v15861_v32 = vld [vmem:[#allocation80_spill] sm:$0xff]  ;;  %v15862_v47 = vld [vmem:[#allocation81_spill] sm:$0xff] }
 0x411   : > { %4113 = vmatpush.bf16.msrb.mxu1 %v9401_v5 }
 0x412   : > { %4162 = vmatpush.bf16.msrb.mxu2 %v9593_v22  ;;  %4211 = vmatpush.bf16.msrb.mxu3 %v9785_v34 }
 0x413   : > { %v3800_v16 = vpop.f32.mrf.mxu2  ;;  %v3705_v36 = vpop.f32.mrf.mxu0  ;;  %4065 = vmatpush.bf16.msrb.mxu0 %v9185_v33 }
 0x414   : > { %v3801_v9 = vadd.f32 %v3800_v16, %v3751_v18  ;;  %v3849_v14 = vpop.f32.mrf.mxu3  ;;  %v14189_v5 = vadd.f32 %v3705_v36, %v14021_v2  ;;  %v15859_v18 = vld [vmem:[#allocation78_spill] sm:$0xff] }
 0x415   : > { %v3754_v22 = vpop.f32.mrf.mxu1  ;;  %4114 = vmatpush.bf16.msrb.mxu1 %v9377_v26  ;;  %v15860_v26 = vld [vmem:[#allocation58_spill] sm:$0xff] }
 0x416   : > { %v14191_v10 = vadd.f32 %v3849_v14, %v3801_v9  ;;  %4163 = vmatpush.bf16.msrb.mxu2 %v9569_v15  ;;  %3900 = vmatmul.bf16.gmra.mxu0 %v15822_v8 }
 0x417   : > { %4212 = vmatpush.bf16.msrb.mxu3 %v9761_v46 }
 0x418   : > { %3949 = vmatmul.bf16.gmra.mxu1 %v15823_v54  ;;  %3998 = vmatmul.bf16.gmra.mxu2 %v15859_v18  ;;  %v15866_v54 = vld [vmem:[#allocation33_spill] sm:$0xff] }
 0x419   : > { %10372 = vmatmul.msk.bf16.gmra.mxu3 %vm2661_vm0, %v13350_v38 }
 0x41b   : > { %v3803_v50 = vpop.f32.mrf.mxu2  ;;  %v3707_v2 = vpop.f32.mrf.mxu0 }
 0x41c   : > { %v3804_v1 = vadd.f32 %v3803_v50, %v3754_v22  ;;  %v3852_v34 = vpop.f32.mrf.mxu3  ;;  %v14199_v45 = vadd.f32 %v3707_v2, %v14024_v19 }
 0x41d   : > { %v3756_v17 = vpop.f32.mrf.mxu1 }
 0x41e   : > { %v14201_v28 = vadd.f32 %v3852_v34, %v3804_v1 }
 0x423   : > { %v3805_v15 = vpop.f32.mrf.mxu2  ;;  %v3710_v33 = vpop.f32.mrf.mxu0 }
 0x424   : > { %v3806_v16 = vadd.f32 %v3805_v15, %v3756_v17  ;;  %v3854_v35 = vpop.f32.mrf.mxu3  ;;  %v14204_v9 = vadd.f32 %v3710_v33, %v14032_v55 }
 0x425   : > { %v3759_v36 = vpop.f32.mrf.mxu1 }
 0x426   : > { %v14206_v14 = vadd.f32 %v3854_v35, %v3806_v16  ;;  %3905 = vmatmul.bf16.gmra.mxu0 %v15860_v26 }
 0x428   : > { %3954 = vmatmul.bf16.gmra.mxu1 %v15861_v32  ;;  %4003 = vmatmul.bf16.gmra.mxu2 %v15862_v47  ;;  %v15863_v32 = vld [vmem:[#allocation29_spill] sm:$0xff] }
 0x429   : > { %10373 = vmatmul.msk.bf16.gmra.mxu3 %vm2661_vm0, %v13385_v48 }
 0x42b   : > { %v3808_v19 = vpop.f32.mrf.mxu2  ;;  %v3712_v46 = vpop.f32.mrf.mxu0 }
 0x42c   : > { %v3809_v22 = vadd.f32 %v3808_v19, %v3759_v36  ;;  %v3857_v50 = vpop.f32.mrf.mxu3  ;;  %v14214_v1 = vadd.f32 %v3712_v46, %v14037_v29  ;;  %v15864_v36 = vld [vmem:[#allocation30_spill] sm:$0xff]  ;;  %v15865_v19 = vld [vmem:[#allocation31_spill] sm:$0xff] }
 0x42d   : > { %v3761_v55 = vpop.f32.mrf.mxu1 }
 0x42e   : > { %v14216_v2 = vadd.f32 %v3857_v50, %v3809_v22 }
 0x433   : > { %v3810_v34 = vpop.f32.mrf.mxu2  ;;  %v3871_v16 = vpop.f32.mrf.mxu0 }
 0x434   : > { %v3811_v17 = vadd.f32 %v3810_v34, %v3761_v55  ;;  %v3859_v15 = vpop.f32.mrf.mxu3  ;;  %v3872_v33 = vadd.f32 %v3871_v16, %v14047_v12 }
 0x435   : > { %v3920_v35 = vpop.f32.mrf.mxu1 }
 0x436   : > { %v14219_v47 = vadd.f32 %v3859_v15, %v3811_v17  ;;  %v3921_v48 = vadd.f32 %v3920_v35, %v3872_v33  ;;  %4066 = vmatmul.bf16.vlgmr.msrb.gmra.mxu0 %v15863_v32 }
 0x438   : > { %4115 = vmatmul.bf16.vlgmr.msrb.gmra.mxu1 %v15864_v36  ;;  %4164 = vmatmul.bf16.vlgmr.msrb.gmra.mxu2 %v15865_v19 }
 0x439   : > { %4213 = vmatmul.bf16.vlgmr.msrb.gmra.mxu3 %v12762_v44 }
 0x43b   : > { %v3969_v29 = vpop.f32.mrf.mxu2  ;;  %v3873_v46 = vpop.f32.mrf.mxu0 }
 0x43c   : > { %v3970_v22 = vadd.f32 %v3969_v29, %v3921_v48  ;;  %v4018_v50 = vpop.f32.mrf.mxu3  ;;  %v3874_v55 = vadd.f32 %v3873_v46, %v14052_v52  ;;  %v15867_v29 = vld [vmem:[#allocation34_spill] sm:$0xff]  ;;  %v15868_v52 = vld [vmem:[#allocation35_spill] sm:$0xff] }
 0x43d   : > { %v3922_v34 = vpop.f32.mrf.mxu1 }
 0x43e   : > { %v4019_v12 = vadd.f32 %v4018_v50, %v3970_v22  ;;  %v3923_v16 = vadd.f32 %v3922_v34, %v3874_v55 }
 0x440   : > { %v4745_v17 = vpack.c.bf16 %v4019_v12, %v14035_v43 }
 0x442   : > { %v4848_v43 = vunpack.c.l.b16 %v4745_v17  ;;  %v4849_v22 = vunpack.c.h.b16 %v4745_v17 }
 0x443   : > { %v3971_v15 = vpop.f32.mrf.mxu2  ;;  %v3876_v35 = vpop.f32.mrf.mxu0 }
 0x444   : > { %v3972_v33 = vadd.f32 %v3971_v15, %v3923_v16  ;;  %v4020_v38 = vpop.f32.mrf.mxu3  ;;  %v3877_v36 = vadd.f32 %v3876_v35, %v14062_v11 }
 0x445   : > { %v3925_v19 = vpop.f32.mrf.mxu1 }
 0x446   : > { %v4021_v18 = vadd.f32 %v4020_v38, %v3972_v33  ;;  %v3926_v44 = vadd.f32 %v3925_v19, %v3877_v36  ;;  %4071 = vmatmul.bf16.gmra.mxu0 %v15866_v54 }
 0x448   : > { %v4748_v48 = vpack.c.bf16 %v4021_v18, %v14045_v30  ;;  %4120 = vmatmul.bf16.gmra.mxu1 %v15867_v29  ;;  %4169 = vmatmul.bf16.gmra.mxu2 %v15868_v52 }
 0x449   : > { %4218 = vmatmul.bf16.gmra.mxu3 %v12798_v56 }
 0x44a   : > { %v4850_v46 = vunpack.c.l.b16 %v4748_v48  ;;  %v4851_v50 = vunpack.c.h.b16 %v4748_v48 }
 0x44b   : > { %v3974_v55 = vpop.f32.mrf.mxu2  ;;  %v3878_v11 = vpop.f32.mrf.mxu0 }
 0x44c   : > { %v3975_v34 = vadd.f32 %v3974_v55, %v3926_v44  ;;  %v4023_v12 = vpop.f32.mrf.mxu3  ;;  %v14233_v38 = vpack.c.b16 %v4850_v46, %v4848_v43  ;;  %v14235_v36 = vpack.c.b16 %v4851_v50, %v4849_v22  ;;  %v3879_v30 = vadd.f32 %v3878_v11, %v14067_v20  ;;  %v15869_v43 = vld [vmem:[#allocation37_spill] sm:$0xff]  ;;  %v15870_v46 = vld [vmem:[#allocation38_spill] sm:$0xff]  ;;  %v15871_v20 = vld [vmem:[#allocation39_spill] sm:$0xff] }
 0x44d   : > { %v3927_v18 = vpop.f32.mrf.mxu1 }
 0x44e   : > { %v4024_v19 = vadd.f32 %v4023_v12, %v3975_v34  ;;  %v3928_v16 = vadd.f32 %v3927_v18, %v3879_v30 }
 0x450   : > { %v4751_v15 = vpack.c.bf16 %v4024_v19, %v14050_v58 }
 0x452   : > { %v4852_v58 = vunpack.c.l.b16 %v4751_v15  ;;  %v4853_v50 = vunpack.c.h.b16 %v4751_v15 }
 0x453   : > { %v3976_v33 = vpop.f32.mrf.mxu2  ;;  %v3881_v17 = vpop.f32.mrf.mxu0 }
 0x454   : > { %v3977_v35 = vadd.f32 %v3976_v33, %v3928_v16  ;;  %v4025_v56 = vpop.f32.mrf.mxu3  ;;  %v3882_v48 = vadd.f32 %v3881_v17, %v14077_v51 }
 0x455   : > { %v3930_v44 = vpop.f32.mrf.mxu1 }
 0x456   : > { %v4026_v55 = vadd.f32 %v4025_v56, %v3977_v35  ;;  %v3931_v52 = vadd.f32 %v3930_v44, %v3882_v48  ;;  %4076 = vmatmul.bf16.gmra.mxu0 %v15869_v43 }
 0x458   : > { %v4754_v22 = vpack.c.bf16 %v4026_v55, %v14060_v61  ;;  %4125 = vmatmul.bf16.gmra.mxu1 %v15870_v46  ;;  %4174 = vmatmul.bf16.gmra.mxu2 %v15871_v20 }
 0x459   : > { %4223 = vmatmul.bf16.gmra.mxu3 %v12834_v4 }
 0x45a   : > { %v4854_v34 = vunpack.c.l.b16 %v4754_v22  ;;  %v4855_v11 = vunpack.c.h.b16 %v4754_v22 }
 0x45b   : > { %v3979_v12 = vpop.f32.mrf.mxu2  ;;  %v3883_v51 = vpop.f32.mrf.mxu0 }
 0x45c   : > { %v3980_v30 = vadd.f32 %v3979_v12, %v3931_v52  ;;  %v4028_v18 = vpop.f32.mrf.mxu3  ;;  %v14245_v56 = vpack.c.b16 %v4854_v34, %v4852_v58  ;;  %v14247_v19 = vpack.c.b16 %v4855_v11, %v4853_v50  ;;  %v3884_v61 = vadd.f32 %v3883_v51, %v14082_v24  ;;  %v15872_v58 = vld [vmem:[#allocation41_spill] sm:$0xff]  ;;  %v15873_v34 = vld [vmem:[#allocation42_spill] sm:$0xff]  ;;  %v15874_v24 = vld [vmem:[#allocation43_spill] sm:$0xff] }
 0x45d   : > { %v3932_v16 = vpop.f32.mrf.mxu1 }
 0x45e   : > { %v4029_v33 = vadd.f32 %v4028_v18, %v3980_v30  ;;  %v3933_v35 = vadd.f32 %v3932_v16, %v3884_v61 }
 0x460   : > { %v4757_v17 = vpack.c.bf16 %v4029_v33, %v14065_v6 }
 0x462   : > { %v4856_v6 = vunpack.c.l.b16 %v4757_v17  ;;  %v4857_v11 = vunpack.c.h.b16 %v4757_v17 }
 0x463   : > { %v3981_v48 = vpop.f32.mrf.mxu2  ;;  %v3886_v15 = vpop.f32.mrf.mxu0 }
 0x464   : > { %v3982_v44 = vadd.f32 %v3981_v48, %v3933_v35  ;;  %v4030_v55 = vpop.f32.mrf.mxu3  ;;  %v3887_v22 = vadd.f32 %v3886_v15, %v14092_v49 }
 0x465   : > { %v3935_v52 = vpop.f32.mrf.mxu1 }
 0x466   : > { %v4031_v12 = vadd.f32 %v4030_v55, %v3982_v44  ;;  %v3936_v4 = vadd.f32 %v3935_v52, %v3887_v22  ;;  %4081 = vmatmul.bf16.gmra.mxu0 %v15872_v58 }
 0x468   : > { %v4760_v50 = vpack.c.bf16 %v4031_v12, %v14075_v0  ;;  %4130 = vmatmul.bf16.gmra.mxu1 %v15873_v34  ;;  %4179 = vmatmul.bf16.gmra.mxu2 %v15874_v24 }
 0x469   : > { %4228 = vmatmul.bf16.gmra.mxu3 %v15800_v41 }
 0x46a   : > { %v4858_v30 = vunpack.c.l.b16 %v4760_v50  ;;  %v4859_v51 = vunpack.c.h.b16 %v4760_v50 }
 0x46b   : > { %v3984_v18 = vpop.f32.mrf.mxu2  ;;  %v3888_v49 = vpop.f32.mrf.mxu0 }
 0x46c   : > { %v3985_v61 = vadd.f32 %v3984_v18, %v3936_v4  ;;  %v4033_v16 = vpop.f32.mrf.mxu3  ;;  %v14257_v33 = vpack.c.b16 %v4858_v30, %v4856_v6  ;;  %v14259_v0 = vpack.c.b16 %v4859_v51, %v4857_v11  ;;  %v3889_v48 = vadd.f32 %v3888_v49, %v14097_v39  ;;  %v10120_v11 = vld [vmem:[%s12634_s24 + $0x760] sm:$0xf]  ;;  %v11628_v39 = vld [vmem:[%s12634_s24 + $0x774] sm:$0xf0]  ;;  %v10336_v49 = vld [vmem:[%s12634_s24 + $0x910] sm:$0xf] }
 0x46d   : > { %v3937_v35 = vpop.f32.mrf.mxu1  ;;  %v10312_v30 = vld [vmem:[%s12634_s24 + $0x8e0] sm:$0xf] }
 0x46e   : > { %v4034_v44 = vadd.f32 %v4033_v16, %v3985_v61  ;;  %v3938_v15 = vadd.f32 %v3937_v35, %v3889_v48  ;;  %v15875_v18 = vld [vmem:[#allocation45_spill] sm:$0xff]  ;;  %v15876_v48 = vld [vmem:[#allocation46_spill] sm:$0xff] }
 0x46f   : > { %v11676_v61 = vld [vmem:[%s12634_s24 + $0x8f4] sm:$0xf0]  ;;  %v11682_v16 = vld [vmem:[%s12634_s24 + $0x924] sm:$0xf0] }
 0x470   : > { %v4763_v17 = vpack.c.bf16 %v4034_v44, %v14080_v53  ;;  %v10121_v53 = vor.u32 %v11628_v39, %v10120_v11  ;;  %v10313_v44 = vor.u32 %v11676_v61, %v10312_v30  ;;  %v10096_v30 = vld [vmem:[%s12634_s24 + $0x730] sm:$0xf]  ;;  %v11622_v61 = vld [vmem:[%s12634_s24 + $0x744] sm:$0xf0] }
 0x472   : > { %4254 = vmatpush.bf16.msra.mxu0 %v10121_v53  ;;  %4303 = vmatpush.bf16.msra.mxu1 %v10313_v44  ;;  %v9330_v44 = vld [vmem:[%s12634_s24 + $0x148] sm:$0xf0] }
 0x473   : > { %v3986_v4 = vpop.f32.mrf.mxu2  ;;  %v3891_v22 = vpop.f32.mrf.mxu0 }
 0x474   : > { %v3987_v55 = vadd.f32 %v3986_v4, %v3938_v15  ;;  %v4035_v52 = vpop.f32.mrf.mxu3  ;;  %v3892_v12 = vadd.f32 %v3891_v22, %v14123_v3  ;;  %v15877_v3 = vld [vmem:[#allocation47_spill] sm:$0xff]  ;;  %v10337_v15 = vor.u32 %v11682_v16, %v10336_v49  ;;  %v11433_v4 = vld [vmem:[%s12634_s24 + $0x164] sm:$0xf] }
 0x475   : > { %v3940_v50 = vpop.f32.mrf.mxu1  ;;  %v11577_v22 = vld [vmem:[%s12634_s24 + $0x5e4] sm:$0xf]  ;;  %v10288_v49 = vld [vmem:[%s12634_s24 + $0x8b0] sm:$0xf] }
 0x476   : > { %v4036_v6 = vadd.f32 %v4035_v52, %v3987_v55  ;;  %v3941_v51 = vadd.f32 %v3940_v50, %v3892_v12  ;;  %4086 = vmatmul.bf16.gmra.mxu0 %v15875_v18  ;;  %v9354_v55 = vld [vmem:[%s12634_s24 + $0x178] sm:$0xf0]  ;;  %v4860_v52 = vunpack.c.l.b16 %v4763_v17  ;;  %4359 = vmatpush.bf16.msra.mxu2 %v10337_v15  ;;  %v11571_v15 = vld [vmem:[%s12634_s24 + $0x5b4] sm:$0xf] }
 0x477   : > { %v9357_v12 = vor.u32 %v11433_v4, %v9354_v55  ;;  %v9930_v50 = vld [vmem:[%s12634_s24 + $0x5f8] sm:$0xf0] }
 0x478   : > { %v4766_v35 = vpack.c.bf16 %v4036_v6, %v14090_v27  ;;  %4135 = vmatmul.bf16.gmra.mxu1 %v15876_v48  ;;  %4184 = vmatmul.bf16.gmra.mxu2 %v15877_v3  ;;  %v4861_v27 = vunpack.c.h.b16 %v4763_v17  ;;  %v9933_v39 = vor.u32 %v11577_v22, %v9930_v50  ;;  %v10097_v3 = vor.u32 %v11622_v61, %v10096_v30  ;;  %v9906_v61 = vld [vmem:[%s12634_s24 + $0x5c8] sm:$0xf0] }
 0x479   : > { %4233 = vmatmul.bf16.gmra.mxu3 %v15853_v59  ;;  %v11670_v59 = vld [vmem:[%s12634_s24 + $0x8c4] sm:$0xf0] }
 0x47a   : > { %v4862_v6 = vunpack.c.l.b16 %v4766_v35  ;;  %v4863_v11 = vunpack.c.h.b16 %v4766_v35  ;;  %4401 = vmatpush.bf16.msra.mxu3 %v9357_v12  ;;  %4548 = vmatpush.bf16.msrb.mxu2 %v9933_v39  ;;  %v10289_v17 = vor.u32 %v11670_v59, %v10288_v49  ;;  %v11427_v35 = vld [vmem:[%s12634_s24 + $0x134] sm:$0xf]  ;;  %v9909_v59 = vor.u32 %v11571_v15, %v9906_v61  ;;  %v10072_v49 = vld [vmem:[%s12634_s24 + $0x700] sm:$0xf]  ;;  %v10048_v15 = vld [vmem:[%s12634_s24 + $0x6d0] sm:$0xf] }
 0x47b   : > { %v3989_v16 = vpop.f32.mrf.mxu2  ;;  %v3893_v4 = vpop.f32.mrf.mxu0  ;;  %4255 = vmatpush.bf16.msra.mxu0 %v10097_v3  ;;  %v11658_v61 = vld [vmem:[%s12634_s24 + $0x864] sm:$0xf0] }
 0x47c   : > { %v3990_v53 = vadd.f32 %v3989_v16, %v3941_v51  ;;  %v4038_v55 = vpop.f32.mrf.mxu3  ;;  %v14286_v22 = vpack.c.b16 %v4862_v6, %v4860_v52  ;;  %v14288_v50 = vpack.c.b16 %v4863_v11, %v4861_v27  ;;  %v3894_v12 = vadd.f32 %v3893_v4, %v14144_v63  ;;  %4304 = vmatpush.bf16.msra.mxu1 %v10289_v17  ;;  %v11616_v16 = vld [vmem:[%s12634_s24 + $0x714] sm:$0xf0]  ;;  %v10264_v52 = vld [vmem:[%s12634_s24 + $0x880] sm:$0xf]  ;;  %v9306_v4 = vld [vmem:[%s12634_s24 + $0x118] sm:$0xf0] }
 0x47d   : > { %v3942_v30 = vpop.f32.mrf.mxu1  ;;  %v9333_v51 = vor.u32 %v11427_v35, %v9330_v44  ;;  %v10073_v63 = vor.u32 %v11616_v16, %v10072_v49  ;;  %v11664_v27 = vld [vmem:[%s12634_s24 + $0x894] sm:$0xf0]  ;;  %v9882_v35 = vld [vmem:[%s12634_s24 + $0x598] sm:$0xf0] }
 0x47e   : > { %v4039_v39 = vadd.f32 %v4038_v55, %v3990_v53  ;;  %v3943_v6 = vadd.f32 %v3942_v30, %v3894_v12  ;;  %4549 = vmatpush.bf16.msrb.mxu2 %v9909_v59  ;;  %v10265_v11 = vor.u32 %v11664_v27, %v10264_v52  ;;  %v11421_v53 = vld [vmem:[%s12634_s24 + $0x104] sm:$0xf]  ;;  %v11610_v12 = vld [vmem:[%s12634_s24 + $0x6e4] sm:$0xf0]  ;;  %v10240_v30 = vld [vmem:[%s12634_s24 + $0x850] sm:$0xf] }
 0x47f   : > { %4402 = vmatpush.bf16.msra.mxu3 %v9333_v51  ;;  %v11565_v55 = vld [vmem:[%s12634_s24 + $0x584] sm:$0xf]  ;;  %4256 = vmatpush.bf16.msra.mxu0 %v10073_v63  ;;  %v9309_v17 = vor.u32 %v11421_v53, %v9306_v4  ;;  %v10241_v16 = vor.u32 %v11658_v61, %v10240_v30  ;;  %v11415_v52 = vld [vmem:[%s12634_s24 + $0xd4] sm:$0xf]  ;;  %v9282_v63 = vld [vmem:[%s12634_s24 + $0xe8] sm:$0xf0] }
 0x480   : > { %v14297_v3 = vpack.c.bf16 %v4039_v39, %v14095_v7  ;;  %4305 = vmatpush.bf16.msra.mxu1 %v10265_v11  ;;  %v9885_v44 = vor.u32 %v11565_v55, %v9882_v35  ;;  %v10049_v7 = vor.u32 %v11610_v12, %v10048_v15  ;;  %v11559_v27 = vld [vmem:[%s12634_s24 + $0x554] sm:$0xf]  ;;  %v9285_v4 = vor.u32 %v11415_v52, %v9282_v63  ;;  %v9858_v55 = vld [vmem:[%s12634_s24 + $0x568] sm:$0xf0]  ;;  %v10024_v35 = vld [vmem:[%s12634_s24 + $0x6a0] sm:$0xf] }
 0x481   : > { %v11604_v15 = vld [vmem:[%s12634_s24 + $0x6b4] sm:$0xf0]  ;;  %v11553_v52 = vld [vmem:[%s12634_s24 + $0x524] sm:$0xf] }
 0x482   : > { %4550 = vmatpush.bf16.msrb.mxu2 %v9885_v44  ;;  %v10216_v44 = vld [vmem:[%s12634_s24 + $0x820] sm:$0xf]  ;;  %v5133_v63 = vunpack.c.l.b16 %v14297_v3 }
 0x483   : > { %v3991_v51 = vpop.f32.mrf.mxu2  ;;  %4403 = vmatpush.bf16.msra.mxu3 %v9309_v17  ;;  %v3896_v59 = vpop.f32.mrf.mxu0  ;;  %4257 = vmatpush.bf16.msra.mxu0 %v10049_v7  ;;  %v15878_v30 = vld [vmem:[#allocation49_spill] sm:$0xff]  ;;  %v15879_v61 = vld [vmem:[#allocation50_spill] sm:$0xff] }
 0x484   : > { %v3992_v39 = vadd.f32 %v3991_v51, %v3943_v6  ;;  %v4040_v49 = vpop.f32.mrf.mxu3  ;;  %v3897_v11 = vadd.f32 %v3896_v59, %v14170_v42  ;;  %4306 = vmatpush.bf16.msra.mxu1 %v10241_v16  ;;  %v9861_v6 = vor.u32 %v11559_v27, %v9858_v55  ;;  %v10025_v51 = vor.u32 %v11604_v15, %v10024_v35  ;;  %v11652_v42 = vld [vmem:[%s12634_s24 + $0x834] sm:$0xf0]  ;;  %v9258_v16 = vld [vmem:[%s12634_s24 + $0xb8] sm:$0xf0]  ;;  %v11598_v35 = vld [vmem:[%s12634_s24 + $0x684] sm:$0xf0] }
 0x485   : > { %v3945_v53 = vpop.f32.mrf.mxu1  ;;  %v15880_v59 = vld [vmem:[#allocation51_spill] sm:$0xff] }
 0x486   : > { %v4041_v17 = vadd.f32 %v4040_v49, %v3992_v39  ;;  %v3946_v12 = vadd.f32 %v3945_v53, %v3897_v11  ;;  %4091 = vmatmul.bf16.gmra.mxu0 %v15878_v30  ;;  %v10217_v39 = vor.u32 %v11652_v42, %v10216_v44  ;;  %v11409_v49 = vld [vmem:[%s12634_s24 + $0xa4] sm:$0xf]  ;;  %4551 = vmatpush.bf16.msrb.mxu2 %v9861_v6  ;;  %v9834_v11 = vld [vmem:[%s12634_s24 + $0x538] sm:$0xf0]  ;;  %v10192_v15 = vld [vmem:[%s12634_s24 + $0x7f0] sm:$0xf] }
 0x487   : > { %4404 = vmatpush.bf16.msra.mxu3 %v9285_v4  ;;  %v9261_v27 = vor.u32 %v11409_v49, %v9258_v16  ;;  %4258 = vmatpush.bf16.msra.mxu0 %v10025_v51  ;;  %v9837_v55 = vor.u32 %v11553_v52, %v9834_v11  ;;  %v11646_v6 = vld [vmem:[%s12634_s24 + $0x804] sm:$0xf0]  ;;  %v9234_v51 = vld [vmem:[%s12634_s24 + $0x88] sm:$0xf0] }
 0x488   : > { %v4772_v7 = vpack.c.bf16 %v4041_v17, %v14121_v40  ;;  %4140 = vmatmul.bf16.gmra.mxu1 %v15879_v61  ;;  %4189 = vmatmul.bf16.gmra.mxu2 %v15880_v59  ;;  %v5134_v40 = vunpack.c.h.b16 %v14297_v3  ;;  %v10000_v17 = vld [vmem:[%s12634_s24 + $0x670] sm:$0xf]  ;;  %v10193_v3 = vor.u32 %v11646_v6, %v10192_v15  ;;  %v11547_v59 = vld [vmem:[%s12634_s24 + $0x4f4] sm:$0xf] }
 0x489   : > { %4238 = vmatmul.bf16.gmra.mxu3 %v15856_v57  ;;  %4307 = vmatpush.bf16.msra.mxu1 %v10217_v39  ;;  %v10001_v42 = vor.u32 %v11598_v35, %v10000_v17  ;;  %v9810_v17 = vld [vmem:[%s12634_s24 + $0x508] sm:$0xf0] }
 0x48a   : > { %v5135_v53 = vunpack.c.l.b16 %v4772_v7  ;;  %v5136_v4 = vunpack.c.h.b16 %v4772_v7  ;;  %v11403_v7 = vld [vmem:[%s12634_s24 + $0x74] sm:$0xf]  ;;  %4552 = vmatpush.bf16.msrb.mxu2 %v9837_v55  ;;  %v9813_v15 = vor.u32 %v11547_v59, %v9810_v17  ;;  %v9786_v59 = vld [vmem:[%s12634_s24 + $0x4d8] sm:$0xf0] }
 0x48b   : > { %v3994_v44 = vpop.f32.mrf.mxu2  ;;  %4405 = vmatpush.bf16.msra.mxu3 %v9261_v27  ;;  %v3898_v16 = vpop.f32.mrf.mxu0  ;;  %4259 = vmatpush.bf16.msra.mxu0 %v10001_v42  ;;  %v11541_v42 = vld [vmem:[%s12634_s24 + $0x4c4] sm:$0xf] }
 0x48c   : > { %v3995_v49 = vadd.f32 %v3994_v44, %v3946_v12  ;;  %v4043_v57 = vpop.f32.mrf.mxu3  ;;  %v14334_v39 = vpack.c.b16 %v5135_v53, %v5133_v63  ;;  %v14336_v52 = vpack.c.b16 %v5136_v4, %v5134_v40  ;;  %v3899_v27 = vadd.f32 %v3898_v16, %v14191_v10  ;;  %v9976_v44 = vld [vmem:[%s12634_s24 + $0x640] sm:$0xf]  ;;  %v11592_v63 = vld [vmem:[%s12634_s24 + $0x654] sm:$0xf0]  ;;  %v11397_v16 = vld [vmem:[%s12634_s24 + $0x44] sm:$0xf] }
 0x48d   : > { %v3947_v11 = vpop.f32.mrf.mxu1  ;;  %v9237_v12 = vor.u32 %v11403_v7, %v9234_v51  ;;  %4308 = vmatpush.bf16.msra.mxu1 %v10193_v3  ;;  %v10168_v53 = vld [vmem:[%s12634_s24 + $0x7c0] sm:$0xf]  ;;  %v9977_v10 = vor.u32 %v11592_v63, %v9976_v44  ;;  %v11640_v4 = vld [vmem:[%s12634_s24 + $0x7d4] sm:$0xf0]  ;;  %v9789_v3 = vor.u32 %v11541_v42, %v9786_v59  ;;  %v9952_v7 = vld [vmem:[%s12634_s24 + $0x610] sm:$0xf] }
 0x48e   : > { %15881 = vst [vmem:[#allocation89_spill] sm:$0xff] %v14336_v52  ;;  %v4044_v35 = vadd.f32 %v4043_v57, %v3995_v49  ;;  %v3948_v40 = vadd.f32 %v3947_v11, %v3899_v27  ;;  %v10169_v6 = vor.u32 %v11640_v4, %v10168_v53  ;;  %v9210_v57 = vld [vmem:[%s12634_s24 + $0x58] sm:$0xf0]  ;;  %4553 = vmatpush.bf16.msrb.mxu2 %v9813_v15  ;;  %v11586_v51 = vld [vmem:[%s12634_s24 + $0x624] sm:$0xf0] }
 0x48f   : > { %4406 = vmatpush.bf16.msra.mxu3 %v9237_v12  ;;  %v9213_v49 = vor.u32 %v11397_v16, %v9210_v57  ;;  %4260 = vmatpush.bf16.msra.mxu0 %v9977_v10  ;;  %v10144_v27 = vld [vmem:[%s12634_s24 + $0x790] sm:$0xf]  ;;  %v11634_v12 = vld [vmem:[%s12634_s24 + $0x7a4] sm:$0xf0]  ;;  %v11391_v63 = vld [vmem:[%s12634_s24 + $0x14] sm:$0xf] }
 0x490   : > { %v4775_v55 = vpack.c.bf16 %v4044_v35, %v14142_v25  ;;  %v9953_v25 = vor.u32 %v11586_v51, %v9952_v7  ;;  %v10145_v15 = vor.u32 %v11634_v12, %v10144_v27  ;;  %v9186_v53 = vld [vmem:[%s12634_s24 + $0x28] sm:$0xf0]  ;;  %v11535_v4 = vld [vmem:[%s12634_s24 + $0x494] sm:$0xf] }
 0x491   : > { %4309 = vmatpush.bf16.msra.mxu1 %v10169_v6  ;;  %v9189_v6 = vor.u32 %v11391_v63, %v9186_v53  ;;  %v9762_v57 = vld [vmem:[%s12634_s24 + $0x4a8] sm:$0xf0] }
 0x492   : > { %4554 = vmatpush.bf16.msrb.mxu2 %v9789_v3  ;;  %v9765_v59 = vor.u32 %v11535_v4, %v9762_v57  ;;  %v5138_v3 = vunpack.c.h.b16 %v4775_v55 }
 0x493   : > { %v3996_v11 = vpop.f32.mrf.mxu2  ;;  %4407 = vmatpush.bf16.msra.mxu3 %v9213_v49  ;;  %v3901_v35 = vpop.f32.mrf.mxu0  ;;  %4261 = vmatpush.bf16.msra.mxu0 %v9953_v25 }
 0x494   : > { %v3997_v17 = vadd.f32 %v3996_v11, %v3948_v40  ;;  %v4045_v44 = vpop.f32.mrf.mxu3  ;;  %v3902_v10 = vadd.f32 %v3901_v35, %v14201_v28  ;;  %v5137_v28 = vunpack.c.l.b16 %v4775_v55 }
 0x495   : > { %v3950_v16 = vpop.f32.mrf.mxu1  ;;  %4310 = vmatpush.bf16.msra.mxu1 %v10145_v15 }
 0x496   : > { %v4046_v42 = vadd.f32 %v4045_v44, %v3997_v17  ;;  %v3951_v49 = vadd.f32 %v3950_v16, %v3902_v10  ;;  %4096 = vmatmul.bf16.gmra.mxu0 %v13017_v23  ;;  %4555 = vmatpush.bf16.msrb.mxu2 %v9765_v59 }
 0x497   : > { %4408 = vmatpush.bf16.msra.mxu3 %v9189_v6 }
 0x498   : > { %v4778_v40 = vpack.c.bf16 %v4046_v42, %v14168_v31  ;;  %4145 = vmatmul.bf16.gmra.mxu1 %v15765_v37  ;;  %4194 = vmatmul.bf16.gmra.mxu2 %v15821_v21 }
 0x499   : > { %4243 = vmatmul.bf16.gmra.mxu3 %v15822_v8 }
 0x49a   : > { %v5139_v7 = vunpack.c.l.b16 %v4778_v40  ;;  %v5140_v51 = vunpack.c.h.b16 %v4778_v40 }
 0x49b   : > { %v3999_v27 = vpop.f32.mrf.mxu2  ;;  %v3903_v25 = vpop.f32.mrf.mxu0 }
 0x49c   : > { %v4000_v11 = vadd.f32 %v3999_v27, %v3951_v49  ;;  %v4048_v12 = vpop.f32.mrf.mxu3  ;;  %v14363_v17 = vpack.c.b16 %v5139_v7, %v5137_v28  ;;  %v14365_v35 = vpack.c.b16 %v5140_v51, %v5138_v3  ;;  %v3904_v31 = vadd.f32 %v3903_v25, %v14206_v14 }
 0x49d   : > { %v3952_v44 = vpop.f32.mrf.mxu1 }
 0x49e   : > { %15882 = vst [vmem:[#allocation57_spill] sm:$0xff] %v14365_v35  ;;  %v4049_v15 = vadd.f32 %v4048_v12, %v4000_v11  ;;  %v3953_v63 = vadd.f32 %v3952_v44, %v3904_v31  ;;  %v9978_v35 = vld [vmem:[%s12634_s24 + $0x658] sm:$0xf0] }
 0x4a0   : > { %v4781_v53 = vpack.c.bf16 %v4049_v15, %v14189_v5 }
 0x4a2   : > { %v5141_v5 = vunpack.c.l.b16 %v4781_v53  ;;  %v5142_v14 = vunpack.c.h.b16 %v4781_v53 }
 0x4a3   : > { %v4001_v4 = vpop.f32.mrf.mxu2  ;;  %v3906_v55 = vpop.f32.mrf.mxu0 }
 0x4a4   : > { %v4002_v10 = vadd.f32 %v4001_v4, %v3953_v63  ;;  %v4050_v16 = vpop.f32.mrf.mxu3  ;;  %v3907_v6 = vadd.f32 %v3906_v55, %v14216_v2 }
 0x4a5   : > { %v3955_v57 = vpop.f32.mrf.mxu1 }
 0x4a6   : > { %v4051_v42 = vadd.f32 %v4050_v16, %v4002_v10  ;;  %v3956_v59 = vadd.f32 %v3955_v57, %v3907_v6  ;;  %4101 = vmatmul.bf16.gmra.mxu0 %v13058_v60  ;;  %v15884_v6 = vld [vmem:[#allocation59_spill] sm:$0xff] }
 0x4a8   : > { %v4784_v49 = vpack.c.bf16 %v4051_v42, %v14199_v45  ;;  %4150 = vmatmul.bf16.gmra.mxu1 %v15770_v62  ;;  %4199 = vmatmul.bf16.gmra.mxu2 %v15828_v13  ;;  %v15885_v42 = vld [vmem:[#allocation60_spill] sm:$0xff] }
 0x4a9   : > { %4248 = vmatmul.bf16.gmra.mxu3 %v15860_v26 }
 0x4aa   : > { %v5143_v40 = vunpack.c.l.b16 %v4784_v49  ;;  %v5144_v28 = vunpack.c.h.b16 %v4784_v49 }
 0x4ab   : > { %v4004_v3 = vpop.f32.mrf.mxu2  ;;  %v3908_v2 = vpop.f32.mrf.mxu0 }
 0x4ac   : > { %v4005_v7 = vadd.f32 %v4004_v3, %v3956_v59  ;;  %v4053_v51 = vpop.f32.mrf.mxu3  ;;  %v14375_v27 = vpack.c.b16 %v5143_v40, %v5141_v5  ;;  %v14377_v11 = vpack.c.b16 %v5144_v28, %v5142_v14  ;;  %v3909_v45 = vadd.f32 %v3908_v2, %v14219_v47  ;;  %v15886_v59 = vld [vmem:[#allocation61_spill] sm:$0xff] }
 0x4ad   : > { %v3957_v25 = vpop.f32.mrf.mxu1 }
 0x4ae   : > { %15883 = vst [vmem:[#allocation56_spill] sm:$0xff] %v14377_v11  ;;  %v4054_v12 = vadd.f32 %v4053_v51, %v4005_v7  ;;  %v3958_v31 = vadd.f32 %v3957_v25, %v3909_v45  ;;  %v11637_v11 = vld [vmem:[%s12634_s24 + $0x7c4] sm:$0xf] }
 0x4b0   : > { %v4787_v44 = vpack.c.bf16 %v4054_v12, %v14204_v9 }
 0x4b2   : > { %v5145_v9 = vunpack.c.l.b16 %v4787_v44  ;;  %v5146_v47 = vunpack.c.h.b16 %v4787_v44 }
 0x4b3   : > { %v4006_v15 = vpop.f32.mrf.mxu2  ;;  %v4067_v4 = vpop.f32.mrf.mxu0 }
 0x4b4   : > { %v4007_v63 = vadd.f32 %v4006_v15, %v3958_v31  ;;  %v4055_v53 = vpop.f32.mrf.mxu3 }
 0x4b5   : > { %v4116_v10 = vpop.f32.mrf.mxu1 }
 0x4b6   : > { %v4056_v55 = vadd.f32 %v4055_v53, %v4007_v63  ;;  %v4117_v16 = vadd.f32 %v4116_v10, %v4067_v4  ;;  %4262 = vmatmul.bf16.vlgmr.msra.gmra.mxu0 %v15884_v6  ;;  %v15888_v63 = vld [vmem:[#allocation62_spill] sm:$0xff]  ;;  %v15889_v53 = vld [vmem:[#allocation63_spill] sm:$0xff]  ;;  %v15891_v4 = vld [vmem:[#allocation44_spill] sm:$0xff] }
 0x4b8   : > { %v4790_v57 = vpack.c.bf16 %v4056_v55, %v14214_v1  ;;  %4311 = vmatmul.bf16.vlgmr.msra.gmra.mxu1 %v15885_v42  ;;  %10374 = vmatmul.msk.bf16.vlgmr.msra.gmra.mxu2 %vm2661_vm0, %v15886_v59 }
 0x4b9   : > { %4969 = vmatpush.bf16.msra.mxu2 %v14286_v22  ;;  %4409 = vmatmul.bf16.vlgmr.msra.gmra.mxu3 %v15863_v32 }
 0x4ba   : > { %v5147_v49 = vunpack.c.l.b16 %v4790_v57  ;;  %v5148_v5 = vunpack.c.h.b16 %v4790_v57 }
 0x4bb   : > { %v4165_v14 = vpop.f32.mrf.mxu2  ;;  %v4069_v28 = vpop.f32.mrf.mxu0 }
 0x4bc   : > { %v4166_v40 = vadd.f32 %v4165_v14, %v4117_v16  ;;  %v4214_v3 = vpop.f32.mrf.mxu3  ;;  %v14388_v7 = vpack.c.b16 %v5147_v49, %v5145_v9  ;;  %v14390_v1 = vpack.c.b16 %v5148_v5, %v5146_v47  ;;  %v15893_v49 = vld [vmem:[#allocation93_spill] sm:$0xff] }
 0x4bd   : > { %4970 = vmatpush.bf16.msra.mxu2 %v14257_v33  ;;  %v4118_v2 = vpop.f32.mrf.mxu1  ;;  %v15890_v33 = vld [vmem:[#allocation64_spill] sm:$0xff] }
 0x4be   : > { %15887 = vst [vmem:[#allocation90_spill] sm:$0xff] %v14390_v1  ;;  %v4119_v51 = vadd.f32 %v4118_v2, %v4069_v28  ;;  %v14393_v45 = vadd.f32 %v4214_v3, %v4166_v40  ;;  %v15894_v3 = vld [vmem:[#allocation91_spill] sm:$0xff]  ;;  %v11631_v1 = vld [vmem:[%s12634_s24 + $0x794] sm:$0xf] }
 0x4c1   : > { %4971 = vmatpush.bf16.msra.mxu2 %v14245_v56 }
 0x4c3   : > { %v4167_v32 = vpop.f32.mrf.mxu2  ;;  %v4072_v25 = vpop.f32.mrf.mxu0 }
 0x4c4   : > { %v4168_v22 = vadd.f32 %v4167_v32, %v4119_v51  ;;  %v4216_v12 = vpop.f32.mrf.mxu3  ;;  %v15895_v32 = vld [vmem:[#allocation65_spill] sm:$0xff] }
 0x4c5   : > { %4972 = vmatpush.bf16.msra.mxu2 %v14233_v38  ;;  %v4121_v31 = vpop.f32.mrf.mxu1  ;;  %v15892_v38 = vld [vmem:[#allocation95_spill] sm:$0xff] }
 0x4c6   : > { %v4122_v44 = vadd.f32 %v4121_v31, %v4072_v25  ;;  %v14397_v15 = vadd.f32 %v4216_v12, %v4168_v22  ;;  %4267 = vmatmul.bf16.gmra.mxu0 %v15888_v63  ;;  %v15896_v22 = vld [vmem:[#allocation66_spill] sm:$0xff]  ;;  %v15897_v25 = vld [vmem:[#allocation67_spill] sm:$0xff] }
 0x4c8   : > { %4316 = vmatmul.bf16.gmra.mxu1 %v15889_v53  ;;  %10375 = vmatmul.msk.bf16.gmra.mxu2 %vm2661_vm0, %v15890_v33  ;;  %v10074_v33 = vld [vmem:[%s12634_s24 + $0x718] sm:$0xf0]  ;;  %v11661_v53 = vld [vmem:[%s12634_s24 + $0x884] sm:$0xf] }
 0x4c9   : > { %4973 = vmatpush.bf16.msra.mxu2 %v15891_v4  ;;  %4414 = vmatmul.bf16.gmra.mxu3 %v15866_v54 }
 0x4cb   : > { %v4170_v56 = vpop.f32.mrf.mxu2  ;;  %v4074_v55 = vpop.f32.mrf.mxu0 }
 0x4cc   : > { %v4171_v10 = vadd.f32 %v4170_v56, %v4122_v44  ;;  %v4219_v16 = vpop.f32.mrf.mxu3  ;;  %v11481_v56 = vld [vmem:[%s12634_s24 + $0x2e4] sm:$0xf] }
 0x4cd   : > { %4974 = vmatpush.bf16.msra.mxu2 %v15892_v38  ;;  %v4123_v57 = vpop.f32.mrf.mxu1 }
 0x4ce   : > { %v4124_v9 = vadd.f32 %v4123_v57, %v4074_v55  ;;  %v14406_v47 = vadd.f32 %v4219_v16, %v4171_v10  ;;  %v9546_v10 = vld [vmem:[%s12634_s24 + $0x2f8] sm:$0xf0] }
 0x4cf   : > { %v9549_v16 = vor.u32 %v11481_v56, %v9546_v10  ;;  %v15899_v56 = vld [vmem:[#allocation69_spill] sm:$0xff]  ;;  %v15900_v10 = vld [vmem:[#allocation70_spill] sm:$0xff] }
 0x4d1   : > { %4975 = vmatpush.bf16.msra.mxu2 %v15893_v49  ;;  %v9522_v49 = vld [vmem:[%s12634_s24 + $0x2c8] sm:$0xf0]  ;;  %4450 = vmatpush.bf16.msrb.mxu0 %v9549_v16 }
 0x4d2   : > { %v9474_v16 = vld [vmem:[%s12634_s24 + $0x268] sm:$0xf0] }
 0x4d3   : > { %v4172_v5 = vpop.f32.mrf.mxu2  ;;  %v4077_v40 = vpop.f32.mrf.mxu0 }
 0x4d4   : > { %v4173_v14 = vadd.f32 %v4172_v5, %v4124_v9  ;;  %v4221_v28 = vpop.f32.mrf.mxu3  ;;  %v11475_v9 = vld [vmem:[%s12634_s24 + $0x2b4] sm:$0xf] }
 0x4d5   : > { %4976 = vmatpush.bf16.msra.mxu2 %v15894_v3  ;;  %v4126_v54 = vpop.f32.mrf.mxu1  ;;  %v9525_v5 = vor.u32 %v11475_v9, %v9522_v49  ;;  %v11469_v3 = vld [vmem:[%s12634_s24 + $0x284] sm:$0xf] }
 0x4d6   : > { %v4127_v2 = vadd.f32 %v4126_v54, %v4077_v40  ;;  %v14410_v51 = vadd.f32 %v4221_v28, %v4173_v14  ;;  %4272 = vmatmul.bf16.gmra.mxu0 %v15895_v32  ;;  %v9498_v54 = vld [vmem:[%s12634_s24 + $0x298] sm:$0xf0] }
 0x4d7   : > { %4451 = vmatpush.bf16.msrb.mxu0 %v9525_v5 }
 0x4d8   : > { %4321 = vmatmul.bf16.gmra.mxu1 %v15896_v22  ;;  %10376 = vmatmul.msk.bf16.gmra.mxu2 %vm2661_vm0, %v15897_v25  ;;  %v9402_v25 = vld [vmem:[%s12634_s24 + $0x1d8] sm:$0xf0] }
 0x4d9   : > { %4419 = vmatmul.bf16.gmra.mxu3 %v15869_v43 }
 0x4db   : > { %v4175_v12 = vpop.f32.mrf.mxu2  ;;  %v4079_v44 = vpop.f32.mrf.mxu0 }
 0x4dc   : > { %v4176_v31 = vadd.f32 %v4175_v12, %v4127_v2  ;;  %v4224_v4 = vpop.f32.mrf.mxu3  ;;  %v9501_v12 = vor.u32 %v11469_v3, %v9498_v54 }
 0x4dd   : > { %v4128_v55 = vpop.f32.mrf.mxu1 }
 0x4de   : > { %v4129_v38 = vadd.f32 %v4128_v55, %v4079_v44  ;;  %v14419_v57 = vadd.f32 %v4224_v4, %v4176_v31  ;;  %v15898_v4 = vld [vmem:[#allocation68_spill] sm:$0xff]  ;;  %4452 = vmatpush.bf16.msrb.mxu0 %v9501_v12 }
 0x4df   : > { %v11463_v55 = vld [vmem:[%s12634_s24 + $0x254] sm:$0xf] }
 0x4e3   : > { %v4177_v43 = vpop.f32.mrf.mxu2  ;;  %v4082_v40 = vpop.f32.mrf.mxu0 }
 0x4e4   : > { %v4178_v14 = vadd.f32 %v4177_v43, %v4129_v38  ;;  %v4226_v28 = vpop.f32.mrf.mxu3  ;;  %v9477_v38 = vor.u32 %v11463_v55, %v9474_v16 }
 0x4e5   : > { %v4131_v2 = vpop.f32.mrf.mxu1 }
 0x4e6   : > { %v4132_v44 = vadd.f32 %v4131_v2, %v4082_v40  ;;  %v14425_v31 = vadd.f32 %v4226_v28, %v4178_v14  ;;  %4277 = vmatmul.bf16.gmra.mxu0 %v15898_v4  ;;  %v11457_v14 = vld [vmem:[%s12634_s24 + $0x224] sm:$0xf]  ;;  %v9450_v40 = vld [vmem:[%s12634_s24 + $0x238] sm:$0xf0] }
 0x4e7   : > { %4453 = vmatpush.bf16.msrb.mxu0 %v9477_v38  ;;  %v9453_v3 = vor.u32 %v11457_v14, %v9450_v40  ;;  %v15902_v14 = vld [vmem:[#allocation72_spill] sm:$0xff]  ;;  %v15903_v40 = vld [vmem:[#allocation73_spill] sm:$0xff] }
 0x4e8   : > { %4326 = vmatmul.bf16.gmra.mxu1 %v15899_v56  ;;  %10377 = vmatmul.msk.bf16.gmra.mxu2 %vm2661_vm0, %v15900_v10  ;;  %v11451_v10 = vld [vmem:[%s12634_s24 + $0x1f4] sm:$0xf]  ;;  %v9426_v56 = vld [vmem:[%s12634_s24 + $0x208] sm:$0xf0] }
 0x4e9   : > { %4424 = vmatmul.bf16.gmra.mxu3 %v15872_v58  ;;  %v9429_v58 = vor.u32 %v11451_v10, %v9426_v56  ;;  %v11529_v56 = vld [vmem:[%s12634_s24 + $0x464] sm:$0xf]  ;;  %v9738_v10 = vld [vmem:[%s12634_s24 + $0x478] sm:$0xf0] }
 0x4eb   : > { %v4180_v9 = vpop.f32.mrf.mxu2  ;;  %v4084_v5 = vpop.f32.mrf.mxu0  ;;  %4454 = vmatpush.bf16.msrb.mxu0 %v9453_v3  ;;  %v11439_v3 = vld [vmem:[%s12634_s24 + $0x194] sm:$0xf] }
 0x4ec   : > { %v4181_v49 = vadd.f32 %v4180_v9, %v4132_v44  ;;  %v4229_v43 = vpop.f32.mrf.mxu3  ;;  %v11445_v9 = vld [vmem:[%s12634_s24 + $0x1c4] sm:$0xf] }
 0x4ed   : > { %v4133_v28 = vpop.f32.mrf.mxu1  ;;  %v9405_v38 = vor.u32 %v11445_v9, %v9402_v25  ;;  %v11625_v25 = vld [vmem:[%s12634_s24 + $0x764] sm:$0xf] }
 0x4ee   : > { %v4134_v54 = vadd.f32 %v4133_v28, %v4084_v5  ;;  %v14436_v2 = vadd.f32 %v4229_v43, %v4181_v49  ;;  %v15901_v43 = vld [vmem:[#allocation71_spill] sm:$0xff]  ;;  %v9741_v28 = vor.u32 %v11529_v56, %v9738_v10 }
 0x4ef   : > { %4455 = vmatpush.bf16.msrb.mxu0 %v9429_v58  ;;  %v10122_v58 = vld [vmem:[%s12634_s24 + $0x778] sm:$0xf0] }
 0x4f0   : > { %4499 = vmatpush.bf16.msrb.mxu1 %v9741_v28  ;;  %v11619_v28 = vld [vmem:[%s12634_s24 + $0x734] sm:$0xf] }
 0x4f3   : > { %v4182_v12 = vpop.f32.mrf.mxu2  ;;  %v4087_v55 = vpop.f32.mrf.mxu0  ;;  %4456 = vmatpush.bf16.msrb.mxu0 %v9405_v38 }
 0x4f4   : > { %v4183_v44 = vadd.f32 %v4182_v12, %v4134_v54  ;;  %v4231_v16 = vpop.f32.mrf.mxu3  ;;  %v9378_v54 = vld [vmem:[%s12634_s24 + $0x1a8] sm:$0xf0]  ;;  %v11673_v12 = vld [vmem:[%s12634_s24 + $0x8e4] sm:$0xf] }
 0x4f5   : > { %v4136_v22 = vpop.f32.mrf.mxu1 }
 0x4f6   : > { %v4137_v49 = vadd.f32 %v4136_v22, %v4087_v55  ;;  %v14442_v5 = vadd.f32 %v4231_v16, %v4183_v44  ;;  %4282 = vmatmul.bf16.gmra.mxu0 %v15901_v43  ;;  %v9381_v22 = vor.u32 %v11439_v3, %v9378_v54  ;;  %v10125_v44 = vor.u32 %v11625_v25, %v10122_v58  ;;  %v10314_v55 = vld [vmem:[%s12634_s24 + $0x8f8] sm:$0xf0]  ;;  %v10098_v54 = vld [vmem:[%s12634_s24 + $0x748] sm:$0xf0]  ;;  %v11667_v25 = vld [vmem:[%s12634_s24 + $0x8b4] sm:$0xf] }
 0x4f7   : > { %v10317_v9 = vor.u32 %v11673_v12, %v10314_v55  ;;  %v10290_v55 = vld [vmem:[%s12634_s24 + $0x8c8] sm:$0xf0] }
 0x4f8   : > { %4331 = vmatmul.bf16.gmra.mxu1 %v15902_v14  ;;  %10378 = vmatmul.msk.bf16.gmra.mxu2 %vm2661_vm0, %v15903_v40  ;;  %v11523_v40 = vld [vmem:[%s12634_s24 + $0x434] sm:$0xf]  ;;  %v9714_v14 = vld [vmem:[%s12634_s24 + $0x448] sm:$0xf0] }
 0x4f9   : > { %4429 = vmatmul.bf16.gmra.mxu3 %v15875_v18  ;;  %v9717_v38 = vor.u32 %v11523_v40, %v9714_v14  ;;  %4457 = vmatpush.bf16.msrb.mxu0 %v9381_v22  ;;  %v9690_v14 = vld [vmem:[%s12634_s24 + $0x418] sm:$0xf0]  ;;  %v10293_v40 = vor.u32 %v11667_v25, %v10290_v55  ;;  %v11613_v22 = vld [vmem:[%s12634_s24 + $0x704] sm:$0xf] }
 0x4fa   : > { %4597 = vmatpush.bf16.msrb.mxu3 %v10125_v44  ;;  %v11517_v44 = vld [vmem:[%s12634_s24 + $0x404] sm:$0xf] }
 0x4fb   : > { %v4185_v16 = vpop.f32.mrf.mxu2  ;;  %v4089_v10 = vpop.f32.mrf.mxu0  ;;  %4500 = vmatpush.bf16.msrb.mxu1 %v9717_v38  ;;  %v11511_v38 = vld [vmem:[%s12634_s24 + $0x3d4] sm:$0xf] }
 0x4fc   : > { %v4186_v56 = vadd.f32 %v4185_v16, %v4137_v49  ;;  %v4234_v18 = vpop.f32.mrf.mxu3  ;;  %v10101_v49 = vor.u32 %v11619_v28, %v10098_v54  ;;  %v9693_v16 = vor.u32 %v11517_v44, %v9690_v14  ;;  %v11607_v44 = vld [vmem:[%s12634_s24 + $0x6d4] sm:$0xf]  ;;  %v10050_v14 = vld [vmem:[%s12634_s24 + $0x6e8] sm:$0xf0] }
 0x4fd   : > { %v4138_v3 = vpop.f32.mrf.mxu1  ;;  %4646 = vmatpush.bf16.msra.mxu0 %v10317_v9  ;;  %v10266_v9 = vld [vmem:[%s12634_s24 + $0x898] sm:$0xf0] }
 0x4fe   : > { %v4139_v58 = vadd.f32 %v4138_v3, %v4089_v10  ;;  %v14462_v12 = vadd.f32 %v4234_v18, %v4186_v56  ;;  %4598 = vmatpush.bf16.msrb.mxu3 %v10101_v49  ;;  %v10077_v56 = vor.u32 %v11613_v22, %v10074_v33  ;;  %v10269_v18 = vor.u32 %v11661_v53, %v10266_v9  ;;  %v9666_v3 = vld [vmem:[%s12634_s24 + $0x3e8] sm:$0xf0]  ;;  %v15904_v22 = vld [vmem:[#allocation74_spill] sm:$0xff] }
 0x4ff   : > { %4501 = vmatpush.bf16.msrb.mxu1 %v9693_v16  ;;  %v9669_v49 = vor.u32 %v11511_v38, %v9666_v3  ;;  %v10053_v53 = vor.u32 %v11607_v44, %v10050_v14  ;;  %v15905_v38 = vld [vmem:[#allocation75_spill] sm:$0xff]  ;;  %v15906_v3 = vld [vmem:[#allocation76_spill] sm:$0xff] }
 0x501   : > { %4647 = vmatpush.bf16.msra.mxu0 %v10293_v40  ;;  %v11655_v40 = vld [vmem:[%s12634_s24 + $0x854] sm:$0xf] }
 0x502   : > { %4599 = vmatpush.bf16.msrb.mxu3 %v10077_v56  ;;  %v11505_v56 = vld [vmem:[%s12634_s24 + $0x3a4] sm:$0xf] }
 0x503   : > { %v4187_v10 = vpop.f32.mrf.mxu2  ;;  %v4092_v54 = vpop.f32.mrf.mxu0  ;;  %4502 = vmatpush.bf16.msrb.mxu1 %v9669_v49 }
 0x504   : > { %v4188_v28 = vadd.f32 %v4187_v10, %v4139_v58  ;;  %v4236_v25 = vpop.f32.mrf.mxu3  ;;  %v10242_v58 = vld [vmem:[%s12634_s24 + $0x868] sm:$0xf0]  ;;  %v9642_v10 = vld [vmem:[%s12634_s24 + $0x3b8] sm:$0xf0] }
 0x505   : > { %v4141_v55 = vpop.f32.mrf.mxu1  ;;  %4648 = vmatpush.bf16.msra.mxu0 %v10269_v18  ;;  %v10245_v9 = vor.u32 %v11655_v40, %v10242_v58  ;;  %v11601_v18 = vld [vmem:[%s12634_s24 + $0x6a4] sm:$0xf]  ;;  %v11499_v40 = vld [vmem:[%s12634_s24 + $0x374] sm:$0xf]  ;;  %v9618_v58 = vld [vmem:[%s12634_s24 + $0x388] sm:$0xf0] }
 0x506   : > { %v4142_v33 = vadd.f32 %v4141_v55, %v4092_v54  ;;  %v14476_v16 = vadd.f32 %v4236_v25, %v4188_v28  ;;  %4287 = vmatmul.bf16.gmra.mxu0 %v15904_v22  ;;  %v9645_v54 = vor.u32 %v11505_v56, %v9642_v10  ;;  %v10026_v28 = vld [vmem:[%s12634_s24 + $0x6b8] sm:$0xf0]  ;;  %v11649_v25 = vld [vmem:[%s12634_s24 + $0x824] sm:$0xf]  ;;  %4600 = vmatpush.bf16.msrb.mxu3 %v10053_v53  ;;  %v11595_v53 = vld [vmem:[%s12634_s24 + $0x674] sm:$0xf] }
 0x507   : > { %v10029_v49 = vor.u32 %v11601_v18, %v10026_v28  ;;  %v10218_v55 = vld [vmem:[%s12634_s24 + $0x838] sm:$0xf0]  ;;  %v11643_v18 = vld [vmem:[%s12634_s24 + $0x7f4] sm:$0xf] }
 0x508   : > { %4336 = vmatmul.bf16.gmra.mxu1 %v15905_v38  ;;  %10379 = vmatmul.msk.bf16.gmra.mxu2 %vm2661_vm0, %v15906_v3  ;;  %v10221_v14 = vor.u32 %v11649_v25, %v10218_v55  ;;  %v9621_v3 = vor.u32 %v11499_v40, %v9618_v58  ;;  %v10194_v25 = vld [vmem:[%s12634_s24 + $0x808] sm:$0xf0]  ;;  %v9594_v55 = vld [vmem:[%s12634_s24 + $0x358] sm:$0xf0]  ;;  %v11589_v58 = vld [vmem:[%s12634_s24 + $0x644] sm:$0xf] }
 0x509   : > { %4434 = vmatmul.bf16.gmra.mxu3 %v15878_v30  ;;  %4649 = vmatpush.bf16.msra.mxu0 %v10245_v9  ;;  %v10002_v9 = vld [vmem:[%s12634_s24 + $0x688] sm:$0xf0] }
 0x50a   : > { %4503 = vmatpush.bf16.msrb.mxu1 %v9645_v54  ;;  %4601 = vmatpush.bf16.msrb.mxu3 %v10029_v49  ;;  %v10005_v54 = vor.u32 %v11595_v53, %v10002_v9  ;;  %v10170_v49 = vld [vmem:[%s12634_s24 + $0x7d8] sm:$0xf0] }
 0x50b   : > { %v4190_v44 = vpop.f32.mrf.mxu2  ;;  %v4094_v30 = vpop.f32.mrf.mxu0 }
 0x50c   : > { %v4191_v56 = vadd.f32 %v4190_v44, %v4142_v33  ;;  %v4239_v10 = vpop.f32.mrf.mxu3  ;;  %v11493_v33 = vld [vmem:[%s12634_s24 + $0x344] sm:$0xf]  ;;  %v10197_v44 = vor.u32 %v11643_v18, %v10194_v25 }
 0x50d   : > { %v4143_v38 = vpop.f32.mrf.mxu1  ;;  %4650 = vmatpush.bf16.msra.mxu0 %v10221_v14  ;;  %v9597_v40 = vor.u32 %v11493_v33, %v9594_v55  ;;  %v11583_v33 = vld [vmem:[%s12634_s24 + $0x614] sm:$0xf]  ;;  %v9954_v55 = vld [vmem:[%s12634_s24 + $0x628] sm:$0xf0] }
 0x50e   : > { %v4144_v28 = vadd.f32 %v4143_v38, %v4094_v30  ;;  %v14495_v52 = vadd.f32 %v4239_v10, %v4191_v56  ;;  %4504 = vmatpush.bf16.msrb.mxu1 %v9621_v3  ;;  %4602 = vmatpush.bf16.msrb.mxu3 %v10005_v54  ;;  %v9981_v38 = vor.u32 %v11589_v58, %v9978_v35  ;;  %v11487_v30 = vld [vmem:[%s12634_s24 + $0x314] sm:$0xf]  ;;  %v9570_v10 = vld [vmem:[%s12634_s24 + $0x328] sm:$0xf0] }
 0x50f   : > { %v10173_v56 = vor.u32 %v11637_v11, %v10170_v49  ;;  %v9573_v18 = vor.u32 %v11487_v30, %v9570_v10  ;;  %v9957_v35 = vor.u32 %v11583_v33, %v9954_v55  ;;  %v15908_v58 = vld [vmem:[#allocation78_spill] sm:$0xff] }
 0x511   : > { %4651 = vmatpush.bf16.msra.mxu0 %v10197_v44  ;;  %v10146_v44 = vld [vmem:[%s12634_s24 + $0x7a8] sm:$0xf0] }
 0x512   : > { %4505 = vmatpush.bf16.msrb.mxu1 %v9597_v40  ;;  %4603 = vmatpush.bf16.msrb.mxu3 %v9981_v38  ;;  %v15907_v40 = vld [vmem:[#allocation77_spill] sm:$0xff]  ;;  %v10149_v11 = vor.u32 %v11631_v1, %v10146_v44  ;;  %v15910_v44 = vld [vmem:[#allocation80_spill] sm:$0xff] }
 0x513   : > { %v4192_v14 = vpop.f32.mrf.mxu2  ;;  %v4097_v3 = vpop.f32.mrf.mxu0 }
 0x514   : > { %v4193_v53 = vadd.f32 %v4192_v14, %v4144_v28  ;;  %v4241_v9 = vpop.f32.mrf.mxu3  ;;  %v15909_v28 = vld [vmem:[#allocation79_spill] sm:$0xff] }
 0x515   : > { %v4146_v25 = vpop.f32.mrf.mxu1  ;;  %4652 = vmatpush.bf16.msra.mxu0 %v10173_v56 }
 0x516   : > { %v4147_v59 = vadd.f32 %v4146_v25, %v4097_v3  ;;  %v14509_v54 = vadd.f32 %v4241_v9, %v4193_v53  ;;  %4292 = vmatmul.bf16.gmra.mxu0 %v15907_v40  ;;  %4506 = vmatpush.bf16.msrb.mxu1 %v9573_v18 }
 0x517   : > { %4604 = vmatpush.bf16.msrb.mxu3 %v9957_v35  ;;  %v15912_v35 = vld [vmem:[#allocation82_spill] sm:$0xff] }
 0x518   : > { %4341 = vmatmul.bf16.gmra.mxu1 %v15908_v58  ;;  %10380 = vmatmul.msk.bf16.gmra.mxu2 %vm2661_vm0, %v15909_v28  ;;  %v15913_v28 = vld [vmem:[#allocation30_spill] sm:$0xff] }
 0x519   : > { %4439 = vmatmul.bf16.gmra.mxu3 %v13017_v23  ;;  %4653 = vmatpush.bf16.msra.mxu0 %v10149_v11  ;;  %v15911_v23 = vld [vmem:[#allocation81_spill] sm:$0xff] }
 0x51b   : > { %v4195_v49 = vpop.f32.mrf.mxu2  ;;  %v4099_v30 = vpop.f32.mrf.mxu0 }
 0x51c   : > { %v4196_v14 = vadd.f32 %v4195_v49, %v4147_v59  ;;  %v4244_v38 = vpop.f32.mrf.mxu3 }
 0x51d   : > { %v4148_v56 = vpop.f32.mrf.mxu1 }
 0x51e   : > { %v4149_v10 = vadd.f32 %v4148_v56, %v4099_v30  ;;  %v14517_v53 = vadd.f32 %v4244_v38, %v4196_v14 }
 0x523   : > { %v4197_v3 = vpop.f32.mrf.mxu2  ;;  %v4102_v1 = vpop.f32.mrf.mxu0 }
 0x524   : > { %v4198_v9 = vadd.f32 %v4197_v3, %v4149_v10  ;;  %v4246_v18 = vpop.f32.mrf.mxu3 }
 0x525   : > { %v4151_v25 = vpop.f32.mrf.mxu1 }
 0x526   : > { %v4152_v33 = vadd.f32 %v4151_v25, %v4102_v1  ;;  %v14519_v55 = vadd.f32 %v4246_v18, %v4198_v9  ;;  %4297 = vmatmul.bf16.gmra.mxu0 %v15910_v44 }
 0x528   : > { %4346 = vmatmul.bf16.gmra.mxu1 %v15911_v23  ;;  %10381 = vmatmul.msk.bf16.gmra.mxu2 %vm2661_vm0, %v15912_v35 }
 0x529   : > { %4444 = vmatmul.bf16.gmra.mxu3 %v13058_v60  ;;  %v15914_v60 = vld [vmem:[#allocation31_spill] sm:$0xff] }
 0x52b   : > { %v4200_v59 = vpop.f32.mrf.mxu2  ;;  %v4104_v49 = vpop.f32.mrf.mxu0 }
 0x52c   : > { %v4201_v11 = vadd.f32 %v4200_v59, %v4152_v33  ;;  %v4249_v14 = vpop.f32.mrf.mxu3  ;;  %v15915_v33 = vld [vmem:[#allocation32_spill] sm:$0xff] }
 0x52d   : > { %v4153_v30 = vpop.f32.mrf.mxu1 }
 0x52e   : > { %v4154_v38 = vadd.f32 %v4153_v30, %v4104_v49  ;;  %v14526_v56 = vadd.f32 %v4249_v14, %v4201_v11 }
 0x533   : > { %v4202_v10 = vpop.f32.mrf.mxu2  ;;  %v4263_v1 = vpop.f32.mrf.mxu0 }
 0x534   : > { %v4203_v3 = vadd.f32 %v4202_v10, %v4154_v38  ;;  %v4251_v9 = vpop.f32.mrf.mxu3  ;;  %v4264_v18 = vadd.f32 %v4263_v1, %v14393_v45  ;;  %v15916_v38 = vld [vmem:[#allocation35_spill] sm:$0xff]  ;;  %v15921_v1 = vld [vmem:[#allocation88_spill] sm:$0xff] }
 0x535   : > { %v4312_v25 = vpop.f32.mrf.mxu1  ;;  %v15919_v10 = vld [vmem:[#allocation55_spill] sm:$0xff] }
 0x536   : > { %v14529_v23 = vadd.f32 %v4251_v9, %v4203_v3  ;;  %v4313_v35 = vadd.f32 %v4312_v25, %v4264_v18  ;;  %4458 = vmatmul.bf16.vlgmr.msrb.gmra.mxu0 %v15913_v28 }
 0x537   : > { %5205 = vmatpush.bf16.msrb.mxu0 %v14388_v7 }
 0x538   : > { %4507 = vmatmul.bf16.vlgmr.msrb.gmra.mxu1 %v15914_v60  ;;  %4556 = vmatmul.bf16.vlgmr.msrb.gmra.mxu2 %v15915_v33  ;;  %v15922_v60 = vld [vmem:[#allocation94_spill] sm:$0xff] }
 0x539   : > { %5027 = vmatpush.bf16.msrb.mxu2 %v14288_v50  ;;  %4605 = vmatmul.bf16.vlgmr.msrb.gmra.mxu3 %v15884_v6  ;;  %v15923_v33 = vld [vmem:[#allocation86_spill] sm:$0xff] }
 0x53b   : > { %v4361_v59 = vpop.f32.mrf.mxu2  ;;  %v4265_v45 = vpop.f32.mrf.mxu0  ;;  %5206 = vmatpush.bf16.msrb.mxu0 %v14375_v27 }
 0x53c   : > { %v14537_v11 = vadd.f32 %v4361_v59, %v4313_v35  ;;  %v14539_v49 = vpop.f32.mrf.mxu3  ;;  %v4266_v28 = vadd.f32 %v4265_v45, %v14397_v15 }
 0x53d   : > { %5028 = vmatpush.bf16.msrb.mxu2 %v14259_v0  ;;  %v4314_v14 = vpop.f32.mrf.mxu1 }
 0x53e   : > { %v4315_v30 = vadd.f32 %v4314_v14, %v4266_v28  ;;  %v15924_v14 = vld [vmem:[#allocation92_spill] sm:$0xff] }
 0x53f   : > { %5207 = vmatpush.bf16.msrb.mxu0 %v14363_v17  ;;  %v15918_v17 = vld [vmem:[#allocation83_spill] sm:$0xff] }
 0x541   : > { %5029 = vmatpush.bf16.msrb.mxu2 %v14247_v19  ;;  %v15917_v19 = vld [vmem:[#allocation36_spill] sm:$0xff] }
 0x543   : > { %v4363_v50 = vpop.f32.mrf.mxu2  ;;  %v4268_v7 = vpop.f32.mrf.mxu0  ;;  %5208 = vmatpush.bf16.msrb.mxu0 %v14334_v39 }
 0x544   : > { %v14546_v6 = vadd.f32 %v4363_v50, %v4315_v30  ;;  %v14548_v35 = vpop.f32.mrf.mxu3  ;;  %v4269_v0 = vadd.f32 %v4268_v7, %v14406_v47  ;;  %v15920_v47 = vld [vmem:[#allocation96_spill] sm:$0xff] }
 0x545   : > { %5030 = vmatpush.bf16.msrb.mxu2 %v14235_v36  ;;  %v4317_v27 = vpop.f32.mrf.mxu1  ;;  %v15925_v30 = vld [vmem:[#allocation84_spill] sm:$0xff] }
 0x546   : > { %v4318_v15 = vadd.f32 %v4317_v27, %v4269_v0  ;;  %4463 = vmatmul.bf16.gmra.mxu0 %v15867_v29  ;;  %v15926_v0 = vld [vmem:[#allocation40_spill] sm:$0xff] }
 0x547   : > { %5209 = vmatpush.bf16.msrb.mxu0 %v15919_v10 }
 0x548   : > { %4512 = vmatmul.bf16.gmra.mxu1 %v15916_v38  ;;  %4561 = vmatmul.bf16.gmra.mxu2 %v15917_v19 }
 0x549   : > { %5031 = vmatpush.bf16.msrb.mxu2 %v15918_v17  ;;  %4610 = vmatmul.bf16.gmra.mxu3 %v15888_v63 }
 0x54b   : > { %v4366_v3 = vpop.f32.mrf.mxu2  ;;  %v4270_v39 = vpop.f32.mrf.mxu0  ;;  %5210 = vmatpush.bf16.msrb.mxu0 %v15921_v1 }
 0x54c   : > { %v14559_v36 = vadd.f32 %v4366_v3, %v4318_v15  ;;  %v14561_v9 = vpop.f32.mrf.mxu3  ;;  %v4271_v29 = vadd.f32 %v4270_v39, %v14410_v51 }
 0x54d   : > { %5032 = vmatpush.bf16.msrb.mxu2 %v15920_v47  ;;  %v4319_v18 = vpop.f32.mrf.mxu1 }
 0x54e   : > { %v4320_v25 = vadd.f32 %v4319_v18, %v4271_v29 }
 0x54f   : > { %5211 = vmatpush.bf16.msrb.mxu0 %v15923_v33 }
 0x551   : > { %5033 = vmatpush.bf16.msrb.mxu2 %v15922_v60 }
 0x553   : > { %v4368_v59 = vpop.f32.mrf.mxu2  ;;  %v4273_v45 = vpop.f32.mrf.mxu0  ;;  %5212 = vmatpush.bf16.msrb.mxu0 %v15925_v30  ;;  %v15927_v30 = vld [vmem:[#allocation47_spill] sm:$0xff] }
 0x554   : > { %v14568_v63 = vadd.f32 %v4368_v59, %v4320_v25  ;;  %v14570_v28 = vpop.f32.mrf.mxu3  ;;  %v4274_v50 = vadd.f32 %v4273_v45, %v14419_v57 }
 0x555   : > { %5034 = vmatpush.bf16.msrb.mxu2 %v15924_v14  ;;  %v4322_v7 = vpop.f32.mrf.mxu1 }
 0x556   : > { %v4323_v51 = vadd.f32 %v4322_v7, %v4274_v50  ;;  %4468 = vmatmul.bf16.gmra.mxu0 %v15870_v46  ;;  %v15928_v50 = vld [vmem:[#allocation48_spill] sm:$0xff] }
 0x558   : > { %4517 = vmatmul.bf16.gmra.mxu1 %v15871_v20  ;;  %4566 = vmatmul.bf16.gmra.mxu2 %v15926_v0 }
 0x559   : > { %4615 = vmatmul.bf16.gmra.mxu3 %v15895_v32 }
 0x55b   : > { %v4371_v27 = vpop.f32.mrf.mxu2  ;;  %v4275_v38 = vpop.f32.mrf.mxu0 }
 0x55c   : > { %v14579_v15 = vadd.f32 %v4371_v27, %v4323_v51  ;;  %v14581_v19 = vpop.f32.mrf.mxu3  ;;  %v4276_v17 = vadd.f32 %v4275_v38, %v14425_v31 }
 0x55d   : > { %v4324_v10 = vpop.f32.mrf.mxu1 }
 0x55e   : > { %v4325_v57 = vadd.f32 %v4324_v10, %v4276_v17 }
 0x563   : > { %v4373_v3 = vpop.f32.mrf.mxu2  ;;  %v4278_v46 = vpop.f32.mrf.mxu0 }
 0x564   : > { %v14584_v39 = vadd.f32 %v4373_v3, %v4325_v57  ;;  %v14586_v47 = vpop.f32.mrf.mxu3  ;;  %v4279_v20 = vadd.f32 %v4278_v46, %v14436_v2 }
 0x565   : > { %v4327_v1 = vpop.f32.mrf.mxu1 }
 0x566   : > { %v4328_v32 = vadd.f32 %v4327_v1, %v4279_v20  ;;  %4473 = vmatmul.bf16.gmra.mxu0 %v15873_v34  ;;  %v15929_v20 = vld [vmem:[#allocation51_spill] sm:$0xff]  ;;  %v15930_v1 = vld [vmem:[#allocation52_spill] sm:$0xff] }
 0x568   : > { %4522 = vmatmul.bf16.gmra.mxu1 %v15874_v24  ;;  %4571 = vmatmul.bf16.gmra.mxu2 %v15800_v41 }
 0x569   : > { %4620 = vmatmul.bf16.gmra.mxu3 %v15898_v4 }
 0x56b   : > { %v4376_v31 = vpop.f32.mrf.mxu2  ;;  %v4280_v18 = vpop.f32.mrf.mxu0 }
 0x56c   : > { %v14593_v29 = vadd.f32 %v4376_v31, %v4328_v32  ;;  %v14595_v25 = vpop.f32.mrf.mxu3  ;;  %v4281_v60 = vadd.f32 %v4280_v18, %v14442_v5 }
 0x56d   : > { %v4329_v33 = vpop.f32.mrf.mxu1 }
 0x56e   : > { %v4330_v2 = vadd.f32 %v4329_v33, %v4281_v60  ;;  %v11679_v60 = vld [vmem:[%s12634_s24 + $0x914] sm:$0xf]  ;;  %v10338_v33 = vld [vmem:[%s12634_s24 + $0x928] sm:$0xf0] }
 0x573   : > { %v4378_v59 = vpop.f32.mrf.mxu2  ;;  %v4283_v34 = vpop.f32.mrf.mxu0 }
 0x574   : > { %v14598_v45 = vadd.f32 %v4378_v59, %v4330_v2  ;;  %v14600_v14 = vpop.f32.mrf.mxu3  ;;  %v4284_v41 = vadd.f32 %v4283_v34, %v14462_v12  ;;  %v10341_v59 = vor.u32 %v11679_v60, %v10338_v33 }
 0x575   : > { %v4332_v24 = vpop.f32.mrf.mxu1 }
 0x576   : > { %v4333_v4 = vadd.f32 %v4332_v24, %v4284_v41  ;;  %4478 = vmatmul.bf16.gmra.mxu0 %v15876_v48  ;;  %4702 = vmatpush.bf16.msra.mxu1 %v10341_v59 }
 0x578   : > { %4527 = vmatmul.bf16.gmra.mxu1 %v15927_v30  ;;  %4576 = vmatmul.bf16.gmra.mxu2 %v15928_v50 }
 0x579   : > { %4625 = vmatmul.bf16.gmra.mxu3 %v15901_v43 }
 0x57b   : > { %v4381_v5 = vpop.f32.mrf.mxu2  ;;  %v4285_v51 = vpop.f32.mrf.mxu0 }
 0x57c   : > { %v14607_v7 = vadd.f32 %v4381_v5, %v4333_v4  ;;  %v14609_v0 = vpop.f32.mrf.mxu3  ;;  %v4286_v27 = vadd.f32 %v4285_v51, %v14476_v16 }
 0x57d   : > { %v4334_v38 = vpop.f32.mrf.mxu1 }
 0x57e   : > { %v4335_v12 = vadd.f32 %v4334_v38, %v4286_v27 }
 0x583   : > { %v4383_v17 = vpop.f32.mrf.mxu2  ;;  %v4288_v10 = vpop.f32.mrf.mxu0 }
 0x584   : > { %v14612_v48 = vadd.f32 %v4383_v17, %v4335_v12  ;;  %v14614_v57 = vpop.f32.mrf.mxu3  ;;  %v4289_v43 = vadd.f32 %v4288_v10, %v14495_v52 }
 0x585   : > { %v4337_v3 = vpop.f32.mrf.mxu1 }
 0x586   : > { %v4338_v46 = vadd.f32 %v4337_v3, %v4289_v43  ;;  %4483 = vmatmul.bf16.gmra.mxu0 %v15879_v61 }
 0x588   : > { %4532 = vmatmul.bf16.gmra.mxu1 %v15929_v20  ;;  %4581 = vmatmul.bf16.gmra.mxu2 %v15930_v1  ;;  %v10392_v1 = vld [vmem:[%s12644_s21] sm:$0xf] }
 0x589   : > { %4630 = vmatmul.bf16.gmra.mxu3 %v15904_v22 }
 0x58b   : > { %v4386_v16 = vpop.f32.mrf.mxu2  ;;  %v4290_v31 = vpop.f32.mrf.mxu0 }
 0x58c   : > { %v14621_v32 = vadd.f32 %v4386_v16, %v4338_v46  ;;  %v14623_v18 = vpop.f32.mrf.mxu3  ;;  %v4291_v52 = vadd.f32 %v4290_v31, %v14509_v54  ;;  %v11684_v16 = vld [vmem:[%s12644_s21 + $0x4] sm:$0xf0] }
 0x58d   : > { %v4339_v2 = vpop.f32.mrf.mxu1  ;;  %v14668_v31 = vor.u32 %v11684_v16, %v10392_v1  ;;  %v15945_v16 = vld [vmem:[#allocation54_spill] sm:$0xff] }
 0x58e   : > { %v14628_v34 = vadd.f32 %v4339_v2, %v4291_v52  ;;  %v15937_v52 = vld [vmem:[#allocation61_spill] sm:$0xff] }
 0x58f   : > { %15936 = vst [vmem:[#allocation38_spill] sm:$0xff] %v14668_v31 }
 0x593   : > { %v14630_v61 = vpop.f32.mrf.mxu2  ;;  %v4293_v41 = vpop.f32.mrf.mxu0 }
 0x594   : > { %v14632_v24 = vpop.f32.mrf.mxu3  ;;  %v4294_v22 = vadd.f32 %v4293_v41, %v14517_v53 }
 0x595   : > { %v4342_v4 = vpop.f32.mrf.mxu1 }
 0x596   : > { %v4343_v30 = vadd.f32 %v4342_v4, %v4294_v22  ;;  %4488 = vmatmul.bf16.gmra.mxu0 %v15765_v37  ;;  %v15939_v22 = vld [vmem:[#allocation56_spill] sm:$0xff] }
 0x598   : > { %4537 = vmatmul.bf16.gmra.mxu1 %v15821_v21  ;;  %4586 = vmatmul.bf16.gmra.mxu2 %v15822_v8 }
 0x599   : > { %4635 = vmatmul.bf16.gmra.mxu3 %v15907_v40 }
 0x59b   : > { %v4391_v54 = vpop.f32.mrf.mxu2  ;;  %v4295_v5 = vpop.f32.mrf.mxu0 }
 0x59c   : > { %v14639_v50 = vadd.f32 %v4391_v54, %v4343_v30  ;;  %v14641_v51 = vpop.f32.mrf.mxu3  ;;  %v4296_v27 = vadd.f32 %v4295_v5, %v14519_v55 }
 0x59d   : > { %v4344_v38 = vpop.f32.mrf.mxu1 }
 0x59e   : > { %v14644_v53 = vadd.f32 %v4344_v38, %v4296_v27 }
 0x5a3   : > { %v14646_v12 = vpop.f32.mrf.mxu2  ;;  %v4298_v37 = vpop.f32.mrf.mxu0 }
 0x5a4   : > { %15931 = vst [vmem:[#allocation58_spill] sm:$0xff] %v14646_v12  ;;  %v14648_v21 = vpop.f32.mrf.mxu3  ;;  %v4299_v8 = vadd.f32 %v4298_v37, %v14526_v56  ;;  %v15941_v37 = vld [vmem:[#allocation89_spill] sm:$0xff] }
 0x5a5   : > { %v4347_v40 = vpop.f32.mrf.mxu1 }
 0x5a6   : > { %v4348_v17 = vadd.f32 %v4347_v40, %v4299_v8  ;;  %4493 = vmatmul.bf16.gmra.mxu0 %v15770_v62 }
 0x5a8   : > { %4542 = vmatmul.bf16.gmra.mxu1 %v15828_v13  ;;  %4591 = vmatmul.bf16.gmra.mxu2 %v15860_v26 }
 0x5a9   : > { %4640 = vmatmul.bf16.gmra.mxu3 %v15910_v44 }
 0x5ab   : > { %v4396_v55 = vpop.f32.mrf.mxu2  ;;  %v4300_v43 = vpop.f32.mrf.mxu0 }
 0x5ac   : > { %v14655_v10 = vadd.f32 %v4396_v55, %v4348_v17  ;;  %v14657_v3 = vpop.f32.mrf.mxu3  ;;  %v4301_v46 = vadd.f32 %v4300_v43, %v14529_v23  ;;  %v15938_v23 = vld [vmem:[#allocation90_spill] sm:$0xff]  ;;  %v15943_v43 = vld [vmem:[#allocation64_spill] sm:$0xff] }
 0x5ad   : > { %v4349_v20 = vpop.f32.mrf.mxu1 }
 0x5ae   : > { %15932 = vst [vmem:[#allocation29_spill] sm:$0xff] %v14655_v10  ;;  %v14660_v56 = vadd.f32 %v4349_v20, %v4301_v46  ;;  %v15944_v46 = vld [vmem:[#allocation53_spill] sm:$0xff] }
 0x5af   : > { %v15957_v10 = vld [vmem:[#allocation81_spill] sm:$0xff] }
 0x5b0   : > { %15933 = vst [vmem:[#allocation33_spill] sm:$0xff] %v14660_v56 }
 0x5b3   : > { %v14664_v62 = vpop.f32.mrf.mxu2  ;;  %v4459_v26 = vpop.f32.mrf.mxu0 }
 0x5b4   : > { %15934 = vst [vmem:[#allocation34_spill] sm:$0xff] %v14664_v62  ;;  %v14666_v13 = vpop.f32.mrf.mxu3  ;;  %v4460_v44 = vadd.f32 %v4459_v26, %v14539_v49 }
 0x5b5   : > { %15935 = vst [vmem:[#allocation37_spill] sm:$0xff] %v14666_v13  ;;  %v4508_v60 = vpop.f32.mrf.mxu1 }
 0x5b6   : > { %v4509_v33 = vadd.f32 %v4508_v60, %v4460_v44  ;;  %4654 = vmatmul.bf16.vlgmr.msra.gmra.mxu0 %v15885_v42  ;;  %v15940_v42 = vld [vmem:[#allocation57_spill] sm:$0xff] }
 0x5b8   : > { %10382 = vmatmul.msk.bf16.vlgmr.msra.gmra.mxu1 %vm2661_vm0, %v15937_v52  ;;  %4977 = vmatmul.bf16.vlgmr.msra.gmra.mxu2 %v14668_v31 }
 0x5b9   : > { %5263 = vmatpush.bf16.msra.mxu2 %v15938_v23 }
 0x5bb   : > { %v4557_v2 = vpop.f32.mrf.mxu2  ;;  %v4461_v41 = vpop.f32.mrf.mxu0 }
 0x5bc   : > { %v4558_v59 = vadd.f32 %v4557_v2, %v4509_v33  ;;  %v4462_v4 = vadd.f32 %v4461_v41, %v14548_v35  ;;  %v4606_v49 = vpop.f32.mrf.mxu3  ;;  %v15942_v35 = vld [vmem:[#allocation63_spill] sm:$0xff]  ;;  %v15947_v2 = vld [vmem:[#allocation85_spill] sm:$0xff] }
 0x5bd   : > { %5264 = vmatpush.bf16.msra.mxu2 %v15939_v22  ;;  %v4510_v30 = vpop.f32.mrf.mxu1  ;;  %v15946_v33 = vld [vmem:[#allocation87_spill] sm:$0xff] }
 0x5be   : > { %v14678_v54 = vadd.f32 %v4606_v49, %v4558_v59  ;;  %v14680_v5 = vadd.f32 %v4510_v30, %v4462_v4  ;;  %v15949_v30 = vld [vmem:[#allocation67_spill] sm:$0xff] }
 0x5c1   : > { %5265 = vmatpush.bf16.msra.mxu2 %v15940_v42 }
 0x5c3   : > { %v14683_v27 = vpop.f32.mrf.mxu2  ;;  %v4464_v38 = vpop.f32.mrf.mxu0 }
 0x5c4   : > { %v4465_v8 = vadd.f32 %v4464_v38, %v14561_v9  ;;  %v14687_v17 = vpop.f32.mrf.mxu3  ;;  %v4560_v13 = vadd.f32 %v14683_v27, %v14680_v5 }
 0x5c5   : > { %5266 = vmatpush.bf16.msra.mxu2 %v15941_v37  ;;  %v4513_v40 = vpop.f32.mrf.mxu1 }
 0x5c6   : > { %v14689_v55 = vadd.f32 %v4513_v40, %v4465_v8  ;;  %4659 = vmatmul.bf16.gmra.mxu0 %v15942_v35 }
 0x5c8   : > { %10383 = vmatmul.msk.bf16.gmra.mxu1 %vm2661_vm0, %v15943_v43 }
 0x5c9   : > { %5267 = vmatpush.bf16.msra.mxu2 %v15944_v46 }
 0x5cb   : > { %v14695_v20 = vpop.f32.mrf.mxu2  ;;  %v4466_v1 = vpop.f32.mrf.mxu0 }
 0x5cc   : > { %v4467_v26 = vadd.f32 %v4466_v1, %v14570_v28  ;;  %v14699_v44 = vpop.f32.mrf.mxu3  ;;  %v15948_v28 = vld [vmem:[#allocation66_spill] sm:$0xff] }
 0x5cd   : > { %5268 = vmatpush.bf16.msra.mxu2 %v15945_v16  ;;  %v4515_v9 = vpop.f32.mrf.mxu1 }
 0x5ce   : > { %v14701_v60 = vadd.f32 %v4515_v9, %v4467_v26  ;;  %v15950_v26 = vld [vmem:[#allocation69_spill] sm:$0xff]  ;;  %v15951_v9 = vld [vmem:[#allocation70_spill] sm:$0xff] }
 0x5d1   : > { %5269 = vmatpush.bf16.msra.mxu2 %v15946_v33 }
 0x5d3   : > { %v14704_v52 = vpop.f32.mrf.mxu2  ;;  %v4469_v23 = vpop.f32.mrf.mxu0 }
 0x5d4   : > { %v4470_v59 = vadd.f32 %v4469_v23, %v14581_v19  ;;  %v14708_v22 = vpop.f32.mrf.mxu3 }
 0x5d5   : > { %5270 = vmatpush.bf16.msra.mxu2 %v15947_v2  ;;  %v4518_v41 = vpop.f32.mrf.mxu1 }
 0x5d6   : > { %v14710_v4 = vadd.f32 %v4518_v41, %v4470_v59  ;;  %4664 = vmatmul.bf16.gmra.mxu0 %v15948_v28 }
 0x5d8   : > { %10384 = vmatmul.msk.bf16.gmra.mxu1 %vm2661_vm0, %v15949_v30 }
 0x5db   : > { %v14715_v49 = vpop.f32.mrf.mxu2  ;;  %v4471_v42 = vpop.f32.mrf.mxu0 }
 0x5dc   : > { %v4472_v38 = vadd.f32 %v4471_v42, %v14586_v47  ;;  %v14718_v8 = vpop.f32.mrf.mxu3 }
 0x5dd   : > { %v4520_v37 = vpop.f32.mrf.mxu1 }
 0x5de   : > { %v14720_v40 = vadd.f32 %v4520_v37, %v4472_v38 }
 0x5e3   : > { %v14722_v19 = vpop.f32.mrf.mxu2  ;;  %v4474_v35 = vpop.f32.mrf.mxu0 }
 0x5e4   : > { %v4475_v43 = vadd.f32 %v4474_v35, %v14595_v25  ;;  %v14725_v1 = vpop.f32.mrf.mxu3  ;;  %v15952_v35 = vld [vmem:[#allocation72_spill] sm:$0xff] }
 0x5e5   : > { %v4523_v46 = vpop.f32.mrf.mxu1 }
 0x5e6   : > { %v14727_v16 = vadd.f32 %v4523_v46, %v4475_v43  ;;  %4669 = vmatmul.bf16.gmra.mxu0 %v15950_v26  ;;  %v15953_v43 = vld [vmem:[#allocation73_spill] sm:$0xff] }
 0x5e8   : > { %10385 = vmatmul.msk.bf16.gmra.mxu1 %vm2661_vm0, %v15951_v9 }
 0x5eb   : > { %v14732_v47 = vpop.f32.mrf.mxu2  ;;  %v4476_v33 = vpop.f32.mrf.mxu0 }
 0x5ec   : > { %v4477_v23 = vadd.f32 %v4476_v33, %v14600_v14  ;;  %v14735_v59 = vpop.f32.mrf.mxu3 }
 0x5ed   : > { %v4525_v2 = vpop.f32.mrf.mxu1 }
 0x5ee   : > { %v14737_v41 = vadd.f32 %v4525_v2, %v4477_v23 }
 0x5f3   : > { %v14739_v25 = vpop.f32.mrf.mxu2  ;;  %v4479_v28 = vpop.f32.mrf.mxu0 }
 0x5f4   : > { %v4480_v30 = vadd.f32 %v4479_v28, %v14609_v0  ;;  %v14742_v38 = vpop.f32.mrf.mxu3 }
 0x5f5   : > { %v4528_v42 = vpop.f32.mrf.mxu1 }
 0x5f6   : > { %v4529_v37 = vadd.f32 %v4528_v42, %v4480_v30  ;;  %4674 = vmatmul.bf16.gmra.mxu0 %v15952_v35  ;;  %v15954_v30 = vld [vmem:[#allocation75_spill] sm:$0xff]  ;;  %v15955_v42 = vld [vmem:[#allocation76_spill] sm:$0xff] }
 0x5f8   : > { %10386 = vmatmul.msk.bf16.gmra.mxu1 %vm2661_vm0, %v15953_v43 }
 0x5fb   : > { %v4577_v14 = vpop.f32.mrf.mxu2  ;;  %v14747_v26 = vpop.f32.mrf.mxu0 }
 0x5fc   : > { %v4578_v46 = vadd.f32 %v4577_v14, %v4529_v37  ;;  %v4626_v33 = vpop.f32.mrf.mxu3 }
 0x5fd   : > { %v14749_v9 = vpop.f32.mrf.mxu1 }
 0x5fe   : > { %v14751_v23 = vadd.f32 %v4626_v33, %v4578_v46 }
 0x603   : > { %v4484_v2 = vpop.f32.mrf.mxu0 }
 0x604   : > { %v4485_v0 = vadd.f32 %v4484_v2, %v14623_v18  ;;  %v15956_v18 = vld [vmem:[#allocation79_spill] sm:$0xff] }
 0x605   : > { %v4533_v28 = vpop.f32.mrf.mxu1 }
 0x606   : > { %v14754_v62 = vadd.f32 %v4533_v28, %v4485_v0  ;;  %4679 = vmatmul.bf16.gmra.mxu0 %v15954_v30 }
 0x608   : > { %10387 = vmatmul.msk.bf16.gmra.mxu1 %vm2661_vm0, %v15955_v42 }
 0x60b   : > { %v14759_v35 = vpop.f32.mrf.mxu0 }
 0x60d   : > { %v14761_v37 = vpop.f32.mrf.mxu1 }
 0x613   : > { %v4489_v43 = vpop.f32.mrf.mxu0 }
 0x614   : > { %v4490_v14 = vadd.f32 %v4489_v43, %v14641_v51  ;;  %v15958_v51 = vld [vmem:[#allocation82_spill] sm:$0xff] }
 0x615   : > { %v4538_v46 = vpop.f32.mrf.mxu1 }
 0x616   : > { %v14764_v33 = vadd.f32 %v4538_v46, %v4490_v14  ;;  %4684 = vmatmul.bf16.gmra.mxu0 %v15908_v58 }
 0x618   : > { %10388 = vmatmul.msk.bf16.gmra.mxu1 %vm2661_vm0, %v15956_v18 }
 0x61b   : > { %v14769_v2 = vpop.f32.mrf.mxu0 }
 0x61d   : > { %v14771_v0 = vpop.f32.mrf.mxu1 }
 0x623   : > { %v4494_v28 = vpop.f32.mrf.mxu0 }
 0x624   : > { %v4495_v30 = vadd.f32 %v4494_v28, %v14657_v3 }
 0x625   : > { %v4543_v42 = vpop.f32.mrf.mxu1 }
 0x626   : > { %v14774_v56 = vadd.f32 %v4543_v42, %v4495_v30  ;;  %4689 = vmatmul.bf16.gmra.mxu0 %v15957_v10  ;;  %v4609_v10 = vadd.f32 %v14687_v17, %v4560_v13  ;;  %v4565_v17 = vadd.f32 %v14704_v52, %v14701_v60 }
 0x628   : > { %10389 = vmatmul.msk.bf16.gmra.mxu1 %vm2661_vm0, %v15958_v51 }
 0x62b   : > { %v14779_v43 = vpop.f32.mrf.mxu0 }
 0x62c   : > { %15959 = vst [vmem:[#allocation39_spill] sm:$0xff] %v14779_v43 }
 0x62d   : > { %v14781_v58 = vpop.f32.mrf.mxu1 }
 0x62e   : > { %15960 = vst [vmem:[#allocation41_spill] sm:$0xff] %v14781_v58  ;;  %v4563_v58 = vadd.f32 %v14695_v20, %v14689_v55 }
 0x633   : > { %v4655_v14 = vpop.f32.mrf.mxu0 }
 0x634   : > { %v4656_v46 = vadd.f32 %v4655_v14, %v14678_v54  ;;  %v4612_v14 = vadd.f32 %v14699_v44, %v4563_v58 }
 0x635   : > { %v4704_v18 = vpop.f32.mrf.mxu1 }
 0x636   : > { %v4705_v3 = vadd.f32 %v4704_v18, %v4656_v46  ;;  %5213 = vmatmul.bf16.vlgmr.msrb.gmra.mxu0 %v14668_v31 }
 0x638   : > { %v4746_v28 = vpack.c.bf16 %v4705_v3, %v14537_v11 }
 0x63a   : > { %v4888_v12 = vunpack.c.l.b16 %v4746_v28  ;;  %v4889_v5 = vunpack.c.h.b16 %v4746_v28  ;;  %v4568_v28 = vadd.f32 %v14715_v49, %v14710_v4 }
 0x63b   : > { %v4657_v30 = vpop.f32.mrf.mxu0 }
 0x63c   : > { %v4658_v42 = vadd.f32 %v4657_v30, %v4609_v10  ;;  %v4617_v30 = vadd.f32 %v14718_v8, %v4568_v28  ;;  %v4579_v28 = vpop.f32.mrf.mxu2 }
 0x63d   : > { %v4706_v51 = vpop.f32.mrf.mxu1 }
 0x63e   : > { %v4707_v43 = vadd.f32 %v4706_v51, %v4658_v42 }
 0x640   : > { %v4749_v54 = vpack.c.bf16 %v4707_v43, %v14546_v6  ;;  %v4614_v6 = vadd.f32 %v14708_v22, %v4565_v17 }
 0x642   : > { %v4890_v27 = vunpack.c.l.b16 %v4749_v54  ;;  %v4891_v46 = vunpack.c.h.b16 %v4749_v54 }
 0x643   : > { %v4660_v18 = vpop.f32.mrf.mxu0 }
 0x644   : > { %v4661_v31 = vadd.f32 %v4660_v18, %v4612_v14  ;;  %v14793_v3 = vpack.c.b16 %v4890_v27, %v4888_v12  ;;  %v14795_v13 = vpack.c.b16 %v4891_v46, %v4889_v5  ;;  %v4570_v5 = vadd.f32 %v14722_v19, %v14720_v40 }
 0x645   : > { %v4709_v11 = vpop.f32.mrf.mxu1  ;;  %v4573_v18 = vadd.f32 %v14732_v47, %v14727_v16  ;;  %v4575_v16 = vadd.f32 %v14739_v25, %v14737_v41  ;;  %v4482_v41 = vadd.f32 %v14747_v26, %v14614_v57  ;;  %v4582_v25 = vpop.f32.mrf.mxu2 }
 0x646   : > { %v4710_v55 = vadd.f32 %v4709_v11, %v4661_v31 }
 0x648   : > { %v4752_v20 = vpack.c.bf16 %v4710_v55, %v14559_v36  ;;  %v4622_v55 = vadd.f32 %v14735_v59, %v4573_v18  ;;  %v4624_v59 = vadd.f32 %v14742_v38, %v4575_v16 }
 0x64a   : > { %v4892_v42 = vunpack.c.l.b16 %v4752_v20  ;;  %v4893_v51 = vunpack.c.h.b16 %v4752_v20 }
 0x64b   : > { %v4662_v44 = vpop.f32.mrf.mxu0 }
 0x64c   : > { %v4663_v43 = vadd.f32 %v4662_v44, %v4614_v6 }
 0x64d   : > { %v4711_v58 = vpop.f32.mrf.mxu1 }
 0x64e   : > { %v4712_v10 = vadd.f32 %v4711_v58, %v4663_v43 }
 0x650   : > { %v4755_v12 = vpack.c.bf16 %v4712_v10, %v14568_v63  ;;  %v4619_v63 = vadd.f32 %v14725_v1, %v4570_v5  ;;  %v4628_v10 = vpop.f32.mrf.mxu3 }
 0x652   : > { %v4894_v54 = vunpack.c.l.b16 %v4755_v12  ;;  %v4895_v60 = vunpack.c.h.b16 %v4755_v12 }
 0x653   : > { %v4665_v31 = vpop.f32.mrf.mxu0 }
 0x654   : > { %v4666_v52 = vadd.f32 %v4665_v31, %v4617_v30  ;;  %v14805_v14 = vpack.c.b16 %v4894_v54, %v4892_v42  ;;  %v14807_v22 = vpack.c.b16 %v4895_v60, %v4893_v51  ;;  %v10400_v51 = vld [vmem:[%s12644_s21 + $0x10] sm:$0xf]  ;;  %v11686_v54 = vld [vmem:[%s12644_s21 + $0x14] sm:$0xf0] }
 0x655   : > { %v4714_v36 = vpop.f32.mrf.mxu1  ;;  %v14825_v60 = vor.u32 %v11686_v54, %v10400_v51 }
 0x656   : > { %v4715_v4 = vadd.f32 %v4714_v36, %v4666_v52 }
 0x657   : > { %4982 = vmatmul.bf16.gmra.mxu2 %v14825_v60  ;;  %5218 = vmatmul.bf16.gmra.mxu0 %v14825_v60 }
 0x658   : > { %v4758_v49 = vpack.c.bf16 %v4715_v4, %v14579_v15  ;;  %v4631_v18 = vpop.f32.mrf.mxu3 }
 0x65a   : > { %v4896_v20 = vunpack.c.l.b16 %v4758_v49  ;;  %v4897_v6 = vunpack.c.h.b16 %v4758_v49  ;;  %v4531_v49 = vadd.f32 %v14749_v9, %v4482_v41 }
 0x65b   : > { %v4667_v8 = vpop.f32.mrf.mxu0 }
 0x65c   : > { %v4668_v27 = vadd.f32 %v4667_v8, %v4619_v63 }
 0x65d   : > { %v4716_v46 = vpop.f32.mrf.mxu1 }
 0x65e   : > { %v4717_v11 = vadd.f32 %v4716_v46, %v4668_v27 }
 0x660   : > { %v4761_v17 = vpack.c.bf16 %v4717_v11, %v14584_v39  ;;  %v4580_v11 = vadd.f32 %v4579_v28, %v4531_v49  ;;  %v4633_v16 = vpop.f32.mrf.mxu3 }
 0x662   : > { %v4898_v44 = vunpack.c.l.b16 %v4761_v17  ;;  %v4899_v40 = vunpack.c.h.b16 %v4761_v17  ;;  %v4629_v26 = vadd.f32 %v4628_v10, %v4580_v11  ;;  %v4584_v17 = vpop.f32.mrf.mxu2 }
 0x663   : > { %v4670_v15 = vpop.f32.mrf.mxu0 }
 0x664   : > { %v4671_v19 = vadd.f32 %v4670_v15, %v4622_v55  ;;  %v4908_v43 = vpack.c.b16 %v4898_v44, %v4896_v20  ;;  %v14817_v58 = vpack.c.b16 %v4899_v40, %v4897_v6  ;;  %v10408_v6 = vld [vmem:[%s12644_s21 + $0x20] sm:$0xf]  ;;  %v11688_v44 = vld [vmem:[%s12644_s21 + $0x24] sm:$0xf0]  ;;  %v4583_v40 = vadd.f32 %v4582_v25, %v14754_v62 }
 0x665   : > { %v4719_v1 = vpop.f32.mrf.mxu1 }
 0x666   : > { %v4720_v47 = vadd.f32 %v4719_v1, %v4671_v19  ;;  %v11683_v19 = vld [vmem:[%s12644_s21 + $0x4] sm:$0xf]  ;;  %v10394_v1 = vld [vmem:[%s12644_s21 + $0x8] sm:$0xf0] }
 0x667   : > { %v14848_v28 = vor.u32 %v11683_v19, %v10394_v1  ;;  %v15961_v1 = vld [vmem:[#allocation58_spill] sm:$0xff] }
 0x668   : > { %v4764_v39 = vpack.c.bf16 %v4720_v47, %v14593_v29  ;;  %v4632_v47 = vadd.f32 %v4631_v18, %v4583_v40 }
 0x66a   : > { %v4900_v38 = vunpack.c.l.b16 %v4764_v39  ;;  %v4901_v52 = vunpack.c.h.b16 %v4764_v39 }
 0x66b   : > { %v4672_v12 = vpop.f32.mrf.mxu0 }
 0x66c   : > { %v4673_v30 = vadd.f32 %v4672_v12, %v4624_v59 }
 0x66d   : > { %v4721_v42 = vpop.f32.mrf.mxu1 }
 0x66e   : > { %v4722_v31 = vadd.f32 %v4721_v42, %v4673_v30 }
 0x670   : > { %v4767_v29 = vpack.c.bf16 %v4722_v31, %v14598_v45 }
 0x672   : > { %v4902_v36 = vunpack.c.l.b16 %v4767_v29  ;;  %v4903_v5 = vunpack.c.h.b16 %v4767_v29 }
 0x673   : > { %v4675_v4 = vpop.f32.mrf.mxu0 }
 0x674   : > { %v4910_v63 = vpack.c.b16 %v4902_v36, %v4900_v38  ;;  %v4911_v8 = vpack.c.b16 %v4903_v5, %v4901_v52  ;;  %v4676_v27 = vadd.f32 %v4675_v4, %v14751_v23  ;;  %v14838_v23 = vor.u32 %v11688_v44, %v10408_v6  ;;  %v10416_v38 = vld [vmem:[%s12644_s21 + $0x30] sm:$0xf]  ;;  %v11690_v52 = vld [vmem:[%s12644_s21 + $0x34] sm:$0xf0] }
 0x675   : > { %v4724_v46 = vpop.f32.mrf.mxu1  ;;  %v14864_v5 = vor.u32 %v11690_v52, %v10416_v38  ;;  %v4389_v4 = vadd.f32 %v14630_v61, %v14628_v34 }
 0x676   : > { %v4725_v57 = vadd.f32 %v4724_v46, %v4676_v27  ;;  %5002 = vmatpush.bf16.msra.mxu3 %v4910_v63  ;;  %4987 = vmatmul.bf16.gmra.mxu2 %v14838_v23  ;;  %v10402_v63 = vld [vmem:[%s12644_s21 + $0x18] sm:$0xf0] }
 0x677   : > { %5223 = vmatmul.bf16.gmra.mxu0 %v14838_v23 }
 0x678   : > { %v4770_v45 = vpack.c.bf16 %v4725_v57, %v14607_v7  ;;  %v4487_v7 = vadd.f32 %v14759_v35, %v14632_v24  ;;  %v4587_v35 = vpop.f32.mrf.mxu2 }
 0x679   : > { %v4588_v36 = vadd.f32 %v4587_v35, %v14764_v33 }
 0x67a   : > { %5003 = vmatpush.bf16.msra.mxu3 %v4908_v43  ;;  %v5173_v62 = vunpack.c.l.b16 %v4770_v45  ;;  %v5174_v39 = vunpack.c.h.b16 %v4770_v45  ;;  %v4536_v12 = vadd.f32 %v14761_v37, %v4487_v7 }
 0x67b   : > { %v4677_v55 = vpop.f32.mrf.mxu0 }
 0x67c   : > { %v4678_v9 = vadd.f32 %v4677_v55, %v4629_v26  ;;  %v4585_v51 = vadd.f32 %v4584_v17, %v4536_v12 }
 0x67d   : > { %v4726_v20 = vpop.f32.mrf.mxu1 }
 0x67e   : > { %v4727_v15 = vadd.f32 %v4726_v20, %v4678_v9  ;;  %5004 = vmatpush.bf16.msra.mxu3 %v14805_v14  ;;  %v4634_v31 = vadd.f32 %v4633_v16, %v4585_v51  ;;  %v4394_v16 = vadd.f32 %v15961_v1, %v14644_v53 }
 0x680   : > { %v4773_v43 = vpack.c.bf16 %v4727_v15, %v14612_v48 }
 0x682   : > { %v5175_v59 = vunpack.c.l.b16 %v4773_v43  ;;  %v5176_v14 = vunpack.c.h.b16 %v4773_v43  ;;  %5005 = vmatpush.bf16.msra.mxu3 %v14793_v3  ;;  %v4636_v3 = vpop.f32.mrf.mxu3  ;;  %v11687_v43 = vld [vmem:[%s12644_s21 + $0x24] sm:$0xf] }
 0x683   : > { %v4680_v10 = vpop.f32.mrf.mxu0  ;;  %v4637_v33 = vadd.f32 %v4636_v3, %v4588_v36  ;;  %v15966_v36 = vld [vmem:[#allocation29_spill] sm:$0xff] }
 0x684   : > { %v4681_v30 = vadd.f32 %v4680_v10, %v4632_v47  ;;  %v14852_v24 = vpack.c.b16 %v5175_v59, %v5173_v62  ;;  %v14854_v48 = vpack.c.b16 %v5176_v14, %v5174_v39  ;;  %v10410_v47 = vld [vmem:[%s12644_s21 + $0x28] sm:$0xf0]  ;;  %v15962_v62 = vld [vmem:[#allocation38_spill] sm:$0xff]  ;;  %v15963_v39 = vld [vmem:[#allocation37_spill] sm:$0xff] }
 0x685   : > { %v4729_v42 = vpop.f32.mrf.mxu1  ;;  %10422 = vmatmul.msk.bf16.vlgmr.msra.gmra.mxu3 %vm4956_vm1, %v14848_v28  ;;  %v15964_v59 = vld [vmem:[#allocation39_spill] sm:$0xff]  ;;  %v14889_v12 = vor.u32 %v11687_v43, %v10410_v47 }
 0x686   : > { %5060 = vmatpush.bf16.msrb.mxu3 %v4911_v8  ;;  %v4730_v54 = vadd.f32 %v4729_v42, %v4681_v30  ;;  %4992 = vmatmul.bf16.gmra.mxu2 %v14864_v5  ;;  %v4497_v14 = vadd.f32 %v15964_v59, %v15963_v39  ;;  %v5327_v39 = vld [vmem:[#allocation2 + $0x30] sm:$0xff] }
 0x687   : > { %5228 = vmatmul.bf16.gmra.mxu0 %v14864_v5 }
 0x688   : > { %v4776_v37 = vpack.c.bf16 %v4730_v54, %v14621_v32  ;;  %v4589_v32 = vpop.f32.mrf.mxu2 }
 0x68a   : > { %5061 = vmatpush.bf16.msrb.mxu3 %v14817_v58  ;;  %v11685_v58 = vld [vmem:[%s12644_s21 + $0x14] sm:$0xf]  ;;  %v5177_v46 = vunpack.c.l.b16 %v4776_v37  ;;  %v5178_v18 = vunpack.c.h.b16 %v4776_v37  ;;  %v4638_v11 = vpop.f32.mrf.mxu3  ;;  %v15965_v37 = vld [vmem:[#allocation41_spill] sm:$0xff] }
 0x68b   : > { %v4682_v41 = vpop.f32.mrf.mxu0  ;;  %v14875_v27 = vor.u32 %v11685_v58, %v10402_v63  ;;  %v4546_v53 = vadd.f32 %v15965_v37, %v4497_v14 }
 0x68c   : > { %v4683_v29 = vadd.f32 %v4682_v41, %v4634_v31 }
 0x68d   : > { %v4731_v25 = vpop.f32.mrf.mxu1 }
 0x68e   : > { %5062 = vmatpush.bf16.msrb.mxu3 %v14807_v22  ;;  %v4732_v49 = vadd.f32 %v4731_v25, %v4683_v29  ;;  %v4492_v22 = vadd.f32 %v14769_v2, %v14648_v21 }
 0x690   : > { %v4779_v8 = vpack.c.bf16 %v4732_v49, %v4389_v4  ;;  %v4541_v45 = vadd.f32 %v14771_v0, %v4492_v22  ;;  %v4592_v20 = vpop.f32.mrf.mxu2  ;;  %v15967_v22 = vld [vmem:[#allocation33_spill] sm:$0xff] }
 0x691   : > { %v4593_v0 = vadd.f32 %v4592_v20, %v14774_v56 }
 0x692   : > { %5063 = vmatpush.bf16.msrb.mxu3 %v14795_v13  ;;  %v5179_v34 = vunpack.c.l.b16 %v4779_v8  ;;  %v5180_v61 = vunpack.c.h.b16 %v4779_v8  ;;  %v4590_v2 = vadd.f32 %v4589_v32, %v4541_v45  ;;  %v4641_v19 = vpop.f32.mrf.mxu3  ;;  %v15968_v8 = vld [vmem:[#allocation34_spill] sm:$0xff] }
 0x693   : > { %v4685_v57 = vpop.f32.mrf.mxu0  ;;  %v4642_v10 = vadd.f32 %v4641_v19, %v4593_v0  ;;  %v5323_v0 = vld [vmem:[#allocation2 + $0xd8] sm:$0xff] }
 0x694   : > { %v4686_v13 = vadd.f32 %v4685_v57, %v4637_v33  ;;  %v5191_v17 = vpack.c.b16 %v5179_v34, %v5177_v46  ;;  %v5192_v21 = vpack.c.b16 %v5180_v61, %v5178_v18  ;;  %v4639_v6 = vadd.f32 %v4638_v11, %v4590_v2  ;;  %v11689_v18 = vld [vmem:[%s12644_s21 + $0x34] sm:$0xf]  ;;  %v10418_v34 = vld [vmem:[%s12644_s21 + $0x38] sm:$0xf0] }
 0x695   : > { %v4734_v26 = vpop.f32.mrf.mxu1  ;;  %10423 = vmatmul.msk.bf16.gmra.mxu3 %vm4956_vm1, %v14875_v27  ;;  %v4399_v33 = vadd.f32 %v15968_v8, %v15967_v22  ;;  %v14900_v11 = vor.u32 %v11689_v18, %v10418_v34  ;;  %v5326_v18 = vld [vmem:[#allocation2 + $0x68] sm:$0xff] }
 0x696   : > { %v4735_v55 = vadd.f32 %v4734_v26, %v4686_v13  ;;  %5035 = vmatmul.bf16.vlgmr.msrb.gmra.mxu2 %v15962_v62 }
 0x698   : > { %v4782_v9 = vpack.c.bf16 %v4735_v55, %v14639_v50  ;;  %v4594_v51 = vpop.f32.mrf.mxu2 }
 0x699   : > { %v4595_v25 = vadd.f32 %v4594_v51, %v4546_v53  ;;  %v5333_v53 = vld [vmem:[#allocation2 + $0x60] sm:$0xff] }
 0x69a   : > { %v5181_v30 = vunpack.c.l.b16 %v4782_v9  ;;  %v5182_v42 = vunpack.c.h.b16 %v4782_v9  ;;  %v4643_v52 = vpop.f32.mrf.mxu3 }
 0x69b   : > { %v4687_v44 = vpop.f32.mrf.mxu0  ;;  %v4644_v49 = vadd.f32 %v4643_v52, %v4595_v25 }
 0x69c   : > { %v4688_v40 = vadd.f32 %v4687_v44, %v4639_v6  ;;  %v5321_v6 = vld [vmem:[#allocation2 + $0xb0] sm:$0xff] }
 0x69d   : > { %v4736_v15 = vpop.f32.mrf.mxu1 }
 0x69e   : > { %v4737_v7 = vadd.f32 %v4736_v15, %v4688_v40 }
 0x6a0   : > { %v4785_v50 = vpack.c.bf16 %v4737_v7, %v4394_v16  ;;  %v5325_v7 = vld [vmem:[#allocation2 + $0x50] sm:$0xff] }
 0x6a2   : > { %v5183_v35 = vunpack.c.l.b16 %v4785_v50  ;;  %v5184_v56 = vunpack.c.h.b16 %v4785_v50  ;;  %v5329_v50 = vld [vmem:[#allocation2 + $0x80] sm:$0xff] }
 0x6a3   : > { %v4690_v54 = vpop.f32.mrf.mxu0 }
 0x6a4   : > { %v4691_v3 = vadd.f32 %v4690_v54, %v4642_v10  ;;  %v5193_v41 = vpack.c.b16 %v5183_v35, %v5181_v30  ;;  %v5194_v29 = vpack.c.b16 %v5184_v56, %v5182_v42  ;;  %v5331_v35 = vld [vmem:[#allocation2 + $0xe8] sm:$0xff] }
 0x6a5   : > { %v4739_v31 = vpop.f32.mrf.mxu1  ;;  %10424 = vmatmul.msk.bf16.gmra.mxu3 %vm4956_vm1, %v14889_v12 }
 0x6a6   : > { %v4740_v38 = vadd.f32 %v4739_v31, %v4691_v3  ;;  %5040 = vmatmul.bf16.gmra.mxu2 %v14825_v60 }
 0x6a8   : > { %v4788_v4 = vpack.c.bf16 %v4740_v38, %v15966_v36 }
 0x6aa   : > { %v5185_v57 = vunpack.c.l.b16 %v4788_v4  ;;  %v5186_v45 = vunpack.c.h.b16 %v4788_v4  ;;  %v5322_v4 = vld [vmem:[#allocation2] sm:$0xff] }
 0x6ab   : > { %v4692_v58 = vpop.f32.mrf.mxu0 }
 0x6ac   : > { %v4693_v63 = vadd.f32 %v4692_v58, %v4644_v49 }
 0x6ad   : > { %v4741_v32 = vpop.f32.mrf.mxu1 }
 0x6ae   : > { %v4742_v46 = vadd.f32 %v4741_v32, %v4693_v63  ;;  %v5324_v32 = vld [vmem:[#allocation2 + $0x18] sm:$0xff] }
 0x6b0   : > { %v4791_v61 = vpack.c.bf16 %v4742_v46, %v4399_v33 }
 0x6b2   : > { %v5187_v13 = vunpack.c.l.b16 %v4791_v61  ;;  %v5188_v26 = vunpack.c.h.b16 %v4791_v61 }
 0x6b4   : > { %v5195_v2 = vpack.c.b16 %v5187_v13, %v5185_v57  ;;  %v5196_v55 = vpack.c.b16 %v5188_v26, %v5186_v45  ;;  %v5328_v45 = vld [vmem:[#allocation2 + $0x48] sm:$0xff]  ;;  %v5214_v26 = vpop.f32.mrf.mxu0 }
 0x6b5   : > { %10425 = vmatmul.msk.bf16.gmra.mxu3 %vm4956_vm1, %v14900_v11 }
 0x6b6   : > { %5238 = vmatpush.bf16.msrb.mxu1 %v5195_v2  ;;  %5296 = vmatpush.bf16.msra.mxu3 %v5196_v55 }
 0x6b7   : > { %5045 = vmatmul.bf16.gmra.mxu2 %v14838_v23 }
 0x6ba   : > { %5239 = vmatpush.bf16.msrb.mxu1 %v5193_v41  ;;  %5297 = vmatpush.bf16.msra.mxu3 %v5194_v29  ;;  %v5335_v29 = vld [vmem:[#allocation2 + $0x8] sm:$0xff] }
 0x6be   : > { %5240 = vmatpush.bf16.msrb.mxu1 %v5191_v17  ;;  %5298 = vmatpush.bf16.msra.mxu3 %v5192_v21  ;;  %v4978_v17 = vpop.f32.mrf.mxu2 }
 0x6c2   : > { %5241 = vmatpush.bf16.msrb.mxu1 %v14852_v24  ;;  %5299 = vmatpush.bf16.msra.mxu3 %v14854_v48 }
 0x6c5   : > { %10426 = vmatmul.msk.bf16.vlgmr.msrb.gmra.mxu3 %vm4956_vm1, %v14848_v28  ;;  %10430 = vmatmul.msk.bf16.vlgmr.msrb.gmra.mxu1 %vm4956_vm1, %v14848_v28 }
 0x6c6   : > { %v4980_v24 = vpop.f32.mrf.mxu2 }
 0x6c7   : > { %5050 = vmatmul.bf16.gmra.mxu2 %v14864_v5 }
 0x6d5   : > { %10427 = vmatmul.msk.bf16.gmra.mxu3 %vm4956_vm1, %v14875_v27  ;;  %10431 = vmatmul.msk.bf16.gmra.mxu1 %vm4956_vm1, %v14875_v27 }
 0x6d7   : > { %5271 = vmatmul.bf16.vlgmr.msra.gmra.mxu2 %v15962_v62 }
 0x6da   : > { %v4983_v48 = vpop.f32.mrf.mxu2 }
 0x6e2   : > { %v4985_v21 = vpop.f32.mrf.mxu2 }
 0x6e5   : > { %10428 = vmatmul.msk.bf16.gmra.mxu3 %vm4956_vm1, %v14889_v12  ;;  %10432 = vmatmul.msk.bf16.gmra.mxu1 %vm4956_vm1, %v14889_v12 }
 0x6e7   : > { %5276 = vmatmul.bf16.gmra.mxu2 %v14825_v60 }
 0x6f5   : > { %10429 = vmatmul.msk.bf16.gmra.mxu3 %vm4956_vm1, %v14900_v11  ;;  %10433 = vmatmul.msk.bf16.gmra.mxu1 %vm4956_vm1, %v14900_v11 }
 0x6f7   : > { %5281 = vmatmul.bf16.gmra.mxu2 %v14838_v23 }
 0x6f9   : > { %v4988_v9 = vpop.f32.mrf.mxu2 }
 0x701   : > { %v4990_v15 = vpop.f32.mrf.mxu2 }
 0x705   : > { %10434 = vmatmul.msk.bf16.vlgmr.msra.gmra.mxu3 %vm4956_vm1, %v14848_v28 }
 0x707   : > { %5286 = vmatmul.bf16.gmra.mxu2 %v14864_v5 }
 0x708   : > { %v5007_v20 = vpop.f32.mrf.mxu3 }
 0x709   : > { %v5008_v44 = vadd.f32 %v5007_v20, %v4978_v17  ;;  %v4993_v23 = vpop.f32.mrf.mxu2  ;;  %v5330_v20 = vld [vmem:[#allocation2 + $0x88] sm:$0xff] }
 0x70b   : > { %v5353_v40 = vadd.f32 %v5321_v6, %v5008_v44  ;;  %v5216_v44 = vpop.f32.mrf.mxu0 }
 0x70d   : > { %5385 = vst [vmem:[#allocation2 + $0xb0] sm:$0xff] %v5353_v40 }
 0x710   : > { %v5009_v60 = vpop.f32.mrf.mxu3 }
 0x711   : > { %v5010_v19 = vadd.f32 %v5009_v60, %v4980_v24  ;;  %v4995_v47 = vpop.f32.mrf.mxu2 }
 0x713   : > { %v5355_v1 = vadd.f32 %v5323_v0, %v5010_v19  ;;  %v5339_v0 = vld [vmem:[#allocation2 + $0x40] sm:$0xff] }
 0x715   : > { %5387 = vst [vmem:[#allocation2 + $0xd8] sm:$0xff] %v5355_v1  ;;  %10435 = vmatmul.msk.bf16.gmra.mxu3 %vm4956_vm1, %v14875_v27 }
 0x718   : > { %v5012_v16 = vpop.f32.mrf.mxu3 }
 0x719   : > { %v5013_v28 = vadd.f32 %v5012_v16, %v4983_v48  ;;  %v5036_v30 = vpop.f32.mrf.mxu2  ;;  %v5337_v48 = vld [vmem:[#allocation2 + $0x38] sm:$0xff] }
 0x71a   : > { %v5332_v16 = vld [vmem:[#allocation2 + $0xb8] sm:$0xff] }
 0x71b   : > { %v5357_v43 = vadd.f32 %v5325_v7, %v5013_v28  ;;  %v5219_v28 = vpop.f32.mrf.mxu0 }
 0x71d   : > { %5389 = vst [vmem:[#allocation2 + $0x50] sm:$0xff] %v5357_v43 }
 0x720   : > { %v5014_v62 = vpop.f32.mrf.mxu3 }
 0x721   : > { %v5015_v59 = vadd.f32 %v5014_v62, %v4985_v21  ;;  %v5038_v54 = vpop.f32.mrf.mxu2 }
 0x723   : > { %v5359_v14 = vadd.f32 %v5327_v39, %v5015_v59  ;;  %v5341_v39 = vld [vmem:[#allocation2 + $0xe0] sm:$0xff] }
 0x725   : > { %5391 = vst [vmem:[#allocation2 + $0x30] sm:$0xff] %v5359_v14  ;;  %10436 = vmatmul.msk.bf16.gmra.mxu3 %vm4956_vm1, %v14889_v12 }
 0x728   : > { %v5017_v5 = vpop.f32.mrf.mxu3 }
 0x729   : > { %v5018_v10 = vadd.f32 %v5017_v5, %v4988_v9  ;;  %v5041_v12 = vpop.f32.mrf.mxu2  ;;  %v5334_v5 = vld [vmem:[#allocation2 + $0xf0] sm:$0xff] }
 0x72b   : > { %v5361_v27 = vadd.f32 %v5329_v50, %v5018_v10 }
 0x72d   : > { %5393 = vst [vmem:[#allocation2 + $0x80] sm:$0xff] %v5361_v27 }
 0x730   : > { %v5019_v42 = vpop.f32.mrf.mxu3 }
 0x731   : > { %v5020_v56 = vadd.f32 %v5019_v42, %v4990_v15  ;;  %v5043_v52 = vpop.f32.mrf.mxu2 }
 0x733   : > { %v5363_v51 = vadd.f32 %v5331_v35, %v5020_v56  ;;  %v5343_v56 = vld [vmem:[#allocation2 + $0x70] sm:$0xff] }
 0x735   : > { %5395 = vst [vmem:[#allocation2 + $0xe8] sm:$0xff] %v5363_v51  ;;  %10437 = vmatmul.msk.bf16.gmra.mxu3 %vm4956_vm1, %v14900_v11 }
 0x738   : > { %v5022_v37 = vpop.f32.mrf.mxu3 }
 0x739   : > { %v5023_v3 = vadd.f32 %v5022_v37, %v4993_v23  ;;  %v5336_v37 = vld [vmem:[#allocation2 + $0x78] sm:$0xff] }
 0x73a   : > { %v5046_v8 = vpop.f32.mrf.mxu2 }
 0x73b   : > { %v5365_v31 = vadd.f32 %v5333_v53, %v5023_v3 }
 0x73d   : > { %5397 = vst [vmem:[#allocation2 + $0x60] sm:$0xff] %v5365_v31 }
 0x740   : > { %v5024_v41 = vpop.f32.mrf.mxu3 }
 0x741   : > { %v5025_v25 = vadd.f32 %v5024_v41, %v4995_v47 }
 0x742   : > { %v5048_v11 = vpop.f32.mrf.mxu2  ;;  %v5243_v2 = vpop.f32.mrf.mxu1 }
 0x743   : > { %v5367_v38 = vadd.f32 %v5335_v29, %v5025_v25  ;;  %v5244_v24 = vadd.f32 %v5243_v2, %v5214_v26  ;;  %v5345_v25 = vld [vmem:[#allocation2 + $0xa8] sm:$0xff] }
 0x745   : > { %5399 = vst [vmem:[#allocation2 + $0x8] sm:$0xff] %v5367_v38  ;;  %v5369_v21 = vadd.f32 %v5337_v48, %v5244_v24 }
 0x747   : > { %5401 = vst [vmem:[#allocation2 + $0x38] sm:$0xff] %v5369_v21 }
 0x748   : > { %v5065_v36 = vpop.f32.mrf.mxu3 }
 0x749   : > { %v5066_v49 = vadd.f32 %v5065_v36, %v5036_v30  ;;  %v5221_v30 = vpop.f32.mrf.mxu0  ;;  %v5338_v36 = vld [vmem:[#allocation2 + $0x58] sm:$0xff] }
 0x74a   : > { %v5051_v17 = vpop.f32.mrf.mxu2  ;;  %v5245_v40 = vpop.f32.mrf.mxu1 }
 0x74b   : > { %v5354_v58 = vadd.f32 %v5322_v4, %v5066_v49  ;;  %v5246_v60 = vadd.f32 %v5245_v40, %v5216_v44 }
 0x74d   : > { %5386 = vst [vmem:[#allocation2] sm:$0xff] %v5354_v58  ;;  %v5371_v19 = vadd.f32 %v5339_v0, %v5246_v60 }
 0x74f   : > { %5403 = vst [vmem:[#allocation2 + $0x40] sm:$0xff] %v5371_v19 }
 0x750   : > { %v5067_v63 = vpop.f32.mrf.mxu3 }
 0x751   : > { %v5068_v22 = vadd.f32 %v5067_v63, %v5038_v54  ;;  %v5224_v3 = vpop.f32.mrf.mxu0 }
 0x752   : > { %v5053_v1 = vpop.f32.mrf.mxu2  ;;  %v5248_v43 = vpop.f32.mrf.mxu1 }
 0x753   : > { %v5356_v33 = vadd.f32 %v5324_v32, %v5068_v22  ;;  %v5249_v62 = vadd.f32 %v5248_v43, %v5219_v28  ;;  %v5347_v22 = vld [vmem:[#allocation2 + $0x10] sm:$0xff] }
 0x755   : > { %5388 = vst [vmem:[#allocation2 + $0x18] sm:$0xff] %v5356_v33  ;;  %v5373_v59 = vadd.f32 %v5341_v39, %v5249_v62 }
 0x757   : > { %5405 = vst [vmem:[#allocation2 + $0xe0] sm:$0xff] %v5373_v59 }
 0x758   : > { %v5070_v46 = vpop.f32.mrf.mxu3 }
 0x759   : > { %v5071_v34 = vadd.f32 %v5070_v46, %v5041_v12  ;;  %v5226_v49 = vpop.f32.mrf.mxu0 }
 0x75a   : > { %v5272_v10 = vpop.f32.mrf.mxu2  ;;  %v5250_v27 = vpop.f32.mrf.mxu1 }
 0x75b   : > { %v5358_v61 = vadd.f32 %v5326_v18, %v5071_v34  ;;  %v5251_v35 = vadd.f32 %v5250_v27, %v5221_v30  ;;  %v5340_v18 = vld [vmem:[#allocation2 + $0xc8] sm:$0xff] }
 0x75d   : > { %5390 = vst [vmem:[#allocation2 + $0x68] sm:$0xff] %v5358_v61  ;;  %v5375_v51 = vadd.f32 %v5343_v56, %v5251_v35 }
 0x75f   : > { %5407 = vst [vmem:[#allocation2 + $0x70] sm:$0xff] %v5375_v51 }
 0x760   : > { %v5072_v57 = vpop.f32.mrf.mxu3 }
 0x761   : > { %v5073_v13 = vadd.f32 %v5072_v57, %v5043_v52  ;;  %v5229_v61 = vpop.f32.mrf.mxu0 }
 0x762   : > { %v5253_v31 = vpop.f32.mrf.mxu1  ;;  %v5274_v41 = vpop.f32.mrf.mxu2 }
 0x763   : > { %v5360_v55 = vadd.f32 %v5328_v45, %v5073_v13  ;;  %v5254_v29 = vadd.f32 %v5253_v31, %v5224_v3  ;;  %v5349_v13 = vld [vmem:[#allocation2 + $0xa0] sm:$0xff] }
 0x765   : > { %5392 = vst [vmem:[#allocation2 + $0x48] sm:$0xff] %v5360_v55  ;;  %v5377_v38 = vadd.f32 %v5345_v25, %v5254_v29  ;;  %v5342_v55 = vld [vmem:[#allocation2 + $0x90] sm:$0xff] }
 0x767   : > { %5409 = vst [vmem:[#allocation2 + $0xa8] sm:$0xff] %v5377_v38 }
 0x768   : > { %v5075_v9 = vpop.f32.mrf.mxu3 }
 0x769   : > { %v5076_v6 = vadd.f32 %v5075_v9, %v5046_v8  ;;  %v5231_v48 = vpop.f32.mrf.mxu0 }
 0x76a   : > { %v5255_v58 = vpop.f32.mrf.mxu1  ;;  %v5277_v33 = vpop.f32.mrf.mxu2 }
 0x76b   : > { %v5362_v15 = vadd.f32 %v5330_v20, %v5076_v6  ;;  %v5256_v32 = vadd.f32 %v5255_v58, %v5226_v49  ;;  %v5351_v6 = vld [vmem:[#allocation2 + $0x20] sm:$0xff] }
 0x76d   : > { %5394 = vst [vmem:[#allocation2 + $0x88] sm:$0xff] %v5362_v15  ;;  %v5379_v8 = vadd.f32 %v5347_v22, %v5256_v32  ;;  %v5344_v15 = vld [vmem:[#allocation2 + $0xc0] sm:$0xff] }
 0x76f   : > { %5411 = vst [vmem:[#allocation2 + $0x10] sm:$0xff] %v5379_v8 }
 0x770   : > { %v5077_v23 = vpop.f32.mrf.mxu3 }
 0x771   : > { %v5078_v7 = vadd.f32 %v5077_v23, %v5048_v11  ;;  %v5346_v23 = vld [vmem:[#allocation2 + $0xd0] sm:$0xff] }
 0x772   : > { %v5258_v11 = vpop.f32.mrf.mxu1 }
 0x773   : > { %v5364_v47 = vadd.f32 %v5332_v16, %v5078_v7  ;;  %v5259_v45 = vadd.f32 %v5258_v11, %v5229_v61 }
 0x775   : > { %5396 = vst [vmem:[#allocation2 + $0xb8] sm:$0xff] %v5364_v47  ;;  %v5381_v26 = vadd.f32 %v5349_v13, %v5259_v45  ;;  %v5348_v47 = vld [vmem:[#allocation2 + $0x28] sm:$0xff] }
 0x777   : > { %5413 = vst [vmem:[#allocation2 + $0xa0] sm:$0xff] %v5381_v26 }
 0x778   : > { %v5080_v14 = vpop.f32.mrf.mxu3 }
 0x779   : > { %v5081_v50 = vadd.f32 %v5080_v14, %v5051_v17  ;;  %v5279_v17 = vpop.f32.mrf.mxu2 }
 0x77a   : > { %v5260_v21 = vpop.f32.mrf.mxu1 }
 0x77b   : > { %v5366_v42 = vadd.f32 %v5334_v5, %v5081_v50  ;;  %v5261_v20 = vadd.f32 %v5260_v21, %v5231_v48  ;;  %v5350_v5 = vld [vmem:[#allocation2 + $0xf8] sm:$0xff] }
 0x77d   : > { %5398 = vst [vmem:[#allocation2 + $0xf0] sm:$0xff] %v5366_v42  ;;  %v5383_v44 = vadd.f32 %v5351_v6, %v5261_v20  ;;  %v5352_v42 = vld [vmem:[#allocation2 + $0x98] sm:$0xff] }
 0x77f   : > { %5415 = vst [vmem:[#allocation2 + $0x20] sm:$0xff] %v5383_v44 }
 0x780   : > { %v5082_v54 = vpop.f32.mrf.mxu3 }
 0x781   : > { %v5083_v53 = vadd.f32 %v5082_v54, %v5053_v1  ;;  %v5282_v0 = vpop.f32.mrf.mxu2 }
 0x783   : > { %v5368_v12 = vadd.f32 %v5336_v37, %v5083_v53 }
 0x785   : > { %5400 = vst [vmem:[#allocation2 + $0x78] sm:$0xff] %v5368_v12 }
 0x788   : > { %v5301_v52 = vpop.f32.mrf.mxu3 }
 0x789   : > { %v5302_v4 = vadd.f32 %v5301_v52, %v5272_v10  ;;  %v5284_v28 = vpop.f32.mrf.mxu2 }
 0x78b   : > { %v5370_v63 = vadd.f32 %v5338_v36, %v5302_v4 }
 0x78d   : > { %5402 = vst [vmem:[#allocation2 + $0x58] sm:$0xff] %v5370_v63 }
 0x790   : > { %v5303_v46 = vpop.f32.mrf.mxu3 }
 0x791   : > { %v5304_v34 = vadd.f32 %v5303_v46, %v5274_v41  ;;  %v5287_v59 = vpop.f32.mrf.mxu2 }
 0x793   : > { %v5372_v57 = vadd.f32 %v5340_v18, %v5304_v34 }
 0x795   : > { %5404 = vst [vmem:[#allocation2 + $0xc8] sm:$0xff] %v5372_v57 }
 0x798   : > { %v5306_v2 = vpop.f32.mrf.mxu3 }
 0x799   : > { %v5307_v24 = vadd.f32 %v5306_v2, %v5277_v33  ;;  %v5289_v30 = vpop.f32.mrf.mxu2 }
 0x79b   : > { %v5374_v9 = vadd.f32 %v5342_v55, %v5307_v24 }
 0x79d   : > { %5406 = vst [vmem:[#allocation2 + $0x90] sm:$0xff] %v5374_v9 }
 0x7a0   : > { %v5308_v40 = vpop.f32.mrf.mxu3 }
 0x7a1   : > { %v5309_v60 = vadd.f32 %v5308_v40, %v5279_v17 }
 0x7a3   : > { %v5376_v19 = vadd.f32 %v5344_v15, %v5309_v60 }
 0x7a5   : > { %5408 = vst [vmem:[#allocation2 + $0xc0] sm:$0xff] %v5376_v19 }
 0x7a8   : > { %v5311_v1 = vpop.f32.mrf.mxu3 }
 0x7a9   : > { %v5312_v16 = vadd.f32 %v5311_v1, %v5282_v0 }
 0x7ab   : > { %v5378_v7 = vadd.f32 %v5346_v23, %v5312_v16 }
 0x7ad   : > { %5410 = vst [vmem:[#allocation2 + $0xd0] sm:$0xff] %v5378_v7 }
 0x7b0   : > { %v5313_v43 = vpop.f32.mrf.mxu3 }
 0x7b1   : > { %v5314_v62 = vadd.f32 %v5313_v43, %v5284_v28 }
 0x7b3   : > { %v5380_v39 = vadd.f32 %v5348_v47, %v5314_v62 }
 0x7b5   : > { %5412 = vst [vmem:[#allocation2 + $0x28] sm:$0xff] %v5380_v39 }
 0x7b8   : > { %v5316_v14 = vpop.f32.mrf.mxu3 }
 0x7b9   : > { %v5317_v50 = vadd.f32 %v5316_v14, %v5287_v59 }
 0x7bb   : > { %v5382_v10 = vadd.f32 %v5350_v5, %v5317_v50 }
 0x7bd   : > { %5414 = vst [vmem:[#allocation2 + $0xf8] sm:$0xff] %v5382_v10 }
 0x7c0   : > { %v5318_v27 = vpop.f32.mrf.mxu3 }
 0x7c1   : > { %v5319_v35 = vadd.f32 %v5318_v27, %v5289_v30  ;;  %5420 = sbr.rel (%p10438_p1) target bundleno = 3310 (0xcee), region = 104 }
 0x7c3   : > { %v5384_v56 = vadd.f32 %v5352_v42, %v5319_v35 }
 0x7c5   : > { %5416 = vst [vmem:[#allocation2 + $0x98] sm:$0xff] %v5384_v56 }
 0x7c6   : > { %v10693_v51 = vld [vmem:[#allocation9 + $0x1f8] sm:$0xf]  ;;  %v11758_v54 = vld [vmem:[#allocation9 + $0x218] sm:$0xf0]  ;;  %v10695_v12 = vld [vmem:[#allocation9 + $0x21c] sm:$0xf0] }
 0x7c7   : > { %v10981_v37 = vld [vmem:[#allocation9 + $0x438] sm:$0xf]  ;;  %v10694_v53 = vor.u32 %v11758_v54, %v10693_v51  ;;  %v11830_v3 = vld [vmem:[#allocation9 + $0x458] sm:$0xf0]  ;;  %v10983_v38 = vld [vmem:[#allocation9 + $0x45c] sm:$0xf0] }
 0x7c8   : > { %v11754_v31 = vld [vmem:[#allocation9 + $0x1fc] sm:$0xf]  ;;  %v10982_v41 = vor.u32 %v11830_v3, %v10981_v37  ;;  %v10657_v52 = vld [vmem:[#allocation9 + $0x1b0] sm:$0xf]  ;;  %v11749_v4 = vld [vmem:[#allocation9 + $0x1d0] sm:$0xf0] }
 0x7c9   : > { %v10698_v29 = vor.u32 %v11754_v31, %v10695_v12  ;;  %v11826_v25 = vld [vmem:[#allocation9 + $0x43c] sm:$0xf]  ;;  %6435 = vmatpush.bf16.msra.mxu0 %v10694_v53  ;;  %v10945_v49 = vld [vmem:[#allocation9 + $0x3f0] sm:$0xf]  ;;  %v11821_v58 = vld [vmem:[#allocation9 + $0x410] sm:$0xf0]  ;;  %v10658_v63 = vor.u32 %v11749_v4, %v10657_v52 }
 0x7ca   : > { %v10986_v36 = vor.u32 %v11826_v25, %v10983_v38  ;;  %6484 = vmatpush.bf16.msra.mxu1 %v10982_v41  ;;  %v10946_v32 = vor.u32 %v11821_v58, %v10945_v49  ;;  %v11745_v22 = vld [vmem:[#allocation9 + $0x1b4] sm:$0xf]  ;;  %v10659_v8 = vld [vmem:[#allocation9 + $0x1d4] sm:$0xf0]  ;;  %v10621_v34 = vld [vmem:[#allocation9 + $0x168] sm:$0xf] }
 0x7cb   : > { %6533 = vmatpush.bf16.msra.mxu2 %v10698_v29  ;;  %v11817_v33 = vld [vmem:[#allocation9 + $0x3f4] sm:$0xf]  ;;  %v10662_v46 = vor.u32 %v11745_v22, %v10659_v8  ;;  %v10947_v18 = vld [vmem:[#allocation9 + $0x414] sm:$0xf0]  ;;  %v11740_v61 = vld [vmem:[#allocation9 + $0x188] sm:$0xf0] }
 0x7cc   : > { %6582 = vmatpush.bf16.msra.mxu3 %v10986_v36  ;;  %v10950_v11 = vor.u32 %v11817_v33, %v10947_v18  ;;  %v10909_v57 = vld [vmem:[#allocation9 + $0x3a8] sm:$0xf]  ;;  %v11812_v45 = vld [vmem:[#allocation9 + $0x3c8] sm:$0xf0]  ;;  %v10622_v26 = vor.u32 %v11740_v61, %v10621_v34  ;;  %v10623_v2 = vld [vmem:[#allocation9 + $0x18c] sm:$0xf0] }
 0x7cd   : > { %v11736_v13 = vld [vmem:[#allocation9 + $0x16c] sm:$0xf]  ;;  %6436 = vmatpush.bf16.msra.mxu0 %v10658_v63  ;;  %v10911_v17 = vld [vmem:[#allocation9 + $0x3cc] sm:$0xf0]  ;;  %v10910_v24 = vor.u32 %v11812_v45, %v10909_v57  ;;  %v10585_v21 = vld [vmem:[#allocation9 + $0x120] sm:$0xf] }
 0x7ce   : > { %v11808_v55 = vld [vmem:[#allocation9 + $0x3ac] sm:$0xf]  ;;  %6485 = vmatpush.bf16.msra.mxu1 %v10946_v32  ;;  %v10626_v48 = vor.u32 %v11736_v13, %v10623_v2  ;;  %v11731_v9 = vld [vmem:[#allocation9 + $0x140] sm:$0xf0]  ;;  %v10873_v20 = vld [vmem:[#allocation9 + $0x360] sm:$0xf] }
 0x7cf   : > { %6534 = vmatpush.bf16.msra.mxu2 %v10662_v46  ;;  %v10914_v6 = vor.u32 %v11808_v55, %v10911_v17  ;;  %v11803_v44 = vld [vmem:[#allocation9 + $0x380] sm:$0xf0]  ;;  %v10587_v15 = vld [vmem:[#allocation9 + $0x144] sm:$0xf0]  ;;  %v10586_v19 = vor.u32 %v11731_v9, %v10585_v21  ;;  %v10549_v16 = vld [vmem:[#allocation9 + $0xd8] sm:$0xf] }
 0x7d0   : > { %6583 = vmatpush.bf16.msra.mxu3 %v10950_v11  ;;  %v11727_v40 = vld [vmem:[#allocation9 + $0x124] sm:$0xf]  ;;  %v10875_v0 = vld [vmem:[#allocation9 + $0x384] sm:$0xf0]  ;;  %v10874_v1 = vor.u32 %v11803_v44, %v10873_v20  ;;  %v11722_v7 = vld [vmem:[#allocation9 + $0xf8] sm:$0xf0] }
 0x7d1   : > { %v11799_v60 = vld [vmem:[#allocation9 + $0x364] sm:$0xf]  ;;  %6437 = vmatpush.bf16.msra.mxu0 %v10622_v26  ;;  %v10590_v23 = vor.u32 %v11727_v40, %v10587_v15  ;;  %v10837_v28 = vld [vmem:[#allocation9 + $0x318] sm:$0xf]  ;;  %v11794_v47 = vld [vmem:[#allocation9 + $0x338] sm:$0xf0]  ;;  %v10550_v5 = vor.u32 %v11722_v7, %v10549_v16 }
 0x7d2   : > { %6486 = vmatpush.bf16.msra.mxu1 %v10910_v24  ;;  %v10878_v43 = vor.u32 %v11799_v60, %v10875_v0  ;;  %v11718_v62 = vld [vmem:[#allocation9 + $0xdc] sm:$0xf]  ;;  %v10551_v39 = vld [vmem:[#allocation9 + $0xfc] sm:$0xf0]  ;;  %v10513_v50 = vld [vmem:[#allocation9 + $0x90] sm:$0xf]  ;;  %v10838_v10 = vor.u32 %v11794_v47, %v10837_v28 }
 0x7d3   : > { %6535 = vmatpush.bf16.msra.mxu2 %v10626_v48  ;;  %v11790_v59 = vld [vmem:[#allocation9 + $0x31c] sm:$0xf]  ;;  %v10839_v14 = vld [vmem:[#allocation9 + $0x33c] sm:$0xf0]  ;;  %v10554_v30 = vor.u32 %v11718_v62, %v10551_v39  ;;  %v11713_v27 = vld [vmem:[#allocation9 + $0xb0] sm:$0xf0] }
 0x7d4   : > { %6584 = vmatpush.bf16.msra.mxu3 %v10914_v6  ;;  %v10801_v42 = vld [vmem:[#allocation9 + $0x2d0] sm:$0xf]  ;;  %v11785_v35 = vld [vmem:[#allocation9 + $0x2f0] sm:$0xf0]  ;;  %v10842_v56 = vor.u32 %v11790_v59, %v10839_v14  ;;  %v10515_v54 = vld [vmem:[#allocation9 + $0xb4] sm:$0xf0]  ;;  %v10514_v12 = vor.u32 %v11713_v27, %v10513_v50 }
 0x7d5   : > { %6438 = vmatpush.bf16.msra.mxu0 %v10586_v19  ;;  %v11709_v51 = vld [vmem:[#allocation9 + $0x94] sm:$0xf]  ;;  %v10803_v53 = vld [vmem:[#allocation9 + $0x2f4] sm:$0xf0]  ;;  %v10477_v3 = vld [vmem:[#allocation9 + $0x48] sm:$0xf]  ;;  %v10802_v38 = vor.u32 %v11785_v35, %v10801_v42 }
 0x7d6   : > { %6487 = vmatpush.bf16.msra.mxu1 %v10874_v1  ;;  %v11781_v37 = vld [vmem:[#allocation9 + $0x2d4] sm:$0xf]  ;;  %v11704_v31 = vld [vmem:[#allocation9 + $0x68] sm:$0xf0]  ;;  %v10765_v41 = vld [vmem:[#allocation9 + $0x288] sm:$0xf]  ;;  %v10518_v52 = vor.u32 %v11709_v51, %v10515_v54 }
 0x7d7   : > { %6536 = vmatpush.bf16.msra.mxu2 %v10590_v23  ;;  %v11776_v29 = vld [vmem:[#allocation9 + $0x2a8] sm:$0xf0]  ;;  %v10479_v36 = vld [vmem:[#allocation9 + $0x6c] sm:$0xf0]  ;;  %v10806_v58 = vor.u32 %v11781_v37, %v10803_v53  ;;  %v10441_v63 = vld [vmem:[#allocation9] sm:$0xf]  ;;  %v10478_v34 = vor.u32 %v11704_v31, %v10477_v3 }
 0x7d8   : > { %6585 = vmatpush.bf16.msra.mxu3 %v10878_v43  ;;  %v11700_v25 = vld [vmem:[#allocation9 + $0x4c] sm:$0xf]  ;;  %v10767_v49 = vld [vmem:[#allocation9 + $0x2ac] sm:$0xf0]  ;;  %v11695_v32 = vld [vmem:[#allocation9 + $0x20] sm:$0xf0]  ;;  %v10766_v13 = vor.u32 %v11776_v29, %v10765_v41 }
 0x7d9   : > { %6439 = vmatpush.bf16.msra.mxu0 %v10550_v5  ;;  %v11772_v4 = vld [vmem:[#allocation9 + $0x28c] sm:$0xf]  ;;  %v5423_v8 = vld [vmem:[#allocation2 + $0xd8] sm:$0xff]  ;;  %v5453_v33 = vld [vmem:[#allocation6] sm:$0x3]  ;;  %v10482_v26 = vor.u32 %v11700_v25, %v10479_v36  ;;  %v10442_v15 = vor.u32 %v11695_v32, %v10441_v63  ;;  %vm8769_vm2 = vcmask 1043456  }
 0x7da   : > { %6488 = vmatpush.bf16.msra.mxu1 %v10838_v10  ;;  %v5421_v22 = vld [vmem:[#allocation2 + $0xb0] sm:$0xff]  ;;  %v5422_v46 = vld [vmem:[#allocation2] sm:$0xff]  ;;  %v5424_v18 = vld [vmem:[#allocation2 + $0x18] sm:$0xff]  ;;  %v14937_v57 = vperm.slane %v5453_v33, 0  ;;  %v14939_v45 = vperm.slane %v5453_v33, 1  ;;  %v10770_v2 = vor.u32 %v11772_v4, %v10767_v49 }
 0x7db   : > { %6537 = vmatpush.bf16.msra.mxu2 %v10554_v30  ;;  %v10729_v61 = vld [vmem:[#allocation9 + $0x240] sm:$0xf]  ;;  %v11767_v11 = vld [vmem:[#allocation9 + $0x260] sm:$0xf0]  ;;  %v10443_v17 = vld [vmem:[#allocation9 + $0x24] sm:$0xf0] }
 0x7dc   : > { %6586 = vmatpush.bf16.msra.mxu3 %v10842_v56  ;;  %v11691_v55 = vld [vmem:[#allocation9 + $0x4] sm:$0xf]  ;;  %v10731_v48 = vld [vmem:[#allocation9 + $0x264] sm:$0xf0]  ;;  %v5459_v21 = vadd.f32 %v14937_v57, %v5421_v22  ;;  %v5461_v9 = vadd.f32 %v14937_v57, %v5423_v8  ;;  %v5460_v20 = vadd.f32 %v14939_v45, %v5422_v46  ;;  %v5462_v6 = vadd.f32 %v14939_v45, %v5424_v18  ;;  %v10701_v44 = vld [vmem:[#allocation9 + $0x200] sm:$0xf] }
 0x7dd   : > { %6440 = vmatpush.bf16.msra.mxu0 %v10514_v12  ;;  %v11763_v24 = vld [vmem:[#allocation9 + $0x244] sm:$0xf]  ;;  %v10989_v60 = vld [vmem:[#allocation9 + $0x440] sm:$0xf]  ;;  %v10730_v7 = vor.u32 %v11767_v11, %v10729_v61  ;;  %v10446_v28 = vor.u32 %v11691_v55, %v10443_v17  ;;  %v5425_v14 = vld [vmem:[#allocation2 + $0x50] sm:$0xff] }
 0x7de   : > { %6489 = vmatpush.bf16.msra.mxu1 %v10802_v38  ;;  %v11759_v40 = vld [vmem:[#allocation9 + $0x220] sm:$0xf0]  ;;  %v5491_v0 = vmax.f32 %v5459_v21, 0.0  ;;  %v5493_v19 = vmax.f32 %v5461_v9, 0.0  ;;  %v5492_v1 = vmax.f32 %v5460_v20, 0.0  ;;  %v5494_v23 = vmax.f32 %v5462_v6, 0.0 }
 0x7df   : > { %6538 = vmatpush.bf16.msra.mxu2 %v10518_v52  ;;  %v11831_v16 = vld [vmem:[#allocation9 + $0x460] sm:$0xf0]  ;;  %v10734_v43 = vor.u32 %v11763_v24, %v10731_v48  ;;  %v10702_v47 = vor.u32 %v11759_v40, %v10701_v44  ;;  %v5427_v5 = vld [vmem:[#allocation2 + $0x30] sm:$0xff]  ;;  %v10665_v30 = vld [vmem:[#allocation9 + $0x1b8] sm:$0xf]  ;;  %v5463_v51 = vadd.f32 %v14937_v57, %v5425_v14 }
 0x7e0   : > { %6587 = vmatpush.bf16.msra.mxu3 %v10806_v58  ;;  %v14945_v62 = vpack.c.bf16 %v5493_v19, %v5491_v0  ;;  %v10990_v39 = vor.u32 %v11831_v16, %v10989_v60  ;;  %v14947_v59 = vpack.c.bf16 %v5494_v23, %v5492_v1  ;;  %v5426_v50 = vld [vmem:[#allocation2 + $0x68] sm:$0xff]  ;;  %v11750_v27 = vld [vmem:[#allocation9 + $0x1d8] sm:$0xf0]  ;;  %v10953_v42 = vld [vmem:[#allocation9 + $0x3f8] sm:$0xf]  ;;  %v5465_v54 = vadd.f32 %v14937_v57, %v5427_v5 }
 0x7e1   : > { %6441 = vmatpush.bf16.msra.mxu0 %v10478_v34  ;;  %v5428_v10 = vld [vmem:[#allocation2 + $0x48] sm:$0xff]  ;;  %v10666_v35 = vor.u32 %v11750_v27, %v10665_v30  ;;  %v11822_v56 = vld [vmem:[#allocation9 + $0x418] sm:$0xf0]  ;;  %v5464_v53 = vadd.f32 %v14939_v45, %v5426_v50  ;;  %v5495_v31 = vmax.f32 %v5463_v51, 0.0  ;;  %v10629_v58 = vld [vmem:[#allocation9 + $0x170] sm:$0xf] }
 0x7e2   : > { %6490 = vmatpush.bf16.msra.mxu1 %v10766_v13  ;;  %v10954_v37 = vor.u32 %v11822_v56, %v10953_v42  ;;  %v5466_v3 = vadd.f32 %v14939_v45, %v5428_v10  ;;  %v5497_v12 = vmax.f32 %v5465_v54, 0.0  ;;  %v5429_v52 = vld [vmem:[#allocation2 + $0x80] sm:$0xff]  ;;  %v5431_v36 = vld [vmem:[#allocation2 + $0xe8] sm:$0xff]  ;;  %v5432_v49 = vld [vmem:[#allocation2 + $0xb8] sm:$0xff] }
 0x7e3   : > { %6539 = vmatpush.bf16.msra.mxu2 %v10482_v26  ;;  %v5496_v41 = vmax.f32 %v5464_v53, 0.0  ;;  %v5430_v4 = vld [vmem:[#allocation2 + $0x88] sm:$0xff]  ;;  %v11741_v63 = vld [vmem:[#allocation9 + $0x190] sm:$0xf0]  ;;  %v10917_v32 = vld [vmem:[#allocation9 + $0x3b0] sm:$0xf]  ;;  %v5467_v33 = vadd.f32 %v14937_v57, %v5429_v52  ;;  %v5469_v46 = vadd.f32 %v14937_v57, %v5431_v36  ;;  %v5470_v61 = vadd.f32 %v14939_v45, %v5432_v49 }
 0x7e4   : > { %6588 = vmatpush.bf16.msra.mxu3 %v10770_v2  ;;  %v5498_v29 = vmax.f32 %v5466_v3, 0.0  ;;  %v14957_v25 = vpack.c.bf16 %v5497_v12, %v5495_v31  ;;  %v10630_v22 = vor.u32 %v11741_v63, %v10629_v58  ;;  %v11813_v8 = vld [vmem:[#allocation9 + $0x3d0] sm:$0xf0]  ;;  %v5468_v34 = vadd.f32 %v14939_v45, %v5430_v4  ;;  %v5433_v24 = vld [vmem:[#allocation2 + $0x60] sm:$0xff]  ;;  %v5435_v48 = vld [vmem:[#allocation2 + $0x8] sm:$0xff] }
 0x7e5   : > { %6442 = vmatpush.bf16.msra.mxu0 %v10442_v15  ;;  %v10918_v18 = vor.u32 %v11813_v8, %v10917_v32  ;;  %v5499_v11 = vmax.f32 %v5467_v33, 0.0  ;;  %v5501_v13 = vmax.f32 %v5469_v46, 0.0  ;;  %v5502_v2 = vmax.f32 %v5470_v61, 0.0  ;;  %v5434_v21 = vld [vmem:[#allocation2 + $0xf0] sm:$0xff]  ;;  %v5436_v9 = vld [vmem:[#allocation2 + $0x78] sm:$0xff]  ;;  %v5439_v5 = vld [vmem:[#allocation2 + $0x40] sm:$0xff] }
 0x7e6   : > { %6491 = vmatpush.bf16.msra.mxu1 %v10730_v7  ;;  %v14959_v38 = vpack.c.bf16 %v5498_v29, %v5496_v41  ;;  %v5500_v26 = vmax.f32 %v5468_v34, 0.0  ;;  %v10593_v20 = vld [vmem:[#allocation9 + $0x128] sm:$0xf]  ;;  %v11732_v6 = vld [vmem:[#allocation9 + $0x148] sm:$0xf0]  ;;  %v5471_v60 = vadd.f32 %v14937_v57, %v5433_v24  ;;  %v5473_v0 = vadd.f32 %v14937_v57, %v5435_v48  ;;  %v5437_v14 = vld [vmem:[#allocation2 + $0x38] sm:$0xff] }
 0x7e7   : > { %6540 = vmatpush.bf16.msra.mxu2 %v10446_v28  ;;  %v14969_v55 = vpack.c.bf16 %v5501_v13, %v5499_v11  ;;  %v10881_v44 = vld [vmem:[#allocation9 + $0x368] sm:$0xf]  ;;  %v10594_v40 = vor.u32 %v11732_v6, %v10593_v20  ;;  %v11804_v15 = vld [vmem:[#allocation9 + $0x388] sm:$0xf0]  ;;  %v5472_v1 = vadd.f32 %v14939_v45, %v5434_v21  ;;  %v5474_v23 = vadd.f32 %v14939_v45, %v5436_v9  ;;  %v5438_v50 = vld [vmem:[#allocation2 + $0x58] sm:$0xff] }
 0x7e8   : > { %6589 = vmatpush.bf16.msra.mxu3 %v10734_v43  ;;  %6443 = vmatmul.bf16.vlgmr.msra.gmra.mxu0 %v14945_v62  ;;  %v14971_v17 = vpack.c.bf16 %v5502_v2, %v5500_v26  ;;  %v10882_v19 = vor.u32 %v11804_v15, %v10881_v44  ;;  %v5503_v16 = vmax.f32 %v5471_v60, 0.0  ;;  %v5505_v7 = vmax.f32 %v5473_v0, 0.0  ;;  %v5440_v10 = vld [vmem:[#allocation2 + $0xc8] sm:$0xff]  ;;  %v10557_v30 = vld [vmem:[#allocation9 + $0xe0] sm:$0xf]  ;;  %v5443_v49 = vld [vmem:[#allocation2 + $0x70] sm:$0xff] }
 0x7e9   : > { %6631 = vmatpush.bf16.msrb.mxu0 %v10702_v47  ;;  %6492 = vmatmul.bf16.vlgmr.msra.gmra.mxu1 %v14947_v59  ;;  %v5504_v28 = vmax.f32 %v5472_v1, 0.0  ;;  %v5506_v43 = vmax.f32 %v5474_v23, 0.0  ;;  %v11723_v27 = vld [vmem:[#allocation9 + $0x100] sm:$0xf0]  ;;  %v10845_v42 = vld [vmem:[#allocation9 + $0x320] sm:$0xf]  ;;  %v5475_v51 = vadd.f32 %v14937_v57, %v5437_v14  ;;  %v5477_v54 = vadd.f32 %v14937_v57, %v5439_v5 }
 0x7ea   : > { %6680 = vmatpush.bf16.msrb.mxu1 %v10990_v39  ;;  %6541 = vmatmul.bf16.vlgmr.msra.gmra.mxu2 %v14945_v62  ;;  %v14981_v47 = vpack.c.bf16 %v5505_v7, %v5503_v16  ;;  %v11795_v56 = vld [vmem:[#allocation9 + $0x340] sm:$0xf0]  ;;  %v5476_v53 = vadd.f32 %v14939_v45, %v5438_v50  ;;  %v5478_v3 = vadd.f32 %v14939_v45, %v5440_v10  ;;  %v10703_v63 = vld [vmem:[#allocation9 + $0x224] sm:$0xf0]  ;;  %v11746_v34 = vld [vmem:[#allocation9 + $0x1bc] sm:$0xf] }
 0x7eb   : > { %6590 = vmatmul.bf16.vlgmr.msra.gmra.mxu3 %v14947_v59  ;;  %v14983_v39 = vpack.c.bf16 %v5506_v43, %v5504_v28  ;;  %v5507_v31 = vmax.f32 %v5475_v51, 0.0  ;;  %v5509_v12 = vmax.f32 %v5477_v54, 0.0  ;;  %v5441_v4 = vld [vmem:[#allocation2 + $0xe0] sm:$0xff]  ;;  %v10991_v46 = vld [vmem:[#allocation9 + $0x464] sm:$0xf0]  ;;  %v5481_v21 = vadd.f32 %v14937_v57, %v5443_v49 }
 0x7ec   : > { %v5508_v41 = vmax.f32 %v5476_v53, 0.0  ;;  %v5510_v29 = vmax.f32 %v5478_v3, 0.0  ;;  %v11755_v58 = vld [vmem:[#allocation9 + $0x204] sm:$0xf]  ;;  %v10667_v61 = vld [vmem:[#allocation9 + $0x1dc] sm:$0xf0]  ;;  %v5479_v48 = vadd.f32 %v14937_v57, %v5441_v4 }
 0x7ed   : > { %6632 = vmatpush.bf16.msrb.mxu0 %v10666_v35  ;;  %v10558_v35 = vor.u32 %v11723_v27, %v10557_v30  ;;  %v14993_v52 = vpack.c.bf16 %v5509_v12, %v5507_v31  ;;  %v11827_v32 = vld [vmem:[#allocation9 + $0x444] sm:$0xf]  ;;  %v10706_v33 = vor.u32 %v11755_v58, %v10703_v63  ;;  %v11818_v11 = vld [vmem:[#allocation9 + $0x3fc] sm:$0xf]  ;;  %v10670_v13 = vor.u32 %v11746_v34, %v10667_v61  ;;  %v10955_v26 = vld [vmem:[#allocation9 + $0x41c] sm:$0xf0] }
 0x7ee   : > { %6681 = vmatpush.bf16.msrb.mxu1 %v10954_v37  ;;  %v10846_v37 = vor.u32 %v11795_v56, %v10845_v42  ;;  %v14995_v36 = vpack.c.bf16 %v5510_v29, %v5508_v41  ;;  %v5444_v8 = vld [vmem:[#allocation2 + $0xc0] sm:$0xff]  ;;  %v10521_v2 = vld [vmem:[#allocation9 + $0x98] sm:$0xf]  ;;  %v10958_v9 = vor.u32 %v11818_v11, %v10955_v26  ;;  %v11809_v1 = vld [vmem:[#allocation9 + $0x3b4] sm:$0xf]  ;;  %v5511_v7 = vmax.f32 %v5479_v48, 0.0 }
 0x7ef   : > { %6729 = vmatpush.bf16.msrb.mxu2 %v10706_v33  ;;  %v11714_v24 = vld [vmem:[#allocation9 + $0xb8] sm:$0xf0]  ;;  %v10809_v6 = vld [vmem:[#allocation9 + $0x2d8] sm:$0xf]  ;;  %v5482_v60 = vadd.f32 %v14939_v45, %v5444_v8  ;;  %v5513_v28 = vmax.f32 %v5481_v21, 0.0  ;;  %v5445_v54 = vld [vmem:[#allocation2 + $0xa8] sm:$0xff] }
 0x7f0   : > { %v10522_v20 = vor.u32 %v11714_v24, %v10521_v2  ;;  %v11786_v44 = vld [vmem:[#allocation9 + $0x2f8] sm:$0xf0]  ;;  %v10919_v23 = vld [vmem:[#allocation9 + $0x3d4] sm:$0xf0]  ;;  %v11728_v14 = vld [vmem:[#allocation9 + $0x12c] sm:$0xf] }
 0x7f1   : > { %6633 = vmatpush.bf16.msrb.mxu0 %v10630_v22  ;;  %v5442_v22 = vld [vmem:[#allocation2 + $0x90] sm:$0xff]  ;;  %v10810_v0 = vor.u32 %v11786_v44, %v10809_v6  ;;  %v10922_v43 = vor.u32 %v11809_v1, %v10919_v23  ;;  %v5514_v10 = vmax.f32 %v5482_v60, 0.0  ;;  %v11719_v53 = vld [vmem:[#allocation9 + $0xe4] sm:$0xf]  ;;  %v10559_v3 = vld [vmem:[#allocation9 + $0x104] sm:$0xf0] }
 0x7f2   : > { %6682 = vmatpush.bf16.msrb.mxu1 %v10918_v18  ;;  %v10994_v18 = vor.u32 %v11827_v32, %v10991_v46  ;;  %v5480_v15 = vadd.f32 %v14939_v45, %v5442_v22  ;;  %v10595_v5 = vld [vmem:[#allocation9 + $0x14c] sm:$0xf0]  ;;  %v11800_v30 = vld [vmem:[#allocation9 + $0x36c] sm:$0xf]  ;;  %v11791_v31 = vld [vmem:[#allocation9 + $0x324] sm:$0xf]  ;;  %v10562_v29 = vor.u32 %v11719_v53, %v10559_v3 }
 0x7f3   : > { %6730 = vmatpush.bf16.msrb.mxu2 %v10670_v13  ;;  %v10883_v27 = vld [vmem:[#allocation9 + $0x38c] sm:$0xf0]  ;;  %v10598_v42 = vor.u32 %v11728_v14, %v10595_v5  ;;  %v5448_v41 = vld [vmem:[#allocation2 + $0x28] sm:$0xff]  ;;  %v11710_v58 = vld [vmem:[#allocation9 + $0x9c] sm:$0xf] }
 0x7f4   : > { %6778 = vmatpush.bf16.msrb.mxu3 %v10994_v18  ;;  %v5512_v50 = vmax.f32 %v5480_v15, 0.0  ;;  %v10886_v56 = vor.u32 %v11800_v30, %v10883_v27  ;;  %v5446_v12 = vld [vmem:[#allocation2 + $0xd0] sm:$0xff]  ;;  %v10847_v4 = vld [vmem:[#allocation9 + $0x344] sm:$0xf0]  ;;  %v10523_v63 = vld [vmem:[#allocation9 + $0xbc] sm:$0xf0]  ;;  %v5483_v18 = vadd.f32 %v14937_v57, %v5445_v54  ;;  %v5486_v48 = vadd.f32 %v14939_v45, %v5448_v41 }
 0x7f5   : > { %6634 = vmatpush.bf16.msrb.mxu0 %v10594_v40  ;;  %v11737_v40 = vld [vmem:[#allocation9 + $0x174] sm:$0xf]  ;;  %v10850_v49 = vor.u32 %v11791_v31, %v10847_v4  ;;  %v11782_v32 = vld [vmem:[#allocation9 + $0x2dc] sm:$0xf]  ;;  %v10526_v22 = vor.u32 %v11710_v58, %v10523_v63  ;;  %v10811_v8 = vld [vmem:[#allocation9 + $0x2fc] sm:$0xf0]  ;;  %v5484_v24 = vadd.f32 %v14939_v45, %v5446_v12 }
 0x7f6   : > { %6683 = vmatpush.bf16.msrb.mxu1 %v10882_v19  ;;  %v10631_v19 = vld [vmem:[#allocation9 + $0x194] sm:$0xf0]  ;;  %v15007_v51 = vpack.c.bf16 %v5514_v10, %v5512_v50  ;;  %v10485_v33 = vld [vmem:[#allocation9 + $0x50] sm:$0xf]  ;;  %v11705_v46 = vld [vmem:[#allocation9 + $0x70] sm:$0xf0]  ;;  %v10814_v61 = vor.u32 %v11782_v32, %v10811_v8 }
 0x7f7   : > { %v10634_v16 = vor.u32 %v11737_v40, %v10631_v19  ;;  %v10486_v11 = vor.u32 %v11705_v46, %v10485_v33  ;;  %v10773_v13 = vld [vmem:[#allocation9 + $0x290] sm:$0xf]  ;;  %v11777_v26 = vld [vmem:[#allocation9 + $0x2b0] sm:$0xf0]  ;;  %v10775_v6 = vld [vmem:[#allocation9 + $0x2b4] sm:$0xf0] }
 0x7f8   : > { %6448 = vmatmul.bf16.gmra.mxu0 %v14957_v25  ;;  %6779 = vmatpush.bf16.msrb.mxu3 %v10958_v9  ;;  %v11701_v2 = vld [vmem:[#allocation9 + $0x54] sm:$0xf]  ;;  %v10774_v21 = vor.u32 %v11777_v26, %v10773_v13  ;;  %v10487_v9 = vld [vmem:[#allocation9 + $0x74] sm:$0xf0]  ;;  %v5515_v40 = vmax.f32 %v5483_v18, 0.0  ;;  %v5518_v19 = vmax.f32 %v5486_v48, 0.0 }
 0x7f9   : > { %6497 = vmatmul.bf16.gmra.mxu1 %v14959_v38  ;;  %6635 = vmatpush.bf16.msrb.mxu0 %v10558_v35  ;;  %v15005_v35 = vpack.c.bf16 %v5513_v28, %v5511_v7  ;;  %v10490_v44 = vor.u32 %v11701_v2, %v10487_v9  ;;  %v10449_v23 = vld [vmem:[#allocation9 + $0x8] sm:$0xf]  ;;  %v11768_v14 = vld [vmem:[#allocation9 + $0x268] sm:$0xf0]  ;;  %v10451_v50 = vld [vmem:[#allocation9 + $0x2c] sm:$0xf0] }
 0x7fa   : > { %6546 = vmatmul.bf16.gmra.mxu2 %v14957_v25  ;;  %6684 = vmatpush.bf16.msrb.mxu1 %v10846_v37  ;;  %v5447_v37 = vld [vmem:[#allocation2 + $0x10] sm:$0xff]  ;;  %v10737_v7 = vld [vmem:[#allocation9 + $0x248] sm:$0xf]  ;;  %v5449_v54 = vld [vmem:[#allocation2 + $0xa0] sm:$0xff] }
 0x7fb   : > { %6595 = vmatmul.bf16.gmra.mxu3 %v14959_v38  ;;  %6731 = vmatpush.bf16.msrb.mxu2 %v10634_v16  ;;  %v5485_v34 = vadd.f32 %v14937_v57, %v5447_v37  ;;  %v11696_v16 = vld [vmem:[#allocation9 + $0x28] sm:$0xf0]  ;;  %v10738_v10 = vor.u32 %v11768_v14, %v10737_v7  ;;  %v5451_v37 = vld [vmem:[#allocation2 + $0x20] sm:$0xff]  ;;  %v5450_v53 = vld [vmem:[#allocation2 + $0xf8] sm:$0xff]  ;;  %v5487_v31 = vadd.f32 %v14937_v57, %v5449_v54 }
 0x7fc   : > { %6780 = vmatpush.bf16.msrb.mxu3 %v10922_v43  ;;  %v10450_v43 = vor.u32 %v11696_v16, %v10449_v23  ;;  %v11692_v5 = vld [vmem:[#allocation9 + $0xc] sm:$0xf]  ;;  %v5452_v3 = vld [vmem:[#allocation2 + $0x98] sm:$0xff]  ;;  %v5489_v12 = vadd.f32 %v14937_v57, %v5451_v37  ;;  %v5488_v41 = vadd.f32 %v14939_v45, %v5450_v53  ;;  %v10709_v57 = vld [vmem:[#allocation9 + $0x208] sm:$0xf] }
 0x7fd   : > { %6636 = vmatpush.bf16.msrb.mxu0 %v10522_v20  ;;  %v11773_v20 = vld [vmem:[#allocation9 + $0x294] sm:$0xf]  ;;  %v5517_v15 = vmax.f32 %v5485_v34, 0.0  ;;  %v10454_v30 = vor.u32 %v11692_v5, %v10451_v50  ;;  %v11764_v27 = vld [vmem:[#allocation9 + $0x24c] sm:$0xf]  ;;  %v5519_v4 = vmax.f32 %v5487_v31, 0.0 }
 0x7fe   : > { %6685 = vmatpush.bf16.msrb.mxu1 %v10810_v0  ;;  %v10778_v60 = vor.u32 %v11773_v20, %v10775_v6  ;;  %v5516_v0 = vmax.f32 %v5484_v24, 0.0  ;;  %v5520_v58 = vmax.f32 %v5488_v41, 0.0  ;;  %v11760_v8 = vld [vmem:[#allocation9 + $0x228] sm:$0xf0]  ;;  %v10997_v33 = vld [vmem:[#allocation9 + $0x448] sm:$0xf] }
 0x7ff   : > { %6732 = vmatpush.bf16.msrb.mxu2 %v10598_v42  ;;  %v15017_v1 = vpack.c.bf16 %v5517_v15, %v5515_v40  ;;  %v10739_v42 = vld [vmem:[#allocation9 + $0x26c] sm:$0xf0]  ;;  %v11832_v46 = vld [vmem:[#allocation9 + $0x468] sm:$0xf0]  ;;  %v10673_v20 = vld [vmem:[#allocation9 + $0x1c0] sm:$0xf] }
 0x800   : > { %6781 = vmatpush.bf16.msrb.mxu3 %v10886_v56  ;;  %v15019_v28 = vpack.c.bf16 %v5518_v19, %v5516_v0  ;;  %v10742_v56 = vor.u32 %v11764_v27, %v10739_v42  ;;  %v10998_v18 = vor.u32 %v11832_v46, %v10997_v33  ;;  %v11751_v6 = vld [vmem:[#allocation9 + $0x1e0] sm:$0xf0]  ;;  %v10637_v41 = vld [vmem:[#allocation9 + $0x178] sm:$0xf] }
 0x801   : > { %6637 = vmatpush.bf16.msrb.mxu0 %v10486_v11  ;;  %v10674_v40 = vor.u32 %v11751_v6, %v10673_v20  ;;  %v11823_v15 = vld [vmem:[#allocation9 + $0x420] sm:$0xf0]  ;;  %v11756_v20 = vld [vmem:[#allocation9 + $0x20c] sm:$0xf]  ;;  %v10711_v6 = vld [vmem:[#allocation9 + $0x22c] sm:$0xf0] }
 0x802   : > { %6686 = vmatpush.bf16.msrb.mxu1 %v10774_v21 }
 0x803   : > { %6733 = vmatpush.bf16.msrb.mxu2 %v10562_v29  ;;  %v5490_v29 = vadd.f32 %v14939_v45, %v5452_v3  ;;  %v10710_v45 = vor.u32 %v11760_v8, %v10709_v57 }
 0x804   : > { %6782 = vmatpush.bf16.msrb.mxu3 %v10850_v49  ;;  %v5521_v49 = vmax.f32 %v5489_v12, 0.0 }
 0x805   : > { %6638 = vmatpush.bf16.msrb.mxu0 %v10450_v43  ;;  %v5522_v63 = vmax.f32 %v5490_v29, 0.0  ;;  %v11742_v29 = vld [vmem:[#allocation9 + $0x198] sm:$0xf0] }
 0x806   : > { %6687 = vmatpush.bf16.msrb.mxu1 %v10738_v10  ;;  %v15029_v32 = vpack.c.bf16 %v5521_v49, %v5519_v4  ;;  %v10925_v4 = vld [vmem:[#allocation9 + $0x3b8] sm:$0xf]  ;;  %v10638_v49 = vor.u32 %v11742_v29, %v10637_v41 }
 0x807   : > { %6734 = vmatpush.bf16.msrb.mxu2 %v10526_v22  ;;  %v15031_v22 = vpack.c.bf16 %v5522_v63, %v5520_v58  ;;  %v11814_v58 = vld [vmem:[#allocation9 + $0x3d8] sm:$0xf0] }
 0x808   : > { %6453 = vmatmul.bf16.gmra.mxu0 %v14969_v55  ;;  %6783 = vmatpush.bf16.msrb.mxu3 %v10814_v61  ;;  %v10926_v57 = vor.u32 %v11814_v58, %v10925_v4  ;;  %v10603_v58 = vld [vmem:[#allocation9 + $0x154] sm:$0xf0] }
 0x809   : > { %6502 = vmatmul.bf16.gmra.mxu1 %v14971_v17  ;;  %6827 = vmatpush.bf16.msra.mxu0 %v10710_v45 }
 0x80a   : > { %6551 = vmatmul.bf16.gmra.mxu2 %v14969_v55  ;;  %6876 = vmatpush.bf16.msra.mxu1 %v10998_v18 }
 0x80b   : > { %6600 = vmatmul.bf16.gmra.mxu3 %v14971_v17  ;;  %6735 = vmatpush.bf16.msrb.mxu2 %v10490_v44  ;;  %v10961_v44 = vld [vmem:[#allocation9 + $0x400] sm:$0xf] }
 0x80c   : > { %6784 = vmatpush.bf16.msrb.mxu3 %v10778_v60  ;;  %v10962_v0 = vor.u32 %v11823_v15, %v10961_v44  ;;  %v10714_v15 = vor.u32 %v11756_v20, %v10711_v6  ;;  %v11711_v6 = vld [vmem:[#allocation9 + $0xa4] sm:$0xf] }
 0x80d   : > { %6828 = vmatpush.bf16.msra.mxu0 %v10674_v40 }
 0x80e   : > { %6877 = vmatpush.bf16.msra.mxu1 %v10962_v0 }
 0x80f   : > { %6736 = vmatpush.bf16.msrb.mxu2 %v10454_v30 }
 0x810   : > { %6785 = vmatpush.bf16.msrb.mxu3 %v10742_v56 }
 0x811   : > { %6829 = vmatpush.bf16.msra.mxu0 %v10638_v49  ;;  %v11729_v49 = vld [vmem:[#allocation9 + $0x134] sm:$0xf] }
 0x812   : > { %6878 = vmatpush.bf16.msra.mxu1 %v10926_v57 }
 0x813   : > { %6925 = vmatpush.bf16.msra.mxu2 %v10714_v15  ;;  %v11724_v15 = vld [vmem:[#allocation9 + $0x108] sm:$0xf0] }
 0x818   : > { %6458 = vmatmul.bf16.gmra.mxu0 %v14981_v47 }
 0x819   : > { %6507 = vmatmul.bf16.gmra.mxu1 %v14983_v39 }
 0x81a   : > { %6556 = vmatmul.bf16.gmra.mxu2 %v14981_v47 }
 0x81b   : > { %6605 = vmatmul.bf16.gmra.mxu3 %v14983_v39 }
 0x828   : > { %6463 = vmatmul.bf16.gmra.mxu0 %v14993_v52 }
 0x829   : > { %6512 = vmatmul.bf16.gmra.mxu1 %v14995_v36 }
 0x82a   : > { %6561 = vmatmul.bf16.gmra.mxu2 %v14993_v52 }
 0x82b   : > { %6610 = vmatmul.bf16.gmra.mxu3 %v14995_v36 }
 0x838   : > { %6468 = vmatmul.bf16.gmra.mxu0 %v15005_v35 }
 0x839   : > { %6517 = vmatmul.bf16.gmra.mxu1 %v15007_v51 }
 0x83a   : > { %6566 = vmatmul.bf16.gmra.mxu2 %v15005_v35 }
 0x83b   : > { %6615 = vmatmul.bf16.gmra.mxu3 %v15007_v51 }
 0x848   : > { %6473 = vmatmul.bf16.gmra.mxu0 %v15017_v1 }
 0x849   : > { %6522 = vmatmul.bf16.gmra.mxu1 %v15019_v28 }
 0x84a   : > { %6571 = vmatmul.bf16.gmra.mxu2 %v15017_v1 }
 0x84b   : > { %6620 = vmatmul.bf16.gmra.mxu3 %v15019_v28 }
 0x858   : > { %6478 = vmatmul.bf16.gmra.mxu0 %v15029_v32 }
 0x859   : > { %6527 = vmatmul.bf16.gmra.mxu1 %v15031_v22 }
 0x85a   : > { %6576 = vmatmul.bf16.gmra.mxu2 %v15029_v32 }
 0x85b   : > { %6625 = vmatmul.bf16.gmra.mxu3 %v15031_v22 }
 0x865   : > { %v6444_v34 = vpop.f32.mrf.mxu0 }
 0x866   : > { %v6493_v61 = vpop.f32.mrf.mxu1 }
 0x867   : > { %v6494_v11 = vadd.f32 %v6493_v61, %v6444_v34 }
 0x868   : > { %6639 = vmatmul.bf16.vlgmr.msrb.gmra.mxu0 %v14945_v62 }
 0x869   : > { %6688 = vmatmul.bf16.vlgmr.msrb.gmra.mxu1 %v14947_v59 }
 0x86a   : > { %6737 = vmatmul.bf16.vlgmr.msrb.gmra.mxu2 %v14945_v62 }
 0x86b   : > { %6786 = vmatmul.bf16.vlgmr.msrb.gmra.mxu3 %v14947_v59 }
 0x86d   : > { %v6542_v13 = vpop.f32.mrf.mxu2  ;;  %v6446_v2 = vpop.f32.mrf.mxu0 }
 0x86e   : > { %v6591_v26 = vpop.f32.mrf.mxu3  ;;  %v6495_v48 = vpop.f32.mrf.mxu1 }
 0x86f   : > { %v6592_v24 = vadd.f32 %v6591_v26, %v6542_v13  ;;  %v6496_v21 = vadd.f32 %v6495_v48, %v6446_v2 }
 0x871   : > { %v7317_v9 = vpack.c.bf16 %v6592_v24, %v6494_v11 }
 0x873   : > { %v7405_v5 = vunpack.c.l.b16 %v7317_v9  ;;  %v7421_v50 = vunpack.c.h.b16 %v7317_v9 }
 0x875   : > { %v6544_v60 = vpop.f32.mrf.mxu2  ;;  %v6449_v23 = vpop.f32.mrf.mxu0 }
 0x876   : > { %v6593_v19 = vpop.f32.mrf.mxu3  ;;  %v6498_v7 = vpop.f32.mrf.mxu1 }
 0x877   : > { %v6594_v16 = vadd.f32 %v6593_v19, %v6544_v60  ;;  %v6499_v43 = vadd.f32 %v6498_v7, %v6449_v23  ;;  %v11747_v19 = vld [vmem:[#allocation9 + $0x1c4] sm:$0xf]  ;;  %v10675_v23 = vld [vmem:[#allocation9 + $0x1e4] sm:$0xf0]  ;;  %v11733_v7 = vld [vmem:[#allocation9 + $0x150] sm:$0xf0] }
 0x878   : > { %6644 = vmatmul.bf16.gmra.mxu0 %v14957_v25 }
 0x879   : > { %v7322_v14 = vpack.c.bf16 %v6594_v16, %v6496_v21  ;;  %6693 = vmatmul.bf16.gmra.mxu1 %v14959_v38  ;;  %v10601_v16 = vld [vmem:[#allocation9 + $0x130] sm:$0xf] }
 0x87a   : > { %6742 = vmatmul.bf16.gmra.mxu2 %v14957_v25 }
 0x87b   : > { %v7406_v10 = vunpack.c.l.b16 %v7322_v14  ;;  %v7422_v30 = vunpack.c.h.b16 %v7322_v14  ;;  %6791 = vmatmul.bf16.gmra.mxu3 %v14959_v38  ;;  %v10678_v14 = vor.u32 %v11747_v19, %v10675_v23  ;;  %v11796_v23 = vld [vmem:[#allocation9 + $0x348] sm:$0xf0] }
 0x87d   : > { %v6547_v27 = vpop.f32.mrf.mxu2  ;;  %v15045_v42 = vpack.c.b16 %v7422_v30, %v7421_v50  ;;  %v15047_v56 = vpack.c.b16 %v7406_v10, %v7405_v5  ;;  %v6451_v37 = vpop.f32.mrf.mxu0  ;;  %v10602_v5 = vor.u32 %v11733_v7, %v10601_v16  ;;  %v11805_v50 = vld [vmem:[#allocation9 + $0x390] sm:$0xf0]  ;;  %6926 = vmatpush.bf16.msra.mxu2 %v10678_v14 }
 0x87e   : > { %v6596_v54 = vpop.f32.mrf.mxu3  ;;  %v6500_v3 = vpop.f32.mrf.mxu1 }
 0x87f   : > { %v6597_v53 = vadd.f32 %v6596_v54, %v6547_v27  ;;  %v6501_v31 = vadd.f32 %v6500_v3, %v6451_v37  ;;  %6830 = vmatpush.bf16.msra.mxu0 %v10602_v5  ;;  %v11738_v37 = vld [vmem:[#allocation9 + $0x17c] sm:$0xf] }
 0x880   : > { %v11702_v5 = vld [vmem:[#allocation9 + $0x5c] sm:$0xf] }
 0x881   : > { %v7327_v12 = vpack.c.bf16 %v6597_v53, %v6499_v43  ;;  %v10889_v43 = vld [vmem:[#allocation9 + $0x370] sm:$0xf]  ;;  %v10639_v53 = vld [vmem:[#allocation9 + $0x19c] sm:$0xf0] }
 0x882   : > { %v10890_v30 = vor.u32 %v11805_v50, %v10889_v43  ;;  %v10495_v50 = vld [vmem:[#allocation9 + $0x7c] sm:$0xf0] }
 0x883   : > { %v7407_v61 = vunpack.c.l.b16 %v7327_v12  ;;  %v7423_v11 = vunpack.c.h.b16 %v7327_v12  ;;  %v10642_v12 = vor.u32 %v11738_v37, %v10639_v53  ;;  %v11828_v53 = vld [vmem:[#allocation9 + $0x44c] sm:$0xf] }
 0x884   : > { %6879 = vmatpush.bf16.msra.mxu1 %v10890_v30 }
 0x885   : > { %v6549_v63 = vpop.f32.mrf.mxu2  ;;  %v6454_v33 = vpop.f32.mrf.mxu0  ;;  %6927 = vmatpush.bf16.msra.mxu2 %v10642_v12 }
 0x886   : > { %v6598_v8 = vpop.f32.mrf.mxu3  ;;  %v6503_v46 = vpop.f32.mrf.mxu1 }
 0x887   : > { %v6599_v45 = vadd.f32 %v6598_v8, %v6549_v63  ;;  %v6504_v18 = vadd.f32 %v6503_v46, %v6454_v33  ;;  %v10606_v33 = vor.u32 %v11729_v49, %v10603_v58 }
 0x888   : > { %6649 = vmatmul.bf16.gmra.mxu0 %v14969_v55 }
 0x889   : > { %v7332_v34 = vpack.c.bf16 %v6599_v45, %v6501_v31  ;;  %6698 = vmatmul.bf16.gmra.mxu1 %v14971_v17  ;;  %6928 = vmatpush.bf16.msra.mxu2 %v10606_v33 }
 0x88a   : > { %6747 = vmatmul.bf16.gmra.mxu2 %v14969_v55 }
 0x88b   : > { %v7408_v13 = vunpack.c.l.b16 %v7332_v34  ;;  %v7424_v26 = vunpack.c.h.b16 %v7332_v34  ;;  %6796 = vmatmul.bf16.gmra.mxu3 %v14971_v17 }
 0x88d   : > { %v6552_v2 = vpop.f32.mrf.mxu2  ;;  %v15053_v24 = vpack.c.b16 %v7424_v26, %v7423_v11  ;;  %v15055_v48 = vpack.c.b16 %v7408_v13, %v7407_v61  ;;  %v6456_v9 = vpop.f32.mrf.mxu0  ;;  %v11720_v11 = vld [vmem:[#allocation9 + $0xec] sm:$0xf]  ;;  %v10567_v13 = vld [vmem:[#allocation9 + $0x10c] sm:$0xf0] }
 0x88e   : > { %v6601_v21 = vpop.f32.mrf.mxu3  ;;  %v6505_v40 = vpop.f32.mrf.mxu1 }
 0x88f   : > { %v6602_v44 = vadd.f32 %v6601_v21, %v6552_v2  ;;  %v6506_v60 = vadd.f32 %v6505_v40, %v6456_v9  ;;  %v10570_v21 = vor.u32 %v11720_v11, %v10567_v13  ;;  %v10565_v40 = vld [vmem:[#allocation9 + $0xe8] sm:$0xf] }
 0x890   : > { %v10566_v19 = vor.u32 %v11724_v15, %v10565_v40 }
 0x891   : > { %v7337_v0 = vpack.c.bf16 %v6602_v44, %v6504_v18  ;;  %6929 = vmatpush.bf16.msra.mxu2 %v10570_v21  ;;  %v10531_v44 = vld [vmem:[#allocation9 + $0xc4] sm:$0xf0] }
 0x892   : > { %6831 = vmatpush.bf16.msra.mxu0 %v10566_v19  ;;  %v10927_v19 = vld [vmem:[#allocation9 + $0x3dc] sm:$0xf0] }
 0x893   : > { %v7409_v4 = vunpack.c.l.b16 %v7337_v0  ;;  %v7425_v63 = vunpack.c.h.b16 %v7337_v0  ;;  %v10534_v0 = vor.u32 %v11711_v6, %v10531_v44  ;;  %v11748_v6 = vld [vmem:[#allocation9 + $0x1cc] sm:$0xf]  ;;  %v10683_v44 = vld [vmem:[#allocation9 + $0x1ec] sm:$0xf0] }
 0x894   : > { %v10686_v15 = vor.u32 %v11748_v6, %v10683_v44  ;;  %v11783_v44 = vld [vmem:[#allocation9 + $0x2e4] sm:$0xf] }
 0x895   : > { %v6554_v10 = vpop.f32.mrf.mxu2  ;;  %v6459_v54 = vpop.f32.mrf.mxu0  ;;  %6930 = vmatpush.bf16.msra.mxu2 %v10534_v0  ;;  %v11810_v0 = vld [vmem:[#allocation9 + $0x3bc] sm:$0xf] }
 0x896   : > { %v6603_v27 = vpop.f32.mrf.mxu3  ;;  %v6508_v31 = vpop.f32.mrf.mxu1 }
 0x897   : > { %v6604_v3 = vadd.f32 %v6603_v27, %v6554_v10  ;;  %v6509_v41 = vadd.f32 %v6508_v31, %v6459_v54  ;;  %v10498_v27 = vor.u32 %v11702_v5, %v10495_v50  ;;  %v11787_v5 = vld [vmem:[#allocation9 + $0x300] sm:$0xf0] }
 0x898   : > { %6654 = vmatmul.bf16.gmra.mxu0 %v14981_v47  ;;  %v11739_v50 = vld [vmem:[#allocation9 + $0x184] sm:$0xf] }
 0x899   : > { %v7342_v29 = vpack.c.bf16 %v6604_v3, %v6506_v60  ;;  %6703 = vmatmul.bf16.gmra.mxu1 %v14983_v39  ;;  %v10853_v60 = vld [vmem:[#allocation9 + $0x328] sm:$0xf]  ;;  %6931 = vmatpush.bf16.msra.mxu2 %v10498_v27  ;;  %v10999_v3 = vld [vmem:[#allocation9 + $0x46c] sm:$0xf0] }
 0x89a   : > { %6752 = vmatmul.bf16.gmra.mxu2 %v14981_v47  ;;  %v10854_v7 = vor.u32 %v11796_v23, %v10853_v60  ;;  %v11002_v12 = vor.u32 %v11828_v53, %v10999_v3  ;;  %v10930_v23 = vor.u32 %v11810_v0, %v10927_v19  ;;  %v11801_v53 = vld [vmem:[#allocation9 + $0x374] sm:$0xf]  ;;  %v10891_v3 = vld [vmem:[#allocation9 + $0x394] sm:$0xf0] }
 0x89b   : > { %v7410_v57 = vunpack.c.l.b16 %v7342_v29  ;;  %v7426_v8 = vunpack.c.h.b16 %v7342_v29  ;;  %6801 = vmatmul.bf16.gmra.mxu3 %v14983_v39  ;;  %v10459_v29 = vld [vmem:[#allocation9 + $0x34] sm:$0xf0] }
 0x89c   : > { %6880 = vmatpush.bf16.msra.mxu1 %v10854_v7  ;;  %6974 = vmatpush.bf16.msra.mxu3 %v11002_v12  ;;  %v11715_v7 = vld [vmem:[#allocation9 + $0xc0] sm:$0xf0] }
 0x89d   : > { %v6557_v45 = vpop.f32.mrf.mxu2  ;;  %v15061_v46 = vpack.c.b16 %v7426_v8, %v7425_v63  ;;  %v15063_v18 = vpack.c.b16 %v7410_v57, %v7409_v4  ;;  %v6461_v61 = vpop.f32.mrf.mxu0  ;;  %v11757_v57 = vld [vmem:[#allocation9 + $0x214] sm:$0xf]  ;;  %v10719_v8 = vld [vmem:[#allocation9 + $0x234] sm:$0xf0] }
 0x89e   : > { %v6606_v34 = vpop.f32.mrf.mxu3  ;;  %v6510_v2 = vpop.f32.mrf.mxu1  ;;  %v10722_v33 = vor.u32 %v11757_v57, %v10719_v8  ;;  %v11792_v8 = vld [vmem:[#allocation9 + $0x32c] sm:$0xf] }
 0x89f   : > { %v6607_v26 = vadd.f32 %v6606_v34, %v6557_v45  ;;  %v6511_v9 = vadd.f32 %v6510_v2, %v6461_v61  ;;  %v11819_v34 = vld [vmem:[#allocation9 + $0x404] sm:$0xf]  ;;  %v10963_v61 = vld [vmem:[#allocation9 + $0x424] sm:$0xf0] }
 0x8a0   : > { %v10966_v21 = vor.u32 %v11819_v34, %v10963_v61 }
 0x8a1   : > { %v7347_v20 = vpack.c.bf16 %v6607_v26, %v6509_v41  ;;  %v11693_v41 = vld [vmem:[#allocation9 + $0x14] sm:$0xf] }
 0x8a2   : > { %v10462_v63 = vor.u32 %v11693_v41, %v10459_v29  ;;  %6975 = vmatpush.bf16.msra.mxu3 %v10966_v21  ;;  %v11721_v21 = vld [vmem:[#allocation9 + $0xf4] sm:$0xf] }
 0x8a3   : > { %v7411_v31 = vunpack.c.l.b16 %v7347_v20  ;;  %v7427_v4 = vunpack.c.h.b16 %v7347_v20 }
 0x8a4   : > { %6932 = vmatpush.bf16.msra.mxu2 %v10462_v63 }
 0x8a5   : > { %v6559_v16 = vpop.f32.mrf.mxu2  ;;  %v6464_v14 = vpop.f32.mrf.mxu0 }
 0x8a6   : > { %v6608_v43 = vpop.f32.mrf.mxu3  ;;  %v6513_v30 = vpop.f32.mrf.mxu1  ;;  %6976 = vmatpush.bf16.msra.mxu3 %v10930_v23 }
 0x8a7   : > { %v6609_v10 = vadd.f32 %v6608_v43, %v6559_v16  ;;  %v6514_v54 = vadd.f32 %v6513_v30, %v6464_v14  ;;  %v10529_v16 = vld [vmem:[#allocation9 + $0xa0] sm:$0xf] }
 0x8a8   : > { %6659 = vmatmul.bf16.gmra.mxu0 %v14993_v52  ;;  %7121 = vmatpush.bf16.msrb.mxu2 %v10722_v33  ;;  %v10817_v43 = vld [vmem:[#allocation9 + $0x2e0] sm:$0xf]  ;;  %v10530_v14 = vor.u32 %v11715_v7, %v10529_v16  ;;  %v10855_v33 = vld [vmem:[#allocation9 + $0x34c] sm:$0xf0] }
 0x8a9   : > { %v7352_v37 = vpack.c.bf16 %v6609_v10, %v6511_v9  ;;  %6708 = vmatmul.bf16.gmra.mxu1 %v14995_v36  ;;  %v10647_v10 = vld [vmem:[#allocation9 + $0x1a4] sm:$0xf0]  ;;  %v10818_v27 = vor.u32 %v11787_v5, %v10817_v43  ;;  %v11712_v43 = vld [vmem:[#allocation9 + $0xac] sm:$0xf] }
 0x8aa   : > { %6757 = vmatmul.bf16.gmra.mxu2 %v14993_v52  ;;  %6832 = vmatpush.bf16.msra.mxu0 %v10530_v14  ;;  %v10539_v14 = vld [vmem:[#allocation9 + $0xcc] sm:$0xf0] }
 0x8ab   : > { %v7412_v49 = vunpack.c.l.b16 %v7352_v37  ;;  %v7428_v58 = vunpack.c.h.b16 %v7352_v37  ;;  %6806 = vmatmul.bf16.gmra.mxu3 %v14995_v36  ;;  %v10650_v37 = vor.u32 %v11739_v50, %v10647_v10  ;;  %6881 = vmatpush.bf16.msra.mxu1 %v10818_v27  ;;  %v10542_v50 = vor.u32 %v11712_v43, %v10539_v14  ;;  %v11706_v27 = vld [vmem:[#allocation9 + $0x78] sm:$0xf0] }
 0x8ac   : > { %7122 = vmatpush.bf16.msrb.mxu2 %v10686_v15 }
 0x8ad   : > { %v6562_v45 = vpop.f32.mrf.mxu2  ;;  %v15069_v11 = vpack.c.b16 %v7428_v58, %v7427_v4  ;;  %v15071_v13 = vpack.c.b16 %v7412_v49, %v7411_v31  ;;  %v6466_v2 = vpop.f32.mrf.mxu0  ;;  %v11730_v4 = vld [vmem:[#allocation9 + $0x13c] sm:$0xf]  ;;  %v10611_v49 = vld [vmem:[#allocation9 + $0x15c] sm:$0xf0] }
 0x8ae   : > { %v6611_v26 = vpop.f32.mrf.mxu3  ;;  %v6515_v20 = vpop.f32.mrf.mxu1  ;;  %v10614_v63 = vor.u32 %v11730_v4, %v10611_v49  ;;  %v10503_v4 = vld [vmem:[#allocation9 + $0x84] sm:$0xf0] }
 0x8af   : > { %v6612_v9 = vadd.f32 %v6611_v26, %v6562_v45  ;;  %v6516_v40 = vadd.f32 %v6515_v20, %v6466_v2  ;;  %v10858_v45 = vor.u32 %v11792_v8, %v10855_v33  ;;  %v11697_v8 = vld [vmem:[#allocation9 + $0x30] sm:$0xf0] }
 0x8b0   : > { %7123 = vmatpush.bf16.msrb.mxu2 %v10650_v37  ;;  %v10781_v37 = vld [vmem:[#allocation9 + $0x298] sm:$0xf] }
 0x8b1   : > { %v7357_v60 = vpack.c.bf16 %v6612_v9, %v6514_v54  ;;  %v10894_v54 = vor.u32 %v11801_v53, %v10891_v3  ;;  %v10575_v9 = vld [vmem:[#allocation9 + $0x114] sm:$0xf0]  ;;  %v11778_v3 = vld [vmem:[#allocation9 + $0x2b8] sm:$0xf0] }
 0x8b2   : > { %v10578_v20 = vor.u32 %v11721_v21, %v10575_v9 }
 0x8b3   : > { %6977 = vmatpush.bf16.msra.mxu3 %v10894_v54  ;;  %v7701_v34 = vunpack.c.l.b16 %v7357_v60  ;;  %v7717_v61 = vunpack.c.h.b16 %v7357_v60  ;;  %v10782_v54 = vor.u32 %v11778_v3, %v10781_v37 }
 0x8b4   : > { %7124 = vmatpush.bf16.msrb.mxu2 %v10614_v63 }
 0x8b5   : > { %v6564_v30 = vpop.f32.mrf.mxu2  ;;  %v6469_v12 = vpop.f32.mrf.mxu0  ;;  %6882 = vmatpush.bf16.msra.mxu1 %v10782_v54 }
 0x8b6   : > { %v6613_v31 = vpop.f32.mrf.mxu3  ;;  %v6518_v29 = vpop.f32.mrf.mxu1 }
 0x8b7   : > { %v6614_v41 = vadd.f32 %v6613_v31, %v6564_v30  ;;  %v6519_v58 = vadd.f32 %v6518_v29, %v6469_v12  ;;  %6978 = vmatpush.bf16.msra.mxu3 %v10858_v45  ;;  %v10493_v30 = vld [vmem:[#allocation9 + $0x58] sm:$0xf]  ;;  %v11774_v31 = vld [vmem:[#allocation9 + $0x29c] sm:$0xf]  ;;  %v10783_v12 = vld [vmem:[#allocation9 + $0x2bc] sm:$0xf0] }
 0x8b8   : > { %6664 = vmatmul.bf16.gmra.mxu0 %v15005_v35  ;;  %7125 = vmatpush.bf16.msrb.mxu2 %v10578_v20  ;;  %v10494_v53 = vor.u32 %v11706_v27, %v10493_v30  ;;  %v11703_v29 = vld [vmem:[#allocation9 + $0x64] sm:$0xf] }
 0x8b9   : > { %v7362_v57 = vpack.c.bf16 %v6614_v41, %v6516_v40  ;;  %6713 = vmatmul.bf16.gmra.mxu1 %v15007_v51  ;;  %v10819_v40 = vld [vmem:[#allocation9 + $0x304] sm:$0xf0]  ;;  %v10786_v41 = vor.u32 %v11774_v31, %v10783_v12  ;;  %v10506_v49 = vor.u32 %v11703_v29, %v10503_v4 }
 0x8ba   : > { %6762 = vmatmul.bf16.gmra.mxu2 %v15005_v35  ;;  %v10822_v16 = vor.u32 %v11783_v44, %v10819_v40  ;;  %6833 = vmatpush.bf16.msra.mxu0 %v10494_v53  ;;  %v10467_v44 = vld [vmem:[#allocation9 + $0x3c] sm:$0xf0] }
 0x8bb   : > { %v7702_v26 = vunpack.c.l.b16 %v7362_v57  ;;  %v7718_v2 = vunpack.c.h.b16 %v7362_v57  ;;  %6811 = vmatmul.bf16.gmra.mxu3 %v15007_v51  ;;  %v10457_v57 = vld [vmem:[#allocation9 + $0x10] sm:$0xf] }
 0x8bc   : > { %6979 = vmatpush.bf16.msra.mxu3 %v10822_v16  ;;  %7126 = vmatpush.bf16.msrb.mxu2 %v10542_v50 }
 0x8bd   : > { %v6567_v6 = vpop.f32.mrf.mxu2  ;;  %v15077_v15 = vpack.c.b16 %v7718_v2, %v7717_v61  ;;  %v15079_v0 = vpack.c.b16 %v7702_v26, %v7701_v34  ;;  %v6471_v23 = vpop.f32.mrf.mxu0  ;;  %v10458_v34 = vor.u32 %v11697_v8, %v10457_v57  ;;  %v11769_v61 = vld [vmem:[#allocation9 + $0x270] sm:$0xf0]  ;;  %v10747_v2 = vld [vmem:[#allocation9 + $0x274] sm:$0xf0] }
 0x8be   : > { %v6616_v19 = vpop.f32.mrf.mxu3  ;;  %v6520_v7 = vpop.f32.mrf.mxu1  ;;  %v11765_v26 = vld [vmem:[#allocation9 + $0x254] sm:$0xf] }
 0x8bf   : > { %15969 = vst [vmem:[#allocation97_spill] sm:$0xff] %v15079_v0  ;;  %v6617_v60 = vadd.f32 %v6616_v19, %v6567_v6  ;;  %v6521_v5 = vadd.f32 %v6520_v7, %v6471_v23  ;;  %v11694_v6 = vld [vmem:[#allocation9 + $0x1c] sm:$0xf]  ;;  %6834 = vmatpush.bf16.msra.mxu0 %v10458_v34  ;;  %v10750_v19 = vor.u32 %v11765_v26, %v10747_v2 }
 0x8c0   : > { %6980 = vmatpush.bf16.msra.mxu3 %v10786_v41  ;;  %7127 = vmatpush.bf16.msrb.mxu2 %v10506_v49  ;;  %v10470_v23 = vor.u32 %v11694_v6, %v10467_v44  ;;  %v10717_v44 = vld [vmem:[#allocation9 + $0x210] sm:$0xf] }
 0x8c1   : > { %v7367_v10 = vpack.c.bf16 %v6617_v60, %v6519_v58  ;;  %v10745_v58 = vld [vmem:[#allocation9 + $0x250] sm:$0xf] }
 0x8c2   : > { %v10746_v20 = vor.u32 %v11769_v61, %v10745_v58 }
 0x8c3   : > { %v7703_v60 = vunpack.c.l.b16 %v7367_v10  ;;  %v7719_v7 = vunpack.c.h.b16 %v7367_v10 }
 0x8c4   : > { %6883 = vmatpush.bf16.msra.mxu1 %v10746_v20  ;;  %7128 = vmatpush.bf16.msrb.mxu2 %v10470_v23 }
 0x8c5   : > { %v6569_v63 = vpop.f32.mrf.mxu2  ;;  %v6474_v45 = vpop.f32.mrf.mxu0  ;;  %6981 = vmatpush.bf16.msra.mxu3 %v10750_v19  ;;  %v11005_v19 = vld [vmem:[#allocation9 + $0x450] sm:$0xf] }
 0x8c6   : > { %v6618_v33 = vpop.f32.mrf.mxu3  ;;  %v6523_v9 = vpop.f32.mrf.mxu1 }
 0x8c7   : > { %v6619_v21 = vadd.f32 %v6618_v33, %v6569_v63  ;;  %v6524_v40 = vadd.f32 %v6523_v9, %v6474_v45 }
 0x8c8   : > { %6669 = vmatmul.bf16.gmra.mxu0 %v15017_v1 }
 0x8c9   : > { %v7372_v16 = vpack.c.bf16 %v6619_v21, %v6521_v5  ;;  %6718 = vmatmul.bf16.gmra.mxu1 %v15019_v28 }
 0x8ca   : > { %6767 = vmatmul.bf16.gmra.mxu2 %v15017_v1 }
 0x8cb   : > { %v7704_v43 = vunpack.c.l.b16 %v7372_v16  ;;  %v7720_v14 = vunpack.c.h.b16 %v7372_v16  ;;  %6816 = vmatmul.bf16.gmra.mxu3 %v15019_v28  ;;  %v11833_v16 = vld [vmem:[#allocation9 + $0x470] sm:$0xf0] }
 0x8cd   : > { %v6572_v50 = vpop.f32.mrf.mxu2  ;;  %v15085_v30 = vpack.c.b16 %v7720_v14, %v7719_v7  ;;  %v15087_v27 = vpack.c.b16 %v7704_v43, %v7703_v60  ;;  %v6476_v37 = vpop.f32.mrf.mxu0  ;;  %v11006_v7 = vor.u32 %v11833_v16, %v11005_v19 }
 0x8ce   : > { %v6621_v5 = vpop.f32.mrf.mxu3  ;;  %v6525_v3 = vpop.f32.mrf.mxu1 }
 0x8cf   : > { %15970 = vst [vmem:[#allocation98_spill] sm:$0xff] %v15087_v27  ;;  %v6622_v53 = vadd.f32 %v6621_v5, %v6572_v50  ;;  %v6526_v31 = vadd.f32 %v6525_v3, %v6476_v37  ;;  %7072 = vmatpush.bf16.msrb.mxu1 %v11006_v7 }
 0x8d1   : > { %v7377_v12 = vpack.c.bf16 %v6622_v53, %v6524_v40  ;;  %v11761_v40 = vld [vmem:[#allocation9 + $0x230] sm:$0xf0] }
 0x8d2   : > { %v10718_v23 = vor.u32 %v11761_v40, %v10717_v44  ;;  %v10971_v44 = vld [vmem:[#allocation9 + $0x42c] sm:$0xf0] }
 0x8d3   : > { %v7705_v57 = vunpack.c.l.b16 %v7377_v12  ;;  %v7721_v8 = vunpack.c.h.b16 %v7377_v12 }
 0x8d4   : > { %7023 = vmatpush.bf16.msrb.mxu0 %v10718_v23 }
 0x8d5   : > { %v6574_v54 = vpop.f32.mrf.mxu2  ;;  %v6479_v10 = vpop.f32.mrf.mxu0 }
 0x8d6   : > { %v6623_v41 = vpop.f32.mrf.mxu3  ;;  %v6528_v4 = vpop.f32.mrf.mxu1 }
 0x8d7   : > { %v6624_v29 = vadd.f32 %v6623_v41, %v6574_v54  ;;  %v6529_v49 = vadd.f32 %v6528_v4, %v6479_v10 }
 0x8d8   : > { %6674 = vmatmul.bf16.gmra.mxu0 %v15029_v32 }
 0x8d9   : > { %v7382_v63 = vpack.c.bf16 %v6624_v29, %v6526_v31  ;;  %6723 = vmatmul.bf16.gmra.mxu1 %v15031_v22 }
 0x8da   : > { %6772 = vmatmul.bf16.gmra.mxu2 %v15029_v32 }
 0x8db   : > { %v7706_v58 = vunpack.c.l.b16 %v7382_v63  ;;  %v7722_v33 = vunpack.c.h.b16 %v7382_v63  ;;  %6821 = vmatmul.bf16.gmra.mxu3 %v15031_v22 }
 0x8dd   : > { %v6577_v45 = vpop.f32.mrf.mxu2  ;;  %v15093_v34 = vpack.c.b16 %v7722_v33, %v7721_v8  ;;  %v15095_v61 = vpack.c.b16 %v7706_v58, %v7705_v57  ;;  %v6481_v2 = vpop.f32.mrf.mxu0  ;;  %v11829_v8 = vld [vmem:[#allocation9 + $0x454] sm:$0xf]  ;;  %v11007_v58 = vld [vmem:[#allocation9 + $0x474] sm:$0xf0] }
 0x8de   : > { %v6626_v26 = vpop.f32.mrf.mxu3  ;;  %v6530_v9 = vpop.f32.mrf.mxu1 }
 0x8df   : > { %15971 = vst [vmem:[#allocation99_spill] sm:$0xff] %v15095_v61  ;;  %v6627_v21 = vadd.f32 %v6626_v26, %v6577_v45  ;;  %v6531_v20 = vadd.f32 %v6530_v9, %v6481_v2  ;;  %v11010_v45 = vor.u32 %v11829_v8, %v11007_v58  ;;  %v11752_v2 = vld [vmem:[#allocation9 + $0x1e8] sm:$0xf0]  ;;  %v11793_v8 = vld [vmem:[#allocation9 + $0x334] sm:$0xf] }
 0x8e1   : > { %v7387_v6 = vpack.c.bf16 %v6627_v21, %v6529_v49  ;;  %7170 = vmatpush.bf16.msrb.mxu3 %v11010_v45  ;;  %v10969_v21 = vld [vmem:[#allocation9 + $0x408] sm:$0xf]  ;;  %v11743_v45 = vld [vmem:[#allocation9 + $0x1a0] sm:$0xf0] }
 0x8e3   : > { %v7707_v3 = vunpack.c.l.b16 %v7387_v6  ;;  %v7723_v31 = vunpack.c.h.b16 %v7387_v6  ;;  %v11820_v6 = vld [vmem:[#allocation9 + $0x40c] sm:$0xf] }
 0x8e4   : > { %v10974_v23 = vor.u32 %v11820_v6, %v10971_v44 }
 0x8e5   : > { %v6579_v60 = vpop.f32.mrf.mxu2  ;;  %v6640_v14 = vpop.f32.mrf.mxu0 }
 0x8e6   : > { %v6628_v43 = vpop.f32.mrf.mxu3  ;;  %v6689_v5 = vpop.f32.mrf.mxu1  ;;  %7171 = vmatpush.bf16.msrb.mxu3 %v10974_v23  ;;  %v10791_v23 = vld [vmem:[#allocation9 + $0x2c4] sm:$0xf0] }
 0x8e7   : > { %v6629_v50 = vadd.f32 %v6628_v43, %v6579_v60  ;;  %v6690_v37 = vadd.f32 %v6689_v5, %v6640_v14  ;;  %v10935_v43 = vld [vmem:[#allocation9 + $0x3e4] sm:$0xf0] }
 0x8e8   : > { %6835 = vmatmul.bf16.vlgmr.msra.gmra.mxu0 %v14945_v62 }
 0x8e9   : > { %v7392_v53 = vpack.c.bf16 %v6629_v50, %v6531_v20  ;;  %6884 = vmatmul.bf16.vlgmr.msra.gmra.mxu1 %v14947_v59  ;;  %v11824_v20 = vld [vmem:[#allocation9 + $0x428] sm:$0xf0] }
 0x8ea   : > { %6933 = vmatmul.bf16.vlgmr.msra.gmra.mxu2 %v14945_v62  ;;  %v10970_v19 = vor.u32 %v11824_v20, %v10969_v21  ;;  %v11784_v21 = vld [vmem:[#allocation9 + $0x2ec] sm:$0xf] }
 0x8eb   : > { %v7708_v12 = vunpack.c.l.b16 %v7392_v53  ;;  %v7724_v54 = vunpack.c.h.b16 %v7392_v53  ;;  %6982 = vmatmul.bf16.vlgmr.msra.gmra.mxu3 %v14947_v59  ;;  %7619 = vmatpush.bf16.msra.mxu2 %v15069_v11  ;;  %v10681_v11 = vld [vmem:[#allocation9 + $0x1c8] sm:$0xf] }
 0x8ec   : > { %v10682_v9 = vor.u32 %v11752_v2, %v10681_v11  ;;  %7073 = vmatpush.bf16.msrb.mxu1 %v10970_v19  ;;  %v11815_v2 = vld [vmem:[#allocation9 + $0x3e0] sm:$0xf0] }
 0x8ed   : > { %v6738_v41 = vpop.f32.mrf.mxu2  ;;  %v15102_v10 = vpack.c.b16 %v7724_v54, %v7723_v31  ;;  %v15104_v29 = vpack.c.b16 %v7708_v12, %v7707_v3  ;;  %v6642_v49 = vpop.f32.mrf.mxu0  ;;  %v10899_v31 = vld [vmem:[#allocation9 + $0x39c] sm:$0xf0]  ;;  %v11775_v19 = vld [vmem:[#allocation9 + $0x2a4] sm:$0xf] }
 0x8ee   : > { %v6787_v4 = vpop.f32.mrf.mxu3  ;;  %v6691_v57 = vpop.f32.mrf.mxu1  ;;  %7024 = vmatpush.bf16.msrb.mxu0 %v10682_v9  ;;  %v10827_v9 = vld [vmem:[#allocation9 + $0x30c] sm:$0xf0] }
 0x8ef   : > { %v6788_v63 = vadd.f32 %v6787_v4, %v6738_v41  ;;  %7620 = vmatpush.bf16.msra.mxu2 %v15061_v46  ;;  %v6692_v33 = vadd.f32 %v6691_v57, %v6642_v49 }
 0x8f1   : > { %v7318_v26 = vpack.c.bf16 %v6788_v63, %v6690_v37 }
 0x8f3   : > { %7621 = vmatpush.bf16.msra.mxu2 %v15053_v24  ;;  %v11811_v24 = vld [vmem:[#allocation9 + $0x3c4] sm:$0xf]  ;;  %v7445_v5 = vunpack.c.l.b16 %v7318_v26  ;;  %v7461_v37 = vunpack.c.h.b16 %v7318_v26  ;;  %v10933_v26 = vld [vmem:[#allocation9 + $0x3c0] sm:$0xf] }
 0x8f4   : > { %v10938_v14 = vor.u32 %v11811_v24, %v10935_v43  ;;  %v10934_v6 = vor.u32 %v11815_v2, %v10933_v26  ;;  %v10755_v24 = vld [vmem:[#allocation9 + $0x27c] sm:$0xf0] }
 0x8f5   : > { %v6740_v40 = vpop.f32.mrf.mxu2  ;;  %v15108_v16 = vpop.f32.mrf.mxu0 }
 0x8f6   : > { %v6789_v46 = vpop.f32.mrf.mxu3  ;;  %v15111_v7 = vpop.f32.mrf.mxu1  ;;  %7172 = vmatpush.bf16.msrb.mxu3 %v10938_v14  ;;  %7074 = vmatpush.bf16.msrb.mxu1 %v10934_v6  ;;  %v11725_v6 = vld [vmem:[#allocation9 + $0x110] sm:$0xf0] }
 0x8f7   : > { %v6790_v60 = vadd.f32 %v6789_v46, %v6740_v40  ;;  %7622 = vmatpush.bf16.msra.mxu2 %v15045_v42  ;;  %v11802_v42 = vld [vmem:[#allocation9 + $0x37c] sm:$0xf]  ;;  %v10794_v46 = vor.u32 %v11775_v19, %v10791_v23 }
 0x8f8   : > { %6840 = vmatmul.bf16.gmra.mxu0 %v14957_v25  ;;  %v10902_v12 = vor.u32 %v11802_v42, %v10899_v31  ;;  %v11806_v31 = vld [vmem:[#allocation9 + $0x398] sm:$0xf0] }
 0x8f9   : > { %v7323_v50 = vpack.c.bf16 %v6790_v60, %v6692_v33  ;;  %6889 = vmatmul.bf16.gmra.mxu1 %v14959_v38  ;;  %v10645_v33 = vld [vmem:[#allocation9 + $0x180] sm:$0xf]  ;;  %v11766_v60 = vld [vmem:[#allocation9 + $0x25c] sm:$0xf] }
 0x8fa   : > { %6938 = vmatmul.bf16.gmra.mxu2 %v14957_v25  ;;  %7173 = vmatpush.bf16.msrb.mxu3 %v10902_v12  ;;  %v10646_v11 = vor.u32 %v11743_v45, %v10645_v33  ;;  %v10758_v43 = vor.u32 %v11766_v60, %v10755_v24  ;;  %v11797_v24 = vld [vmem:[#allocation9 + $0x350] sm:$0xf0] }
 0x8fb   : > { %v7446_v53 = vunpack.c.l.b16 %v7323_v50  ;;  %v7462_v3 = vunpack.c.h.b16 %v7323_v50  ;;  %6987 = vmatmul.bf16.gmra.mxu3 %v14959_v38  ;;  %7623 = vmatpush.bf16.msra.mxu2 %v15071_v13  ;;  %v10863_v13 = vld [vmem:[#allocation9 + $0x354] sm:$0xf0] }
 0x8fc   : > { %v10866_v58 = vor.u32 %v11793_v8, %v10863_v13  ;;  %7025 = vmatpush.bf16.msrb.mxu0 %v10646_v11 }
 0x8fd   : > { %v15118_v54 = vpop.f32.mrf.mxu2  ;;  %v15120_v41 = vpack.c.b16 %v7462_v3, %v7461_v37  ;;  %v15122_v4 = vpack.c.b16 %v7446_v53, %v7445_v5  ;;  %v15126_v63 = vpop.f32.mrf.mxu0  ;;  %v10609_v37 = vld [vmem:[#allocation9 + $0x138] sm:$0xf]  ;;  %v11734_v53 = vld [vmem:[#allocation9 + $0x158] sm:$0xf0] }
 0x8fe   : > { %v15124_v49 = vpop.f32.mrf.mxu3  ;;  %v15129_v57 = vpop.f32.mrf.mxu1  ;;  %7174 = vmatpush.bf16.msrb.mxu3 %v10866_v58  ;;  %v10897_v3 = vld [vmem:[#allocation9 + $0x378] sm:$0xf]  ;;  %v10610_v42 = vor.u32 %v11734_v53, %v10609_v37 }
 0x8ff   : > { %7624 = vmatpush.bf16.msra.mxu2 %v15063_v18  ;;  %v10830_v18 = vor.u32 %v11784_v21, %v10827_v9  ;;  %v10898_v8 = vor.u32 %v11806_v31, %v10897_v3  ;;  %v10573_v9 = vld [vmem:[#allocation9 + $0xf0] sm:$0xf] }
 0x900   : > { %7026 = vmatpush.bf16.msrb.mxu0 %v10610_v42  ;;  %v10574_v60 = vor.u32 %v11725_v6, %v10573_v9  ;;  %v10537_v6 = vld [vmem:[#allocation9 + $0xa8] sm:$0xf] }
 0x901   : > { %7075 = vmatpush.bf16.msrb.mxu1 %v10898_v8 }
 0x902   : > { %7175 = vmatpush.bf16.msrb.mxu3 %v10830_v18  ;;  %v10861_v18 = vld [vmem:[#allocation9 + $0x330] sm:$0xf] }
 0x903   : > { %7625 = vmatpush.bf16.msra.mxu2 %v15055_v48  ;;  %v10862_v3 = vor.u32 %v11797_v24, %v10861_v18  ;;  %v11716_v18 = vld [vmem:[#allocation9 + $0xc8] sm:$0xf0] }
 0x904   : > { %7027 = vmatpush.bf16.msrb.mxu0 %v10574_v60 }
 0x905   : > { %v15132_v20 = vpop.f32.mrf.mxu2  ;;  %v15136_v40 = vpop.f32.mrf.mxu0  ;;  %7076 = vmatpush.bf16.msrb.mxu1 %v10862_v3 }
 0x906   : > { %v15134_v44 = vpop.f32.mrf.mxu3  ;;  %v6699_v48 = vpop.f32.mrf.mxu1  ;;  %7176 = vmatpush.bf16.msrb.mxu3 %v10794_v46 }
 0x907   : > { %7626 = vmatpush.bf16.msra.mxu2 %v15047_v56 }
 0x908   : > { %6845 = vmatmul.bf16.gmra.mxu0 %v14969_v55 }
 0x909   : > { %6894 = vmatmul.bf16.gmra.mxu1 %v14971_v17 }
 0x90a   : > { %6943 = vmatmul.bf16.gmra.mxu2 %v14969_v55  ;;  %7177 = vmatpush.bf16.msrb.mxu3 %v10758_v43 }
 0x90b   : > { %6992 = vmatmul.bf16.gmra.mxu3 %v14971_v17 }
 0x90d   : > { %v6748_v14 = vpop.f32.mrf.mxu2  ;;  %v6652_v50 = vpop.f32.mrf.mxu0 }
 0x90e   : > { %v6797_v56 = vpop.f32.mrf.mxu3  ;;  %v6701_v5 = vpop.f32.mrf.mxu1 }
 0x90f   : > { %v6798_v43 = vadd.f32 %v6797_v56, %v6748_v14  ;;  %v6702_v42 = vadd.f32 %v6701_v5, %v6652_v50  ;;  %v6793_v56 = vadd.f32 %v15124_v49, %v15118_v54 }
 0x915   : > { %v6750_v12 = vpop.f32.mrf.mxu2  ;;  %v6655_v58 = vpop.f32.mrf.mxu0 }
 0x916   : > { %v6799_v13 = vpop.f32.mrf.mxu3  ;;  %v6704_v33 = vpop.f32.mrf.mxu1 }
 0x917   : > { %v6800_v19 = vadd.f32 %v6799_v13, %v6750_v12  ;;  %v6705_v23 = vadd.f32 %v6704_v33, %v6655_v58  ;;  %v6795_v12 = vadd.f32 %v15134_v44, %v15132_v20  ;;  %v6700_v13 = vadd.f32 %v6699_v48, %v15136_v40 }
 0x918   : > { %6850 = vmatmul.bf16.gmra.mxu0 %v14981_v47 }
 0x919   : > { %6899 = vmatmul.bf16.gmra.mxu1 %v14983_v39  ;;  %v15152_v58 = vpack.c.bf16 %v6800_v19, %v6702_v42  ;;  %v15161_v50 = vpack.c.bf16 %v6798_v43, %v6700_v13  ;;  %v10825_v19 = vld [vmem:[#allocation9 + $0x2e8] sm:$0xf] }
 0x91a   : > { %6948 = vmatmul.bf16.gmra.mxu2 %v14981_v47 }
 0x91b   : > { %6997 = vmatmul.bf16.gmra.mxu3 %v14983_v39  ;;  %v7466_v54 = vunpack.c.h.b16 %v15152_v58 }
 0x91d   : > { %v6753_v45 = vpop.f32.mrf.mxu2  ;;  %v6657_v11 = vpop.f32.mrf.mxu0 }
 0x91e   : > { %v6802_v26 = vpop.f32.mrf.mxu3  ;;  %v6706_v2 = vpop.f32.mrf.mxu1 }
 0x91f   : > { %v6803_v21 = vadd.f32 %v6802_v26, %v6753_v45  ;;  %v6707_v8 = vadd.f32 %v6706_v2, %v6657_v11 }
 0x921   : > { %v15147_v31 = vpack.c.bf16 %v6803_v21, %v6705_v23  ;;  %v10538_v23 = vor.u32 %v11716_v18, %v10537_v6  ;;  %v11779_v18 = vld [vmem:[#allocation9 + $0x2c0] sm:$0xf0] }
 0x923   : > { %v7467_v20 = vunpack.c.h.b16 %v15147_v31  ;;  %7028 = vmatpush.bf16.msrb.mxu0 %v10538_v23 }
 0x925   : > { %v6755_v46 = vpop.f32.mrf.mxu2  ;;  %v6660_v53 = vpop.f32.mrf.mxu0 }
 0x926   : > { %v6804_v37 = vpop.f32.mrf.mxu3  ;;  %v6709_v27 = vpop.f32.mrf.mxu1 }
 0x927   : > { %v6805_v0 = vadd.f32 %v6804_v37, %v6755_v46  ;;  %v6710_v45 = vadd.f32 %v6709_v27, %v6660_v53  ;;  %v6697_v27 = vadd.f32 %v15129_v57, %v15126_v63  ;;  %v7465_v63 = vunpack.c.h.b16 %v15161_v50  ;;  %v11788_v46 = vld [vmem:[#allocation9 + $0x308] sm:$0xf0] }
 0x928   : > { %6855 = vmatmul.bf16.gmra.mxu0 %v14993_v52  ;;  %v10826_v43 = vor.u32 %v11788_v46, %v10825_v19 }
 0x929   : > { %v7353_v14 = vpack.c.bf16 %v6805_v0, %v6707_v8  ;;  %6904 = vmatmul.bf16.gmra.mxu1 %v14995_v36  ;;  %v6695_v0 = vadd.f32 %v15111_v7, %v15108_v16  ;;  %v15167_v40 = vpack.c.bf16 %v6795_v12, %v6697_v27  ;;  %v7471_v16 = vpack.c.b16 %v7466_v54, %v7465_v63 }
 0x92a   : > { %6953 = vmatmul.bf16.gmra.mxu2 %v14993_v52  ;;  %7077 = vmatpush.bf16.msrb.mxu1 %v10826_v43  ;;  %v11698_v43 = vld [vmem:[#allocation9 + $0x38] sm:$0xf0] }
 0x92b   : > { %v7468_v44 = vunpack.c.h.b16 %v7353_v14  ;;  %7002 = vmatmul.bf16.gmra.mxu3 %v14995_v36  ;;  %v15170_v26 = vpack.c.bf16 %v6793_v56, %v6695_v0  ;;  %v7464_v21 = vunpack.c.h.b16 %v15167_v40  ;;  %v7452_v12 = vunpack.c.l.b16 %v7353_v14 }
 0x92c   : > { %v7450_v14 = vunpack.c.l.b16 %v15152_v58 }
 0x92d   : > { %v6758_v49 = vpop.f32.mrf.mxu2  ;;  %v7472_v48 = vpack.c.b16 %v7468_v44, %v7467_v20  ;;  %v6662_v33 = vpop.f32.mrf.mxu0  ;;  %v7463_v7 = vunpack.c.h.b16 %v15170_v26  ;;  %v7451_v44 = vunpack.c.l.b16 %v15147_v31  ;;  %v7448_v31 = vunpack.c.l.b16 %v15167_v40 }
 0x92e   : > { %v6807_v5 = vpop.f32.mrf.mxu3  ;;  %v6711_v11 = vpop.f32.mrf.mxu1  ;;  %v7447_v58 = vunpack.c.l.b16 %v15170_v26 }
 0x92f   : > { %v6808_v57 = vadd.f32 %v6807_v5, %v6758_v49  ;;  %7633 = vmatpush.bf16.msra.mxu3 %v7472_v48  ;;  %v6712_v2 = vadd.f32 %v6711_v11, %v6662_v33  ;;  %v7470_v24 = vpack.c.b16 %v7464_v21, %v7463_v7  ;;  %v7456_v5 = vpack.c.b16 %v7452_v12, %v7451_v44  ;;  %v10789_v7 = vld [vmem:[#allocation9 + $0x2a0] sm:$0xf] }
 0x930   : > { %v7449_v11 = vunpack.c.l.b16 %v15161_v50  ;;  %v10790_v19 = vor.u32 %v11779_v18, %v10789_v7 }
 0x931   : > { %v7358_v9 = vpack.c.bf16 %v6808_v57, %v6710_v45 }
 0x932   : > { %7078 = vmatpush.bf16.msrb.mxu1 %v10790_v19 }
 0x933   : > { %7634 = vmatpush.bf16.msra.mxu3 %v7471_v16  ;;  %v7741_v13 = vunpack.c.l.b16 %v7358_v9  ;;  %v7757_v56 = vunpack.c.h.b16 %v7358_v9  ;;  %v10501_v9 = vld [vmem:[#allocation9 + $0x60] sm:$0xf]  ;;  %v11707_v16 = vld [vmem:[#allocation9 + $0x80] sm:$0xf0] }
 0x934   : > { %v10502_v6 = vor.u32 %v11707_v16, %v10501_v9 }
 0x935   : > { %v6760_v60 = vpop.f32.mrf.mxu2  ;;  %v6665_v53 = vpop.f32.mrf.mxu0 }
 0x936   : > { %v6809_v37 = vpop.f32.mrf.mxu3  ;;  %v6714_v42 = vpop.f32.mrf.mxu1  ;;  %7029 = vmatpush.bf16.msrb.mxu0 %v10502_v6 }
 0x937   : > { %v6810_v3 = vadd.f32 %v6809_v37, %v6760_v60  ;;  %7635 = vmatpush.bf16.msra.mxu3 %v7470_v24  ;;  %v6715_v8 = vadd.f32 %v6714_v42, %v6665_v53  ;;  %v7454_v60 = vpack.c.b16 %v7448_v31, %v7447_v58  ;;  %v10465_v24 = vld [vmem:[#allocation9 + $0x18] sm:$0xf]  ;;  %v11770_v42 = vld [vmem:[#allocation9 + $0x278] sm:$0xf0] }
 0x938   : > { %6860 = vmatmul.bf16.gmra.mxu0 %v15005_v35  ;;  %v10753_v37 = vld [vmem:[#allocation9 + $0x258] sm:$0xf] }
 0x939   : > { %v7363_v45 = vpack.c.bf16 %v6810_v3, %v6712_v2  ;;  %6909 = vmatmul.bf16.gmra.mxu1 %v15007_v51  ;;  %v10466_v3 = vor.u32 %v11698_v43, %v10465_v24 }
 0x93a   : > { %6958 = vmatmul.bf16.gmra.mxu2 %v15005_v35 }
 0x93b   : > { %v7742_v27 = vunpack.c.l.b16 %v7363_v45  ;;  %v7758_v20 = vunpack.c.h.b16 %v7363_v45  ;;  %7007 = vmatmul.bf16.gmra.mxu3 %v15007_v51  ;;  %v10754_v45 = vor.u32 %v11770_v42, %v10753_v37  ;;  %7030 = vmatpush.bf16.msrb.mxu0 %v10466_v3  ;;  %v11013_v3 = vld [vmem:[#allocation9 + $0x458] sm:$0xf] }
 0x93c   : > { %7636 = vmatpush.bf16.msra.mxu3 %v15120_v41  ;;  %v7455_v41 = vpack.c.b16 %v7450_v14, %v7449_v11 }
 0x93d   : > { %v6763_v0 = vpop.f32.mrf.mxu2  ;;  %v15181_v54 = vpack.c.b16 %v7758_v20, %v7757_v56  ;;  %v15183_v49 = vpack.c.b16 %v7742_v27, %v7741_v13  ;;  %v6667_v33 = vpop.f32.mrf.mxu0  ;;  %7079 = vmatpush.bf16.msrb.mxu1 %v10754_v45 }
 0x93e   : > { %v6812_v48 = vpop.f32.mrf.mxu3  ;;  %v6716_v57 = vpop.f32.mrf.mxu1 }
 0x93f   : > { %15972 = vst [vmem:[#allocation100_spill] sm:$0xff] %v15181_v54  ;;  %v6813_v63 = vadd.f32 %v6812_v48, %v6763_v0  ;;  %v6717_v2 = vadd.f32 %v6716_v57, %v6667_v33 }
 0x940   : > { %15973 = vst [vmem:[#allocation101_spill] sm:$0xff] %v15183_v49  ;;  %7637 = vmatpush.bf16.msra.mxu3 %v7456_v5 }
 0x941   : > { %v7368_v21 = vpack.c.bf16 %v6813_v63, %v6715_v8 }
 0x943   : > { %v7743_v26 = vunpack.c.l.b16 %v7368_v21  ;;  %v7759_v13 = vunpack.c.h.b16 %v7368_v21 }
 0x944   : > { %7638 = vmatpush.bf16.msra.mxu3 %v7455_v41 }
 0x945   : > { %v6765_v23 = vpop.f32.mrf.mxu2  ;;  %v6670_v50 = vpop.f32.mrf.mxu0 }
 0x946   : > { %v6814_v46 = vpop.f32.mrf.mxu3  ;;  %v6719_v53 = vpop.f32.mrf.mxu1 }
 0x947   : > { %v6815_v40 = vadd.f32 %v6814_v46, %v6765_v23  ;;  %v6720_v8 = vadd.f32 %v6719_v53, %v6670_v50  ;;  %v11762_v53 = vld [vmem:[#allocation9 + $0x238] sm:$0xf0] }
 0x948   : > { %7639 = vmatpush.bf16.msra.mxu3 %v7454_v60  ;;  %6865 = vmatmul.bf16.gmra.mxu0 %v15017_v1 }
 0x949   : > { %v7373_v12 = vpack.c.bf16 %v6815_v40, %v6717_v2  ;;  %6914 = vmatmul.bf16.gmra.mxu1 %v15019_v28  ;;  %v10725_v40 = vld [vmem:[#allocation9 + $0x218] sm:$0xf] }
 0x94a   : > { %6963 = vmatmul.bf16.gmra.mxu2 %v15017_v1  ;;  %v10726_v42 = vor.u32 %v11762_v53, %v10725_v40 }
 0x94b   : > { %v7744_v56 = vunpack.c.l.b16 %v7373_v12  ;;  %v7760_v27 = vunpack.c.h.b16 %v7373_v12  ;;  %7012 = vmatmul.bf16.gmra.mxu3 %v15019_v28 }
 0x94c   : > { %7640 = vmatpush.bf16.msra.mxu3 %v15122_v4  ;;  %7219 = vmatpush.bf16.msra.mxu0 %v10726_v42 }
 0x94d   : > { %v6768_v20 = vpop.f32.mrf.mxu2  ;;  %v15194_v44 = vpack.c.b16 %v7760_v27, %v7759_v13  ;;  %v15196_v0 = vpack.c.b16 %v7744_v56, %v7743_v26  ;;  %v6672_v48 = vpop.f32.mrf.mxu0 }
 0x94e   : > { %v6817_v14 = vpop.f32.mrf.mxu3  ;;  %v6721_v33 = vpop.f32.mrf.mxu1 }
 0x94f   : > { %15974 = vst [vmem:[#allocation102_spill] sm:$0xff] %v15194_v44  ;;  %v6818_v5 = vadd.f32 %v6817_v14, %v6768_v20  ;;  %v6722_v63 = vadd.f32 %v6721_v33, %v6672_v48 }
 0x950   : > { %15975 = vst [vmem:[#allocation103_spill] sm:$0xff] %v15196_v0 }
 0x951   : > { %v7378_v57 = vpack.c.bf16 %v6818_v5, %v6720_v8  ;;  %v11834_v8 = vld [vmem:[#allocation9 + $0x478] sm:$0xf0] }
 0x952   : > { %v11014_v12 = vor.u32 %v11834_v8, %v11013_v3 }
 0x953   : > { %v7745_v4 = vunpack.c.l.b16 %v7378_v57  ;;  %v7761_v7 = vunpack.c.h.b16 %v7378_v57 }
 0x954   : > { %7268 = vmatpush.bf16.msra.mxu1 %v11014_v12 }
 0x955   : > { %v6770_v11 = vpop.f32.mrf.mxu2  ;;  %v6675_v21 = vpop.f32.mrf.mxu0 }
 0x956   : > { %v6819_v2 = vpop.f32.mrf.mxu3  ;;  %v6724_v41 = vpop.f32.mrf.mxu1 }
 0x957   : > { %v6820_v31 = vadd.f32 %v6819_v2, %v6770_v11  ;;  %v6725_v9 = vadd.f32 %v6724_v41, %v6675_v21 }
 0x958   : > { %6870 = vmatmul.bf16.gmra.mxu0 %v15029_v32 }
 0x959   : > { %v7383_v16 = vpack.c.bf16 %v6820_v31, %v6722_v63  ;;  %6919 = vmatmul.bf16.gmra.mxu1 %v15031_v22 }
 0x95a   : > { %6968 = vmatmul.bf16.gmra.mxu2 %v15029_v32 }
 0x95b   : > { %v7746_v6 = vunpack.c.l.b16 %v7383_v16  ;;  %v7762_v18 = vunpack.c.h.b16 %v7383_v16  ;;  %7017 = vmatmul.bf16.gmra.mxu3 %v15031_v22 }
 0x95d   : > { %v6773_v58 = vpop.f32.mrf.mxu2  ;;  %v15202_v19 = vpack.c.b16 %v7762_v18, %v7761_v7  ;;  %v15204_v23 = vpack.c.b16 %v7746_v6, %v7745_v4  ;;  %v6677_v60 = vpop.f32.mrf.mxu0  ;;  %v10689_v7 = vld [vmem:[#allocation9 + $0x1d0] sm:$0xf]  ;;  %v11753_v6 = vld [vmem:[#allocation9 + $0x1f0] sm:$0xf0] }
 0x95e   : > { %v6822_v46 = vpop.f32.mrf.mxu3  ;;  %v6726_v24 = vpop.f32.mrf.mxu1  ;;  %v10977_v18 = vld [vmem:[#allocation9 + $0x410] sm:$0xf] }
 0x95f   : > { %15976 = vst [vmem:[#allocation104_spill] sm:$0xff] %v15202_v19  ;;  %v6823_v50 = vadd.f32 %v6822_v46, %v6773_v58  ;;  %v6727_v43 = vadd.f32 %v6726_v24, %v6677_v60  ;;  %v10690_v58 = vor.u32 %v11753_v6, %v10689_v7  ;;  %v11825_v46 = vld [vmem:[#allocation9 + $0x430] sm:$0xf0] }
 0x960   : > { %15977 = vst [vmem:[#allocation105_spill] sm:$0xff] %v15204_v23 }
 0x961   : > { %v7388_v37 = vpack.c.bf16 %v6823_v50, %v6725_v9  ;;  %v10978_v50 = vor.u32 %v11825_v46, %v10977_v18  ;;  %7220 = vmatpush.bf16.msra.mxu0 %v10690_v58  ;;  %v10617_v18 = vld [vmem:[#allocation9 + $0x140] sm:$0xf]  ;;  %v11735_v58 = vld [vmem:[#allocation9 + $0x160] sm:$0xf0] }
 0x962   : > { %v10905_v46 = vld [vmem:[#allocation9 + $0x380] sm:$0xf] }
 0x963   : > { %v7747_v48 = vunpack.c.l.b16 %v7388_v37  ;;  %v7763_v5 = vunpack.c.h.b16 %v7388_v37  ;;  %7269 = vmatpush.bf16.msra.mxu1 %v10978_v50  ;;  %v11807_v50 = vld [vmem:[#allocation9 + $0x3a0] sm:$0xf0] }
 0x965   : > { %v6775_v45 = vpop.f32.mrf.mxu2  ;;  %v6836_v13 = vpop.f32.mrf.mxu0 }
 0x966   : > { %v6824_v26 = vpop.f32.mrf.mxu3  ;;  %v6885_v27 = vpop.f32.mrf.mxu1 }
 0x967   : > { %v6825_v56 = vadd.f32 %v6824_v26, %v6775_v45  ;;  %v6886_v20 = vadd.f32 %v6885_v27, %v6836_v13 }
 0x968   : > { %7031 = vmatmul.bf16.vlgmr.msrb.gmra.mxu0 %v14945_v62 }
 0x969   : > { %v7393_v14 = vpack.c.bf16 %v6825_v56, %v6727_v43  ;;  %7080 = vmatmul.bf16.vlgmr.msrb.gmra.mxu1 %v14947_v59 }
 0x96a   : > { %7129 = vmatmul.bf16.vlgmr.msrb.gmra.mxu2 %v14945_v62 }
 0x96b   : > { %v7748_v33 = vunpack.c.l.b16 %v7393_v14  ;;  %v7764_v63 = vunpack.c.h.b16 %v7393_v14  ;;  %7178 = vmatmul.bf16.vlgmr.msrb.gmra.mxu3 %v14947_v59  ;;  %v10653_v14 = vld [vmem:[#allocation9 + $0x188] sm:$0xf] }
 0x96d   : > { %v6934_v57 = vpop.f32.mrf.mxu2  ;;  %v15210_v11 = vpack.c.b16 %v7764_v63, %v7763_v5  ;;  %v15212_v2 = vpack.c.b16 %v7748_v33, %v7747_v48  ;;  %v6838_v31 = vpop.f32.mrf.mxu0  ;;  %v11744_v48 = vld [vmem:[#allocation9 + $0x1a8] sm:$0xf0]  ;;  %v10941_v5 = vld [vmem:[#allocation9 + $0x3c8] sm:$0xf] }
 0x96e   : > { %v6983_v21 = vpop.f32.mrf.mxu3  ;;  %v6887_v9 = vpop.f32.mrf.mxu1  ;;  %v10654_v33 = vor.u32 %v11744_v48, %v10653_v14  ;;  %v11816_v63 = vld [vmem:[#allocation9 + $0x3e8] sm:$0xf0] }
 0x96f   : > { %15978 = vst [vmem:[#allocation106_spill] sm:$0xff] %v15210_v11  ;;  %v6984_v41 = vadd.f32 %v6983_v21, %v6934_v57  ;;  %v6888_v16 = vadd.f32 %v6887_v9, %v6838_v31  ;;  %v10942_v21 = vor.u32 %v11816_v63, %v10941_v5  ;;  %v11726_v63 = vld [vmem:[#allocation9 + $0x118] sm:$0xf0] }
 0x970   : > { %15979 = vst [vmem:[#allocation107_spill] sm:$0xff] %v15212_v2  ;;  %7221 = vmatpush.bf16.msra.mxu0 %v10654_v33  ;;  %v10581_v33 = vld [vmem:[#allocation9 + $0xf8] sm:$0xf] }
 0x971   : > { %v7319_v4 = vpack.c.bf16 %v6984_v41, %v6886_v20  ;;  %7270 = vmatpush.bf16.msra.mxu1 %v10942_v21  ;;  %v10869_v21 = vld [vmem:[#allocation9 + $0x338] sm:$0xf] }
 0x973   : > { %v7485_v3 = vunpack.c.l.b16 %v7319_v4  ;;  %v7501_v42 = vunpack.c.h.b16 %v7319_v4 }
 0x975   : > { %v6936_v60 = vpop.f32.mrf.mxu2  ;;  %v15214_v43 = vpop.f32.mrf.mxu0 }
 0x976   : > { %v6985_v24 = vpop.f32.mrf.mxu3  ;;  %v15216_v40 = vpop.f32.mrf.mxu1 }
 0x977   : > { %v6986_v37 = vadd.f32 %v6985_v24, %v6936_v60  ;;  %v10618_v60 = vor.u32 %v11735_v58, %v10617_v18  ;;  %v10582_v18 = vor.u32 %v11726_v63, %v10581_v33  ;;  %v11798_v58 = vld [vmem:[#allocation9 + $0x358] sm:$0xf0] }
 0x978   : > { %7036 = vmatmul.bf16.gmra.mxu0 %v14957_v25 }
 0x979   : > { %v7324_v53 = vpack.c.bf16 %v6986_v37, %v6888_v16  ;;  %7085 = vmatmul.bf16.gmra.mxu1 %v14959_v38  ;;  %v10906_v37 = vor.u32 %v11807_v50, %v10905_v46  ;;  %7222 = vmatpush.bf16.msra.mxu0 %v10618_v60 }
 0x97a   : > { %7134 = vmatmul.bf16.gmra.mxu2 %v14957_v25 }
 0x97b   : > { %v7486_v8 = vunpack.c.l.b16 %v7324_v53  ;;  %v7502_v45 = vunpack.c.h.b16 %v7324_v53  ;;  %7183 = vmatmul.bf16.gmra.mxu3 %v14959_v38  ;;  %7271 = vmatpush.bf16.msra.mxu1 %v10906_v37  ;;  %v10870_v37 = vor.u32 %v11798_v58, %v10869_v21 }
 0x97d   : > { %v15222_v12 = vpop.f32.mrf.mxu2  ;;  %v15224_v26 = vpack.c.b16 %v7502_v45, %v7501_v42  ;;  %v15226_v13 = vpack.c.b16 %v7486_v8, %v7485_v3  ;;  %v15230_v27 = vpop.f32.mrf.mxu0  ;;  %7223 = vmatpush.bf16.msra.mxu0 %v10582_v18 }
 0x97e   : > { %v15228_v56 = vpop.f32.mrf.mxu3  ;;  %v15232_v20 = vpop.f32.mrf.mxu1 }
 0x97f   : > { %7272 = vmatpush.bf16.msra.mxu1 %v10870_v37 }
 0x985   : > { %v6941_v57 = vpop.f32.mrf.mxu2  ;;  %v6846_v41 = vpop.f32.mrf.mxu0 }
 0x986   : > { %v6990_v31 = vpop.f32.mrf.mxu3  ;;  %v6895_v9 = vpop.f32.mrf.mxu1 }
 0x987   : > { %v6896_v61 = vadd.f32 %v6895_v9, %v6846_v41 }
 0x988   : > { %7041 = vmatmul.bf16.gmra.mxu0 %v14969_v55 }
 0x989   : > { %7090 = vmatmul.bf16.gmra.mxu1 %v14971_v17 }
 0x98a   : > { %7139 = vmatmul.bf16.gmra.mxu2 %v14969_v55 }
 0x98b   : > { %7188 = vmatmul.bf16.gmra.mxu3 %v14971_v17 }
 0x98d   : > { %v6944_v16 = vpop.f32.mrf.mxu2  ;;  %v6848_v7 = vpop.f32.mrf.mxu0 }
 0x98e   : > { %v6993_v4 = vpop.f32.mrf.mxu3  ;;  %v6897_v6 = vpop.f32.mrf.mxu1 }
 0x98f   : > { %v6994_v49 = vadd.f32 %v6993_v4, %v6944_v16  ;;  %v6898_v2 = vadd.f32 %v6897_v6, %v6848_v7  ;;  %v6989_v16 = vadd.f32 %v15228_v56, %v15222_v12  ;;  %v10545_v6 = vld [vmem:[#allocation9 + $0xb0] sm:$0xf] }
 0x991   : > { %v15253_v4 = vpack.c.bf16 %v6994_v49, %v6896_v61 }
 0x993   : > { %v7505_v61 = vunpack.c.h.b16 %v15253_v4 }
 0x995   : > { %v6946_v24 = vpop.f32.mrf.mxu2  ;;  %v6851_v3 = vpop.f32.mrf.mxu0 }
 0x996   : > { %v6995_v53 = vpop.f32.mrf.mxu3  ;;  %v6900_v42 = vpop.f32.mrf.mxu1 }
 0x997   : > { %v6996_v46 = vadd.f32 %v6995_v53, %v6946_v24  ;;  %v6901_v60 = vadd.f32 %v6900_v42, %v6851_v3  ;;  %v11717_v53 = vld [vmem:[#allocation9 + $0xd0] sm:$0xf0]  ;;  %v10833_v3 = vld [vmem:[#allocation9 + $0x2f0] sm:$0xf] }
 0x998   : > { %7046 = vmatmul.bf16.gmra.mxu0 %v14981_v47  ;;  %v10546_v42 = vor.u32 %v11717_v53, %v10545_v6  ;;  %v11780_v6 = vld [vmem:[#allocation9 + $0x2c8] sm:$0xf0] }
 0x999   : > { %7095 = vmatmul.bf16.gmra.mxu1 %v14983_v39  ;;  %v15244_v33 = vpack.c.bf16 %v6996_v46, %v6898_v2 }
 0x99a   : > { %7144 = vmatmul.bf16.gmra.mxu2 %v14981_v47  ;;  %7224 = vmatpush.bf16.msra.mxu0 %v10546_v42 }
 0x99b   : > { %7193 = vmatmul.bf16.gmra.mxu3 %v14983_v39  ;;  %v7506_v2 = vunpack.c.h.b16 %v15244_v33 }
 0x99d   : > { %v6949_v8 = vpop.f32.mrf.mxu2  ;;  %v6853_v14 = vpop.f32.mrf.mxu0 }
 0x99e   : > { %v6998_v45 = vpop.f32.mrf.mxu3  ;;  %v6902_v48 = vpop.f32.mrf.mxu1 }
 0x99f   : > { %v6999_v5 = vadd.f32 %v6998_v45, %v6949_v8  ;;  %v6903_v44 = vadd.f32 %v6902_v48, %v6853_v14  ;;  %v6991_v45 = vadd.f32 %v6990_v31, %v6941_v57  ;;  %v11789_v14 = vld [vmem:[#allocation9 + $0x310] sm:$0xf0] }
 0x9a0   : > { %v10834_v63 = vor.u32 %v11789_v14, %v10833_v3 }
 0x9a1   : > { %v15242_v54 = vpack.c.bf16 %v6999_v5, %v6901_v60 }
 0x9a2   : > { %7273 = vmatpush.bf16.msra.mxu1 %v10834_v63 }
 0x9a5   : > { %v6951_v50 = vpop.f32.mrf.mxu2  ;;  %v6856_v23 = vpop.f32.mrf.mxu0 }
 0x9a6   : > { %v7000_v0 = vpop.f32.mrf.mxu3  ;;  %v6905_v11 = vpop.f32.mrf.mxu1 }
 0x9a7   : > { %v7001_v19 = vadd.f32 %v7000_v0, %v6951_v50  ;;  %v6906_v8 = vadd.f32 %v6905_v11, %v6856_v23  ;;  %v6893_v0 = vadd.f32 %v15232_v20, %v15230_v27  ;;  %v7507_v23 = vunpack.c.h.b16 %v15242_v54 }
 0x9a8   : > { %7051 = vmatmul.bf16.gmra.mxu0 %v14993_v52 }
 0x9a9   : > { %v7354_v24 = vpack.c.bf16 %v7001_v19, %v6903_v44  ;;  %7100 = vmatmul.bf16.gmra.mxu1 %v14995_v36  ;;  %v6891_v44 = vadd.f32 %v15216_v40, %v15214_v43  ;;  %v15259_v19 = vpack.c.bf16 %v6991_v45, %v6893_v0  ;;  %v7511_v43 = vpack.c.b16 %v7506_v2, %v7505_v61 }
 0x9aa   : > { %7149 = vmatmul.bf16.gmra.mxu2 %v14993_v52 }
 0x9ab   : > { %v7508_v11 = vunpack.c.h.b16 %v7354_v24  ;;  %7198 = vmatmul.bf16.gmra.mxu3 %v14995_v36  ;;  %v15262_v41 = vpack.c.bf16 %v6989_v16, %v6891_v44  ;;  %v7504_v9 = vunpack.c.h.b16 %v15259_v19  ;;  %v7492_v50 = vunpack.c.l.b16 %v7354_v24 }
 0x9ad   : > { %v6954_v12 = vpop.f32.mrf.mxu2  ;;  %v7512_v56 = vpack.c.b16 %v7508_v11, %v7507_v23  ;;  %v6858_v31 = vpop.f32.mrf.mxu0  ;;  %v7503_v40 = vunpack.c.h.b16 %v15262_v41  ;;  %v7490_v11 = vunpack.c.l.b16 %v15244_v33  ;;  %v11708_v33 = vld [vmem:[#allocation9 + $0x88] sm:$0xf0] }
 0x9ae   : > { %v7003_v57 = vpop.f32.mrf.mxu3  ;;  %v6907_v27 = vpop.f32.mrf.mxu1 }
 0x9af   : > { %v7004_v49 = vadd.f32 %v7003_v57, %v6954_v12  ;;  %7647 = vmatpush.bf16.msrb.mxu2 %v7512_v56  ;;  %v6908_v20 = vadd.f32 %v6907_v27, %v6858_v31  ;;  %v7510_v5 = vpack.c.b16 %v7504_v9, %v7503_v40  ;;  %v7489_v57 = vunpack.c.l.b16 %v15253_v4  ;;  %v10509_v9 = vld [vmem:[#allocation9 + $0x68] sm:$0xf] }
 0x9b0   : > { %v7488_v27 = vunpack.c.l.b16 %v15259_v19  ;;  %v10510_v40 = vor.u32 %v11708_v33, %v10509_v9  ;;  %v10761_v19 = vld [vmem:[#allocation9 + $0x260] sm:$0xf] }
 0x9b1   : > { %v7359_v7 = vpack.c.bf16 %v7004_v49, %v6906_v8  ;;  %v7491_v8 = vunpack.c.l.b16 %v15242_v54 }
 0x9b2   : > { %7225 = vmatpush.bf16.msra.mxu0 %v10510_v40 }
 0x9b3   : > { %7648 = vmatpush.bf16.msrb.mxu2 %v7511_v43  ;;  %v7781_v45 = vunpack.c.l.b16 %v7359_v7  ;;  %v7797_v16 = vunpack.c.h.b16 %v7359_v7  ;;  %v7496_v44 = vpack.c.b16 %v7492_v50, %v7491_v8  ;;  %v10797_v7 = vld [vmem:[#allocation9 + $0x2a8] sm:$0xf]  ;;  %v7487_v43 = vunpack.c.l.b16 %v15262_v41 }
 0x9b4   : > { %v10798_v53 = vor.u32 %v11780_v6, %v10797_v7 }
 0x9b5   : > { %v6956_v48 = vpop.f32.mrf.mxu2  ;;  %v6861_v18 = vpop.f32.mrf.mxu0  ;;  %v7494_v42 = vpack.c.b16 %v7488_v27, %v7487_v43 }
 0x9b6   : > { %v7005_v21 = vpop.f32.mrf.mxu3  ;;  %v6910_v46 = vpop.f32.mrf.mxu1  ;;  %7274 = vmatpush.bf16.msra.mxu1 %v10798_v53 }
 0x9b7   : > { %v7006_v58 = vadd.f32 %v7005_v21, %v6956_v48  ;;  %7649 = vmatpush.bf16.msrb.mxu2 %v7510_v5  ;;  %v6911_v60 = vadd.f32 %v6910_v46, %v6861_v18  ;;  %v10473_v48 = vld [vmem:[#allocation9 + $0x20] sm:$0xf]  ;;  %v11699_v5 = vld [vmem:[#allocation9 + $0x40] sm:$0xf0] }
 0x9b8   : > { %7056 = vmatmul.bf16.gmra.mxu0 %v15005_v35  ;;  %v11771_v18 = vld [vmem:[#allocation9 + $0x280] sm:$0xf0]  ;;  %v10474_v46 = vor.u32 %v11699_v5, %v10473_v48 }
 0x9b9   : > { %v7364_v37 = vpack.c.bf16 %v7006_v58, %v6908_v20  ;;  %7105 = vmatmul.bf16.gmra.mxu1 %v15007_v51  ;;  %v10762_v41 = vor.u32 %v11771_v18, %v10761_v19 }
 0x9ba   : > { %7154 = vmatmul.bf16.gmra.mxu2 %v15005_v35  ;;  %7226 = vmatpush.bf16.msra.mxu0 %v10474_v46 }
 0x9bb   : > { %v7782_v0 = vunpack.c.l.b16 %v7364_v37  ;;  %v7798_v23 = vunpack.c.h.b16 %v7364_v37  ;;  %7203 = vmatmul.bf16.gmra.mxu3 %v15007_v51  ;;  %7650 = vmatpush.bf16.msrb.mxu2 %v15224_v26  ;;  %v7495_v26 = vpack.c.b16 %v7490_v11, %v7489_v57 }
 0x9bc   : > { %7275 = vmatpush.bf16.msra.mxu1 %v10762_v41 }
 0x9bd   : > { %v6959_v24 = vpop.f32.mrf.mxu2  ;;  %v15274_v2 = vpack.c.b16 %v7798_v23, %v7797_v16  ;;  %v15276_v12 = vpack.c.b16 %v7782_v0, %v7781_v45  ;;  %v6863_v56 = vpop.f32.mrf.mxu0 }
 0x9be   : > { %v7008_v54 = vpop.f32.mrf.mxu3  ;;  %v6912_v61 = vpop.f32.mrf.mxu1 }
 0x9bf   : > { %v7009_v31 = vadd.f32 %v7008_v54, %v6959_v24  ;;  %7651 = vmatpush.bf16.msrb.mxu2 %v7496_v44  ;;  %v6913_v49 = vadd.f32 %v6912_v61, %v6863_v56 }
 0x9c1   : > { %v7369_v20 = vpack.c.bf16 %v7009_v31, %v6911_v60 }
 0x9c3   : > { %7652 = vmatpush.bf16.msrb.mxu2 %v7495_v26  ;;  %v7783_v50 = vunpack.c.l.b16 %v7369_v20  ;;  %v7799_v37 = vunpack.c.h.b16 %v7369_v20 }
 0x9c5   : > { %v6961_v3 = vpop.f32.mrf.mxu2  ;;  %v6866_v14 = vpop.f32.mrf.mxu0 }
 0x9c6   : > { %v7010_v4 = vpop.f32.mrf.mxu3  ;;  %v6915_v21 = vpop.f32.mrf.mxu1 }
 0x9c7   : > { %v7011_v63 = vadd.f32 %v7010_v4, %v6961_v3  ;;  %7653 = vmatpush.bf16.msrb.mxu2 %v7494_v42  ;;  %v6916_v58 = vadd.f32 %v6915_v21, %v6866_v14 }
 0x9c8   : > { %7061 = vmatmul.bf16.gmra.mxu0 %v15017_v1 }
 0x9c9   : > { %v7374_v60 = vpack.c.bf16 %v7011_v63, %v6913_v49  ;;  %7110 = vmatmul.bf16.gmra.mxu1 %v15019_v28 }
 0x9ca   : > { %7159 = vmatmul.bf16.gmra.mxu2 %v15017_v1 }
 0x9cb   : > { %v7784_v8 = vunpack.c.l.b16 %v7374_v60  ;;  %v7800_v45 = vunpack.c.h.b16 %v7374_v60  ;;  %7208 = vmatmul.bf16.gmra.mxu3 %v15019_v28  ;;  %7654 = vmatpush.bf16.msrb.mxu2 %v15226_v13 }
 0x9cd   : > { %v6964_v16 = vpop.f32.mrf.mxu2  ;;  %v15286_v0 = vpack.c.b16 %v7800_v45, %v7799_v37  ;;  %v15288_v23 = vpack.c.b16 %v7784_v8, %v7783_v50  ;;  %v6868_v24 = vpop.f32.mrf.mxu0 }
 0x9ce   : > { %v7013_v11 = vpop.f32.mrf.mxu3  ;;  %v6917_v54 = vpop.f32.mrf.mxu1 }
 0x9cf   : > { %v7014_v44 = vadd.f32 %v7013_v11, %v6964_v16  ;;  %v6918_v56 = vadd.f32 %v6917_v54, %v6868_v24 }
 0x9d1   : > { %v7379_v57 = vpack.c.bf16 %v7014_v44, %v6916_v58 }
 0x9d3   : > { %v7785_v9 = vunpack.c.l.b16 %v7379_v57  ;;  %v7801_v33 = vunpack.c.h.b16 %v7379_v57 }
 0x9d5   : > { %v6966_v31 = vpop.f32.mrf.mxu2  ;;  %v6871_v49 = vpop.f32.mrf.mxu0 }
 0x9d6   : > { %v7015_v61 = vpop.f32.mrf.mxu3  ;;  %v6920_v20 = vpop.f32.mrf.mxu1 }
 0x9d7   : > { %v7016_v27 = vadd.f32 %v7015_v61, %v6966_v31  ;;  %v6921_v26 = vadd.f32 %v6920_v20, %v6871_v49 }
 0x9d8   : > { %7066 = vmatmul.bf16.gmra.mxu0 %v15029_v32 }
 0x9d9   : > { %v7384_v13 = vpack.c.bf16 %v7016_v27, %v6918_v56  ;;  %7115 = vmatmul.bf16.gmra.mxu1 %v15031_v22 }
 0x9da   : > { %7164 = vmatmul.bf16.gmra.mxu2 %v15029_v32 }
 0x9db   : > { %v7786_v7 = vunpack.c.l.b16 %v7384_v13  ;;  %v7802_v43 = vunpack.c.h.b16 %v7384_v13  ;;  %7213 = vmatmul.bf16.gmra.mxu3 %v15031_v22 }
 0x9dd   : > { %v6969_v40 = vpop.f32.mrf.mxu2  ;;  %v15294_v6 = vpack.c.b16 %v7802_v43, %v7801_v33  ;;  %v15296_v53 = vpack.c.b16 %v7786_v7, %v7785_v9  ;;  %v6873_v42 = vpop.f32.mrf.mxu0 }
 0x9de   : > { %v7018_v3 = vpop.f32.mrf.mxu3  ;;  %v6922_v14 = vpop.f32.mrf.mxu1 }
 0x9df   : > { %v7019_v4 = vadd.f32 %v7018_v3, %v6969_v40  ;;  %v6923_v48 = vadd.f32 %v6922_v14, %v6873_v42 }
 0x9e1   : > { %v7389_v5 = vpack.c.bf16 %v7019_v4, %v6921_v26 }
 0x9e3   : > { %v7787_v60 = vunpack.c.l.b16 %v7389_v5  ;;  %v7803_v50 = vunpack.c.h.b16 %v7389_v5 }
 0x9e5   : > { %v6971_v19 = vpop.f32.mrf.mxu2  ;;  %v7032_v21 = vpop.f32.mrf.mxu0 }
 0x9e6   : > { %v7020_v63 = vpop.f32.mrf.mxu3  ;;  %v7081_v58 = vpop.f32.mrf.mxu1 }
 0x9e7   : > { %v7021_v18 = vadd.f32 %v7020_v63, %v6971_v19  ;;  %v7082_v46 = vadd.f32 %v7081_v58, %v7032_v21 }
 0x9e8   : > { %7227 = vmatmul.bf16.vlgmr.msra.gmra.mxu0 %v14945_v62 }
 0x9e9   : > { %v7394_v41 = vpack.c.bf16 %v7021_v18, %v6923_v48  ;;  %7276 = vmatmul.bf16.vlgmr.msra.gmra.mxu1 %v14947_v59 }
 0x9eb   : > { %v7788_v37 = vunpack.c.l.b16 %v7394_v41  ;;  %v7804_v8 = vunpack.c.h.b16 %v7394_v41 }
 0x9ed   : > { %v7130_v45 = vpop.f32.mrf.mxu2  ;;  %v15300_v16 = vpack.c.b16 %v7804_v8, %v7803_v50  ;;  %v15302_v11 = vpack.c.b16 %v7788_v37, %v7787_v60  ;;  %v7034_v44 = vpop.f32.mrf.mxu0 }
 0x9ee   : > { %v7179_v24 = vpop.f32.mrf.mxu3  ;;  %v7083_v56 = vpop.f32.mrf.mxu1 }
 0x9ef   : > { %v7180_v54 = vadd.f32 %v7179_v24, %v7130_v45  ;;  %v7084_v57 = vadd.f32 %v7083_v56, %v7034_v44 }
 0x9f1   : > { %v7320_v31 = vpack.c.bf16 %v7180_v54, %v7082_v46 }
 0x9f3   : > { %v7525_v26 = vunpack.c.l.b16 %v7320_v31  ;;  %v7541_v13 = vunpack.c.h.b16 %v7320_v31 }
 0x9f5   : > { %v7132_v61 = vpop.f32.mrf.mxu2  ;;  %v15304_v62 = vpop.f32.mrf.mxu0 }
 0x9f6   : > { %v7181_v49 = vpop.f32.mrf.mxu3  ;;  %v7086_v27 = vpop.f32.mrf.mxu1 }
 0x9f7   : > { %v7182_v59 = vadd.f32 %v7181_v49, %v7132_v61 }
 0x9f8   : > { %7232 = vmatmul.bf16.gmra.mxu0 %v14957_v25 }
 0x9f9   : > { %v7325_v20 = vpack.c.bf16 %v7182_v59, %v7084_v57  ;;  %7281 = vmatmul.bf16.gmra.mxu1 %v14959_v38 }
 0x9fb   : > { %v7526_v9 = vunpack.c.l.b16 %v7325_v20  ;;  %v7542_v33 = vunpack.c.h.b16 %v7325_v20 }
 0x9fd   : > { %v7135_v7 = vpop.f32.mrf.mxu2  ;;  %v15308_v43 = vpack.c.b16 %v7542_v33, %v7541_v13  ;;  %v15310_v40 = vpack.c.b16 %v7526_v9, %v7525_v26  ;;  %v7039_v42 = vpop.f32.mrf.mxu0 }
 0x9fe   : > { %v7184_v3 = vpop.f32.mrf.mxu3  ;;  %v7088_v4 = vpop.f32.mrf.mxu1 }
 0x9ff   : > { %v7185_v9 = vadd.f32 %v7184_v3, %v7135_v7  ;;  %v7089_v33 = vadd.f32 %v7088_v4, %v7039_v42 }
 0xa05   : > { %v7137_v14 = vpop.f32.mrf.mxu2  ;;  %v7042_v5 = vpop.f32.mrf.mxu0 }
 0xa06   : > { %v7186_v48 = vpop.f32.mrf.mxu3  ;;  %v7091_v19 = vpop.f32.mrf.mxu1 }
 0xa07   : > { %v7092_v26 = vadd.f32 %v7091_v19, %v7042_v5 }
 0xa08   : > { %7237 = vmatmul.bf16.gmra.mxu0 %v14969_v55 }
 0xa09   : > { %7286 = vmatmul.bf16.gmra.mxu1 %v14971_v17 }
 0xa0d   : > { %v7140_v25 = vpop.f32.mrf.mxu2  ;;  %v7044_v63 = vpop.f32.mrf.mxu0 }
 0xa0e   : > { %v7189_v38 = vpop.f32.mrf.mxu3  ;;  %v7093_v21 = vpop.f32.mrf.mxu1 }
 0xa0f   : > { %v7190_v44 = vadd.f32 %v7189_v38, %v7140_v25  ;;  %v7094_v57 = vadd.f32 %v7093_v21, %v7044_v63  ;;  %v11019_v25 = vld [vmem:[#allocation12 + $0x14] sm:$0xf0] }
 0xa11   : > { %v7340_v38 = vpack.c.bf16 %v7190_v44, %v7092_v26 }
 0xa15   : > { %v7142_v18 = vpop.f32.mrf.mxu2  ;;  %v7047_v46 = vpop.f32.mrf.mxu0 }
 0xa16   : > { %v7191_v58 = vpop.f32.mrf.mxu3  ;;  %v7096_v41 = vpop.f32.mrf.mxu1 }
 0xa17   : > { %v7192_v55 = vadd.f32 %v7191_v58, %v7142_v18  ;;  %v7097_v24 = vadd.f32 %v7096_v41, %v7047_v46  ;;  %v11835_v18 = vld [vmem:[#allocation12 + $0x4] sm:$0xf]  ;;  %v7087_v46 = vadd.f32 %v7086_v27, %v15304_v62 }
 0xa18   : > { %7242 = vmatmul.bf16.gmra.mxu0 %v14981_v47  ;;  %v7187_v47 = vadd.f32 %v7186_v48, %v7137_v14  ;;  %v15318_v21 = vor.u32 %v11835_v18, %v11019_v25 }
 0xa19   : > { %7291 = vmatmul.bf16.gmra.mxu1 %v14983_v39  ;;  %v7345_v39 = vpack.c.bf16 %v7192_v55, %v7094_v57  ;;  %v7330_v3 = vpack.c.bf16 %v7185_v9, %v7087_v46 }
 0xa1a   : > { %v7335_v41 = vpack.c.bf16 %v7187_v47, %v7089_v33  ;;  %7641 = vmatmul.bf16.vlgmr.msra.gmra.mxu3 %v15318_v21 }
 0xa1b   : > { %v7546_v14 = vunpack.c.h.b16 %v7345_v39  ;;  %v7543_v62 = vunpack.c.h.b16 %v7330_v3 }
 0xa1c   : > { %v7544_v19 = vunpack.c.h.b16 %v7335_v41 }
 0xa1d   : > { %v7145_v60 = vpop.f32.mrf.mxu2  ;;  %v7049_v37 = vpop.f32.mrf.mxu0 }
 0xa1e   : > { %v7194_v50 = vpop.f32.mrf.mxu3  ;;  %v7098_v8 = vpop.f32.mrf.mxu1  ;;  %v7550_v27 = vpack.c.b16 %v7544_v19, %v7543_v62 }
 0xa1f   : > { %v7195_v45 = vadd.f32 %v7194_v50, %v7145_v60  ;;  %v7099_v61 = vadd.f32 %v7098_v8, %v7049_v37 }
 0xa21   : > { %v7350_v31 = vpack.c.bf16 %v7195_v45, %v7097_v24 }
 0xa23   : > { %v7547_v58 = vunpack.c.h.b16 %v7350_v31  ;;  %v7531_v24 = vunpack.c.l.b16 %v7350_v31  ;;  %v11027_v31 = vld [vmem:[#allocation12 + $0x1c] sm:$0xf0] }
 0xa25   : > { %v7147_v17 = vpop.f32.mrf.mxu2  ;;  %v7052_v56 = vpop.f32.mrf.mxu0 }
 0xa26   : > { %v7196_v54 = vpop.f32.mrf.mxu3  ;;  %v7101_v59 = vpop.f32.mrf.mxu1 }
 0xa27   : > { %v7197_v49 = vadd.f32 %v7196_v54, %v7147_v17  ;;  %v7102_v20 = vadd.f32 %v7101_v59, %v7052_v56  ;;  %v7530_v17 = vunpack.c.l.b16 %v7345_v39  ;;  %v7529_v56 = vunpack.c.l.b16 %v7340_v38 }
 0xa28   : > { %7247 = vmatmul.bf16.gmra.mxu0 %v14993_v52  ;;  %v7527_v59 = vunpack.c.l.b16 %v7330_v3 }
 0xa29   : > { %v7355_v13 = vpack.c.bf16 %v7197_v49, %v7099_v61  ;;  %7296 = vmatmul.bf16.gmra.mxu1 %v14995_v36  ;;  %v7545_v36 = vunpack.c.h.b16 %v7340_v38  ;;  %v7528_v61 = vunpack.c.l.b16 %v7335_v41  ;;  %v7535_v49 = vpack.c.b16 %v7530_v17, %v7529_v56  ;;  %v15982_v38 = vld [vmem:[#allocation97_spill] sm:$0xff] }
 0xa2b   : > { %v7548_v63 = vunpack.c.h.b16 %v7355_v13  ;;  %v7551_v50 = vpack.c.b16 %v7546_v14, %v7545_v36  ;;  %v7532_v55 = vunpack.c.l.b16 %v7355_v13  ;;  %v11838_v14 = vld [vmem:[#allocation12 + $0x18] sm:$0xf0] }
 0xa2d   : > { %v7150_v48 = vpop.f32.mrf.mxu2  ;;  %v7552_v5 = vpack.c.b16 %v7548_v63, %v7547_v58  ;;  %v15322_v7 = vpop.f32.mrf.mxu0  ;;  %v7536_v44 = vpack.c.b16 %v7532_v55, %v7531_v24 }
 0xa2e   : > { %v7199_v52 = vpop.f32.mrf.mxu3  ;;  %v15324_v4 = vpop.f32.mrf.mxu1 }
 0xa2f   : > { %v7200_v42 = vadd.f32 %v7199_v52, %v7150_v48  ;;  %7661 = vmatpush.bf16.msrb.mxu3 %v7552_v5 }
 0xa31   : > { %v15326_v60 = vpack.c.bf16 %v7200_v42, %v7102_v20  ;;  %v7534_v20 = vpack.c.b16 %v7528_v61, %v7527_v59 }
 0xa33   : > { %7662 = vmatpush.bf16.msrb.mxu3 %v7551_v50 }
 0xa35   : > { %v7057_v37 = vpop.f32.mrf.mxu0 }
 0xa36   : > { %v7106_v8 = vpop.f32.mrf.mxu1  ;;  %v15376_v48 = vpop.f32.mrf.mxu3 }
 0xa37   : > { %7663 = vmatpush.bf16.msrb.mxu3 %v7550_v27  ;;  %v15328_v45 = vadd.f32 %v7106_v8, %v7057_v37 }
 0xa38   : > { %7252 = vmatmul.bf16.gmra.mxu0 %v15005_v35 }
 0xa39   : > { %7301 = vmatmul.bf16.gmra.mxu1 %v15007_v51  ;;  %v11836_v51 = vld [vmem:[#allocation12 + $0xc] sm:$0xf] }
 0xa3b   : > { %7664 = vmatpush.bf16.msrb.mxu3 %v15308_v43  ;;  %v15341_v43 = vor.u32 %v11836_v51, %v11027_v31 }
 0xa3d   : > { %v15333_v54 = vpop.f32.mrf.mxu0 }
 0xa3e   : > { %v15335_v57 = vpop.f32.mrf.mxu1  ;;  %v15381_v3 = vpop.f32.mrf.mxu3 }
 0xa3f   : > { %7665 = vmatpush.bf16.msrb.mxu3 %v7536_v44 }
 0xa43   : > { %7666 = vmatpush.bf16.msrb.mxu3 %v7535_v49 }
 0xa45   : > { %v7062_v47 = vpop.f32.mrf.mxu0 }
 0xa46   : > { %v7111_v35 = vpop.f32.mrf.mxu1  ;;  %v15385_v50 = vpop.f32.mrf.mxu3 }
 0xa47   : > { %7667 = vmatpush.bf16.msrb.mxu3 %v7534_v20  ;;  %v15337_v26 = vadd.f32 %v7111_v35, %v7062_v47 }
 0xa48   : > { %7257 = vmatmul.bf16.gmra.mxu0 %v15017_v1 }
 0xa49   : > { %7306 = vmatmul.bf16.gmra.mxu1 %v15019_v28 }
 0xa4b   : > { %7668 = vmatpush.bf16.msrb.mxu3 %v15310_v40  ;;  %v15980_v40 = vld [vmem:[#allocation99_spill] sm:$0xff] }
 0xa4d   : > { %v15345_v39 = vpop.f32.mrf.mxu0 }
 0xa4e   : > { %7669 = vmatmul.bf16.vlgmr.msrb.gmra.mxu3 %v15341_v43  ;;  %v15348_v13 = vpop.f32.mrf.mxu1  ;;  %v7209_v49 = vpop.f32.mrf.mxu3 }
 0xa4f   : > { %7877 = vmatpush.bf16.msra.mxu3 %v15102_v10 }
 0xa53   : > { %7878 = vmatpush.bf16.msra.mxu3 %v15093_v34  ;;  %v15981_v34 = vld [vmem:[#allocation98_spill] sm:$0xff] }
 0xa55   : > { %v7067_v9 = vpop.f32.mrf.mxu0 }
 0xa56   : > { %v7116_v1 = vpop.f32.mrf.mxu1 }
 0xa57   : > { %7879 = vmatpush.bf16.msra.mxu3 %v15085_v30  ;;  %v15352_v33 = vadd.f32 %v7116_v1, %v7067_v9 }
 0xa58   : > { %7262 = vmatmul.bf16.gmra.mxu0 %v15029_v32 }
 0xa59   : > { %7311 = vmatmul.bf16.gmra.mxu1 %v15031_v22 }
 0xa5b   : > { %7880 = vmatpush.bf16.msra.mxu3 %v15077_v15  ;;  %v11017_v15 = vld [vmem:[#allocation12] sm:$0xf] }
 0xa5d   : > { %v15358_v28 = vpop.f32.mrf.mxu0 }
 0xa5e   : > { %v15360_v10 = vpop.f32.mrf.mxu1 }
 0xa5f   : > { %7881 = vmatpush.bf16.msra.mxu3 %v15104_v29  ;;  %v11837_v29 = vld [vmem:[#allocation12 + $0x10] sm:$0xf0] }
 0xa60   : > { %v11018_v58 = vor.u32 %v11837_v29, %v11017_v15 }
 0xa62   : > { %7627 = vmatmul.bf16.vlgmr.msra.gmra.mxu2 %v11018_v58 }
 0xa63   : > { %7882 = vmatpush.bf16.msra.mxu3 %v15980_v40 }
 0xa65   : > { %v7228_v30 = vpop.f32.mrf.mxu0 }
 0xa66   : > { %v7277_v18 = vpop.f32.mrf.mxu1 }
 0xa67   : > { %7883 = vmatpush.bf16.msra.mxu3 %v15981_v34  ;;  %v15364_v25 = vadd.f32 %v7277_v18, %v7228_v30 }
 0xa6b   : > { %7884 = vmatpush.bf16.msra.mxu3 %v15982_v38 }
 0xa6d   : > { %v7230_v32 = vpop.f32.mrf.mxu0 }
 0xa6e   : > { %v7279_v22 = vpop.f32.mrf.mxu1  ;;  %7885 = vmatmul.bf16.vlgmr.msra.gmra.mxu3 %v11018_v58 }
 0xa6f   : > { %7905 = vmatpush.bf16.msrb.mxu3 %v15300_v16  ;;  %v7280_v51 = vadd.f32 %v7279_v22, %v7230_v32  ;;  %v7211_v32 = vpop.f32.mrf.mxu3 }
 0xa71   : > { %v7326_v15 = vpack.c.bf16 %v7280_v51, %v7280_v51 }
 0xa73   : > { %7906 = vmatpush.bf16.msrb.mxu3 %v15294_v6  ;;  %v15374_v6 = vpop.f32.mrf.mxu2  ;;  %v7566_v22 = vunpack.c.l.b16 %v7326_v15 }
 0xa75   : > { %v7233_v63 = vpop.f32.mrf.mxu0 }
 0xa76   : > { %v7282_v46 = vpop.f32.mrf.mxu1 }
 0xa77   : > { %7907 = vmatpush.bf16.msrb.mxu3 %v15286_v0  ;;  %v11025_v0 = vld [vmem:[#allocation12 + $0x8] sm:$0xf]  ;;  %v7283_v59 = vadd.f32 %v7282_v46, %v7233_v63  ;;  %v7321_v63 = vpack.c.bf16 %v15364_v25, %v15364_v25 }
 0xa79   : > { %v7331_v30 = vpack.c.bf16 %v7283_v59, %v7283_v59  ;;  %v15987_v59 = vld [vmem:[#allocation107_spill] sm:$0xff] }
 0xa7b   : > { %7908 = vmatpush.bf16.msrb.mxu3 %v15274_v2  ;;  %v11026_v2 = vor.u32 %v11838_v14, %v11025_v0  ;;  %v7567_v46 = vunpack.c.l.b16 %v7331_v30 }
 0xa7d   : > { %v7235_v16 = vpop.f32.mrf.mxu0  ;;  %7655 = vmatmul.bf16.vlgmr.msrb.gmra.mxu2 %v11026_v2 }
 0xa7e   : > { %v7284_v41 = vpop.f32.mrf.mxu1 }
 0xa7f   : > { %7909 = vmatpush.bf16.msrb.mxu3 %v15302_v11  ;;  %v15379_v11 = vpop.f32.mrf.mxu2  ;;  %v7285_v44 = vadd.f32 %v7284_v41, %v7235_v16 }
 0xa81   : > { %v7336_v31 = vpack.c.bf16 %v7285_v44, %v7285_v44 }
 0xa83   : > { %7910 = vmatpush.bf16.msrb.mxu3 %v15296_v53  ;;  %v7568_v29 = vunpack.c.l.b16 %v7336_v31 }
 0xa85   : > { %v7238_v5 = vpop.f32.mrf.mxu0  ;;  %v7574_v0 = vpack.c.b16 %v7568_v29, %v7567_v46  ;;  %v7104_v46 = vadd.f32 %v15324_v4, %v15322_v7 }
 0xa86   : > { %v7287_v52 = vpop.f32.mrf.mxu1 }
 0xa87   : > { %7911 = vmatpush.bf16.msrb.mxu3 %v15288_v23  ;;  %v15383_v19 = vpop.f32.mrf.mxu2  ;;  %v7288_v8 = vadd.f32 %v7287_v52, %v7238_v5  ;;  %v11033_v5 = vld [vmem:[#allocation12 + $0x10] sm:$0xf]  ;;  %v11839_v52 = vld [vmem:[#allocation12 + $0x20] sm:$0xf0] }
 0xa89   : > { %v7341_v20 = vpack.c.bf16 %v7288_v8, %v7288_v8 }
 0xa8b   : > { %7912 = vmatpush.bf16.msrb.mxu3 %v15276_v12  ;;  %v7569_v18 = vunpack.c.l.b16 %v7341_v20 }
 0xa8d   : > { %v7240_v53 = vpop.f32.mrf.mxu0 }
 0xa8e   : > { %7913 = vmatmul.bf16.vlgmr.msrb.gmra.mxu3 %v11026_v2  ;;  %v7289_v36 = vpop.f32.mrf.mxu1  ;;  %v7565_v2 = vunpack.c.l.b16 %v7321_v63  ;;  %v15990_v63 = vld [vmem:[#allocation101_spill] sm:$0xff] }
 0xa8f   : > { %v7290_v27 = vadd.f32 %v7289_v36, %v7240_v53  ;;  %v7160_v17 = vpop.f32.mrf.mxu2  ;;  %v15395_v36 = vor.u32 %v11839_v52, %v11033_v5  ;;  %v11291_v5 = vld [vmem:[#allocation13 + $0x1f8] sm:$0xf]  ;;  %v11907_v52 = vld [vmem:[#allocation13 + $0x218] sm:$0xf0] }
 0xa90   : > { %v7573_v53 = vpack.c.b16 %v7566_v22, %v7565_v2  ;;  %v7837_v2 = vunpack.c.h.b16 %v15326_v60 }
 0xa91   : > { %v7346_v56 = vpack.c.bf16 %v7290_v27, %v7290_v27 }
 0xa93   : > { %v7570_v9 = vunpack.c.l.b16 %v7346_v56  ;;  %v15986_v56 = vld [vmem:[#allocation100_spill] sm:$0xff] }
 0xa95   : > { %v7243_v23 = vpop.f32.mrf.mxu0  ;;  %v7575_v58 = vpack.c.b16 %v7570_v9, %v7569_v18  ;;  %v7207_v18 = vadd.f32 %v15385_v50, %v15383_v19 }
 0xa96   : > { %v7292_v42 = vpop.f32.mrf.mxu1 }
 0xa97   : > { %v7293_v62 = vadd.f32 %v7292_v42, %v7243_v23  ;;  %v7162_v16 = vpop.f32.mrf.mxu2  ;;  %v15983_v23 = vld [vmem:[#allocation106_spill] sm:$0xff] }
 0xa98   : > { %v7212_v31 = vadd.f32 %v7211_v32, %v7162_v16 }
 0xa99   : > { %v7351_v55 = vpack.c.bf16 %v7293_v62, %v7293_v62  ;;  %v7214_v62 = vpop.f32.mrf.mxu3 }
 0xa9b   : > { %v7571_v47 = vunpack.c.l.b16 %v7351_v55 }
 0xa9d   : > { %v7245_v12 = vpop.f32.mrf.mxu0 }
 0xa9e   : > { %v7294_v37 = vpop.f32.mrf.mxu1 }
 0xa9f   : > { %v7295_v24 = vadd.f32 %v7294_v37, %v7245_v12  ;;  %v7165_v25 = vpop.f32.mrf.mxu2  ;;  %v15984_v12 = vld [vmem:[#allocation104_spill] sm:$0xff]  ;;  %v15985_v37 = vld [vmem:[#allocation102_spill] sm:$0xff] }
 0xaa0   : > { %v7215_v20 = vadd.f32 %v7214_v62, %v7165_v25  ;;  %v11292_v25 = vor.u32 %v11907_v52, %v11291_v5  ;;  %v11219_v52 = vld [vmem:[#allocation13 + $0x168] sm:$0xf] }
 0xaa1   : > { %v7356_v61 = vpack.c.bf16 %v7295_v24, %v7295_v24  ;;  %v7216_v44 = vpop.f32.mrf.mxu3 }
 0xaa2   : > { %v7390_v30 = vpack.c.bf16 %v7215_v20, %v15352_v33  ;;  %8411 = vmatpush.bf16.msrb.mxu0 %v11292_v25  ;;  %v11227_v25 = vld [vmem:[#allocation13 + $0x170] sm:$0xf] }
 0xaa3   : > { %v7572_v35 = vunpack.c.l.b16 %v7356_v61 }
 0xaa5   : > { %v7576_v1 = vpack.c.b16 %v7572_v35, %v7571_v47  ;;  %v7248_v40 = vpop.f32.mrf.mxu0  ;;  %v7119_v47 = vadd.f32 %v15360_v10, %v15358_v28  ;;  %v7205_v28 = vadd.f32 %v15381_v3, %v15379_v11  ;;  %v7109_v10 = vadd.f32 %v15335_v57, %v15333_v54 }
 0xaa6   : > { %v7297_v34 = vpop.f32.mrf.mxu1 }
 0xaa7   : > { %v15387_v38 = vadd.f32 %v7297_v34, %v7248_v40  ;;  %7679 = vmatpush.bf16.msra.mxu2 %v7576_v1  ;;  %v7167_v24 = vpop.f32.mrf.mxu2  ;;  %v15988_v1 = vld [vmem:[#allocation105_spill] sm:$0xff]  ;;  %v7210_v40 = vadd.f32 %v7209_v49, %v7160_v17  ;;  %v7114_v34 = vadd.f32 %v15348_v13, %v15345_v39  ;;  %v7843_v49 = vunpack.c.h.b16 %v7390_v30 }
 0xaa8   : > { %v7217_v61 = vadd.f32 %v7216_v44, %v7167_v24  ;;  %v7202_v13 = vadd.f32 %v15376_v48, %v15374_v6  ;;  %v7375_v33 = vpack.c.bf16 %v7207_v18, %v7109_v10  ;;  %v7370_v11 = vpack.c.bf16 %v7205_v28, %v15328_v45  ;;  %v11903_v18 = vld [vmem:[#allocation13 + $0x1fc] sm:$0xf] }
 0xaa9   : > { %v7385_v15 = vpack.c.bf16 %v7212_v31, %v7114_v34  ;;  %v7380_v17 = vpack.c.bf16 %v7210_v40, %v15337_v26 }
 0xaaa   : > { %v7395_v9 = vpack.c.bf16 %v7217_v61, %v7119_v47  ;;  %v15432_v54 = vpack.c.bf16 %v7202_v13, %v7104_v46  ;;  %v7840_v57 = vunpack.c.h.b16 %v7375_v33  ;;  %v7839_v32 = vunpack.c.h.b16 %v7370_v11 }
 0xaab   : > { %7680 = vmatpush.bf16.msra.mxu2 %v7575_v58  ;;  %v15989_v58 = vld [vmem:[#allocation103_spill] sm:$0xff]  ;;  %v7842_v19 = vunpack.c.h.b16 %v7385_v15  ;;  %v7841_v3 = vunpack.c.h.b16 %v7380_v17  ;;  %v7826_v62 = vunpack.c.l.b16 %v7385_v15  ;;  %v7825_v61 = vunpack.c.l.b16 %v7380_v17 }
 0xaac   : > { %v7844_v29 = vunpack.c.h.b16 %v7395_v9  ;;  %v7838_v22 = vunpack.c.h.b16 %v15432_v54  ;;  %v7828_v7 = vunpack.c.l.b16 %v7395_v9  ;;  %v7824_v31 = vunpack.c.l.b16 %v7375_v33  ;;  %v11293_v15 = vld [vmem:[#allocation13 + $0x21c] sm:$0xf0]  ;;  %v11255_v33 = vld [vmem:[#allocation13 + $0x1b0] sm:$0xf] }
 0xaad   : > { %v15391_v41 = vpop.f32.mrf.mxu0  ;;  %v7847_v26 = vpack.c.b16 %v7842_v19, %v7841_v3  ;;  %v7831_v9 = vpack.c.b16 %v7826_v62, %v7825_v61  ;;  %v7822_v28 = vunpack.c.l.b16 %v15432_v54  ;;  %v11898_v19 = vld [vmem:[#allocation13 + $0x1d0] sm:$0xf0]  ;;  %v11908_v3 = vld [vmem:[#allocation13 + $0x220] sm:$0xf0]  ;;  %v11183_v61 = vld [vmem:[#allocation13 + $0x120] sm:$0xf] }
 0xaae   : > { %v15393_v14 = vpop.f32.mrf.mxu1  ;;  %v7848_v50 = vpack.c.b16 %v7844_v29, %v7843_v49  ;;  %v7845_v45 = vpack.c.b16 %v7838_v22, %v7837_v2  ;;  %v11904_v54 = vld [vmem:[#allocation13 + $0x204] sm:$0xf]  ;;  %v11263_v22 = vld [vmem:[#allocation13 + $0x1b8] sm:$0xf]  ;;  %v11899_v2 = vld [vmem:[#allocation13 + $0x1d8] sm:$0xf0] }
 0xaaf   : > { %7681 = vmatpush.bf16.msra.mxu2 %v7574_v0  ;;  %v7846_v0 = vpack.c.b16 %v7840_v57, %v7839_v32  ;;  %v11890_v62 = vld [vmem:[#allocation13 + $0x190] sm:$0xf0] }
 0xab3   : > { %7682 = vmatpush.bf16.msra.mxu2 %v7573_v53  ;;  %v7827_v53 = vunpack.c.l.b16 %v7390_v30 }
 0xab5   : > { %v15398_v42 = vpop.f32.mrf.mxu0 }
 0xab6   : > { %v15400_v27 = vpop.f32.mrf.mxu1  ;;  %11035 = vmatmul.msk.bf16.vlgmr.msra.gmra.mxu2 %vm4956_vm1, %v15395_v36 }
 0xab7   : > { %7891 = vmatpush.bf16.msrb.mxu2 %v15983_v23 }
 0xabb   : > { %7892 = vmatpush.bf16.msrb.mxu2 %v15984_v12 }
 0xabd   : > { %v15406_v8 = vpop.f32.mrf.mxu0 }
 0xabe   : > { %v15408_v55 = vpop.f32.mrf.mxu1 }
 0xabf   : > { %7893 = vmatpush.bf16.msrb.mxu2 %v15985_v37 }
 0xac3   : > { %7894 = vmatpush.bf16.msrb.mxu2 %v15986_v56  ;;  %v7832_v56 = vpack.c.b16 %v7828_v7, %v7827_v53  ;;  %v11895_v7 = vld [vmem:[#allocation13 + $0x1bc] sm:$0xf]  ;;  %v11889_v53 = vld [vmem:[#allocation13 + $0x188] sm:$0xf0] }
 0xac5   : > { %v7258_v35 = vpop.f32.mrf.mxu0 }
 0xac6   : > { %v7307_v51 = vpop.f32.mrf.mxu1 }
 0xac7   : > { %7895 = vmatpush.bf16.msrb.mxu2 %v15987_v59  ;;  %v7308_v37 = vadd.f32 %v7307_v51, %v7258_v35  ;;  %v7305_v59 = vadd.f32 %v15408_v55, %v15406_v8  ;;  %v7823_v35 = vunpack.c.l.b16 %v7370_v11  ;;  %v7300_v51 = vadd.f32 %v15393_v14, %v15391_v41 }
 0xac8   : > { %v11296_v55 = vor.u32 %v11903_v18, %v11293_v15  ;;  %v7361_v41 = vpack.c.bf16 %v15387_v38, %v15387_v38  ;;  %v11256_v11 = vor.u32 %v11898_v19, %v11255_v33  ;;  %v11147_v18 = vld [vmem:[#allocation13 + $0xd8] sm:$0xf]  ;;  %v11871_v15 = vld [vmem:[#allocation13 + $0xf8] sm:$0xf0] }
 0xac9   : > { %v7381_v40 = vpack.c.bf16 %v7308_v37, %v7308_v37  ;;  %v7376_v29 = vpack.c.bf16 %v7305_v59, %v7305_v59  ;;  %v7366_v49 = vpack.c.bf16 %v7300_v51, %v7300_v51  ;;  %v11228_v37 = vor.u32 %v11890_v62, %v11227_v25  ;;  %v11880_v59 = vld [vmem:[#allocation13 + $0x140] sm:$0xf0]  ;;  %v11113_v19 = vld [vmem:[#allocation13 + $0xb4] sm:$0xf0]  ;;  %v11041_v25 = vld [vmem:[#allocation13 + $0x24] sm:$0xf0] }
 0xaca   : > { %8430 = vmatpush.bf16.msrb.mxu1 %v11296_v55  ;;  %8412 = vmatpush.bf16.msrb.mxu0 %v11256_v11  ;;  %v11149_v55 = vld [vmem:[#allocation13 + $0xfc] sm:$0xf0]  ;;  %v11047_v62 = vld [vmem:[#allocation13 + $0x8] sm:$0xf] }
 0xacb   : > { %7896 = vmatpush.bf16.msrb.mxu2 %v15988_v1  ;;  %v7303_v1 = vadd.f32 %v15400_v27, %v15398_v42  ;;  %v7865_v17 = vunpack.c.l.b16 %v7381_v40  ;;  %v7830_v42 = vpack.c.b16 %v7824_v31, %v7823_v35  ;;  %v7821_v27 = vunpack.c.l.b16 %v15326_v60  ;;  %v11301_v60 = vld [vmem:[#allocation13 + $0x224] sm:$0xf0]  ;;  %v11193_v35 = vld [vmem:[#allocation13 + $0x14c] sm:$0xf0] }
 0xacc   : > { %v11304_v38 = vor.u32 %v11904_v54, %v11301_v60  ;;  %v11185_v31 = vld [vmem:[#allocation13 + $0x144] sm:$0xf0]  ;;  %v11121_v54 = vld [vmem:[#allocation13 + $0xbc] sm:$0xf0] }
 0xacd   : > { %v7260_v16 = vpop.f32.mrf.mxu0  ;;  %v7371_v10 = vpack.c.bf16 %v7303_v1, %v7303_v1  ;;  %v7829_v13 = vpack.c.b16 %v7822_v28, %v7821_v27  ;;  %v11881_v1 = vld [vmem:[#allocation13 + $0x148] sm:$0xf0]  ;;  %v11155_v28 = vld [vmem:[#allocation13 + $0xe0] sm:$0xf]  ;;  %v11868_v27 = vld [vmem:[#allocation13 + $0xe4] sm:$0xf] }
 0xace   : > { %v7309_v39 = vpop.f32.mrf.mxu1 }
 0xacf   : > { %7897 = vmatpush.bf16.msrb.mxu2 %v15989_v58  ;;  %v7310_v23 = vadd.f32 %v7309_v39, %v7260_v16  ;;  %v7864_v16 = vunpack.c.l.b16 %v7376_v29  ;;  %v7863_v14 = vunpack.c.l.b16 %v7371_v10  ;;  %v11867_v29 = vld [vmem:[#allocation13 + $0xdc] sm:$0xf]  ;;  %v11872_v10 = vld [vmem:[#allocation13 + $0x100] sm:$0xf0] }
 0xad1   : > { %v7386_v20 = vpack.c.bf16 %v7310_v23, %v7310_v23  ;;  %v7870_v46 = vpack.c.b16 %v7864_v16, %v7863_v14  ;;  %v11220_v23 = vor.u32 %v11889_v53, %v11219_v52  ;;  %v7642_v16 = vpop.f32.mrf.mxu3  ;;  %v11862_v14 = vld [vmem:[#allocation13 + $0xb0] sm:$0xf0]  ;;  %v11039_v52 = vld [vmem:[#allocation13] sm:$0xf]  ;;  %v11844_v53 = vld [vmem:[#allocation13 + $0x20] sm:$0xf0] }
 0xad3   : > { %7898 = vmatpush.bf16.msrb.mxu2 %v15990_v63  ;;  %v7866_v58 = vunpack.c.l.b16 %v7386_v20  ;;  %v7862_v63 = vunpack.c.l.b16 %v7366_v49  ;;  %8413 = vmatpush.bf16.msrb.mxu0 %v11220_v23  ;;  %v11876_v20 = vld [vmem:[#allocation13 + $0x124] sm:$0xf]  ;;  %v11157_v49 = vld [vmem:[#allocation13 + $0x104] sm:$0xf0] }
 0xad4   : > { %v11188_v40 = vor.u32 %v11876_v20, %v11185_v31 }
 0xad5   : > { %v7263_v6 = vpop.f32.mrf.mxu0  ;;  %v7871_v39 = vpack.c.b16 %v7866_v58, %v7865_v17  ;;  %v11152_v17 = vor.u32 %v11867_v29, %v11149_v55 }
 0xad6   : > { %7899 = vmatmul.bf16.vlgmr.msrb.gmra.mxu2 %v15318_v21  ;;  %v7312_v48 = vpop.f32.mrf.mxu1 }
 0xad7   : > { %7919 = vmatpush.bf16.msra.mxu2 %v7848_v50  ;;  %v7313_v4 = vadd.f32 %v7312_v48, %v7263_v6  ;;  %v11299_v50 = vld [vmem:[#allocation13 + $0x200] sm:$0xf]  ;;  %v11894_v6 = vld [vmem:[#allocation13 + $0x1b4] sm:$0xf]  ;;  %v11257_v48 = vld [vmem:[#allocation13 + $0x1d4] sm:$0xf0] }
 0xad8   : > { %v11300_v57 = vor.u32 %v11908_v3, %v11299_v50  ;;  %v11119_v50 = vld [vmem:[#allocation13 + $0x98] sm:$0xf]  ;;  %v11859_v3 = vld [vmem:[#allocation13 + $0x9c] sm:$0xf] }
 0xad9   : > { %v7391_v24 = vpack.c.bf16 %v7313_v4, %v7313_v4  ;;  %v11265_v4 = vld [vmem:[#allocation13 + $0x1dc] sm:$0xf0]  ;;  %v11124_v60 = vor.u32 %v11859_v3, %v11121_v54  ;;  %v7644_v23 = vpop.f32.mrf.mxu3  ;;  %v11317_v3 = vld [vmem:[#allocation13 + $0x234] sm:$0xf0] }
 0xada   : > { %v11268_v5 = vor.u32 %v11895_v7, %v11265_v4  ;;  %v11850_v7 = vld [vmem:[#allocation13 + $0x54] sm:$0xf]  ;;  %v11085_v4 = vld [vmem:[#allocation13 + $0x74] sm:$0xf0] }
 0xadb   : > { %7920 = vmatpush.bf16.msra.mxu2 %v7847_v26  ;;  %v7867_v34 = vunpack.c.l.b16 %v7391_v24  ;;  %v7861_v26 = vunpack.c.l.b16 %v7361_v41  ;;  %v11886_v24 = vld [vmem:[#allocation13 + $0x174] sm:$0xf]  ;;  %v11111_v41 = vld [vmem:[#allocation13 + $0x90] sm:$0xf] }
 0xadc   : > { %v11112_v33 = vor.u32 %v11862_v14, %v11111_v41  ;;  %v11905_v41 = vld [vmem:[#allocation13 + $0x20c] sm:$0xf] }
 0xadd   : > { %v7265_v21 = vpop.f32.mrf.mxu0  ;;  %v7869_v32 = vpack.c.b16 %v7862_v63, %v7861_v26  ;;  %v11863_v63 = vld [vmem:[#allocation13 + $0xb8] sm:$0xf0]  ;;  %v11853_v26 = vld [vmem:[#allocation13 + $0x68] sm:$0xf0] }
 0xade   : > { %v7314_v12 = vpop.f32.mrf.mxu1  ;;  %v11120_v11 = vor.u32 %v11863_v63, %v11119_v50  ;;  %v11910_v50 = vld [vmem:[#allocation13 + $0x230] sm:$0xf0] }
 0xadf   : > { %7921 = vmatpush.bf16.msra.mxu2 %v7846_v0  ;;  %v7315_v44 = vadd.f32 %v7314_v12, %v7265_v21  ;;  %v11260_v0 = vor.u32 %v11894_v6, %v11257_v48  ;;  %v11221_v21 = vld [vmem:[#allocation13 + $0x18c] sm:$0xf0] }
 0xae0   : > { %v11077_v6 = vld [vmem:[#allocation13 + $0x6c] sm:$0xf0] }
 0xae1   : > { %v7396_v47 = vpack.c.bf16 %v7315_v44, %v7315_v44  ;;  %8431 = vmatpush.bf16.msrb.mxu1 %v11260_v0  ;;  %v11229_v44 = vld [vmem:[#allocation13 + $0x194] sm:$0xf0]  ;;  %v11083_v48 = vld [vmem:[#allocation13 + $0x50] sm:$0xf] }
 0xae3   : > { %7922 = vmatpush.bf16.msra.mxu2 %v7845_v45  ;;  %v7868_v30 = vunpack.c.l.b16 %v7396_v47  ;;  %v11264_v45 = vor.u32 %v11899_v2, %v11263_v22  ;;  %v11184_v47 = vor.u32 %v11880_v59, %v11183_v61  ;;  %v11854_v22 = vld [vmem:[#allocation13 + $0x70] sm:$0xf0]  ;;  %v11049_v61 = vld [vmem:[#allocation13 + $0x2c] sm:$0xf0] }
 0xae4   : > { %v11084_v2 = vor.u32 %v11854_v22, %v11083_v48  ;;  %v11279_v48 = vld [vmem:[#allocation13 + $0x1c8] sm:$0xf]  ;;  %v11901_v22 = vld [vmem:[#allocation13 + $0x1e8] sm:$0xf0] }
 0xae5   : > { %v7872_v8 = vpack.c.b16 %v7868_v30, %v7867_v34  ;;  %v11877_v30 = vld [vmem:[#allocation13 + $0x12c] sm:$0xf]  ;;  %8414 = vmatpush.bf16.msrb.mxu0 %v11184_v47 }
 0xae6   : > { %v11196_v51 = vor.u32 %v11877_v30, %v11193_v35 }
 0xae7   : > { %7923 = vmatpush.bf16.msra.mxu2 %v7832_v56  ;;  %7937 = vmatpush.bf16.msra.mxu3 %v7872_v8  ;;  %v11232_v56 = vor.u32 %v11886_v24, %v11229_v44  ;;  %v11148_v8 = vor.u32 %v11871_v15, %v11147_v18 }
 0xae9   : > { %8415 = vmatpush.bf16.msrb.mxu0 %v11148_v8 }
 0xaeb   : > { %7924 = vmatpush.bf16.msra.mxu2 %v7831_v9  ;;  %7938 = vmatpush.bf16.msra.mxu3 %v7871_v39  ;;  %v11191_v9 = vld [vmem:[#allocation13 + $0x128] sm:$0xf]  ;;  %v11160_v39 = vor.u32 %v11868_v27, %v11157_v49 }
 0xaec   : > { %v11192_v34 = vor.u32 %v11881_v1, %v11191_v9  ;;  %v7670_v9 = vpop.f32.mrf.mxu3 }
 0xaed   : > { %8416 = vmatpush.bf16.msrb.mxu0 %v11112_v33  ;;  %v11309_v33 = vld [vmem:[#allocation13 + $0x22c] sm:$0xf0] }
 0xaee   : > { %v11312_v63 = vor.u32 %v11905_v41, %v11309_v33  ;;  %v11127_v41 = vld [vmem:[#allocation13 + $0xa0] sm:$0xf]  ;;  %v11864_v33 = vld [vmem:[#allocation13 + $0xc0] sm:$0xf0] }
 0xaef   : > { %7925 = vmatpush.bf16.msra.mxu2 %v7830_v42  ;;  %7939 = vmatpush.bf16.msra.mxu3 %v7870_v46  ;;  %v11156_v42 = vor.u32 %v11872_v10, %v11155_v28 }
 0xaf3   : > { %7926 = vmatpush.bf16.msra.mxu2 %v7829_v13  ;;  %7940 = vmatpush.bf16.msra.mxu3 %v7869_v32  ;;  %v11858_v13 = vld [vmem:[#allocation13 + $0x94] sm:$0xf] }
 0xaf4   : > { %v11116_v46 = vor.u32 %v11858_v13, %v11113_v19  ;;  %v7672_v15 = vpop.f32.mrf.mxu3  ;;  %v11315_v19 = vld [vmem:[#allocation13 + $0x210] sm:$0xf] }
 0xaf6   : > { %7927 = vmatmul.bf16.vlgmr.msra.gmra.mxu2 %v15341_v43  ;;  %11036 = vmatmul.msk.bf16.vlgmr.msra.gmra.mxu3 %vm4956_vm1, %v15395_v36  ;;  %v11885_v43 = vld [vmem:[#allocation13 + $0x16c] sm:$0xf]  ;;  %v15450_v36 = vpop.f32.mrf.mxu2 }
 0xaf7   : > { %8449 = vmatpush.bf16.msrb.mxu2 %v11300_v57  ;;  %8468 = vmatpush.bf16.msrb.mxu3 %v11304_v38  ;;  %v11224_v12 = vor.u32 %v11885_v43, %v11221_v21  ;;  %v11075_v57 = vld [vmem:[#allocation13 + $0x48] sm:$0xf]  ;;  %v11849_v38 = vld [vmem:[#allocation13 + $0x4c] sm:$0xf]  ;;  %v11840_v43 = vld [vmem:[#allocation13 + $0x4] sm:$0xf]  ;;  %v11040_v21 = vor.u32 %v11844_v53, %v11039_v52 }
 0xaf8   : > { %v11076_v32 = vor.u32 %v11853_v26, %v11075_v57  ;;  %v11080_v0 = vor.u32 %v11849_v38, %v11077_v6  ;;  %v11044_v24 = vor.u32 %v11840_v43, %v11041_v25  ;;  %v11900_v57 = vld [vmem:[#allocation13 + $0x1e0] sm:$0xf0]  ;;  %v11273_v6 = vld [vmem:[#allocation13 + $0x1e4] sm:$0xf0]  ;;  %v11891_v52 = vld [vmem:[#allocation13 + $0x198] sm:$0xf0] }
 0xaf9   : > { %8432 = vmatpush.bf16.msrb.mxu1 %v11224_v12  ;;  %v11845_v12 = vld [vmem:[#allocation13 + $0x28] sm:$0xf0]  ;;  %v11896_v26 = vld [vmem:[#allocation13 + $0x1c4] sm:$0xf]  ;;  %v11887_v53 = vld [vmem:[#allocation13 + $0x17c] sm:$0xf] }
 0xafa   : > { %8417 = vmatpush.bf16.msrb.mxu0 %v11076_v32  ;;  %v11048_v44 = vor.u32 %v11845_v12, %v11047_v62  ;;  %v11892_v25 = vld [vmem:[#allocation13 + $0x1a0] sm:$0xf0] }
 0xafb   : > { %8450 = vmatpush.bf16.msrb.mxu2 %v11264_v45  ;;  %8469 = vmatpush.bf16.msrb.mxu3 %v11268_v5  ;;  %v11088_v5 = vor.u32 %v11850_v7, %v11085_v4  ;;  %v11897_v7 = vld [vmem:[#allocation13 + $0x1cc] sm:$0xf]  ;;  %v11281_v4 = vld [vmem:[#allocation13 + $0x1ec] sm:$0xf0] }
 0xafd   : > { %8433 = vmatpush.bf16.msrb.mxu1 %v11188_v40 }
 0xafe   : > { %v15452_v58 = vpop.f32.mrf.mxu2  ;;  %8418 = vmatpush.bf16.msrb.mxu0 %v11040_v21  ;;  %v11243_v21 = vld [vmem:[#allocation13 + $0x180] sm:$0xf] }
 0xaff   : > { %8451 = vmatpush.bf16.msrb.mxu2 %v11228_v37  ;;  %8470 = vmatpush.bf16.msrb.mxu3 %v11232_v56  ;;  %v15454_v37 = vld [vmem:[#allocation10] ss:$0 sm:$0xff]  ;;  %v11841_v56 = vld [vmem:[#allocation13 + $0xc] sm:$0xf]  ;;  %v11244_v12 = vor.u32 %v11892_v25, %v11243_v21  ;;  %v11055_v21 = vld [vmem:[#allocation13 + $0x10] sm:$0xf] }
 0xb00   : > { %v11052_v59 = vor.u32 %v11841_v56, %v11049_v61  ;;  %v7629_v20 = vadd.f32 %v15454_v37, %v15450_v36  ;;  %v7631_v1 = vadd.f32 %v15454_v37, %v15452_v58  ;;  %v15466_v58 = vpop.f32.mrf.mxu3  ;;  %v11846_v25 = vld [vmem:[#allocation13 + $0x30] sm:$0xf0] }
 0xb01   : > { %8434 = vmatpush.bf16.msrb.mxu1 %v11152_v17 }
 0xb02   : > { %v7643_v31 = vadd.f32 %v7642_v16, %v7629_v20  ;;  %v11307_v16 = vld [vmem:[#allocation13 + $0x208] sm:$0xf]  ;;  %v11882_v20 = vld [vmem:[#allocation13 + $0x150] sm:$0xf0] }
 0xb03   : > { %8452 = vmatpush.bf16.msrb.mxu2 %v11192_v34  ;;  %8471 = vmatpush.bf16.msrb.mxu3 %v11196_v51  ;;  %v7645_v34 = vadd.f32 %v7644_v23, %v7631_v1  ;;  %v11237_v23 = vld [vmem:[#allocation13 + $0x19c] sm:$0xf0]  ;;  %v11207_v1 = vld [vmem:[#allocation13 + $0x138] sm:$0xf] }
 0xb04   : > { %v11240_v62 = vor.u32 %v11887_v53, %v11237_v23 }
 0xb05   : > { %8435 = vmatpush.bf16.msrb.mxu1 %v11116_v46  ;;  %v11316_v46 = vor.u32 %v11910_v50, %v11315_v19  ;;  %v11860_v19 = vld [vmem:[#allocation13 + $0xa4] sm:$0xf]  ;;  %v11129_v50 = vld [vmem:[#allocation13 + $0xc4] sm:$0xf0] }
 0xb06   : > { %v7656_v45 = vpop.f32.mrf.mxu2 }
 0xb07   : > { %8453 = vmatpush.bf16.msrb.mxu2 %v11156_v42  ;;  %8472 = vmatpush.bf16.msrb.mxu3 %v11160_v39  ;;  %v7657_v40 = vadd.f32 %v7656_v45, %v7643_v31  ;;  %v11909_v39 = vld [vmem:[#allocation13 + $0x228] sm:$0xf0]  ;;  %v11284_v45 = vor.u32 %v11897_v7, %v11281_v4  ;;  %v11099_v7 = vld [vmem:[#allocation13 + $0x60] sm:$0xf] }
 0xb08   : > { %v15468_v14 = vpop.f32.mrf.mxu3  ;;  %v11308_v13 = vor.u32 %v11909_v39, %v11307_v16  ;;  %v11870_v16 = vld [vmem:[#allocation13 + $0xf4] sm:$0xf]  ;;  %v11173_v39 = vld [vmem:[#allocation13 + $0x114] sm:$0xf0] }
 0xb09   : > { %8436 = vmatpush.bf16.msrb.mxu1 %v11080_v0  ;;  %v7671_v35 = vadd.f32 %v7670_v9, %v7657_v40  ;;  %v11276_v0 = vor.u32 %v11896_v26, %v11273_v6  ;;  %v11201_v9 = vld [vmem:[#allocation13 + $0x154] sm:$0xf0]  ;;  %v11883_v40 = vld [vmem:[#allocation13 + $0x158] sm:$0xf0] }
 0xb0a   : > { %8487 = vmatpush.bf16.msra.mxu0 %v11308_v13  ;;  %v11176_v13 = vor.u32 %v11870_v16, %v11173_v39  ;;  %v11091_v6 = vld [vmem:[#allocation13 + $0x58] sm:$0xf] }
 0xb0b   : > { %8454 = vmatpush.bf16.msrb.mxu2 %v11120_v11  ;;  %8473 = vmatpush.bf16.msrb.mxu3 %v11124_v60  ;;  %v11906_v11 = vld [vmem:[#allocation13 + $0x214] sm:$0xf]  ;;  %v11271_v60 = vld [vmem:[#allocation13 + $0x1c0] sm:$0xf] }
 0xb0c   : > { %v11320_v54 = vor.u32 %v11906_v11, %v11317_v3  ;;  %v11272_v32 = vor.u32 %v11900_v57, %v11271_v60  ;;  %v11132_v11 = vor.u32 %v11860_v19, %v11129_v50  ;;  %v11135_v3 = vld [vmem:[#allocation13 + $0xa8] sm:$0xf]  ;;  %v11861_v60 = vld [vmem:[#allocation13 + $0xac] sm:$0xf] }
 0xb0d   : > { %8437 = vmatpush.bf16.msrb.mxu1 %v11044_v24  ;;  %v11888_v24 = vld [vmem:[#allocation13 + $0x184] sm:$0xf] }
 0xb0e   : > { %v7658_v47 = vpop.f32.mrf.mxu2  ;;  %8488 = vmatpush.bf16.msra.mxu0 %v11272_v32  ;;  %v11137_v32 = vld [vmem:[#allocation13 + $0xcc] sm:$0xf0] }
 0xb0f   : > { %8455 = vmatpush.bf16.msrb.mxu2 %v11084_v2  ;;  %8474 = vmatpush.bf16.msrb.mxu3 %v11088_v5  ;;  %v7659_v51 = vadd.f32 %v7658_v47, %v7645_v34  ;;  %v11280_v2 = vor.u32 %v11901_v22, %v11279_v48  ;;  %v11235_v5 = vld [vmem:[#allocation13 + $0x178] sm:$0xf]  ;;  %v11878_v47 = vld [vmem:[#allocation13 + $0x134] sm:$0xf]  ;;  %v11855_v48 = vld [vmem:[#allocation13 + $0x78] sm:$0xf0]  ;;  %v11140_v22 = vor.u32 %v11861_v60, %v11137_v32 }
 0xb10   : > { %v11236_v43 = vor.u32 %v11891_v52, %v11235_v5  ;;  %v11204_v34 = vor.u32 %v11878_v47, %v11201_v9  ;;  %v11852_v5 = vld [vmem:[#allocation13 + $0x64] sm:$0xf]  ;;  %v11101_v52 = vld [vmem:[#allocation13 + $0x84] sm:$0xf0]  ;;  %v7889_v47 = vadd.f32 %v15454_v37, %v15468_v14 }
 0xb11   : > { %v7673_v29 = vadd.f32 %v7672_v15, %v7659_v51  ;;  %8506 = vmatpush.bf16.msra.mxu1 %v11312_v63  ;;  %v15472_v56 = vpop.f32.mrf.mxu3  ;;  %v11209_v51 = vld [vmem:[#allocation13 + $0x15c] sm:$0xf0]  ;;  %v7887_v63 = vadd.f32 %v15454_v37, %v15466_v58  ;;  %v11092_v58 = vor.u32 %v11855_v48, %v11091_v6  ;;  %v11911_v37 = vld [vmem:[#allocation13 + $0x238] sm:$0xf0]  ;;  %v11107_v6 = vld [vmem:[#allocation13 + $0x68] sm:$0xf] }
 0xb12   : > { %8489 = vmatpush.bf16.msra.mxu0 %v11236_v43  ;;  %v11857_v48 = vld [vmem:[#allocation13 + $0x88] sm:$0xf0] }
 0xb13   : > { %8456 = vmatpush.bf16.msrb.mxu2 %v11048_v44  ;;  %8475 = vmatpush.bf16.msrb.mxu3 %v11052_v59  ;;  %v11245_v44 = vld [vmem:[#allocation13 + $0x1a4] sm:$0xf0]  ;;  %v11199_v59 = vld [vmem:[#allocation13 + $0x130] sm:$0xf] }
 0xb14   : > { %v11248_v61 = vor.u32 %v11888_v24, %v11245_v44  ;;  %v11200_v31 = vor.u32 %v11882_v20, %v11199_v59  ;;  %v11057_v24 = vld [vmem:[#allocation13 + $0x34] sm:$0xf0]  ;;  %v11843_v59 = vld [vmem:[#allocation13 + $0x1c] sm:$0xf]  ;;  %v11065_v20 = vld [vmem:[#allocation13 + $0x3c] sm:$0xf0] }
 0xb15   : > { %8507 = vmatpush.bf16.msra.mxu1 %v11276_v0  ;;  %v11851_v0 = vld [vmem:[#allocation13 + $0x5c] sm:$0xf]  ;;  %v11063_v44 = vld [vmem:[#allocation13 + $0x18] sm:$0xf] }
 0xb16   : > { %8490 = vmatpush.bf16.msra.mxu0 %v11200_v31  ;;  %v11056_v31 = vor.u32 %v11846_v25, %v11055_v21 }
 0xb17   : > { %8525 = vmatpush.bf16.msra.mxu2 %v11316_v46  ;;  %8544 = vmatpush.bf16.msra.mxu3 %v11320_v54  ;;  %v11128_v46 = vor.u32 %v11864_v33, %v11127_v41  ;;  %v11865_v54 = vld [vmem:[#allocation13 + $0xc8] sm:$0xf0]  ;;  %v11884_v33 = vld [vmem:[#allocation13 + $0x160] sm:$0xf0] }
 0xb18   : > { %v11136_v26 = vor.u32 %v11865_v54, %v11135_v3  ;;  %v11179_v3 = vld [vmem:[#allocation13 + $0xf8] sm:$0xf]  ;;  %v11875_v54 = vld [vmem:[#allocation13 + $0x118] sm:$0xf0] }
 0xb19   : > { %8508 = vmatpush.bf16.msra.mxu1 %v11240_v62  ;;  %v7916_v57 = vpop.f32.mrf.mxu3  ;;  %v11842_v62 = vld [vmem:[#allocation13 + $0x14] sm:$0xf]  ;;  %v11180_v60 = vor.u32 %v11875_v54, %v11179_v3 }
 0xb1a   : > { %v11060_v9 = vor.u32 %v11842_v62, %v11057_v24 }
 0xb1b   : > { %8526 = vmatpush.bf16.msra.mxu2 %v11280_v2  ;;  %8545 = vmatpush.bf16.msra.mxu3 %v11284_v45  ;;  %v11093_v2 = vld [vmem:[#allocation13 + $0x7c] sm:$0xf0]  ;;  %v11856_v45 = vld [vmem:[#allocation13 + $0x80] sm:$0xf0] }
 0xb1c   : > { %v11096_v43 = vor.u32 %v11851_v0, %v11093_v2  ;;  %v11100_v23 = vor.u32 %v11856_v45, %v11099_v7  ;;  %v11071_v0 = vld [vmem:[#allocation13 + $0x20] sm:$0xf]  ;;  %v11848_v2 = vld [vmem:[#allocation13 + $0x40] sm:$0xf0] }
 0xb1d   : > { %8509 = vmatpush.bf16.msra.mxu1 %v11204_v34  ;;  %v11068_v34 = vor.u32 %v11843_v59, %v11065_v20  ;;  %v11072_v7 = vor.u32 %v11848_v2, %v11071_v0 }
 0xb1f   : > { %8527 = vmatpush.bf16.msra.mxu2 %v11244_v12  ;;  %8546 = vmatpush.bf16.msra.mxu3 %v11248_v61  ;;  %v11104_v12 = vor.u32 %v11852_v5, %v11101_v52  ;;  %v11847_v61 = vld [vmem:[#allocation13 + $0x38] sm:$0xf0] }
 0xb39   : > { %v7684_v30 = vpop.f32.mrf.mxu2 }
 0xb3a   : > { %v7685_v18 = vadd.f32 %v7684_v30, %v7671_v35  ;;  %v11208_v30 = vor.u32 %v11883_v40, %v11207_v1  ;;  %v11879_v35 = vld [vmem:[#allocation13 + $0x13c] sm:$0xf]  ;;  %v11064_v1 = vor.u32 %v11847_v61, %v11063_v44 }
 0xb3b   : > { %v11212_v15 = vor.u32 %v11879_v35, %v11209_v51 }
 0xb3c   : > { %v7689_v8 = vmax.f32 %v7685_v18, 0.0  ;;  %8528 = vmatpush.bf16.msra.mxu2 %v11208_v30 }
 0xb3d   : > { %8547 = vmatpush.bf16.msra.mxu3 %v11212_v15  ;;  %v11323_v15 = vld [vmem:[#allocation13 + $0x218] sm:$0xf] }
 0xb3e   : > { %v7691_v10 = vpack.c.bf16 %v7689_v8, %v7689_v8  ;;  %v11873_v8 = vld [vmem:[#allocation13 + $0x108] sm:$0xf0] }
 0xb40   : > { %v7953_v42 = vunpack.c.l.b16 %v7691_v10  ;;  %v11165_v10 = vld [vmem:[#allocation13 + $0x10c] sm:$0xf0] }
 0xb41   : > { %v7686_v55 = vpop.f32.mrf.mxu2  ;;  %8548 = vmatpush.bf16.msra.mxu3 %v11176_v13  ;;  %v11215_v13 = vld [vmem:[#allocation13 + $0x140] sm:$0xf] }
 0xb42   : > { %v7687_v28 = vadd.f32 %v7686_v55, %v7673_v29  ;;  %v11163_v29 = vld [vmem:[#allocation13 + $0xe8] sm:$0xf]  ;;  %v11869_v55 = vld [vmem:[#allocation13 + $0xec] sm:$0xf]  ;;  %v11216_v50 = vor.u32 %v11884_v33, %v11215_v13 }
 0xb44   : > { %v7690_v17 = vmax.f32 %v7687_v28, 0.0  ;;  %v11164_v28 = vor.u32 %v11873_v8, %v11163_v29  ;;  %v11324_v29 = vor.u32 %v11911_v37, %v11323_v15  ;;  %v11902_v8 = vld [vmem:[#allocation13 + $0x1f0] sm:$0xf0] }
 0xb45   : > { %8549 = vmatpush.bf16.msra.mxu3 %v11140_v22  ;;  %v11108_v22 = vor.u32 %v11857_v48, %v11107_v6 }
 0xb46   : > { %v7692_v36 = vpack.c.bf16 %v7690_v17, %v7690_v17  ;;  %v11171_v17 = vld [vmem:[#allocation13 + $0xf0] sm:$0xf]  ;;  %8491 = vmatpush.bf16.msra.mxu0 %v11164_v28 }
 0xb48   : > { %v7954_v27 = vunpack.c.l.b16 %v7692_v36  ;;  %v11874_v36 = vld [vmem:[#allocation13 + $0x110] sm:$0xf0] }
 0xb49   : > { %8550 = vmatpush.bf16.msra.mxu3 %v11104_v12 }
 0xb4a   : > { %v15460_v49 = vpack.c.b16 %v7954_v27, %v7953_v42  ;;  %v11168_v42 = vor.u32 %v11869_v55, %v11165_v10  ;;  %v11172_v27 = vor.u32 %v11874_v36, %v11171_v17  ;;  %8492 = vmatpush.bf16.msra.mxu0 %v11128_v46  ;;  %v11251_v36 = vld [vmem:[#allocation13 + $0x188] sm:$0xf] }
 0xb4c   : > { %8419 = vmatmul.bf16.vlgmr.msrb.gmra.mxu0 %v15460_v49  ;;  %8438 = vmatmul.bf16.vlgmr.msrb.gmra.mxu1 %v15460_v49 }
 0xb4d   : > { %8457 = vmatmul.bf16.vlgmr.msrb.gmra.mxu2 %v15460_v49  ;;  %8476 = vmatmul.bf16.vlgmr.msrb.gmra.mxu3 %v15460_v49 }
 0xb4e   : > { %8510 = vmatpush.bf16.msra.mxu1 %v11168_v42  ;;  %8529 = vmatpush.bf16.msra.mxu2 %v11172_v27  ;;  %v11893_v42 = vld [vmem:[#allocation13 + $0x1a8] sm:$0xf0] }
 0xb4f   : > { %8493 = vmatpush.bf16.msra.mxu0 %v11092_v58  ;;  %8551 = vmatpush.bf16.msra.mxu3 %v11068_v34  ;;  %v11252_v16 = vor.u32 %v11893_v42, %v11251_v36 }
 0xb52   : > { %8511 = vmatpush.bf16.msra.mxu1 %v11132_v11  ;;  %8530 = vmatpush.bf16.msra.mxu2 %v11136_v26  ;;  %v11866_v26 = vld [vmem:[#allocation13 + $0xd0] sm:$0xf0] }
 0xb53   : > { %8494 = vmatpush.bf16.msra.mxu0 %v11056_v31 }
 0xb56   : > { %8512 = vmatpush.bf16.msra.mxu1 %v11096_v43  ;;  %8531 = vmatpush.bf16.msra.mxu2 %v11100_v23 }
 0xb57   : > { %8563 = vmatpush.bf16.msrb.mxu0 %v11324_v29 }
 0xb59   : > { %v15470_v38 = vpop.f32.mrf.mxu2 }
 0xb5a   : > { %v7901_v53 = vadd.f32 %v15470_v38, %v7887_v63  ;;  %8513 = vmatpush.bf16.msra.mxu1 %v11060_v9  ;;  %8532 = vmatpush.bf16.msra.mxu2 %v11064_v1  ;;  %v8648_v1 = vld [vmem:[#allocation16] sm:$0xf] }
 0xb5b   : > { %8654 = vst [vmem:[#allocation1] ss:$4 sm:$0xff] %v8648_v1 }
 0xb5c   : > { %v7915_v38 = vadd.f32 %v15472_v56, %v7901_v53  ;;  %v11287_v56 = vld [vmem:[#allocation13 + $0x1d0] sm:$0xf] }
 0xb5d   : > { %v11288_v28 = vor.u32 %v11902_v8, %v11287_v56 }
 0xb5f   : > { %8564 = vmatpush.bf16.msrb.mxu0 %v11288_v28 }
 0xb61   : > { %v15474_v18 = vpop.f32.mrf.mxu2 }
 0xb62   : > { %v7903_v30 = vadd.f32 %v15474_v18, %v7889_v47 }
 0xb63   : > { %8565 = vmatpush.bf16.msrb.mxu0 %v11252_v16  ;;  %v15508_v16 = vld.sshfl [vmem:[#allocation1] sm:$0xff pattern:$0x73625140] }
 0xb64   : > { %v7917_v55 = vadd.f32 %v7916_v57, %v7903_v30  ;;  %v11143_v57 = vld [vmem:[#allocation13 + $0xb0] sm:$0xf] }
 0xb65   : > { %v11144_v32 = vor.u32 %v11866_v26, %v11143_v57 }
 0xb67   : > { %8566 = vmatpush.bf16.msrb.mxu0 %v11216_v50 }
 0xb6b   : > { %8567 = vmatpush.bf16.msrb.mxu0 %v11180_v60 }
 0xb6f   : > { %8568 = vmatpush.bf16.msrb.mxu0 %v11144_v32 }
 0xb73   : > { %8569 = vmatpush.bf16.msrb.mxu0 %v11108_v22 }
 0xb77   : > { %8570 = vmatpush.bf16.msrb.mxu0 %v11072_v7 }
 0xb79   : > { %v7928_v4 = vpop.f32.mrf.mxu2  ;;  %v7942_v40 = vpop.f32.mrf.mxu3 }
 0xb7a   : > { %v7929_v35 = vadd.f32 %v7928_v4, %v7915_v38 }
 0xb7c   : > { %v7943_v51 = vadd.f32 %v7942_v40, %v7929_v35 }
 0xb7e   : > { %v7947_v10 = vmax.f32 %v7943_v51, 0.0 }
 0xb80   : > { %v7949_v39 = vpack.c.bf16 %v7947_v10, %v7947_v10 }
 0xb81   : > { %v7930_v14 = vpop.f32.mrf.mxu2  ;;  %v7944_v18 = vpop.f32.mrf.mxu3 }
 0xb82   : > { %v7931_v17 = vadd.f32 %v7930_v14, %v7917_v55  ;;  %v7959_v63 = vunpack.c.l.b16 %v7949_v39  ;;  %v15510_v39 = vld.sshfl [vmem:[#allocation1 + $0x8] sm:$0xff pattern:$0x73625140] }
 0xb83   : > { %8733 = vst [vmem:[#allocation1] ss:$4 sm:$0xff] %v8648_v1 }
 0xb84   : > { %v7945_v27 = vadd.f32 %v7944_v18, %v7931_v17 }
 0xb86   : > { %v7948_v41 = vmax.f32 %v7945_v27, 0.0 }
 0xb88   : > { %v7950_v19 = vpack.c.bf16 %v7948_v41, %v7948_v41 }
 0xb8a   : > { %v7960_v46 = vunpack.c.l.b16 %v7950_v19 }
 0xb8c   : > { %v7961_v11 = vpack.c.b16 %v7960_v46, %v7959_v63 }
 0xb8e   : > { %8424 = vmatmul.bf16.gmra.mxu0 %v7961_v11  ;;  %8443 = vmatmul.bf16.gmra.mxu1 %v7961_v11 }
 0xb8f   : > { %8462 = vmatmul.bf16.gmra.mxu2 %v7961_v11  ;;  %8481 = vmatmul.bf16.gmra.mxu3 %v7961_v11 }
 0xb9e   : > { %8495 = vmatmul.bf16.vlgmr.msra.gmra.mxu0 %v15460_v49  ;;  %8514 = vmatmul.bf16.vlgmr.msra.gmra.mxu1 %v15460_v49 }
 0xb9f   : > { %8533 = vmatmul.bf16.vlgmr.msra.gmra.mxu2 %v15460_v49  ;;  %8552 = vmatmul.bf16.vlgmr.msra.gmra.mxu3 %v15460_v49 }
 0xbae   : > { %8500 = vmatmul.bf16.gmra.mxu0 %v7961_v11  ;;  %8519 = vmatmul.bf16.gmra.mxu1 %v7961_v11 }
 0xbaf   : > { %8538 = vmatmul.bf16.gmra.mxu2 %v7961_v11  ;;  %8557 = vmatmul.bf16.gmra.mxu3 %v7961_v11 }
 0xbbe   : > { %8571 = vmatmul.bf16.vlgmr.msrb.gmra.mxu0 %v15460_v49 }
 0xbc9   : > { %v15488_v4 = vpop.f32.mrf.mxu0  ;;  %v15490_v58 = vpop.f32.mrf.mxu1 }
 0xbce   : > { %8576 = vmatmul.bf16.gmra.mxu0 %v7961_v11 }
 0xbd0   : > { %v8458_v45 = vpop.f32.mrf.mxu2  ;;  %v8477_v5 = vpop.f32.mrf.mxu3 }
 0xbd1   : > { %v8422_v52 = vpop.f32.mrf.mxu0  ;;  %v8441_v53 = vpop.f32.mrf.mxu1  ;;  %v8583_v19 = vpack.c.bf16 %v8477_v5, %v8458_v45  ;;  %v8582_v5 = vpack.c.bf16 %v15490_v58, %v15488_v4 }
 0xbd2   : > { %v8587_v22 = vpack.c.bf16 %v8441_v53, %v8422_v52 }
 0xbd3   : > { %v8618_v32 = vunpack.c.h.b16 %v8583_v19  ;;  %v8608_v52 = vunpack.c.h.b16 %v8582_v5 }
 0xbd8   : > { %v8460_v43 = vpop.f32.mrf.mxu2  ;;  %v8479_v23 = vpop.f32.mrf.mxu3 }
 0xbd9   : > { %v8588_v41 = vpack.c.bf16 %v8479_v23, %v8460_v43  ;;  %v8614_v23 = vunpack.c.l.b16 %v8583_v19 }
 0xbdb   : > { %v8619_v3 = vunpack.c.h.b16 %v8588_v41  ;;  %v8615_v0 = vunpack.c.l.b16 %v8588_v41 }
 0xbdd   : > { %v8620_v45 = vpack.c.b16 %v8619_v3, %v8618_v32 }
 0xc0b   : > { %v15492_v21 = vpop.f32.mrf.mxu0  ;;  %v15494_v25 = vpop.f32.mrf.mxu1 }
 0xc12   : > { %v15496_v62 = vpop.f32.mrf.mxu2  ;;  %v15498_v12 = vpop.f32.mrf.mxu3 }
 0xc13   : > { %v15500_v49 = vpop.f32.mrf.mxu0  ;;  %v15502_v24 = vpop.f32.mrf.mxu1 }
 0xc1a   : > { %v15504_v44 = vpop.f32.mrf.mxu2  ;;  %v15506_v61 = vpop.f32.mrf.mxu3 }
 0xc1b   : > { %v8496_v59 = vpop.f32.mrf.mxu0  ;;  %v8515_v20 = vpop.f32.mrf.mxu1  ;;  %v8598_v4 = vpack.c.bf16 %v15506_v61, %v15504_v44  ;;  %v8597_v44 = vpack.c.bf16 %v15502_v24, %v15500_v49 }
 0xc1c   : > { %v8584_v8 = vpack.c.bf16 %v8515_v20, %v8496_v59 }
 0xc1d   : > { %v8700_v61 = vunpack.c.l.b16 %v8598_v4 }
 0xc1e   : > { %v8628_v27 = vunpack.c.h.b16 %v8584_v8  ;;  %v8624_v50 = vunpack.c.l.b16 %v8584_v8  ;;  %v8704_v8 = vunpack.c.h.b16 %v8598_v4 }
 0xc22   : > { %v8534_v47 = vpop.f32.mrf.mxu2  ;;  %v8553_v31 = vpop.f32.mrf.mxu3 }
 0xc23   : > { %v8498_v38 = vpop.f32.mrf.mxu0  ;;  %v8517_v9 = vpop.f32.mrf.mxu1  ;;  %v8585_v40 = vpack.c.bf16 %v8553_v31, %v8534_v47  ;;  %v8609_v47 = vunpack.c.h.b16 %v8587_v22 }
 0xc24   : > { %v8589_v14 = vpack.c.bf16 %v8517_v9, %v8498_v38  ;;  %v8616_v9 = vpack.c.b16 %v8615_v0, %v8614_v23 }
 0xc25   : > { %v8638_v15 = vunpack.c.h.b16 %v8585_v40  ;;  %v8634_v55 = vunpack.c.l.b16 %v8585_v40 }
 0xc26   : > { %v8629_v36 = vunpack.c.h.b16 %v8589_v14  ;;  %v8625_v13 = vunpack.c.l.b16 %v8589_v14  ;;  %v8593_v14 = vpack.c.bf16 %v15498_v12, %v15496_v62  ;;  %v8592_v62 = vpack.c.bf16 %v15494_v25, %v15492_v21  ;;  %v8734_v21 = vld.sshfl [vmem:[#allocation1] sm:$0xff pattern:$0x73625140] }
 0xc28   : > { %v8630_v33 = vpack.c.b16 %v8629_v36, %v8628_v27  ;;  %v8626_v57 = vpack.c.b16 %v8625_v13, %v8624_v50  ;;  %v8703_v36 = vunpack.c.h.b16 %v8593_v14  ;;  %v8699_v12 = vunpack.c.l.b16 %v8593_v14 }
 0xc29   : > { %v8694_v27 = vunpack.c.h.b16 %v8597_v44  ;;  %v8693_v19 = vunpack.c.h.b16 %v8592_v62 }
 0xc2a   : > { %v8536_v34 = vpop.f32.mrf.mxu2  ;;  %v8555_v30 = vpop.f32.mrf.mxu3  ;;  %v8701_v13 = vpack.c.b16 %v8700_v61, %v8699_v12 }
 0xc2b   : > { %v8590_v35 = vpack.c.bf16 %v8555_v30, %v8536_v34  ;;  %v8501_v51 = vpop.f32.mrf.mxu0  ;;  %v8520_v28 = vpop.f32.mrf.mxu1  ;;  %v8605_v34 = vunpack.c.l.b16 %v8587_v22  ;;  %v8695_v49 = vpack.c.b16 %v8694_v27, %v8693_v19 }
 0xc2c   : > { %v8594_v59 = vpack.c.bf16 %v8520_v28, %v8501_v51 }
 0xc2d   : > { %v8639_v37 = vunpack.c.h.b16 %v8590_v35  ;;  %v8635_v29 = vunpack.c.l.b16 %v8590_v35  ;;  %v8610_v35 = vpack.c.b16 %v8609_v47, %v8608_v52 }
 0xc2e   : > { %v8713_v53 = vunpack.c.h.b16 %v8594_v59 }
 0xc2f   : > { %v8640_v56 = vpack.c.b16 %v8639_v37, %v8638_v15  ;;  %v8636_v18 = vpack.c.b16 %v8635_v29, %v8634_v55  ;;  %v8604_v37 = vunpack.c.l.b16 %v8582_v5  ;;  %v8709_v29 = vunpack.c.l.b16 %v8594_v59 }
 0xc31   : > { %8660 = vmatpush.bf16.msrb.mxu1 %v8640_v56  ;;  %v8606_v28 = vpack.c.b16 %v8605_v34, %v8604_v37 }
 0xc32   : > { %v8539_v10 = vpop.f32.mrf.mxu2  ;;  %v8558_v17 = vpop.f32.mrf.mxu3 }
 0xc33   : > { %v8503_v42 = vpop.f32.mrf.mxu0  ;;  %v8595_v63 = vpack.c.bf16 %v8558_v17, %v8539_v10  ;;  %v8522_v26 = vpop.f32.mrf.mxu1 }
 0xc34   : > { %v8599_v2 = vpack.c.bf16 %v8522_v26, %v8503_v42  ;;  %v8705_v42 = vpack.c.b16 %v8704_v8, %v8703_v36 }
 0xc35   : > { %8661 = vmatpush.bf16.msrb.mxu1 %v8636_v18  ;;  %v8723_v6 = vunpack.c.h.b16 %v8595_v63  ;;  %v8719_v20 = vunpack.c.l.b16 %v8595_v63 }
 0xc36   : > { %v8714_v31 = vunpack.c.h.b16 %v8599_v2  ;;  %v8710_v58 = vunpack.c.l.b16 %v8599_v2 }
 0xc38   : > { %v8715_v51 = vpack.c.b16 %v8714_v31, %v8713_v53  ;;  %v8711_v10 = vpack.c.b16 %v8710_v58, %v8709_v29 }
 0xc39   : > { %8662 = vmatpush.bf16.msrb.mxu1 %v8630_v33 }
 0xc3a   : > { %v8541_v46 = vpop.f32.mrf.mxu2  ;;  %v8560_v11 = vpop.f32.mrf.mxu3 }
 0xc3b   : > { %v8600_v54 = vpack.c.bf16 %v8560_v11, %v8541_v46  ;;  %v8572_v60 = vpop.f32.mrf.mxu0  ;;  %v8690_v46 = vunpack.c.l.b16 %v8597_v44  ;;  %v8689_v11 = vunpack.c.l.b16 %v8592_v62 }
 0xc3c   : > { %v8586_v30 = vpack.c.bf16 %v8572_v60, %v8572_v60 }
 0xc3d   : > { %v8724_v48 = vunpack.c.h.b16 %v8600_v54  ;;  %8663 = vmatpush.bf16.msrb.mxu1 %v8626_v57  ;;  %v8720_v7 = vunpack.c.l.b16 %v8600_v54  ;;  %v8691_v3 = vpack.c.b16 %v8690_v46, %v8689_v11  ;;  %v12047_v57 = vld [vmem:[#allocation15] ss:$0 sm:$0xff] }
 0xc3e   : > { %v8644_v56 = vunpack.c.l.b16 %v8586_v30 }
 0xc3f   : > { %v8725_v43 = vpack.c.b16 %v8724_v48, %v8723_v6  ;;  %v8721_v1 = vpack.c.b16 %v8720_v7, %v8719_v20 }
 0xc41   : > { %8664 = vmatpush.bf16.msrb.mxu1 %v8620_v45  ;;  %8739 = vmatpush.bf16.msrb.mxu2 %v8725_v43 }
 0xc43   : > { %v8574_v38 = vpop.f32.mrf.mxu0 }
 0xc44   : > { %v8591_v40 = vpack.c.bf16 %v8574_v38, %v8574_v38 }
 0xc45   : > { %8665 = vmatpush.bf16.msrb.mxu1 %v8616_v9  ;;  %8740 = vmatpush.bf16.msrb.mxu2 %v8721_v1 }
 0xc46   : > { %v8645_v15 = vunpack.c.l.b16 %v8591_v40 }
 0xc48   : > { %v8646_v17 = vpack.c.b16 %v8645_v15, %v8644_v56 }
 0xc49   : > { %8666 = vmatpush.bf16.msrb.mxu1 %v8610_v35  ;;  %8741 = vmatpush.bf16.msrb.mxu2 %v8715_v51 }
 0xc4b   : > { %v8577_v55 = vpop.f32.mrf.mxu0 }
 0xc4c   : > { %v8596_v18 = vpack.c.bf16 %v8577_v55, %v8577_v55 }
 0xc4d   : > { %8667 = vmatpush.bf16.msrb.mxu1 %v8606_v28  ;;  %8742 = vmatpush.bf16.msrb.mxu2 %v8711_v10 }
 0xc4e   : > { %v8729_v50 = vunpack.c.l.b16 %v8596_v18 }
 0xc50   : > { %8668 = vmatmul.bf16.vlgmr.msrb.gmra.mxu1 %v15508_v16  ;;  %v8735_v16 = vld.sshfl [vmem:[#allocation1 + $0x8] sm:$0xff pattern:$0x73625140] }
 0xc51   : > { %8680 = vmatpush.bf16.msra.mxu1 %v8646_v17  ;;  %8743 = vmatpush.bf16.msrb.mxu2 %v8705_v42 }
 0xc53   : > { %v8579_v41 = vpop.f32.mrf.mxu0 }
 0xc54   : > { %v8601_v33 = vpack.c.bf16 %v8579_v41, %v8579_v41 }
 0xc55   : > { %8744 = vmatpush.bf16.msrb.mxu2 %v8701_v13 }
 0xc56   : > { %v8730_v63 = vunpack.c.l.b16 %v8601_v33 }
 0xc58   : > { %v8731_v24 = vpack.c.b16 %v8730_v63, %v8729_v50 }
 0xc59   : > { %8745 = vmatpush.bf16.msrb.mxu2 %v8695_v49 }
 0xc5a   : > { %8759 = vmatpush.bf16.msrb.mxu3 %v8731_v24 }
 0xc5d   : > { %8746 = vmatpush.bf16.msrb.mxu2 %v8691_v3  ;;  %11326 = vmatmul.msk.bf16.vlgmr.msrb.gmra.mxu3 %vm2661_vm0, %v8735_v16 }
 0xc60   : > { %8747 = vmatmul.bf16.vlgmr.msrb.gmra.mxu2 %v8734_v21  ;;  %11325 = vmatmul.msk.bf16.vlgmr.msra.gmra.mxu1 %vm2661_vm0, %v15510_v39 }
 0xccd   : > { %v8669_v25 = vpop.f32.mrf.mxu1 }
 0xcce   : > { %v8670_v6 = vadd.f32 %v12047_v57, %v8669_v25 }
 0xcd5   : > { %v8671_v54 = vpop.f32.mrf.mxu1 }
 0xcdd   : > { %v8682_v60 = vpop.f32.mrf.mxu1 }
 0xcde   : > { %v8683_v2 = vadd.f32 %v8682_v60, %v8670_v6 }
 0xce0   : > { %v8761_v26 = vpop.f32.mrf.mxu3  ;;  %v8686_v5 = vmax.f32 %v8683_v2, 0.0 }
 0xce3   : > { %v8748_v32 = vpop.f32.mrf.mxu2 }
 0xce4   : > { %v8749_v48 = vadd.f32 %v12047_v57, %v8748_v32 }
 0xce5   : > { %v8684_v22 = vpop.f32.mrf.mxu1 }
 0xce6   : > { %v8762_v0 = vadd.f32 %v8761_v26, %v8749_v48 }
 0xce8   : > { %v8765_v7 = vmax.f32 %v8762_v0, 0.0  ;;  %v8763_v43 = vpop.f32.mrf.mxu3 }
 0xcea   : > { %v8767_v45 = vrot.slane %v8765_v7, 4 }
 0xceb   : > { %v8750_v23 = vpop.f32.mrf.mxu2 }
 0xcec   : > { %v8770_v59 = vsel %vm8769_vm2, %v8686_v5, %v8767_v45 }
 0xced   : > { %8771 = vst [vmem:[#allocation18] sm:$0xff] %v8770_v59 }
 0xcee PF: > { %p11994_p3 = scmp.eq.s32.totalorder %s12507_s20, 2  ;;  %s12427_s24 = smov [#allocation18]  }
 0xcef   : > { %s8778_s21 = sshll.u32 %s12427_s24, 4  ;;  %s8780_s29 = sshll.u32 %s15553_s10, 4  ;;  %s8779_s21 = int_to_ptr.vmem [resolvable:$true] %s8778_s21  ;;  %s8781_s29 = int_to_ptr.hbm [resolvable:$true] %s8780_s29 }
 0xcf0   : > { %11947 = dma.vmem_to_hbm [thread:$0]  (%p11994_p3), %s8779_s21, 128, %s8781_s29, [#allocation5]  }
 0xcf1   : > { %12391 = dma.done.wait (%p11994_p3), [#allocation5], 128  }
 0xcf2   : > { %12393 = vsyncadd (%p11994_p3), [#allocation5], 4294967168 }
 0xcf3 PF: > { %s15991_s16 = sld [smem:[#allocation27_spill]]  ;;  %s15993_s13 = smov %s12400_s14 }
 0xcf4   : > { %s15992_s2 = sld [smem:[#allocation28_spill]]  ;;  %s15994_s14 = smov %s12404_s15 }
 0xcf9   : > { %p25_p4 = scmp.ge.s32.totalorder %s15991_s16, 5  }
 0xcfa   : > { %s15995_s15 = smov %s15992_s2 }
 0xcfb   :  { %27 = sbr.rel (!%p25_p4) target bundleno = 14 (0xe), region = 144 }
 0xd00   :  { %8794 = vsyncpa [#allocation4], 1 }
 0xd01   :  { %8796 = vsyncpa [#allocation4 + $0x1], 1 }
 0xd02   :  { %8797 = vsyncpa [#allocation7], 1 }
 0xd03   :  { %8798 = vsyncpa [#allocation11], 1 }
 0xd04   :  { %8799 = vsyncpa [#allocation14], 1 }
 0xd05   :  { %8800 = vsyncpa [#allocation17], 1 }
 0xd06   :  { %8801 = vsyncpa [#allocation5], 1 }
 0xd07   :  { %8803 = vsyncpa [#allocation5 + $0x1], 1 }

</bundles_post_ra>
